<compile_context>
chip_gen: v6e
topology: v6e:2x2x1
jax: 0.10.0
libtpu: 0.0.40
codegen_flags: <defaults>
</compile_context>

<pallas_src>
import math
import jax
import jax.numpy as jnp
import numpy as np
from jax import lax
from jax.experimental import pallas as pl
from jax.experimental.pallas import tpu as pltpu

B_TILE = 8   # batch sublane tile (batch is zero-padded up to a multiple of this)


# ---------------------------------------------------------------------------
# Fused kernel: all layers + fc, for one batch tile.
# ---------------------------------------------------------------------------
def _fused_sqapcilstm_kernel(ping_ref,                                   # (B_pad*S,) int32 in SMEM
                             x_ref, qain_ref, wqa_ref, ball_ref,
                             wrl0_ref, wrlr_ref, wh_ref, fcw_ref, fcb_ref,
                             out_ref,
                             hbuf, pre_scr, projl_scr):
    S, Bt, _ = x_ref.shape
    L, H, n4h = wh_ref.shape                       # n4h == 4*H
    O = out_ref.shape[-1]
    f32 = jnp.float32
    bf16 = jnp.bfloat16

    base_col = pl.program_id(0) * Bt
    unroll = bool(S <= 16)                         # short fixed loop -> unroll for LLO

    # Per-sublane one-hot masks, hoisted out of all loops (JAX does not CSE
    # broadcast_in_dim, so build them exactly once).
    row_sel = [lax.broadcasted_iota(jnp.int32, (Bt, 1), 0) == b for b in range(Bt)]

    # question/answer contribution + all biases, for every layer at once.
    qa_all = (jnp.dot(qain_ref[...].astype(bf16), wqa_ref[...],
                      preferred_element_type=f32) + ball_ref[...])       # (Bt, L*4H)

    for l in range(L):                             # static layer loop (fused in-kernel)
        # ---- hoisted input projections: one big MXU matmul per layer ----
        if l == 0:
            inp = x_ref[...]                       # (S, Bt, I)  f32
            w_rl = wrl0_ref[...]                   # (I, 8H)     bf16
        else:
            inp = hbuf[...]                        # (S, Bt, H)  f32 (prev layer output)
            w_rl = wrlr_ref[l - 1]                 # (H, 8H)     bf16  (static index)
        din = inp.shape[-1]
        proj = jnp.dot(inp.reshape(S * Bt, din).astype(bf16), w_rl,
                       preferred_element_type=f32)                       # (S*Bt, 8H)
        qa_l = qa_all[:, l * n4h:(l + 1) * n4h]                          # (Bt, 4H)
        pre_scr[...] = proj[:, :n4h].reshape(S, Bt, n4h) + qa_l[None]    # right + qa + bias
        projl_scr[...] = proj[:, n4h:].reshape(S, Bt, n4h)               # left-projection bank

        wh_l = wh_ref[l]                                                 # (H, 4H) bf16

        # ---- fused recurrence: ping-gather + h@Wh + LSTM math per step ----
        # left[t,b] = inputs[ping[b,t]-1, b] (if t>0 and ping>0), already in
        # projected 4H space via projl_scr (projection commutes with the
        # row gather, so results are bit-identical to gather-then-project).
        def step(t, carry):
            h, c = carry                           # h: (Bt,H) bf16, c: (Bt,H) f32
            gates = pre_scr[t]                                           # (Bt, 4H)
            for b in range(Bt):                    # static sublane loop
                idx = ping_ref[(base_col + b) * S + t]
                src = projl_scr[jnp.clip(idx - 1, 0, S - 1)]             # (Bt, 4H)
                m = jnp.logical_and(row_sel[b],
                                    jnp.logical_and(idx > 0, t > 0))
                gates = gates + jnp.where(m, src, 0.0)
            gates = gates + jnp.dot(h, wh_l, preferred_element_type=f32)
            i_g = jax.nn.sigmoid(gates[:, 0:H])
            f_g = jax.nn.sigmoid(gates[:, H:2 * H])
            g_g = jnp.tanh(gates[:, 2 * H:3 * H])
            o_g = jax.nn.sigmoid(gates[:, 3 * H:4 * H])
            c_new = f_g * c + i_g * g_g
            h_new = o_g * jnp.tanh(c_new)
            hbuf[t] = h_new                        # safe: pre/projl already consumed hbuf
            return (h_new.astype(bf16), c_new)

        lax.fori_loop(0, S, step,
                      (jnp.zeros((Bt, H), bf16), jnp.zeros((Bt, H), f32)),
                      unroll=unroll)

    # ---- fused final fc (nn.Linear) over the whole hidden slab ----
    out = (jnp.dot(hbuf[...].reshape(S * Bt, H).astype(bf16), fcw_ref[...],
                   preferred_element_type=f32) + fcb_ref[...])
    out_ref[...] = out.reshape(S, Bt, O)


# ---------------------------------------------------------------------------
# Parameter packing (concat / stack / bf16 cast) for the fused kernel.
# ---------------------------------------------------------------------------
def pack_params(params):
    bf = jnp.bfloat16
    layers = params["layers"]
    L = len(layers)
    H = layers[0]["wh"].shape[0]
    wqa = jnp.concatenate(
        [jnp.concatenate([lp["wq"], lp["wa"]], axis=0) for lp in layers],
        axis=1).astype(bf)                                          # (Q+A, L*4H)
    ball = jnp.concatenate([lp["b"] for lp in layers], axis=1)      # (1, L*4H)  f32
    wrl0 = jnp.concatenate([layers[0]["wr"], layers[0]["wl"]], axis=1).astype(bf)  # (I, 8H)
    if L > 1:
        wrlr = jnp.stack(
            [jnp.concatenate([lp["wr"], lp["wl"]], axis=1) for lp in layers[1:]],
            axis=0).astype(bf)                                      # (L-1, H, 8H)
    else:
        wrlr = jnp.zeros((1, H, 8 * H), bf)                         # unused dummy
    wh = jnp.stack([lp["wh"] for lp in layers], axis=0).astype(bf)  # (L, H, 4H)
    fcw = params["fc_w"].astype(bf)                                 # (H, O)
    fcb = params["fc_b"].astype(jnp.float32)                        # (1, O)
    return dict(wqa=wqa, ball=ball, wrl0=wrl0, wrlr=wrlr, wh=wh, fcw=fcw, fcb=fcb)


# ---------------------------------------------------------------------------
# Model wrapper.
# ---------------------------------------------------------------------------
def sqapcilstm_model_forward(params, question, answer, x, ping):
    B, S, I = x.shape
    layers = params["layers"]
    H = layers[0]["wh"].shape[0]
    O = params["fc_w"].shape[1]
    QA = layers[0]["wq"].shape[0] + layers[0]["wa"].shape[0]
    packed = pack_params(params)

    B_pad = ((B + B_TILE - 1) // B_TILE) * B_TILE
    pad = B_pad - B

    qa_in = jnp.concatenate([question[:, 0, :], answer[:, 0, :]], axis=-1)
    qa_in = jnp.pad(qa_in, ((0, pad), (0, 0))).astype(jnp.float32)            # (B_pad, Q+A)
    x_seq = jnp.pad(jnp.transpose(x, (1, 0, 2)),
                    ((0, 0), (0, pad), (0, 0))).astype(jnp.float32)           # (S, B_pad, I)
    # ping flattened to 1D -> tight SMEM footprint (next_pow2(4*B_pad*S) bytes)
    ping_flat = jnp.pad(ping.astype(jnp.int32), ((0, pad), (0, 0))).reshape(-1)  # (B_pad*S,)

    n4h = 4 * H
    grid = (B_pad // B_TILE,)

    out = pl.pallas_call(
        _fused_sqapcilstm_kernel,
        out_shape=jax.ShapeDtypeStruct((S, B_pad, O), jnp.float32),
        grid_spec=pltpu.PrefetchScalarGridSpec(
            num_scalar_prefetch=1,                       # ping -> SMEM
            grid=grid,
            in_specs=[
                pl.BlockSpec((S, B_TILE, I), lambda i, p: (0, i, 0)),
                pl.BlockSpec((B_TILE, QA), lambda i, p: (i, 0)),
                pl.BlockSpec(packed["wqa"].shape, lambda i, p: (0, 0)),
                pl.BlockSpec(packed["ball"].shape, lambda i, p: (0, 0)),
                pl.BlockSpec(packed["wrl0"].shape, lambda i, p: (0, 0)),
                pl.BlockSpec(packed["wrlr"].shape, lambda i, p: (0, 0, 0)),
                pl.BlockSpec(packed["wh"].shape, lambda i, p: (0, 0, 0)),
                pl.BlockSpec(packed["fcw"].shape, lambda i, p: (0, 0)),
                pl.BlockSpec(packed["fcb"].shape, lambda i, p: (0, 0)),
            ],
            out_specs=pl.BlockSpec((S, B_TILE, O), lambda i, p: (0, i, 0)),
            scratch_shapes=[
                pltpu.VMEM((S, B_TILE, H), jnp.float32),      # inter-layer hidden seq
                pltpu.VMEM((S, B_TILE, n4h), jnp.float32),    # pre-activations (right+qa)
                pltpu.VMEM((S, B_TILE, n4h), jnp.float32),    # left-projection bank
            ],
        ),
        compiler_params=pltpu.CompilerParams(
            dimension_semantics=("parallel",)),
    )(ping_flat, x_seq, qa_in, packed["wqa"], packed["ball"], packed["wrl0"],
      packed["wrlr"], packed["wh"], packed["fcw"], packed["fcb"])

    return jnp.transpose(out[:, :B, :], (1, 0, 2))            # (B, S, O)


# ---------------------------------------------------------------------------
# Pure-JAX reference (mirrors the PyTorch forward; operands bf16-cast like the
# kernel's MXU matmuls, accumulation in f32).
# ---------------------------------------------------------------------------
def reference_forward(params, question, answer, x, ping):
    bf = jnp.bfloat16
    f32 = jnp.float32

    def bdot(a, w):
        return jnp.dot(a.astype(bf), w.astype(bf), preferred_element_type=f32)

    B, S, _ = x.shape
    q0 = question[:, 0, :]
    a0 = answer[:, 0, :]
    inputs = jnp.transpose(x, (1, 0, 2))
    for lp in params["layers"]:
        H = lp["wh"].shape[0]
        qa = bdot(q0, lp["wq"]) + bdot(a0, lp["wa"]) + lp["b"][0]
        h = jnp.zeros((B, H), f32)
        c = jnp.zeros((B, H), f32)
        hs = []
        for t in range(S):
            right = inputs[t]
            if t == 0:
                left = jnp.zeros_like(right)
            else:
                idx = ping[:, t]
                gathered = inputs[jnp.clip(idx - 1, 0, S - 1), jnp.arange(B)]
                left = jnp.where((idx > 0)[:, None], gathered, 0.0)
            gates = qa + bdot(left, lp["wl"]) + bdot(right, lp["wr"]) + bdot(h, lp["wh"])
            i_g = jax.nn.sigmoid(gates[:, 0:H])
            f_g = jax.nn.sigmoid(gates[:, H:2 * H])
            g_g = jnp.tanh(gates[:, 2 * H:3 * H])
            o_g = jax.nn.sigmoid(gates[:, 3 * H:4 * H])
            c = f_g * c + i_g * g_g
            h = o_g * jnp.tanh(c)
            hs.append(h)
        inputs = jnp.stack(hs, axis=0)
    h_last = jnp.transpose(inputs, (1, 0, 2))
    return bdot(h_last, params["fc_w"]) + params["fc_b"]


# ---------------------------------------------------------------------------
# Deterministic parameter init (matches shapes of SQAPCILSTMModel.__init__).
# ---------------------------------------------------------------------------
def init_params(key, Q, A, I, H, L, O):
    stdv = 1.0 / math.sqrt(H)

    def u(k, shape):
        return jax.random.uniform(k, shape, jnp.float32, -stdv, stdv)

    layers = []
    for li in range(L):
        din = I if li == 0 else H
        key, *ks = jax.random.split(key, 11)
        wq = u(ks[0], (Q, 4 * H))
        wa = u(ks[1], (A, 4 * H))
        wl = u(ks[2], (din, 4 * H))
        wr = u(ks[3], (din, 4 * H))
        wh = u(ks[4], (H, 4 * H))
        # bias_qh + bias_ah + bias_lh + bias_rh + bias_hh (is_peephole=False)
        b = (u(ks[5], (4 * H,)) + u(ks[6], (4 * H,)) + u(ks[7], (4 * H,))
             + u(ks[8], (4 * H,)) + u(ks[9], (4 * H,)))[None, :]
        layers.append(dict(wq=wq, wa=wa, wl=wl, wr=wr, wh=wh, b=b))

    key, k1, k2 = jax.random.split(key, 3)
    fc_w = jax.random.uniform(k1, (H, O), jnp.float32, -stdv, stdv)
    fc_b = jax.random.uniform(k2, (1, O), jnp.float32, -stdv, stdv)
    return dict(layers=layers, fc_w=fc_w, fc_b=fc_b)


if __name__ == "__main__":
    B, S, Q, A, I, H, O, L = 2, 8, 16, 16, 32, 32, 8, 2

    key = jax.random.PRNGKey(0)
    key, kq, ka, kx, kp, kparam = jax.random.split(key, 6)
    question = jax.random.normal(kq, (B, S, Q), jnp.float32)
    answer = jax.random.normal(ka, (B, S, A), jnp.float32)
    x = jax.random.normal(kx, (B, S, I), jnp.float32)
    ping = jax.random.randint(kp, (B, S), 0, S, jnp.int32)   # 0 => no left input

    params = init_params(kparam, Q, A, I, H, L, O)

    out = jax.jit(sqapcilstm_model_forward)(params, question, answer, x, ping)
    out = jax.block_until_ready(out)

    ref = jax.block_until_ready(reference_forward(params, question, answer, x, ping))

    assert out.shape == (B, S, O), out.shape
    assert np.allclose(np.asarray(out), np.asarray(ref), atol=1e-2, rtol=1e-2), (
        float(np.max(np.abs(np.asarray(out) - np.asarray(ref)))))

    print("KERNEL_OK")
</pallas_src>

<mosaic_0001>
module attributes {stable_mosaic.version = 11 : i64} {
  func.func @_fused_sqapcilstm_kernel(%arg0: i32, %arg1: memref<64xi32, #tpu.memory_space<smem>>, %arg2: memref<8x8x32xf32, #tpu.memory_space<vmem>>, %arg3: memref<8x32xf32, #tpu.memory_space<vmem>>, %arg4: memref<32x256xbf16, #tpu.memory_space<vmem>>, %arg5: memref<1x256xf32, #tpu.memory_space<vmem>>, %arg6: memref<32x256xbf16, #tpu.memory_space<vmem>>, %arg7: memref<1x32x256xbf16, #tpu.memory_space<vmem>>, %arg8: memref<2x32x128xbf16, #tpu.memory_space<vmem>>, %arg9: memref<32x8xbf16, #tpu.memory_space<vmem>>, %arg10: memref<1x8xf32, #tpu.memory_space<vmem>>, %arg11: memref<8x8x8xf32, #tpu.memory_space<vmem>>, %arg12: memref<8x8x32xf32, #tpu.memory_space<vmem>>, %arg13: memref<8x8x128xf32, #tpu.memory_space<vmem>>, %arg14: memref<8x8x128xf32, #tpu.memory_space<vmem>>) attributes {dimension_semantics = [#tpu.dimension_semantics<parallel>], iteration_bounds = array<i64: 1>, scalar_prefetch = 1 : i64, scratch_operands = 3 : i64, tpu.core_type = #tpu.core_type<tc>, window_params = [{transform_indices = @transform_0, window_bounds = array<i64: 8, 8, 32>}, {transform_indices = @transform_1, window_bounds = array<i64: 8, 32>}, {pipeline_mode = #tpu.pipeline_mode<synchronous>, transform_indices = @transform_2, window_bounds = array<i64: 32, 256>}, {pipeline_mode = #tpu.pipeline_mode<synchronous>, transform_indices = @transform_3, window_bounds = array<i64: 1, 256>}, {pipeline_mode = #tpu.pipeline_mode<synchronous>, transform_indices = @transform_4, window_bounds = array<i64: 32, 256>}, {pipeline_mode = #tpu.pipeline_mode<synchronous>, transform_indices = @transform_5, window_bounds = array<i64: 1, 32, 256>}, {pipeline_mode = #tpu.pipeline_mode<synchronous>, transform_indices = @transform_6, window_bounds = array<i64: 2, 32, 128>}, {pipeline_mode = #tpu.pipeline_mode<synchronous>, transform_indices = @transform_7, window_bounds = array<i64: 32, 8>}, {pipeline_mode = #tpu.pipeline_mode<synchronous>, transform_indices = @transform_8, window_bounds = array<i64: 1, 8>}, {transform_indices = @transform_9, window_bounds = array<i64: 8, 8, 8>}]} {
    %c8_i32 = arith.constant 8 : i32
    %0 = arith.muli %arg0, %c8_i32 : i32
    %1 = tpu.iota {dimensions = array<i32: 0>} : vector<8x1xi32>
    %c0_i32 = arith.constant 0 : i32
    %2 = vector.broadcast %c0_i32 : i32 to vector<8x1xi32>
    %3 = arith.cmpi eq, %1, %2 : vector<8x1xi32>
    %4 = tpu.iota {dimensions = array<i32: 0>} : vector<8x1xi32>
    %c1_i32 = arith.constant 1 : i32
    %5 = vector.broadcast %c1_i32 : i32 to vector<8x1xi32>
    %6 = arith.cmpi eq, %4, %5 : vector<8x1xi32>
    %7 = tpu.iota {dimensions = array<i32: 0>} : vector<8x1xi32>
    %c2_i32 = arith.constant 2 : i32
    %8 = vector.broadcast %c2_i32 : i32 to vector<8x1xi32>
    %9 = arith.cmpi eq, %7, %8 : vector<8x1xi32>
    %10 = tpu.iota {dimensions = array<i32: 0>} : vector<8x1xi32>
    %c3_i32 = arith.constant 3 : i32
    %11 = vector.broadcast %c3_i32 : i32 to vector<8x1xi32>
    %12 = arith.cmpi eq, %10, %11 : vector<8x1xi32>
    %13 = tpu.iota {dimensions = array<i32: 0>} : vector<8x1xi32>
    %c4_i32 = arith.constant 4 : i32
    %14 = vector.broadcast %c4_i32 : i32 to vector<8x1xi32>
    %15 = arith.cmpi eq, %13, %14 : vector<8x1xi32>
    %16 = tpu.iota {dimensions = array<i32: 0>} : vector<8x1xi32>
    %c5_i32 = arith.constant 5 : i32
    %17 = vector.broadcast %c5_i32 : i32 to vector<8x1xi32>
    %18 = arith.cmpi eq, %16, %17 : vector<8x1xi32>
    %19 = tpu.iota {dimensions = array<i32: 0>} : vector<8x1xi32>
    %c6_i32 = arith.constant 6 : i32
    %20 = vector.broadcast %c6_i32 : i32 to vector<8x1xi32>
    %21 = arith.cmpi eq, %19, %20 : vector<8x1xi32>
    %22 = tpu.iota {dimensions = array<i32: 0>} : vector<8x1xi32>
    %c7_i32 = arith.constant 7 : i32
    %23 = vector.broadcast %c7_i32 : i32 to vector<8x1xi32>
    %24 = arith.cmpi eq, %22, %23 : vector<8x1xi32>
    %c0 = arith.constant 0 : index
    %c0_0 = arith.constant 0 : index
    %25 = vector.load %arg3[%c0, %c0_0] : memref<8x32xf32, #tpu.memory_space<vmem>>, vector<8x32xf32>
    %26 = arith.truncf %25 : vector<8x32xf32> to vector<8x32xbf16>
    %c0_1 = arith.constant 0 : index
    %c0_2 = arith.constant 0 : index
    %27 = vector.load %arg4[%c0_1, %c0_2] : memref<32x256xbf16, #tpu.memory_space<vmem>>, vector<32x256xbf16>
    %cst = arith.constant dense<0.000000e+00> : vector<8x256xf32>
    %28 = tpu.matmul %26, %27, %cst {dimension_numbers = #tpu.dot_dimension_numbers<[1], [0], [0], [1], [0, 0, 1, 1], [], []>} : vector<8x32xbf16>, vector<32x256xbf16>, vector<8x256xf32> -> vector<8x256xf32>
    %c0_3 = arith.constant 0 : index
    %c0_4 = arith.constant 0 : index
    %29 = vector.load %arg5[%c0_3, %c0_4] : memref<1x256xf32, #tpu.memory_space<vmem>>, vector<1x256xf32>
    %30 = vector.broadcast %29 : vector<1x256xf32> to vector<8x256xf32>
    %31 = arith.addf %28, %30 : vector<8x256xf32>
    %c0_5 = arith.constant 0 : index
    %c0_6 = arith.constant 0 : index
    %c0_7 = arith.constant 0 : index
    %32 = vector.load %arg2[%c0_5, %c0_6, %c0_7] : memref<8x8x32xf32, #tpu.memory_space<vmem>>, vector<8x8x32xf32>
    %c0_8 = arith.constant 0 : index
    %c0_9 = arith.constant 0 : index
    %33 = vector.load %arg6[%c0_8, %c0_9] : memref<32x256xbf16, #tpu.memory_space<vmem>>, vector<32x256xbf16>
    %34 = vector.shape_cast %32 : vector<8x8x32xf32> to vector<64x32xf32>
    %35 = arith.truncf %34 : vector<64x32xf32> to vector<64x32xbf16>
    %cst_10 = arith.constant dense<0.000000e+00> : vector<64x256xf32>
    %36 = tpu.matmul %35, %33, %cst_10 {dimension_numbers = #tpu.dot_dimension_numbers<[1], [0], [0], [1], [0, 0, 1, 1], [], []>} : vector<64x32xbf16>, vector<32x256xbf16>, vector<64x256xf32> -> vector<64x256xf32>
    %37 = vector.extract_strided_slice %31 {offsets = [0, 0], sizes = [8, 128], strides = [1, 1]} : vector<8x256xf32> to vector<8x128xf32>
    %38 = vector.extract_strided_slice %36 {offsets = [0, 0], sizes = [64, 128], strides = [1, 1]} : vector<64x256xf32> to vector<64x128xf32>
    %39 = vector.shape_cast %38 : vector<64x128xf32> to vector<8x8x128xf32>
    %40 = vector.shape_cast %37 : vector<8x128xf32> to vector<1x8x128xf32>
    %41 = vector.broadcast %40 : vector<1x8x128xf32> to vector<8x8x128xf32>
    %42 = arith.addf %39, %41 : vector<8x8x128xf32>
    %c0_11 = arith.constant 0 : index
    %c0_12 = arith.constant 0 : index
    %c0_13 = arith.constant 0 : index
    %43 = vector.load %arg13[%c0_11, %c0_12, %c0_13] : memref<8x8x128xf32, #tpu.memory_space<vmem>>, vector<8x8x128xf32>
    tpu.vector_store %arg13[%c0_11, %c0_12, %c0_13], %42 {strides = array<i32>} : memref<8x8x128xf32, #tpu.memory_space<vmem>>, vector<8x8x128xf32>,
    %44 = vector.extract_strided_slice %36 {offsets = [0, 128], sizes = [64, 128], strides = [1, 1]} : vector<64x256xf32> to vector<64x128xf32>
    %45 = vector.shape_cast %44 : vector<64x128xf32> to vector<8x8x128xf32>
    %c0_14 = arith.constant 0 : index
    %c0_15 = arith.constant 0 : index
    %c0_16 = arith.constant 0 : index
    %46 = vector.load %arg14[%c0_14, %c0_15, %c0_16] : memref<8x8x128xf32, #tpu.memory_space<vmem>>, vector<8x8x128xf32>
    tpu.vector_store %arg14[%c0_14, %c0_15, %c0_16], %45 {strides = array<i32>} : memref<8x8x128xf32, #tpu.memory_space<vmem>>, vector<8x8x128xf32>,
    %c0_17 = arith.constant 0 : index
    %c0_18 = arith.constant 0 : index
    %c0_19 = arith.constant 0 : index
    %47 = vector.load %arg8[%c0_17, %c0_18, %c0_19] : memref<2x32x128xbf16, #tpu.memory_space<vmem>>, vector<1x32x128xbf16>
    %48 = vector.shape_cast %47 : vector<1x32x128xbf16> to vector<32x128xbf16>
    %cst_20 = arith.constant 0.000000e+00 : bf16
    %49 = vector.broadcast %cst_20 : bf16 to vector<8x32xbf16>
    %cst_21 = arith.constant 0.000000e+00 : f32
    %50 = vector.broadcast %cst_21 : f32 to vector<8x32xf32>
    %c0_i32_22 = arith.constant 0 : i32
    %51 = arith.index_cast %c0_i32_22 : i32 to index
    %c0_23 = arith.constant 0 : index
    %c0_24 = arith.constant 0 : index
    %52 = vector.load %arg13[%51, %c0_23, %c0_24] : memref<8x8x128xf32, #tpu.memory_space<vmem>>, vector<1x8x128xf32>
    %53 = vector.shape_cast %52 : vector<1x8x128xf32> to vector<8x128xf32>
    %c0_i32_25 = arith.constant 0 : i32
    %54 = arith.addi %0, %c0_i32_25 : i32
    %c8_i32_26 = arith.constant 8 : i32
    %55 = arith.muli %54, %c8_i32_26 : i32
    %56 = arith.addi %55, %c0_i32_22 : i32
    %57 = arith.index_cast %56 : i32 to index
    %58 = memref.load %arg1[%57] : memref<64xi32, #tpu.memory_space<smem>>
    %c1_i32_27 = arith.constant 1 : i32
    %59 = arith.subi %58, %c1_i32_27 : i32
    %c0_i32_28 = arith.constant 0 : i32
    %c7_i32_29 = arith.constant 7 : i32
    %60 = arith.maxsi %c0_i32_28, %59 : i32
    %61 = arith.minsi %c7_i32_29, %60 : i32
    %62 = arith.index_cast %61 : i32 to index
    %c0_30 = arith.constant 0 : index
    %c0_31 = arith.constant 0 : index
    %63 = vector.load %arg14[%62, %c0_30, %c0_31] : memref<8x8x128xf32, #tpu.memory_space<vmem>>, vector<1x8x128xf32>
    %64 = vector.shape_cast %63 : vector<1x8x128xf32> to vector<8x128xf32>
    %c0_i32_32 = arith.constant 0 : i32
    %65 = arith.cmpi sgt, %58, %c0_i32_32 : i32
    %c0_i32_33 = arith.constant 0 : i32
    %66 = arith.cmpi sgt, %c0_i32_22, %c0_i32_33 : i32
    %67 = arith.andi %65, %66 : i1
    %68 = vector.broadcast %67 : i1 to vector<8x1xi1>
    %69 = arith.andi %3, %68 : vector<8x1xi1>
    %cst_34 = arith.constant 0.000000e+00 : f32
    %70 = vector.shape_cast %69 : vector<8x1xi1> to vector<8x1xi1>
    %71 = vector.broadcast %70 : vector<8x1xi1> to vector<8x128xi1>
    %72 = vector.broadcast %cst_34 : f32 to vector<8x128xf32>
    %73 = arith.select %71, %64, %72 : vector<8x128xi1>, vector<8x128xf32>
    %74 = arith.addf %53, %73 : vector<8x128xf32>
    %c1_i32_35 = arith.constant 1 : i32
    %75 = arith.addi %0, %c1_i32_35 : i32
    %c8_i32_36 = arith.constant 8 : i32
    %76 = arith.muli %75, %c8_i32_36 : i32
    %77 = arith.addi %76, %c0_i32_22 : i32
    %78 = arith.index_cast %77 : i32 to index
    %79 = memref.load %arg1[%78] : memref<64xi32, #tpu.memory_space<smem>>
    %c1_i32_37 = arith.constant 1 : i32
    %80 = arith.subi %79, %c1_i32_37 : i32
    %c0_i32_38 = arith.constant 0 : i32
    %c7_i32_39 = arith.constant 7 : i32
    %81 = arith.maxsi %c0_i32_38, %80 : i32
    %82 = arith.minsi %c7_i32_39, %81 : i32
    %83 = arith.index_cast %82 : i32 to index
    %c0_40 = arith.constant 0 : index
    %c0_41 = arith.constant 0 : index
    %84 = vector.load %arg14[%83, %c0_40, %c0_41] : memref<8x8x128xf32, #tpu.memory_space<vmem>>, vector<1x8x128xf32>
    %85 = vector.shape_cast %84 : vector<1x8x128xf32> to vector<8x128xf32>
    %c0_i32_42 = arith.constant 0 : i32
    %86 = arith.cmpi sgt, %79, %c0_i32_42 : i32
    %c0_i32_43 = arith.constant 0 : i32
    %87 = arith.cmpi sgt, %c0_i32_22, %c0_i32_43 : i32
    %88 = arith.andi %86, %87 : i1
    %89 = vector.broadcast %88 : i1 to vector<8x1xi1>
    %90 = arith.andi %6, %89 : vector<8x1xi1>
    %cst_44 = arith.constant 0.000000e+00 : f32
    %91 = vector.shape_cast %90 : vector<8x1xi1> to vector<8x1xi1>
    %92 = vector.broadcast %91 : vector<8x1xi1> to vector<8x128xi1>
    %93 = vector.broadcast %cst_44 : f32 to vector<8x128xf32>
    %94 = arith.select %92, %85, %93 : vector<8x128xi1>, vector<8x128xf32>
    %95 = arith.addf %74, %94 : vector<8x128xf32>
    %c2_i32_45 = arith.constant 2 : i32
    %96 = arith.addi %0, %c2_i32_45 : i32
    %c8_i32_46 = arith.constant 8 : i32
    %97 = arith.muli %96, %c8_i32_46 : i32
    %98 = arith.addi %97, %c0_i32_22 : i32
    %99 = arith.index_cast %98 : i32 to index
    %100 = memref.load %arg1[%99] : memref<64xi32, #tpu.memory_space<smem>>
    %c1_i32_47 = arith.constant 1 : i32
    %101 = arith.subi %100, %c1_i32_47 : i32
    %c0_i32_48 = arith.constant 0 : i32
    %c7_i32_49 = arith.constant 7 : i32
    %102 = arith.maxsi %c0_i32_48, %101 : i32
    %103 = arith.minsi %c7_i32_49, %102 : i32
    %104 = arith.index_cast %103 : i32 to index
    %c0_50 = arith.constant 0 : index
    %c0_51 = arith.constant 0 : index
    %105 = vector.load %arg14[%104, %c0_50, %c0_51] : memref<8x8x128xf32, #tpu.memory_space<vmem>>, vector<1x8x128xf32>
    %106 = vector.shape_cast %105 : vector<1x8x128xf32> to vector<8x128xf32>
    %c0_i32_52 = arith.constant 0 : i32
    %107 = arith.cmpi sgt, %100, %c0_i32_52 : i32
    %c0_i32_53 = arith.constant 0 : i32
    %108 = arith.cmpi sgt, %c0_i32_22, %c0_i32_53 : i32
    %109 = arith.andi %107, %108 : i1
    %110 = vector.broadcast %109 : i1 to vector<8x1xi1>
    %111 = arith.andi %9, %110 : vector<8x1xi1>
    %cst_54 = arith.constant 0.000000e+00 : f32
    %112 = vector.shape_cast %111 : vector<8x1xi1> to vector<8x1xi1>
    %113 = vector.broadcast %112 : vector<8x1xi1> to vector<8x128xi1>
    %114 = vector.broadcast %cst_54 : f32 to vector<8x128xf32>
    %115 = arith.select %113, %106, %114 : vector<8x128xi1>, vector<8x128xf32>
    %116 = arith.addf %95, %115 : vector<8x128xf32>
    %c3_i32_55 = arith.constant 3 : i32
    %117 = arith.addi %0, %c3_i32_55 : i32
    %c8_i32_56 = arith.constant 8 : i32
    %118 = arith.muli %117, %c8_i32_56 : i32
    %119 = arith.addi %118, %c0_i32_22 : i32
    %120 = arith.index_cast %119 : i32 to index
    %121 = memref.load %arg1[%120] : memref<64xi32, #tpu.memory_space<smem>>
    %c1_i32_57 = arith.constant 1 : i32
    %122 = arith.subi %121, %c1_i32_57 : i32
    %c0_i32_58 = arith.constant 0 : i32
    %c7_i32_59 = arith.constant 7 : i32
    %123 = arith.maxsi %c0_i32_58, %122 : i32
    %124 = arith.minsi %c7_i32_59, %123 : i32
    %125 = arith.index_cast %124 : i32 to index
    %c0_60 = arith.constant 0 : index
    %c0_61 = arith.constant 0 : index
    %126 = vector.load %arg14[%125, %c0_60, %c0_61] : memref<8x8x128xf32, #tpu.memory_space<vmem>>, vector<1x8x128xf32>
    %127 = vector.shape_cast %126 : vector<1x8x128xf32> to vector<8x128xf32>
    %c0_i32_62 = arith.constant 0 : i32
    %128 = arith.cmpi sgt, %121, %c0_i32_62 : i32
    %c0_i32_63 = arith.constant 0 : i32
    %129 = arith.cmpi sgt, %c0_i32_22, %c0_i32_63 : i32
    %130 = arith.andi %128, %129 : i1
    %131 = vector.broadcast %130 : i1 to vector<8x1xi1>
    %132 = arith.andi %12, %131 : vector<8x1xi1>
    %cst_64 = arith.constant 0.000000e+00 : f32
    %133 = vector.shape_cast %132 : vector<8x1xi1> to vector<8x1xi1>
    %134 = vector.broadcast %133 : vector<8x1xi1> to vector<8x128xi1>
    %135 = vector.broadcast %cst_64 : f32 to vector<8x128xf32>
    %136 = arith.select %134, %127, %135 : vector<8x128xi1>, vector<8x128xf32>
    %137 = arith.addf %116, %136 : vector<8x128xf32>
    %c4_i32_65 = arith.constant 4 : i32
    %138 = arith.addi %0, %c4_i32_65 : i32
    %c8_i32_66 = arith.constant 8 : i32
    %139 = arith.muli %138, %c8_i32_66 : i32
    %140 = arith.addi %139, %c0_i32_22 : i32
    %141 = arith.index_cast %140 : i32 to index
    %142 = memref.load %arg1[%141] : memref<64xi32, #tpu.memory_space<smem>>
    %c1_i32_67 = arith.constant 1 : i32
    %143 = arith.subi %142, %c1_i32_67 : i32
    %c0_i32_68 = arith.constant 0 : i32
    %c7_i32_69 = arith.constant 7 : i32
    %144 = arith.maxsi %c0_i32_68, %143 : i32
    %145 = arith.minsi %c7_i32_69, %144 : i32
    %146 = arith.index_cast %145 : i32 to index
    %c0_70 = arith.constant 0 : index
    %c0_71 = arith.constant 0 : index
    %147 = vector.load %arg14[%146, %c0_70, %c0_71] : memref<8x8x128xf32, #tpu.memory_space<vmem>>, vector<1x8x128xf32>
    %148 = vector.shape_cast %147 : vector<1x8x128xf32> to vector<8x128xf32>
    %c0_i32_72 = arith.constant 0 : i32
    %149 = arith.cmpi sgt, %142, %c0_i32_72 : i32
    %c0_i32_73 = arith.constant 0 : i32
    %150 = arith.cmpi sgt, %c0_i32_22, %c0_i32_73 : i32
    %151 = arith.andi %149, %150 : i1
    %152 = vector.broadcast %151 : i1 to vector<8x1xi1>
    %153 = arith.andi %15, %152 : vector<8x1xi1>
    %cst_74 = arith.constant 0.000000e+00 : f32
    %154 = vector.shape_cast %153 : vector<8x1xi1> to vector<8x1xi1>
    %155 = vector.broadcast %154 : vector<8x1xi1> to vector<8x128xi1>
    %156 = vector.broadcast %cst_74 : f32 to vector<8x128xf32>
    %157 = arith.select %155, %148, %156 : vector<8x128xi1>, vector<8x128xf32>
    %158 = arith.addf %137, %157 : vector<8x128xf32>
    %c5_i32_75 = arith.constant 5 : i32
    %159 = arith.addi %0, %c5_i32_75 : i32
    %c8_i32_76 = arith.constant 8 : i32
    %160 = arith.muli %159, %c8_i32_76 : i32
    %161 = arith.addi %160, %c0_i32_22 : i32
    %162 = arith.index_cast %161 : i32 to index
    %163 = memref.load %arg1[%162] : memref<64xi32, #tpu.memory_space<smem>>
    %c1_i32_77 = arith.constant 1 : i32
    %164 = arith.subi %163, %c1_i32_77 : i32
    %c0_i32_78 = arith.constant 0 : i32
    %c7_i32_79 = arith.constant 7 : i32
    %165 = arith.maxsi %c0_i32_78, %164 : i32
    %166 = arith.minsi %c7_i32_79, %165 : i32
    %167 = arith.index_cast %166 : i32 to index
    %c0_80 = arith.constant 0 : index
    %c0_81 = arith.constant 0 : index
    %168 = vector.load %arg14[%167, %c0_80, %c0_81] : memref<8x8x128xf32, #tpu.memory_space<vmem>>, vector<1x8x128xf32>
    %169 = vector.shape_cast %168 : vector<1x8x128xf32> to vector<8x128xf32>
    %c0_i32_82 = arith.constant 0 : i32
    %170 = arith.cmpi sgt, %163, %c0_i32_82 : i32
    %c0_i32_83 = arith.constant 0 : i32
    %171 = arith.cmpi sgt, %c0_i32_22, %c0_i32_83 : i32
    %172 = arith.andi %170, %171 : i1
    %173 = vector.broadcast %172 : i1 to vector<8x1xi1>
    %174 = arith.andi %18, %173 : vector<8x1xi1>
    %cst_84 = arith.constant 0.000000e+00 : f32
    %175 = vector.shape_cast %174 : vector<8x1xi1> to vector<8x1xi1>
    %176 = vector.broadcast %175 : vector<8x1xi1> to vector<8x128xi1>
    %177 = vector.broadcast %cst_84 : f32 to vector<8x128xf32>
    %178 = arith.select %176, %169, %177 : vector<8x128xi1>, vector<8x128xf32>
    %179 = arith.addf %158, %178 : vector<8x128xf32>
    %c6_i32_85 = arith.constant 6 : i32
    %180 = arith.addi %0, %c6_i32_85 : i32
    %c8_i32_86 = arith.constant 8 : i32
    %181 = arith.muli %180, %c8_i32_86 : i32
    %182 = arith.addi %181, %c0_i32_22 : i32
    %183 = arith.index_cast %182 : i32 to index
    %184 = memref.load %arg1[%183] : memref<64xi32, #tpu.memory_space<smem>>
    %c1_i32_87 = arith.constant 1 : i32
    %185 = arith.subi %184, %c1_i32_87 : i32
    %c0_i32_88 = arith.constant 0 : i32
    %c7_i32_89 = arith.constant 7 : i32
    %186 = arith.maxsi %c0_i32_88, %185 : i32
    %187 = arith.minsi %c7_i32_89, %186 : i32
    %188 = arith.index_cast %187 : i32 to index
    %c0_90 = arith.constant 0 : index
    %c0_91 = arith.constant 0 : index
    %189 = vector.load %arg14[%188, %c0_90, %c0_91] : memref<8x8x128xf32, #tpu.memory_space<vmem>>, vector<1x8x128xf32>
    %190 = vector.shape_cast %189 : vector<1x8x128xf32> to vector<8x128xf32>
    %c0_i32_92 = arith.constant 0 : i32
    %191 = arith.cmpi sgt, %184, %c0_i32_92 : i32
    %c0_i32_93 = arith.constant 0 : i32
    %192 = arith.cmpi sgt, %c0_i32_22, %c0_i32_93 : i32
    %193 = arith.andi %191, %192 : i1
    %194 = vector.broadcast %193 : i1 to vector<8x1xi1>
    %195 = arith.andi %21, %194 : vector<8x1xi1>
    %cst_94 = arith.constant 0.000000e+00 : f32
    %196 = vector.shape_cast %195 : vector<8x1xi1> to vector<8x1xi1>
    %197 = vector.broadcast %196 : vector<8x1xi1> to vector<8x128xi1>
    %198 = vector.broadcast %cst_94 : f32 to vector<8x128xf32>
    %199 = arith.select %197, %190, %198 : vector<8x128xi1>, vector<8x128xf32>
    %200 = arith.addf %179, %199 : vector<8x128xf32>
    %c7_i32_95 = arith.constant 7 : i32
    %201 = arith.addi %0, %c7_i32_95 : i32
    %c8_i32_96 = arith.constant 8 : i32
    %202 = arith.muli %201, %c8_i32_96 : i32
    %203 = arith.addi %202, %c0_i32_22 : i32
    %204 = arith.index_cast %203 : i32 to index
    %205 = memref.load %arg1[%204] : memref<64xi32, #tpu.memory_space<smem>>
    %c1_i32_97 = arith.constant 1 : i32
    %206 = arith.subi %205, %c1_i32_97 : i32
    %c0_i32_98 = arith.constant 0 : i32
    %c7_i32_99 = arith.constant 7 : i32
    %207 = arith.maxsi %c0_i32_98, %206 : i32
    %208 = arith.minsi %c7_i32_99, %207 : i32
    %209 = arith.index_cast %208 : i32 to index
    %c0_100 = arith.constant 0 : index
    %c0_101 = arith.constant 0 : index
    %210 = vector.load %arg14[%209, %c0_100, %c0_101] : memref<8x8x128xf32, #tpu.memory_space<vmem>>, vector<1x8x128xf32>
    %211 = vector.shape_cast %210 : vector<1x8x128xf32> to vector<8x128xf32>
    %c0_i32_102 = arith.constant 0 : i32
    %212 = arith.cmpi sgt, %205, %c0_i32_102 : i32
    %c0_i32_103 = arith.constant 0 : i32
    %213 = arith.cmpi sgt, %c0_i32_22, %c0_i32_103 : i32
    %214 = arith.andi %212, %213 : i1
    %215 = vector.broadcast %214 : i1 to vector<8x1xi1>
    %216 = arith.andi %24, %215 : vector<8x1xi1>
    %cst_104 = arith.constant 0.000000e+00 : f32
    %217 = vector.shape_cast %216 : vector<8x1xi1> to vector<8x1xi1>
    %218 = vector.broadcast %217 : vector<8x1xi1> to vector<8x128xi1>
    %219 = vector.broadcast %cst_104 : f32 to vector<8x128xf32>
    %220 = arith.select %218, %211, %219 : vector<8x128xi1>, vector<8x128xf32>
    %221 = arith.addf %200, %220 : vector<8x128xf32>
    %cst_105 = arith.constant dense<0.000000e+00> : vector<8x128xf32>
    %222 = tpu.matmul %49, %48, %cst_105 {dimension_numbers = #tpu.dot_dimension_numbers<[1], [0], [0], [1], [0, 0, 1, 1], [], []>} : vector<8x32xbf16>, vector<32x128xbf16>, vector<8x128xf32> -> vector<8x128xf32>
    %223 = arith.addf %221, %222 : vector<8x128xf32>
    %224 = vector.extract_strided_slice %223 {offsets = [0, 0], sizes = [8, 32], strides = [1, 1]} : vector<8x128xf32> to vector<8x32xf32>
    %225 = arith.negf %224 : vector<8x32xf32>
    %226 = math.exp %225 : vector<8x32xf32>
    %cst_106 = arith.constant 1.000000e+00 : f32
    %227 = vector.broadcast %cst_106 : f32 to vector<8x32xf32>
    %228 = arith.addf %227, %226 : vector<8x32xf32>
    %229 = arith.divf %227, %228 : vector<8x32xf32>
    %230 = vector.extract_strided_slice %223 {offsets = [0, 32], sizes = [8, 32], strides = [1, 1]} : vector<8x128xf32> to vector<8x32xf32>
    %231 = arith.negf %230 : vector<8x32xf32>
    %232 = math.exp %231 : vector<8x32xf32>
    %cst_107 = arith.constant 1.000000e+00 : f32
    %233 = vector.broadcast %cst_107 : f32 to vector<8x32xf32>
    %234 = arith.addf %233, %232 : vector<8x32xf32>
    %235 = arith.divf %233, %234 : vector<8x32xf32>
    %236 = vector.extract_strided_slice %223 {offsets = [0, 64], sizes = [8, 32], strides = [1, 1]} : vector<8x128xf32> to vector<8x32xf32>
    %237 = math.tanh %236 : vector<8x32xf32>
    %238 = vector.extract_strided_slice %223 {offsets = [0, 96], sizes = [8, 32], strides = [1, 1]} : vector<8x128xf32> to vector<8x32xf32>
    %239 = arith.negf %238 : vector<8x32xf32>
    %240 = math.exp %239 : vector<8x32xf32>
    %cst_108 = arith.constant 1.000000e+00 : f32
    %241 = vector.broadcast %cst_108 : f32 to vector<8x32xf32>
    %242 = arith.addf %241, %240 : vector<8x32xf32>
    %243 = arith.divf %241, %242 : vector<8x32xf32>
    %244 = arith.mulf %235, %50 : vector<8x32xf32>
    %245 = arith.mulf %229, %237 : vector<8x32xf32>
    %246 = arith.addf %244, %245 : vector<8x32xf32>
    %247 = math.tanh %246 : vector<8x32xf32>
    %248 = arith.mulf %243, %247 : vector<8x32xf32>
    %249 = arith.index_cast %c0_i32_22 : i32 to index
    %c0_109 = arith.constant 0 : index
    %c0_110 = arith.constant 0 : index
    %250 = vector.load %arg12[%249, %c0_109, %c0_110] : memref<8x8x32xf32, #tpu.memory_space<vmem>>, vector<1x8x32xf32>
    %251 = vector.shape_cast %250 : vector<1x8x32xf32> to vector<8x32xf32>
    %252 = vector.shape_cast %248 : vector<8x32xf32> to vector<1x8x32xf32>
    tpu.vector_store %arg12[%249, %c0_109, %c0_110], %252 {strides = array<i32>} : memref<8x8x32xf32, #tpu.memory_space<vmem>>, vector<1x8x32xf32>,
    %253 = arith.truncf %248 : vector<8x32xf32> to vector<8x32xbf16>
    %c1_i32_111 = arith.constant 1 : i32
    %254 = arith.index_cast %c1_i32_111 : i32 to index
    %c0_112 = arith.constant 0 : index
    %c0_113 = arith.constant 0 : index
    %255 = vector.load %arg13[%254, %c0_112, %c0_113] : memref<8x8x128xf32, #tpu.memory_space<vmem>>, vector<1x8x128xf32>
    %256 = vector.shape_cast %255 : vector<1x8x128xf32> to vector<8x128xf32>
    %c0_i32_114 = arith.constant 0 : i32
    %257 = arith.addi %0, %c0_i32_114 : i32
    %c8_i32_115 = arith.constant 8 : i32
    %258 = arith.muli %257, %c8_i32_115 : i32
    %259 = arith.addi %258, %c1_i32_111 : i32
    %260 = arith.index_cast %259 : i32 to index
    %261 = memref.load %arg1[%260] : memref<64xi32, #tpu.memory_space<smem>>
    %c1_i32_116 = arith.constant 1 : i32
    %262 = arith.subi %261, %c1_i32_116 : i32
    %c0_i32_117 = arith.constant 0 : i32
    %c7_i32_118 = arith.constant 7 : i32
    %263 = arith.maxsi %c0_i32_117, %262 : i32
    %264 = arith.minsi %c7_i32_118, %263 : i32
    %265 = arith.index_cast %264 : i32 to index
    %c0_119 = arith.constant 0 : index
    %c0_120 = arith.constant 0 : index
    %266 = vector.load %arg14[%265, %c0_119, %c0_120] : memref<8x8x128xf32, #tpu.memory_space<vmem>>, vector<1x8x128xf32>
    %267 = vector.shape_cast %266 : vector<1x8x128xf32> to vector<8x128xf32>
    %c0_i32_121 = arith.constant 0 : i32
    %268 = arith.cmpi sgt, %261, %c0_i32_121 : i32
    %c0_i32_122 = arith.constant 0 : i32
    %269 = arith.cmpi sgt, %c1_i32_111, %c0_i32_122 : i32
    %270 = arith.andi %268, %269 : i1
    %271 = vector.broadcast %270 : i1 to vector<8x1xi1>
    %272 = arith.andi %3, %271 : vector<8x1xi1>
    %cst_123 = arith.constant 0.000000e+00 : f32
    %273 = vector.shape_cast %272 : vector<8x1xi1> to vector<8x1xi1>
    %274 = vector.broadcast %273 : vector<8x1xi1> to vector<8x128xi1>
    %275 = vector.broadcast %cst_123 : f32 to vector<8x128xf32>
    %276 = arith.select %274, %267, %275 : vector<8x128xi1>, vector<8x128xf32>
    %277 = arith.addf %256, %276 : vector<8x128xf32>
    %c1_i32_124 = arith.constant 1 : i32
    %278 = arith.addi %0, %c1_i32_124 : i32
    %c8_i32_125 = arith.constant 8 : i32
    %279 = arith.muli %278, %c8_i32_125 : i32
    %280 = arith.addi %279, %c1_i32_111 : i32
    %281 = arith.index_cast %280 : i32 to index
    %282 = memref.load %arg1[%281] : memref<64xi32, #tpu.memory_space<smem>>
    %c1_i32_126 = arith.constant 1 : i32
    %283 = arith.subi %282, %c1_i32_126 : i32
    %c0_i32_127 = arith.constant 0 : i32
    %c7_i32_128 = arith.constant 7 : i32
    %284 = arith.maxsi %c0_i32_127, %283 : i32
    %285 = arith.minsi %c7_i32_128, %284 : i32
    %286 = arith.index_cast %285 : i32 to index
    %c0_129 = arith.constant 0 : index
    %c0_130 = arith.constant 0 : index
    %287 = vector.load %arg14[%286, %c0_129, %c0_130] : memref<8x8x128xf32, #tpu.memory_space<vmem>>, vector<1x8x128xf32>
    %288 = vector.shape_cast %287 : vector<1x8x128xf32> to vector<8x128xf32>
    %c0_i32_131 = arith.constant 0 : i32
    %289 = arith.cmpi sgt, %282, %c0_i32_131 : i32
    %c0_i32_132 = arith.constant 0 : i32
    %290 = arith.cmpi sgt, %c1_i32_111, %c0_i32_132 : i32
    %291 = arith.andi %289, %290 : i1
    %292 = vector.broadcast %291 : i1 to vector<8x1xi1>
    %293 = arith.andi %6, %292 : vector<8x1xi1>
    %cst_133 = arith.constant 0.000000e+00 : f32
    %294 = vector.shape_cast %293 : vector<8x1xi1> to vector<8x1xi1>
    %295 = vector.broadcast %294 : vector<8x1xi1> to vector<8x128xi1>
    %296 = vector.broadcast %cst_133 : f32 to vector<8x128xf32>
    %297 = arith.select %295, %288, %296 : vector<8x128xi1>, vector<8x128xf32>
    %298 = arith.addf %277, %297 : vector<8x128xf32>
    %c2_i32_134 = arith.constant 2 : i32
    %299 = arith.addi %0, %c2_i32_134 : i32
    %c8_i32_135 = arith.constant 8 : i32
    %300 = arith.muli %299, %c8_i32_135 : i32
    %301 = arith.addi %300, %c1_i32_111 : i32
    %302 = arith.index_cast %301 : i32 to index
    %303 = memref.load %arg1[%302] : memref<64xi32, #tpu.memory_space<smem>>
    %c1_i32_136 = arith.constant 1 : i32
    %304 = arith.subi %303, %c1_i32_136 : i32
    %c0_i32_137 = arith.constant 0 : i32
    %c7_i32_138 = arith.constant 7 : i32
    %305 = arith.maxsi %c0_i32_137, %304 : i32
    %306 = arith.minsi %c7_i32_138, %305 : i32
    %307 = arith.index_cast %306 : i32 to index
    %c0_139 = arith.constant 0 : index
    %c0_140 = arith.constant 0 : index
    %308 = vector.load %arg14[%307, %c0_139, %c0_140] : memref<8x8x128xf32, #tpu.memory_space<vmem>>, vector<1x8x128xf32>
    %309 = vector.shape_cast %308 : vector<1x8x128xf32> to vector<8x128xf32>
    %c0_i32_141 = arith.constant 0 : i32
    %310 = arith.cmpi sgt, %303, %c0_i32_141 : i32
    %c0_i32_142 = arith.constant 0 : i32
    %311 = arith.cmpi sgt, %c1_i32_111, %c0_i32_142 : i32
    %312 = arith.andi %310, %311 : i1
    %313 = vector.broadcast %312 : i1 to vector<8x1xi1>
    %314 = arith.andi %9, %313 : vector<8x1xi1>
    %cst_143 = arith.constant 0.000000e+00 : f32
    %315 = vector.shape_cast %314 : vector<8x1xi1> to vector<8x1xi1>
    %316 = vector.broadcast %315 : vector<8x1xi1> to vector<8x128xi1>
    %317 = vector.broadcast %cst_143 : f32 to vector<8x128xf32>
    %318 = arith.select %316, %309, %317 : vector<8x128xi1>, vector<8x128xf32>
    %319 = arith.addf %298, %318 : vector<8x128xf32>
    %c3_i32_144 = arith.constant 3 : i32
    %320 = arith.addi %0, %c3_i32_144 : i32
    %c8_i32_145 = arith.constant 8 : i32
    %321 = arith.muli %320, %c8_i32_145 : i32
    %322 = arith.addi %321, %c1_i32_111 : i32
    %323 = arith.index_cast %322 : i32 to index
    %324 = memref.load %arg1[%323] : memref<64xi32, #tpu.memory_space<smem>>
    %c1_i32_146 = arith.constant 1 : i32
    %325 = arith.subi %324, %c1_i32_146 : i32
    %c0_i32_147 = arith.constant 0 : i32
    %c7_i32_148 = arith.constant 7 : i32
    %326 = arith.maxsi %c0_i32_147, %325 : i32
    %327 = arith.minsi %c7_i32_148, %326 : i32
    %328 = arith.index_cast %327 : i32 to index
    %c0_149 = arith.constant 0 : index
    %c0_150 = arith.constant 0 : index
    %329 = vector.load %arg14[%328, %c0_149, %c0_150] : memref<8x8x128xf32, #tpu.memory_space<vmem>>, vector<1x8x128xf32>
    %330 = vector.shape_cast %329 : vector<1x8x128xf32> to vector<8x128xf32>
    %c0_i32_151 = arith.constant 0 : i32
    %331 = arith.cmpi sgt, %324, %c0_i32_151 : i32
    %c0_i32_152 = arith.constant 0 : i32
    %332 = arith.cmpi sgt, %c1_i32_111, %c0_i32_152 : i32
    %333 = arith.andi %331, %332 : i1
    %334 = vector.broadcast %333 : i1 to vector<8x1xi1>
    %335 = arith.andi %12, %334 : vector<8x1xi1>
    %cst_153 = arith.constant 0.000000e+00 : f32
    %336 = vector.shape_cast %335 : vector<8x1xi1> to vector<8x1xi1>
    %337 = vector.broadcast %336 : vector<8x1xi1> to vector<8x128xi1>
    %338 = vector.broadcast %cst_153 : f32 to vector<8x128xf32>
    %339 = arith.select %337, %330, %338 : vector<8x128xi1>, vector<8x128xf32>
    %340 = arith.addf %319, %339 : vector<8x128xf32>
    %c4_i32_154 = arith.constant 4 : i32
    %341 = arith.addi %0, %c4_i32_154 : i32
    %c8_i32_155 = arith.constant 8 : i32
    %342 = arith.muli %341, %c8_i32_155 : i32
    %343 = arith.addi %342, %c1_i32_111 : i32
    %344 = arith.index_cast %343 : i32 to index
    %345 = memref.load %arg1[%344] : memref<64xi32, #tpu.memory_space<smem>>
    %c1_i32_156 = arith.constant 1 : i32
    %346 = arith.subi %345, %c1_i32_156 : i32
    %c0_i32_157 = arith.constant 0 : i32
    %c7_i32_158 = arith.constant 7 : i32
    %347 = arith.maxsi %c0_i32_157, %346 : i32
    %348 = arith.minsi %c7_i32_158, %347 : i32
    %349 = arith.index_cast %348 : i32 to index
    %c0_159 = arith.constant 0 : index
    %c0_160 = arith.constant 0 : index
    %350 = vector.load %arg14[%349, %c0_159, %c0_160] : memref<8x8x128xf32, #tpu.memory_space<vmem>>, vector<1x8x128xf32>
    %351 = vector.shape_cast %350 : vector<1x8x128xf32> to vector<8x128xf32>
    %c0_i32_161 = arith.constant 0 : i32
    %352 = arith.cmpi sgt, %345, %c0_i32_161 : i32
    %c0_i32_162 = arith.constant 0 : i32
    %353 = arith.cmpi sgt, %c1_i32_111, %c0_i32_162 : i32
    %354 = arith.andi %352, %353 : i1
    %355 = vector.broadcast %354 : i1 to vector<8x1xi1>
    %356 = arith.andi %15, %355 : vector<8x1xi1>
    %cst_163 = arith.constant 0.000000e+00 : f32
    %357 = vector.shape_cast %356 : vector<8x1xi1> to vector<8x1xi1>
    %358 = vector.broadcast %357 : vector<8x1xi1> to vector<8x128xi1>
    %359 = vector.broadcast %cst_163 : f32 to vector<8x128xf32>
    %360 = arith.select %358, %351, %359 : vector<8x128xi1>, vector<8x128xf32>
    %361 = arith.addf %340, %360 : vector<8x128xf32>
    %c5_i32_164 = arith.constant 5 : i32
    %362 = arith.addi %0, %c5_i32_164 : i32
    %c8_i32_165 = arith.constant 8 : i32
    %363 = arith.muli %362, %c8_i32_165 : i32
    %364 = arith.addi %363, %c1_i32_111 : i32
    %365 = arith.index_cast %364 : i32 to index
    %366 = memref.load %arg1[%365] : memref<64xi32, #tpu.memory_space<smem>>
    %c1_i32_166 = arith.constant 1 : i32
    %367 = arith.subi %366, %c1_i32_166 : i32
    %c0_i32_167 = arith.constant 0 : i32
    %c7_i32_168 = arith.constant 7 : i32
    %368 = arith.maxsi %c0_i32_167, %367 : i32
    %369 = arith.minsi %c7_i32_168, %368 : i32
    %370 = arith.index_cast %369 : i32 to index
    %c0_169 = arith.constant 0 : index
    %c0_170 = arith.constant 0 : index
    %371 = vector.load %arg14[%370, %c0_169, %c0_170] : memref<8x8x128xf32, #tpu.memory_space<vmem>>, vector<1x8x128xf32>
    %372 = vector.shape_cast %371 : vector<1x8x128xf32> to vector<8x128xf32>
    %c0_i32_171 = arith.constant 0 : i32
    %373 = arith.cmpi sgt, %366, %c0_i32_171 : i32
    %c0_i32_172 = arith.constant 0 : i32
    %374 = arith.cmpi sgt, %c1_i32_111, %c0_i32_172 : i32
    %375 = arith.andi %373, %374 : i1
    %376 = vector.broadcast %375 : i1 to vector<8x1xi1>
    %377 = arith.andi %18, %376 : vector<8x1xi1>
    %cst_173 = arith.constant 0.000000e+00 : f32
    %378 = vector.shape_cast %377 : vector<8x1xi1> to vector<8x1xi1>
    %379 = vector.broadcast %378 : vector<8x1xi1> to vector<8x128xi1>
    %380 = vector.broadcast %cst_173 : f32 to vector<8x128xf32>
    %381 = arith.select %379, %372, %380 : vector<8x128xi1>, vector<8x128xf32>
    %382 = arith.addf %361, %381 : vector<8x128xf32>
    %c6_i32_174 = arith.constant 6 : i32
    %383 = arith.addi %0, %c6_i32_174 : i32
    %c8_i32_175 = arith.constant 8 : i32
    %384 = arith.muli %383, %c8_i32_175 : i32
    %385 = arith.addi %384, %c1_i32_111 : i32
    %386 = arith.index_cast %385 : i32 to index
    %387 = memref.load %arg1[%386] : memref<64xi32, #tpu.memory_space<smem>>
    %c1_i32_176 = arith.constant 1 : i32
    %388 = arith.subi %387, %c1_i32_176 : i32
    %c0_i32_177 = arith.constant 0 : i32
    %c7_i32_178 = arith.constant 7 : i32
    %389 = arith.maxsi %c0_i32_177, %388 : i32
    %390 = arith.minsi %c7_i32_178, %389 : i32
    %391 = arith.index_cast %390 : i32 to index
    %c0_179 = arith.constant 0 : index
    %c0_180 = arith.constant 0 : index
    %392 = vector.load %arg14[%391, %c0_179, %c0_180] : memref<8x8x128xf32, #tpu.memory_space<vmem>>, vector<1x8x128xf32>
    %393 = vector.shape_cast %392 : vector<1x8x128xf32> to vector<8x128xf32>
    %c0_i32_181 = arith.constant 0 : i32
    %394 = arith.cmpi sgt, %387, %c0_i32_181 : i32
    %c0_i32_182 = arith.constant 0 : i32
    %395 = arith.cmpi sgt, %c1_i32_111, %c0_i32_182 : i32
    %396 = arith.andi %394, %395 : i1
    %397 = vector.broadcast %396 : i1 to vector<8x1xi1>
    %398 = arith.andi %21, %397 : vector<8x1xi1>
    %cst_183 = arith.constant 0.000000e+00 : f32
    %399 = vector.shape_cast %398 : vector<8x1xi1> to vector<8x1xi1>
    %400 = vector.broadcast %399 : vector<8x1xi1> to vector<8x128xi1>
    %401 = vector.broadcast %cst_183 : f32 to vector<8x128xf32>
    %402 = arith.select %400, %393, %401 : vector<8x128xi1>, vector<8x128xf32>
    %403 = arith.addf %382, %402 : vector<8x128xf32>
    %c7_i32_184 = arith.constant 7 : i32
    %404 = arith.addi %0, %c7_i32_184 : i32
    %c8_i32_185 = arith.constant 8 : i32
    %405 = arith.muli %404, %c8_i32_185 : i32
    %406 = arith.addi %405, %c1_i32_111 : i32
    %407 = arith.index_cast %406 : i32 to index
    %408 = memref.load %arg1[%407] : memref<64xi32, #tpu.memory_space<smem>>
    %c1_i32_186 = arith.constant 1 : i32
    %409 = arith.subi %408, %c1_i32_186 : i32
    %c0_i32_187 = arith.constant 0 : i32
    %c7_i32_188 = arith.constant 7 : i32
    %410 = arith.maxsi %c0_i32_187, %409 : i32
    %411 = arith.minsi %c7_i32_188, %410 : i32
    %412 = arith.index_cast %411 : i32 to index
    %c0_189 = arith.constant 0 : index
    %c0_190 = arith.constant 0 : index
    %413 = vector.load %arg14[%412, %c0_189, %c0_190] : memref<8x8x128xf32, #tpu.memory_space<vmem>>, vector<1x8x128xf32>
    %414 = vector.shape_cast %413 : vector<1x8x128xf32> to vector<8x128xf32>
    %c0_i32_191 = arith.constant 0 : i32
    %415 = arith.cmpi sgt, %408, %c0_i32_191 : i32
    %c0_i32_192 = arith.constant 0 : i32
    %416 = arith.cmpi sgt, %c1_i32_111, %c0_i32_192 : i32
    %417 = arith.andi %415, %416 : i1
    %418 = vector.broadcast %417 : i1 to vector<8x1xi1>
    %419 = arith.andi %24, %418 : vector<8x1xi1>
    %cst_193 = arith.constant 0.000000e+00 : f32
    %420 = vector.shape_cast %419 : vector<8x1xi1> to vector<8x1xi1>
    %421 = vector.broadcast %420 : vector<8x1xi1> to vector<8x128xi1>
    %422 = vector.broadcast %cst_193 : f32 to vector<8x128xf32>
    %423 = arith.select %421, %414, %422 : vector<8x128xi1>, vector<8x128xf32>
    %424 = arith.addf %403, %423 : vector<8x128xf32>
    %cst_194 = arith.constant dense<0.000000e+00> : vector<8x128xf32>
    %425 = tpu.matmul %253, %48, %cst_194 {dimension_numbers = #tpu.dot_dimension_numbers<[1], [0], [0], [1], [0, 0, 1, 1], [], []>} : vector<8x32xbf16>, vector<32x128xbf16>, vector<8x128xf32> -> vector<8x128xf32>
    %426 = arith.addf %424, %425 : vector<8x128xf32>
    %427 = vector.extract_strided_slice %426 {offsets = [0, 0], sizes = [8, 32], strides = [1, 1]} : vector<8x128xf32> to vector<8x32xf32>
    %428 = arith.negf %427 : vector<8x32xf32>
    %429 = math.exp %428 : vector<8x32xf32>
    %cst_195 = arith.constant 1.000000e+00 : f32
    %430 = vector.broadcast %cst_195 : f32 to vector<8x32xf32>
    %431 = arith.addf %430, %429 : vector<8x32xf32>
    %432 = arith.divf %430, %431 : vector<8x32xf32>
    %433 = vector.extract_strided_slice %426 {offsets = [0, 32], sizes = [8, 32], strides = [1, 1]} : vector<8x128xf32> to vector<8x32xf32>
    %434 = arith.negf %433 : vector<8x32xf32>
    %435 = math.exp %434 : vector<8x32xf32>
    %cst_196 = arith.constant 1.000000e+00 : f32
    %436 = vector.broadcast %cst_196 : f32 to vector<8x32xf32>
    %437 = arith.addf %436, %435 : vector<8x32xf32>
    %438 = arith.divf %436, %437 : vector<8x32xf32>
    %439 = vector.extract_strided_slice %426 {offsets = [0, 64], sizes = [8, 32], strides = [1, 1]} : vector<8x128xf32> to vector<8x32xf32>
    %440 = math.tanh %439 : vector<8x32xf32>
    %441 = vector.extract_strided_slice %426 {offsets = [0, 96], sizes = [8, 32], strides = [1, 1]} : vector<8x128xf32> to vector<8x32xf32>
    %442 = arith.negf %441 : vector<8x32xf32>
    %443 = math.exp %442 : vector<8x32xf32>
    %cst_197 = arith.constant 1.000000e+00 : f32
    %444 = vector.broadcast %cst_197 : f32 to vector<8x32xf32>
    %445 = arith.addf %444, %443 : vector<8x32xf32>
    %446 = arith.divf %444, %445 : vector<8x32xf32>
    %447 = arith.mulf %438, %246 : vector<8x32xf32>
    %448 = arith.mulf %432, %440 : vector<8x32xf32>
    %449 = arith.addf %447, %448 : vector<8x32xf32>
    %450 = math.tanh %449 : vector<8x32xf32>
    %451 = arith.mulf %446, %450 : vector<8x32xf32>
    %452 = arith.index_cast %c1_i32_111 : i32 to index
    %c0_198 = arith.constant 0 : index
    %c0_199 = arith.constant 0 : index
    %453 = vector.load %arg12[%452, %c0_198, %c0_199] : memref<8x8x32xf32, #tpu.memory_space<vmem>>, vector<1x8x32xf32>
    %454 = vector.shape_cast %453 : vector<1x8x32xf32> to vector<8x32xf32>
    %455 = vector.shape_cast %451 : vector<8x32xf32> to vector<1x8x32xf32>
    tpu.vector_store %arg12[%452, %c0_198, %c0_199], %455 {strides = array<i32>} : memref<8x8x32xf32, #tpu.memory_space<vmem>>, vector<1x8x32xf32>,
    %456 = arith.truncf %451 : vector<8x32xf32> to vector<8x32xbf16>
    %c2_i32_200 = arith.constant 2 : i32
    %457 = arith.index_cast %c2_i32_200 : i32 to index
    %c0_201 = arith.constant 0 : index
    %c0_202 = arith.constant 0 : index
    %458 = vector.load %arg13[%457, %c0_201, %c0_202] : memref<8x8x128xf32, #tpu.memory_space<vmem>>, vector<1x8x128xf32>
    %459 = vector.shape_cast %458 : vector<1x8x128xf32> to vector<8x128xf32>
    %c0_i32_203 = arith.constant 0 : i32
    %460 = arith.addi %0, %c0_i32_203 : i32
    %c8_i32_204 = arith.constant 8 : i32
    %461 = arith.muli %460, %c8_i32_204 : i32
    %462 = arith.addi %461, %c2_i32_200 : i32
    %463 = arith.index_cast %462 : i32 to index
    %464 = memref.load %arg1[%463] : memref<64xi32, #tpu.memory_space<smem>>
    %c1_i32_205 = arith.constant 1 : i32
    %465 = arith.subi %464, %c1_i32_205 : i32
    %c0_i32_206 = arith.constant 0 : i32
    %c7_i32_207 = arith.constant 7 : i32
    %466 = arith.maxsi %c0_i32_206, %465 : i32
    %467 = arith.minsi %c7_i32_207, %466 : i32
    %468 = arith.index_cast %467 : i32 to index
    %c0_208 = arith.constant 0 : index
    %c0_209 = arith.constant 0 : index
    %469 = vector.load %arg14[%468, %c0_208, %c0_209] : memref<8x8x128xf32, #tpu.memory_space<vmem>>, vector<1x8x128xf32>
    %470 = vector.shape_cast %469 : vector<1x8x128xf32> to vector<8x128xf32>
    %c0_i32_210 = arith.constant 0 : i32
    %471 = arith.cmpi sgt, %464, %c0_i32_210 : i32
    %c0_i32_211 = arith.constant 0 : i32
    %472 = arith.cmpi sgt, %c2_i32_200, %c0_i32_211 : i32
    %473 = arith.andi %471, %472 : i1
    %474 = vector.broadcast %473 : i1 to vector<8x1xi1>
    %475 = arith.andi %3, %474 : vector<8x1xi1>
    %cst_212 = arith.constant 0.000000e+00 : f32
    %476 = vector.shape_cast %475 : vector<8x1xi1> to vector<8x1xi1>
    %477 = vector.broadcast %476 : vector<8x1xi1> to vector<8x128xi1>
    %478 = vector.broadcast %cst_212 : f32 to vector<8x128xf32>
    %479 = arith.select %477, %470, %478 : vector<8x128xi1>, vector<8x128xf32>
    %480 = arith.addf %459, %479 : vector<8x128xf32>
    %c1_i32_213 = arith.constant 1 : i32
    %481 = arith.addi %0, %c1_i32_213 : i32
    %c8_i32_214 = arith.constant 8 : i32
    %482 = arith.muli %481, %c8_i32_214 : i32
    %483 = arith.addi %482, %c2_i32_200 : i32
    %484 = arith.index_cast %483 : i32 to index
    %485 = memref.load %arg1[%484] : memref<64xi32, #tpu.memory_space<smem>>
    %c1_i32_215 = arith.constant 1 : i32
    %486 = arith.subi %485, %c1_i32_215 : i32
    %c0_i32_216 = arith.constant 0 : i32
    %c7_i32_217 = arith.constant 7 : i32
    %487 = arith.maxsi %c0_i32_216, %486 : i32
    %488 = arith.minsi %c7_i32_217, %487 : i32
    %489 = arith.index_cast %488 : i32 to index
    %c0_218 = arith.constant 0 : index
    %c0_219 = arith.constant 0 : index
    %490 = vector.load %arg14[%489, %c0_218, %c0_219] : memref<8x8x128xf32, #tpu.memory_space<vmem>>, vector<1x8x128xf32>
    %491 = vector.shape_cast %490 : vector<1x8x128xf32> to vector<8x128xf32>
    %c0_i32_220 = arith.constant 0 : i32
    %492 = arith.cmpi sgt, %485, %c0_i32_220 : i32
    %c0_i32_221 = arith.constant 0 : i32
    %493 = arith.cmpi sgt, %c2_i32_200, %c0_i32_221 : i32
    %494 = arith.andi %492, %493 : i1
    %495 = vector.broadcast %494 : i1 to vector<8x1xi1>
    %496 = arith.andi %6, %495 : vector<8x1xi1>
    %cst_222 = arith.constant 0.000000e+00 : f32
    %497 = vector.shape_cast %496 : vector<8x1xi1> to vector<8x1xi1>
    %498 = vector.broadcast %497 : vector<8x1xi1> to vector<8x128xi1>
    %499 = vector.broadcast %cst_222 : f32 to vector<8x128xf32>
    %500 = arith.select %498, %491, %499 : vector<8x128xi1>, vector<8x128xf32>
    %501 = arith.addf %480, %500 : vector<8x128xf32>
    %c2_i32_223 = arith.constant 2 : i32
    %502 = arith.addi %0, %c2_i32_223 : i32
    %c8_i32_224 = arith.constant 8 : i32
    %503 = arith.muli %502, %c8_i32_224 : i32
    %504 = arith.addi %503, %c2_i32_200 : i32
    %505 = arith.index_cast %504 : i32 to index
    %506 = memref.load %arg1[%505] : memref<64xi32, #tpu.memory_space<smem>>
    %c1_i32_225 = arith.constant 1 : i32
    %507 = arith.subi %506, %c1_i32_225 : i32
    %c0_i32_226 = arith.constant 0 : i32
    %c7_i32_227 = arith.constant 7 : i32
    %508 = arith.maxsi %c0_i32_226, %507 : i32
    %509 = arith.minsi %c7_i32_227, %508 : i32
    %510 = arith.index_cast %509 : i32 to index
    %c0_228 = arith.constant 0 : index
    %c0_229 = arith.constant 0 : index
    %511 = vector.load %arg14[%510, %c0_228, %c0_229] : memref<8x8x128xf32, #tpu.memory_space<vmem>>, vector<1x8x128xf32>
    %512 = vector.shape_cast %511 : vector<1x8x128xf32> to vector<8x128xf32>
    %c0_i32_230 = arith.constant 0 : i32
    %513 = arith.cmpi sgt, %506, %c0_i32_230 : i32
    %c0_i32_231 = arith.constant 0 : i32
    %514 = arith.cmpi sgt, %c2_i32_200, %c0_i32_231 : i32
    %515 = arith.andi %513, %514 : i1
    %516 = vector.broadcast %515 : i1 to vector<8x1xi1>
    %517 = arith.andi %9, %516 : vector<8x1xi1>
    %cst_232 = arith.constant 0.000000e+00 : f32
    %518 = vector.shape_cast %517 : vector<8x1xi1> to vector<8x1xi1>
    %519 = vector.broadcast %518 : vector<8x1xi1> to vector<8x128xi1>
    %520 = vector.broadcast %cst_232 : f32 to vector<8x128xf32>
    %521 = arith.select %519, %512, %520 : vector<8x128xi1>, vector<8x128xf32>
    %522 = arith.addf %501, %521 : vector<8x128xf32>
    %c3_i32_233 = arith.constant 3 : i32
    %523 = arith.addi %0, %c3_i32_233 : i32
    %c8_i32_234 = arith.constant 8 : i32
    %524 = arith.muli %523, %c8_i32_234 : i32
    %525 = arith.addi %524, %c2_i32_200 : i32
    %526 = arith.index_cast %525 : i32 to index
    %527 = memref.load %arg1[%526] : memref<64xi32, #tpu.memory_space<smem>>
    %c1_i32_235 = arith.constant 1 : i32
    %528 = arith.subi %527, %c1_i32_235 : i32
    %c0_i32_236 = arith.constant 0 : i32
    %c7_i32_237 = arith.constant 7 : i32
    %529 = arith.maxsi %c0_i32_236, %528 : i32
    %530 = arith.minsi %c7_i32_237, %529 : i32
    %531 = arith.index_cast %530 : i32 to index
    %c0_238 = arith.constant 0 : index
    %c0_239 = arith.constant 0 : index
    %532 = vector.load %arg14[%531, %c0_238, %c0_239] : memref<8x8x128xf32, #tpu.memory_space<vmem>>, vector<1x8x128xf32>
    %533 = vector.shape_cast %532 : vector<1x8x128xf32> to vector<8x128xf32>
    %c0_i32_240 = arith.constant 0 : i32
    %534 = arith.cmpi sgt, %527, %c0_i32_240 : i32
    %c0_i32_241 = arith.constant 0 : i32
    %535 = arith.cmpi sgt, %c2_i32_200, %c0_i32_241 : i32
    %536 = arith.andi %534, %535 : i1
    %537 = vector.broadcast %536 : i1 to vector<8x1xi1>
    %538 = arith.andi %12, %537 : vector<8x1xi1>
    %cst_242 = arith.constant 0.000000e+00 : f32
    %539 = vector.shape_cast %538 : vector<8x1xi1> to vector<8x1xi1>
    %540 = vector.broadcast %539 : vector<8x1xi1> to vector<8x128xi1>
    %541 = vector.broadcast %cst_242 : f32 to vector<8x128xf32>
    %542 = arith.select %540, %533, %541 : vector<8x128xi1>, vector<8x128xf32>
    %543 = arith.addf %522, %542 : vector<8x128xf32>
    %c4_i32_243 = arith.constant 4 : i32
    %544 = arith.addi %0, %c4_i32_243 : i32
    %c8_i32_244 = arith.constant 8 : i32
    %545 = arith.muli %544, %c8_i32_244 : i32
    %546 = arith.addi %545, %c2_i32_200 : i32
    %547 = arith.index_cast %546 : i32 to index
    %548 = memref.load %arg1[%547] : memref<64xi32, #tpu.memory_space<smem>>
    %c1_i32_245 = arith.constant 1 : i32
    %549 = arith.subi %548, %c1_i32_245 : i32
    %c0_i32_246 = arith.constant 0 : i32
    %c7_i32_247 = arith.constant 7 : i32
    %550 = arith.maxsi %c0_i32_246, %549 : i32
    %551 = arith.minsi %c7_i32_247, %550 : i32
    %552 = arith.index_cast %551 : i32 to index
    %c0_248 = arith.constant 0 : index
    %c0_249 = arith.constant 0 : index
    %553 = vector.load %arg14[%552, %c0_248, %c0_249] : memref<8x8x128xf32, #tpu.memory_space<vmem>>, vector<1x8x128xf32>
    %554 = vector.shape_cast %553 : vector<1x8x128xf32> to vector<8x128xf32>
    %c0_i32_250 = arith.constant 0 : i32
    %555 = arith.cmpi sgt, %548, %c0_i32_250 : i32
    %c0_i32_251 = arith.constant 0 : i32
    %556 = arith.cmpi sgt, %c2_i32_200, %c0_i32_251 : i32
    %557 = arith.andi %555, %556 : i1
    %558 = vector.broadcast %557 : i1 to vector<8x1xi1>
    %559 = arith.andi %15, %558 : vector<8x1xi1>
    %cst_252 = arith.constant 0.000000e+00 : f32
    %560 = vector.shape_cast %559 : vector<8x1xi1> to vector<8x1xi1>
    %561 = vector.broadcast %560 : vector<8x1xi1> to vector<8x128xi1>
    %562 = vector.broadcast %cst_252 : f32 to vector<8x128xf32>
    %563 = arith.select %561, %554, %562 : vector<8x128xi1>, vector<8x128xf32>
    %564 = arith.addf %543, %563 : vector<8x128xf32>
    %c5_i32_253 = arith.constant 5 : i32
    %565 = arith.addi %0, %c5_i32_253 : i32
    %c8_i32_254 = arith.constant 8 : i32
    %566 = arith.muli %565, %c8_i32_254 : i32
    %567 = arith.addi %566, %c2_i32_200 : i32
    %568 = arith.index_cast %567 : i32 to index
    %569 = memref.load %arg1[%568] : memref<64xi32, #tpu.memory_space<smem>>
    %c1_i32_255 = arith.constant 1 : i32
    %570 = arith.subi %569, %c1_i32_255 : i32
    %c0_i32_256 = arith.constant 0 : i32
    %c7_i32_257 = arith.constant 7 : i32
    %571 = arith.maxsi %c0_i32_256, %570 : i32
    %572 = arith.minsi %c7_i32_257, %571 : i32
    %573 = arith.index_cast %572 : i32 to index
    %c0_258 = arith.constant 0 : index
    %c0_259 = arith.constant 0 : index
    %574 = vector.load %arg14[%573, %c0_258, %c0_259] : memref<8x8x128xf32, #tpu.memory_space<vmem>>, vector<1x8x128xf32>
    %575 = vector.shape_cast %574 : vector<1x8x128xf32> to vector<8x128xf32>
    %c0_i32_260 = arith.constant 0 : i32
    %576 = arith.cmpi sgt, %569, %c0_i32_260 : i32
    %c0_i32_261 = arith.constant 0 : i32
    %577 = arith.cmpi sgt, %c2_i32_200, %c0_i32_261 : i32
    %578 = arith.andi %576, %577 : i1
    %579 = vector.broadcast %578 : i1 to vector<8x1xi1>
    %580 = arith.andi %18, %579 : vector<8x1xi1>
    %cst_262 = arith.constant 0.000000e+00 : f32
    %581 = vector.shape_cast %580 : vector<8x1xi1> to vector<8x1xi1>
    %582 = vector.broadcast %581 : vector<8x1xi1> to vector<8x128xi1>
    %583 = vector.broadcast %cst_262 : f32 to vector<8x128xf32>
    %584 = arith.select %582, %575, %583 : vector<8x128xi1>, vector<8x128xf32>
    %585 = arith.addf %564, %584 : vector<8x128xf32>
    %c6_i32_263 = arith.constant 6 : i32
    %586 = arith.addi %0, %c6_i32_263 : i32
    %c8_i32_264 = arith.constant 8 : i32
    %587 = arith.muli %586, %c8_i32_264 : i32
    %588 = arith.addi %587, %c2_i32_200 : i32
    %589 = arith.index_cast %588 : i32 to index
    %590 = memref.load %arg1[%589] : memref<64xi32, #tpu.memory_space<smem>>
    %c1_i32_265 = arith.constant 1 : i32
    %591 = arith.subi %590, %c1_i32_265 : i32
    %c0_i32_266 = arith.constant 0 : i32
    %c7_i32_267 = arith.constant 7 : i32
    %592 = arith.maxsi %c0_i32_266, %591 : i32
    %593 = arith.minsi %c7_i32_267, %592 : i32
    %594 = arith.index_cast %593 : i32 to index
    %c0_268 = arith.constant 0 : index
    %c0_269 = arith.constant 0 : index
    %595 = vector.load %arg14[%594, %c0_268, %c0_269] : memref<8x8x128xf32, #tpu.memory_space<vmem>>, vector<1x8x128xf32>
    %596 = vector.shape_cast %595 : vector<1x8x128xf32> to vector<8x128xf32>
    %c0_i32_270 = arith.constant 0 : i32
    %597 = arith.cmpi sgt, %590, %c0_i32_270 : i32
    %c0_i32_271 = arith.constant 0 : i32
    %598 = arith.cmpi sgt, %c2_i32_200, %c0_i32_271 : i32
    %599 = arith.andi %597, %598 : i1
    %600 = vector.broadcast %599 : i1 to vector<8x1xi1>
    %601 = arith.andi %21, %600 : vector<8x1xi1>
    %cst_272 = arith.constant 0.000000e+00 : f32
    %602 = vector.shape_cast %601 : vector<8x1xi1> to vector<8x1xi1>
    %603 = vector.broadcast %602 : vector<8x1xi1> to vector<8x128xi1>
    %604 = vector.broadcast %cst_272 : f32 to vector<8x128xf32>
    %605 = arith.select %603, %596, %604 : vector<8x128xi1>, vector<8x128xf32>
    %606 = arith.addf %585, %605 : vector<8x128xf32>
    %c7_i32_273 = arith.constant 7 : i32
    %607 = arith.addi %0, %c7_i32_273 : i32
    %c8_i32_274 = arith.constant 8 : i32
    %608 = arith.muli %607, %c8_i32_274 : i32
    %609 = arith.addi %608, %c2_i32_200 : i32
    %610 = arith.index_cast %609 : i32 to index
    %611 = memref.load %arg1[%610] : memref<64xi32, #tpu.memory_space<smem>>
    %c1_i32_275 = arith.constant 1 : i32
    %612 = arith.subi %611, %c1_i32_275 : i32
    %c0_i32_276 = arith.constant 0 : i32
    %c7_i32_277 = arith.constant 7 : i32
    %613 = arith.maxsi %c0_i32_276, %612 : i32
    %614 = arith.minsi %c7_i32_277, %613 : i32
    %615 = arith.index_cast %614 : i32 to index
    %c0_278 = arith.constant 0 : index
    %c0_279 = arith.constant 0 : index
    %616 = vector.load %arg14[%615, %c0_278, %c0_279] : memref<8x8x128xf32, #tpu.memory_space<vmem>>, vector<1x8x128xf32>
    %617 = vector.shape_cast %616 : vector<1x8x128xf32> to vector<8x128xf32>
    %c0_i32_280 = arith.constant 0 : i32
    %618 = arith.cmpi sgt, %611, %c0_i32_280 : i32
    %c0_i32_281 = arith.constant 0 : i32
    %619 = arith.cmpi sgt, %c2_i32_200, %c0_i32_281 : i32
    %620 = arith.andi %618, %619 : i1
    %621 = vector.broadcast %620 : i1 to vector<8x1xi1>
    %622 = arith.andi %24, %621 : vector<8x1xi1>
    %cst_282 = arith.constant 0.000000e+00 : f32
    %623 = vector.shape_cast %622 : vector<8x1xi1> to vector<8x1xi1>
    %624 = vector.broadcast %623 : vector<8x1xi1> to vector<8x128xi1>
    %625 = vector.broadcast %cst_282 : f32 to vector<8x128xf32>
    %626 = arith.select %624, %617, %625 : vector<8x128xi1>, vector<8x128xf32>
    %627 = arith.addf %606, %626 : vector<8x128xf32>
    %cst_283 = arith.constant dense<0.000000e+00> : vector<8x128xf32>
    %628 = tpu.matmul %456, %48, %cst_283 {dimension_numbers = #tpu.dot_dimension_numbers<[1], [0], [0], [1], [0, 0, 1, 1], [], []>} : vector<8x32xbf16>, vector<32x128xbf16>, vector<8x128xf32> -> vector<8x128xf32>
    %629 = arith.addf %627, %628 : vector<8x128xf32>
    %630 = vector.extract_strided_slice %629 {offsets = [0, 0], sizes = [8, 32], strides = [1, 1]} : vector<8x128xf32> to vector<8x32xf32>
    %631 = arith.negf %630 : vector<8x32xf32>
    %632 = math.exp %631 : vector<8x32xf32>
    %cst_284 = arith.constant 1.000000e+00 : f32
    %633 = vector.broadcast %cst_284 : f32 to vector<8x32xf32>
    %634 = arith.addf %633, %632 : vector<8x32xf32>
    %635 = arith.divf %633, %634 : vector<8x32xf32>
    %636 = vector.extract_strided_slice %629 {offsets = [0, 32], sizes = [8, 32], strides = [1, 1]} : vector<8x128xf32> to vector<8x32xf32>
    %637 = arith.negf %636 : vector<8x32xf32>
    %638 = math.exp %637 : vector<8x32xf32>
    %cst_285 = arith.constant 1.000000e+00 : f32
    %639 = vector.broadcast %cst_285 : f32 to vector<8x32xf32>
    %640 = arith.addf %639, %638 : vector<8x32xf32>
    %641 = arith.divf %639, %640 : vector<8x32xf32>
    %642 = vector.extract_strided_slice %629 {offsets = [0, 64], sizes = [8, 32], strides = [1, 1]} : vector<8x128xf32> to vector<8x32xf32>
    %643 = math.tanh %642 : vector<8x32xf32>
    %644 = vector.extract_strided_slice %629 {offsets = [0, 96], sizes = [8, 32], strides = [1, 1]} : vector<8x128xf32> to vector<8x32xf32>
    %645 = arith.negf %644 : vector<8x32xf32>
    %646 = math.exp %645 : vector<8x32xf32>
    %cst_286 = arith.constant 1.000000e+00 : f32
    %647 = vector.broadcast %cst_286 : f32 to vector<8x32xf32>
    %648 = arith.addf %647, %646 : vector<8x32xf32>
    %649 = arith.divf %647, %648 : vector<8x32xf32>
    %650 = arith.mulf %641, %449 : vector<8x32xf32>
    %651 = arith.mulf %635, %643 : vector<8x32xf32>
    %652 = arith.addf %650, %651 : vector<8x32xf32>
    %653 = math.tanh %652 : vector<8x32xf32>
    %654 = arith.mulf %649, %653 : vector<8x32xf32>
    %655 = arith.index_cast %c2_i32_200 : i32 to index
    %c0_287 = arith.constant 0 : index
    %c0_288 = arith.constant 0 : index
    %656 = vector.load %arg12[%655, %c0_287, %c0_288] : memref<8x8x32xf32, #tpu.memory_space<vmem>>, vector<1x8x32xf32>
    %657 = vector.shape_cast %656 : vector<1x8x32xf32> to vector<8x32xf32>
    %658 = vector.shape_cast %654 : vector<8x32xf32> to vector<1x8x32xf32>
    tpu.vector_store %arg12[%655, %c0_287, %c0_288], %658 {strides = array<i32>} : memref<8x8x32xf32, #tpu.memory_space<vmem>>, vector<1x8x32xf32>,
    %659 = arith.truncf %654 : vector<8x32xf32> to vector<8x32xbf16>
    %c3_i32_289 = arith.constant 3 : i32
    %660 = arith.index_cast %c3_i32_289 : i32 to index
    %c0_290 = arith.constant 0 : index
    %c0_291 = arith.constant 0 : index
    %661 = vector.load %arg13[%660, %c0_290, %c0_291] : memref<8x8x128xf32, #tpu.memory_space<vmem>>, vector<1x8x128xf32>
    %662 = vector.shape_cast %661 : vector<1x8x128xf32> to vector<8x128xf32>
    %c0_i32_292 = arith.constant 0 : i32
    %663 = arith.addi %0, %c0_i32_292 : i32
    %c8_i32_293 = arith.constant 8 : i32
    %664 = arith.muli %663, %c8_i32_293 : i32
    %665 = arith.addi %664, %c3_i32_289 : i32
    %666 = arith.index_cast %665 : i32 to index
    %667 = memref.load %arg1[%666] : memref<64xi32, #tpu.memory_space<smem>>
    %c1_i32_294 = arith.constant 1 : i32
    %668 = arith.subi %667, %c1_i32_294 : i32
    %c0_i32_295 = arith.constant 0 : i32
    %c7_i32_296 = arith.constant 7 : i32
    %669 = arith.maxsi %c0_i32_295, %668 : i32
    %670 = arith.minsi %c7_i32_296, %669 : i32
    %671 = arith.index_cast %670 : i32 to index
    %c0_297 = arith.constant 0 : index
    %c0_298 = arith.constant 0 : index
    %672 = vector.load %arg14[%671, %c0_297, %c0_298] : memref<8x8x128xf32, #tpu.memory_space<vmem>>, vector<1x8x128xf32>
    %673 = vector.shape_cast %672 : vector<1x8x128xf32> to vector<8x128xf32>
    %c0_i32_299 = arith.constant 0 : i32
    %674 = arith.cmpi sgt, %667, %c0_i32_299 : i32
    %c0_i32_300 = arith.constant 0 : i32
    %675 = arith.cmpi sgt, %c3_i32_289, %c0_i32_300 : i32
    %676 = arith.andi %674, %675 : i1
    %677 = vector.broadcast %676 : i1 to vector<8x1xi1>
    %678 = arith.andi %3, %677 : vector<8x1xi1>
    %cst_301 = arith.constant 0.000000e+00 : f32
    %679 = vector.shape_cast %678 : vector<8x1xi1> to vector<8x1xi1>
    %680 = vector.broadcast %679 : vector<8x1xi1> to vector<8x128xi1>
    %681 = vector.broadcast %cst_301 : f32 to vector<8x128xf32>
    %682 = arith.select %680, %673, %681 : vector<8x128xi1>, vector<8x128xf32>
    %683 = arith.addf %662, %682 : vector<8x128xf32>
    %c1_i32_302 = arith.constant 1 : i32
    %684 = arith.addi %0, %c1_i32_302 : i32
    %c8_i32_303 = arith.constant 8 : i32
    %685 = arith.muli %684, %c8_i32_303 : i32
    %686 = arith.addi %685, %c3_i32_289 : i32
    %687 = arith.index_cast %686 : i32 to index
    %688 = memref.load %arg1[%687] : memref<64xi32, #tpu.memory_space<smem>>
    %c1_i32_304 = arith.constant 1 : i32
    %689 = arith.subi %688, %c1_i32_304 : i32
    %c0_i32_305 = arith.constant 0 : i32
    %c7_i32_306 = arith.constant 7 : i32
    %690 = arith.maxsi %c0_i32_305, %689 : i32
    %691 = arith.minsi %c7_i32_306, %690 : i32
    %692 = arith.index_cast %691 : i32 to index
    %c0_307 = arith.constant 0 : index
    %c0_308 = arith.constant 0 : index
    %693 = vector.load %arg14[%692, %c0_307, %c0_308] : memref<8x8x128xf32, #tpu.memory_space<vmem>>, vector<1x8x128xf32>
    %694 = vector.shape_cast %693 : vector<1x8x128xf32> to vector<8x128xf32>
    %c0_i32_309 = arith.constant 0 : i32
    %695 = arith.cmpi sgt, %688, %c0_i32_309 : i32
    %c0_i32_310 = arith.constant 0 : i32
    %696 = arith.cmpi sgt, %c3_i32_289, %c0_i32_310 : i32
    %697 = arith.andi %695, %696 : i1
    %698 = vector.broadcast %697 : i1 to vector<8x1xi1>
    %699 = arith.andi %6, %698 : vector<8x1xi1>
    %cst_311 = arith.constant 0.000000e+00 : f32
    %700 = vector.shape_cast %699 : vector<8x1xi1> to vector<8x1xi1>
    %701 = vector.broadcast %700 : vector<8x1xi1> to vector<8x128xi1>
    %702 = vector.broadcast %cst_311 : f32 to vector<8x128xf32>
    %703 = arith.select %701, %694, %702 : vector<8x128xi1>, vector<8x128xf32>
    %704 = arith.addf %683, %703 : vector<8x128xf32>
    %c2_i32_312 = arith.constant 2 : i32
    %705 = arith.addi %0, %c2_i32_312 : i32
    %c8_i32_313 = arith.constant 8 : i32
    %706 = arith.muli %705, %c8_i32_313 : i32
    %707 = arith.addi %706, %c3_i32_289 : i32
    %708 = arith.index_cast %707 : i32 to index
    %709 = memref.load %arg1[%708] : memref<64xi32, #tpu.memory_space<smem>>
    %c1_i32_314 = arith.constant 1 : i32
    %710 = arith.subi %709, %c1_i32_314 : i32
    %c0_i32_315 = arith.constant 0 : i32
    %c7_i32_316 = arith.constant 7 : i32
    %711 = arith.maxsi %c0_i32_315, %710 : i32
    %712 = arith.minsi %c7_i32_316, %711 : i32
    %713 = arith.index_cast %712 : i32 to index
    %c0_317 = arith.constant 0 : index
    %c0_318 = arith.constant 0 : index
    %714 = vector.load %arg14[%713, %c0_317, %c0_318] : memref<8x8x128xf32, #tpu.memory_space<vmem>>, vector<1x8x128xf32>
    %715 = vector.shape_cast %714 : vector<1x8x128xf32> to vector<8x128xf32>
    %c0_i32_319 = arith.constant 0 : i32
    %716 = arith.cmpi sgt, %709, %c0_i32_319 : i32
    %c0_i32_320 = arith.constant 0 : i32
    %717 = arith.cmpi sgt, %c3_i32_289, %c0_i32_320 : i32
    %718 = arith.andi %716, %717 : i1
    %719 = vector.broadcast %718 : i1 to vector<8x1xi1>
    %720 = arith.andi %9, %719 : vector<8x1xi1>
    %cst_321 = arith.constant 0.000000e+00 : f32
    %721 = vector.shape_cast %720 : vector<8x1xi1> to vector<8x1xi1>
    %722 = vector.broadcast %721 : vector<8x1xi1> to vector<8x128xi1>
    %723 = vector.broadcast %cst_321 : f32 to vector<8x128xf32>
    %724 = arith.select %722, %715, %723 : vector<8x128xi1>, vector<8x128xf32>
    %725 = arith.addf %704, %724 : vector<8x128xf32>
    %c3_i32_322 = arith.constant 3 : i32
    %726 = arith.addi %0, %c3_i32_322 : i32
    %c8_i32_323 = arith.constant 8 : i32
    %727 = arith.muli %726, %c8_i32_323 : i32
    %728 = arith.addi %727, %c3_i32_289 : i32
    %729 = arith.index_cast %728 : i32 to index
    %730 = memref.load %arg1[%729] : memref<64xi32, #tpu.memory_space<smem>>
    %c1_i32_324 = arith.constant 1 : i32
    %731 = arith.subi %730, %c1_i32_324 : i32
    %c0_i32_325 = arith.constant 0 : i32
    %c7_i32_326 = arith.constant 7 : i32
    %732 = arith.maxsi %c0_i32_325, %731 : i32
    %733 = arith.minsi %c7_i32_326, %732 : i32
    %734 = arith.index_cast %733 : i32 to index
    %c0_327 = arith.constant 0 : index
    %c0_328 = arith.constant 0 : index
    %735 = vector.load %arg14[%734, %c0_327, %c0_328] : memref<8x8x128xf32, #tpu.memory_space<vmem>>, vector<1x8x128xf32>
    %736 = vector.shape_cast %735 : vector<1x8x128xf32> to vector<8x128xf32>
    %c0_i32_329 = arith.constant 0 : i32
    %737 = arith.cmpi sgt, %730, %c0_i32_329 : i32
    %c0_i32_330 = arith.constant 0 : i32
    %738 = arith.cmpi sgt, %c3_i32_289, %c0_i32_330 : i32
    %739 = arith.andi %737, %738 : i1
    %740 = vector.broadcast %739 : i1 to vector<8x1xi1>
    %741 = arith.andi %12, %740 : vector<8x1xi1>
    %cst_331 = arith.constant 0.000000e+00 : f32
    %742 = vector.shape_cast %741 : vector<8x1xi1> to vector<8x1xi1>
    %743 = vector.broadcast %742 : vector<8x1xi1> to vector<8x128xi1>
    %744 = vector.broadcast %cst_331 : f32 to vector<8x128xf32>
    %745 = arith.select %743, %736, %744 : vector<8x128xi1>, vector<8x128xf32>
    %746 = arith.addf %725, %745 : vector<8x128xf32>
    %c4_i32_332 = arith.constant 4 : i32
    %747 = arith.addi %0, %c4_i32_332 : i32
    %c8_i32_333 = arith.constant 8 : i32
    %748 = arith.muli %747, %c8_i32_333 : i32
    %749 = arith.addi %748, %c3_i32_289 : i32
    %750 = arith.index_cast %749 : i32 to index
    %751 = memref.load %arg1[%750] : memref<64xi32, #tpu.memory_space<smem>>
    %c1_i32_334 = arith.constant 1 : i32
    %752 = arith.subi %751, %c1_i32_334 : i32
    %c0_i32_335 = arith.constant 0 : i32
    %c7_i32_336 = arith.constant 7 : i32
    %753 = arith.maxsi %c0_i32_335, %752 : i32
    %754 = arith.minsi %c7_i32_336, %753 : i32
    %755 = arith.index_cast %754 : i32 to index
    %c0_337 = arith.constant 0 : index
    %c0_338 = arith.constant 0 : index
    %756 = vector.load %arg14[%755, %c0_337, %c0_338] : memref<8x8x128xf32, #tpu.memory_space<vmem>>, vector<1x8x128xf32>
    %757 = vector.shape_cast %756 : vector<1x8x128xf32> to vector<8x128xf32>
    %c0_i32_339 = arith.constant 0 : i32
    %758 = arith.cmpi sgt, %751, %c0_i32_339 : i32
    %c0_i32_340 = arith.constant 0 : i32
    %759 = arith.cmpi sgt, %c3_i32_289, %c0_i32_340 : i32
    %760 = arith.andi %758, %759 : i1
    %761 = vector.broadcast %760 : i1 to vector<8x1xi1>
    %762 = arith.andi %15, %761 : vector<8x1xi1>
    %cst_341 = arith.constant 0.000000e+00 : f32
    %763 = vector.shape_cast %762 : vector<8x1xi1> to vector<8x1xi1>
    %764 = vector.broadcast %763 : vector<8x1xi1> to vector<8x128xi1>
    %765 = vector.broadcast %cst_341 : f32 to vector<8x128xf32>
    %766 = arith.select %764, %757, %765 : vector<8x128xi1>, vector<8x128xf32>
    %767 = arith.addf %746, %766 : vector<8x128xf32>
    %c5_i32_342 = arith.constant 5 : i32
    %768 = arith.addi %0, %c5_i32_342 : i32
    %c8_i32_343 = arith.constant 8 : i32
    %769 = arith.muli %768, %c8_i32_343 : i32
    %770 = arith.addi %769, %c3_i32_289 : i32
    %771 = arith.index_cast %770 : i32 to index
    %772 = memref.load %arg1[%771] : memref<64xi32, #tpu.memory_space<smem>>
    %c1_i32_344 = arith.constant 1 : i32
    %773 = arith.subi %772, %c1_i32_344 : i32
    %c0_i32_345 = arith.constant 0 : i32
    %c7_i32_346 = arith.constant 7 : i32
    %774 = arith.maxsi %c0_i32_345, %773 : i32
    %775 = arith.minsi %c7_i32_346, %774 : i32
    %776 = arith.index_cast %775 : i32 to index
    %c0_347 = arith.constant 0 : index
    %c0_348 = arith.constant 0 : index
    %777 = vector.load %arg14[%776, %c0_347, %c0_348] : memref<8x8x128xf32, #tpu.memory_space<vmem>>, vector<1x8x128xf32>
    %778 = vector.shape_cast %777 : vector<1x8x128xf32> to vector<8x128xf32>
    %c0_i32_349 = arith.constant 0 : i32
    %779 = arith.cmpi sgt, %772, %c0_i32_349 : i32
    %c0_i32_350 = arith.constant 0 : i32
    %780 = arith.cmpi sgt, %c3_i32_289, %c0_i32_350 : i32
    %781 = arith.andi %779, %780 : i1
    %782 = vector.broadcast %781 : i1 to vector<8x1xi1>
    %783 = arith.andi %18, %782 : vector<8x1xi1>
    %cst_351 = arith.constant 0.000000e+00 : f32
    %784 = vector.shape_cast %783 : vector<8x1xi1> to vector<8x1xi1>
    %785 = vector.broadcast %784 : vector<8x1xi1> to vector<8x128xi1>
    %786 = vector.broadcast %cst_351 : f32 to vector<8x128xf32>
    %787 = arith.select %785, %778, %786 : vector<8x128xi1>, vector<8x128xf32>
    %788 = arith.addf %767, %787 : vector<8x128xf32>
    %c6_i32_352 = arith.constant 6 : i32
    %789 = arith.addi %0, %c6_i32_352 : i32
    %c8_i32_353 = arith.constant 8 : i32
    %790 = arith.muli %789, %c8_i32_353 : i32
    %791 = arith.addi %790, %c3_i32_289 : i32
    %792 = arith.index_cast %791 : i32 to index
    %793 = memref.load %arg1[%792] : memref<64xi32, #tpu.memory_space<smem>>
    %c1_i32_354 = arith.constant 1 : i32
    %794 = arith.subi %793, %c1_i32_354 : i32
    %c0_i32_355 = arith.constant 0 : i32
    %c7_i32_356 = arith.constant 7 : i32
    %795 = arith.maxsi %c0_i32_355, %794 : i32
    %796 = arith.minsi %c7_i32_356, %795 : i32
    %797 = arith.index_cast %796 : i32 to index
    %c0_357 = arith.constant 0 : index
    %c0_358 = arith.constant 0 : index
    %798 = vector.load %arg14[%797, %c0_357, %c0_358] : memref<8x8x128xf32, #tpu.memory_space<vmem>>, vector<1x8x128xf32>
    %799 = vector.shape_cast %798 : vector<1x8x128xf32> to vector<8x128xf32>
    %c0_i32_359 = arith.constant 0 : i32
    %800 = arith.cmpi sgt, %793, %c0_i32_359 : i32
    %c0_i32_360 = arith.constant 0 : i32
    %801 = arith.cmpi sgt, %c3_i32_289, %c0_i32_360 : i32
    %802 = arith.andi %800, %801 : i1
    %803 = vector.broadcast %802 : i1 to vector<8x1xi1>
    %804 = arith.andi %21, %803 : vector<8x1xi1>
    %cst_361 = arith.constant 0.000000e+00 : f32
    %805 = vector.shape_cast %804 : vector<8x1xi1> to vector<8x1xi1>
    %806 = vector.broadcast %805 : vector<8x1xi1> to vector<8x128xi1>
    %807 = vector.broadcast %cst_361 : f32 to vector<8x128xf32>
    %808 = arith.select %806, %799, %807 : vector<8x128xi1>, vector<8x128xf32>
    %809 = arith.addf %788, %808 : vector<8x128xf32>
    %c7_i32_362 = arith.constant 7 : i32
    %810 = arith.addi %0, %c7_i32_362 : i32
    %c8_i32_363 = arith.constant 8 : i32
    %811 = arith.muli %810, %c8_i32_363 : i32
    %812 = arith.addi %811, %c3_i32_289 : i32
    %813 = arith.index_cast %812 : i32 to index
    %814 = memref.load %arg1[%813] : memref<64xi32, #tpu.memory_space<smem>>
    %c1_i32_364 = arith.constant 1 : i32
    %815 = arith.subi %814, %c1_i32_364 : i32
    %c0_i32_365 = arith.constant 0 : i32
    %c7_i32_366 = arith.constant 7 : i32
    %816 = arith.maxsi %c0_i32_365, %815 : i32
    %817 = arith.minsi %c7_i32_366, %816 : i32
    %818 = arith.index_cast %817 : i32 to index
    %c0_367 = arith.constant 0 : index
    %c0_368 = arith.constant 0 : index
    %819 = vector.load %arg14[%818, %c0_367, %c0_368] : memref<8x8x128xf32, #tpu.memory_space<vmem>>, vector<1x8x128xf32>
    %820 = vector.shape_cast %819 : vector<1x8x128xf32> to vector<8x128xf32>
    %c0_i32_369 = arith.constant 0 : i32
    %821 = arith.cmpi sgt, %814, %c0_i32_369 : i32
    %c0_i32_370 = arith.constant 0 : i32
    %822 = arith.cmpi sgt, %c3_i32_289, %c0_i32_370 : i32
    %823 = arith.andi %821, %822 : i1
    %824 = vector.broadcast %823 : i1 to vector<8x1xi1>
    %825 = arith.andi %24, %824 : vector<8x1xi1>
    %cst_371 = arith.constant 0.000000e+00 : f32
    %826 = vector.shape_cast %825 : vector<8x1xi1> to vector<8x1xi1>
    %827 = vector.broadcast %826 : vector<8x1xi1> to vector<8x128xi1>
    %828 = vector.broadcast %cst_371 : f32 to vector<8x128xf32>
    %829 = arith.select %827, %820, %828 : vector<8x128xi1>, vector<8x128xf32>
    %830 = arith.addf %809, %829 : vector<8x128xf32>
    %cst_372 = arith.constant dense<0.000000e+00> : vector<8x128xf32>
    %831 = tpu.matmul %659, %48, %cst_372 {dimension_numbers = #tpu.dot_dimension_numbers<[1], [0], [0], [1], [0, 0, 1, 1], [], []>} : vector<8x32xbf16>, vector<32x128xbf16>, vector<8x128xf32> -> vector<8x128xf32>
    %832 = arith.addf %830, %831 : vector<8x128xf32>
    %833 = vector.extract_strided_slice %832 {offsets = [0, 0], sizes = [8, 32], strides = [1, 1]} : vector<8x128xf32> to vector<8x32xf32>
    %834 = arith.negf %833 : vector<8x32xf32>
    %835 = math.exp %834 : vector<8x32xf32>
    %cst_373 = arith.constant 1.000000e+00 : f32
    %836 = vector.broadcast %cst_373 : f32 to vector<8x32xf32>
    %837 = arith.addf %836, %835 : vector<8x32xf32>
    %838 = arith.divf %836, %837 : vector<8x32xf32>
    %839 = vector.extract_strided_slice %832 {offsets = [0, 32], sizes = [8, 32], strides = [1, 1]} : vector<8x128xf32> to vector<8x32xf32>
    %840 = arith.negf %839 : vector<8x32xf32>
    %841 = math.exp %840 : vector<8x32xf32>
    %cst_374 = arith.constant 1.000000e+00 : f32
    %842 = vector.broadcast %cst_374 : f32 to vector<8x32xf32>
    %843 = arith.addf %842, %841 : vector<8x32xf32>
    %844 = arith.divf %842, %843 : vector<8x32xf32>
    %845 = vector.extract_strided_slice %832 {offsets = [0, 64], sizes = [8, 32], strides = [1, 1]} : vector<8x128xf32> to vector<8x32xf32>
    %846 = math.tanh %845 : vector<8x32xf32>
    %847 = vector.extract_strided_slice %832 {offsets = [0, 96], sizes = [8, 32], strides = [1, 1]} : vector<8x128xf32> to vector<8x32xf32>
    %848 = arith.negf %847 : vector<8x32xf32>
    %849 = math.exp %848 : vector<8x32xf32>
    %cst_375 = arith.constant 1.000000e+00 : f32
    %850 = vector.broadcast %cst_375 : f32 to vector<8x32xf32>
    %851 = arith.addf %850, %849 : vector<8x32xf32>
    %852 = arith.divf %850, %851 : vector<8x32xf32>
    %853 = arith.mulf %844, %652 : vector<8x32xf32>
    %854 = arith.mulf %838, %846 : vector<8x32xf32>
    %855 = arith.addf %853, %854 : vector<8x32xf32>
    %856 = math.tanh %855 : vector<8x32xf32>
    %857 = arith.mulf %852, %856 : vector<8x32xf32>
    %858 = arith.index_cast %c3_i32_289 : i32 to index
    %c0_376 = arith.constant 0 : index
    %c0_377 = arith.constant 0 : index
    %859 = vector.load %arg12[%858, %c0_376, %c0_377] : memref<8x8x32xf32, #tpu.memory_space<vmem>>, vector<1x8x32xf32>
    %860 = vector.shape_cast %859 : vector<1x8x32xf32> to vector<8x32xf32>
    %861 = vector.shape_cast %857 : vector<8x32xf32> to vector<1x8x32xf32>
    tpu.vector_store %arg12[%858, %c0_376, %c0_377], %861 {strides = array<i32>} : memref<8x8x32xf32, #tpu.memory_space<vmem>>, vector<1x8x32xf32>,
    %862 = arith.truncf %857 : vector<8x32xf32> to vector<8x32xbf16>
    %c4_i32_378 = arith.constant 4 : i32
    %863 = arith.index_cast %c4_i32_378 : i32 to index
    %c0_379 = arith.constant 0 : index
    %c0_380 = arith.constant 0 : index
    %864 = vector.load %arg13[%863, %c0_379, %c0_380] : memref<8x8x128xf32, #tpu.memory_space<vmem>>, vector<1x8x128xf32>
    %865 = vector.shape_cast %864 : vector<1x8x128xf32> to vector<8x128xf32>
    %c0_i32_381 = arith.constant 0 : i32
    %866 = arith.addi %0, %c0_i32_381 : i32
    %c8_i32_382 = arith.constant 8 : i32
    %867 = arith.muli %866, %c8_i32_382 : i32
    %868 = arith.addi %867, %c4_i32_378 : i32
    %869 = arith.index_cast %868 : i32 to index
    %870 = memref.load %arg1[%869] : memref<64xi32, #tpu.memory_space<smem>>
    %c1_i32_383 = arith.constant 1 : i32
    %871 = arith.subi %870, %c1_i32_383 : i32
    %c0_i32_384 = arith.constant 0 : i32
    %c7_i32_385 = arith.constant 7 : i32
    %872 = arith.maxsi %c0_i32_384, %871 : i32
    %873 = arith.minsi %c7_i32_385, %872 : i32
    %874 = arith.index_cast %873 : i32 to index
    %c0_386 = arith.constant 0 : index
    %c0_387 = arith.constant 0 : index
    %875 = vector.load %arg14[%874, %c0_386, %c0_387] : memref<8x8x128xf32, #tpu.memory_space<vmem>>, vector<1x8x128xf32>
    %876 = vector.shape_cast %875 : vector<1x8x128xf32> to vector<8x128xf32>
    %c0_i32_388 = arith.constant 0 : i32
    %877 = arith.cmpi sgt, %870, %c0_i32_388 : i32
    %c0_i32_389 = arith.constant 0 : i32
    %878 = arith.cmpi sgt, %c4_i32_378, %c0_i32_389 : i32
    %879 = arith.andi %877, %878 : i1
    %880 = vector.broadcast %879 : i1 to vector<8x1xi1>
    %881 = arith.andi %3, %880 : vector<8x1xi1>
    %cst_390 = arith.constant 0.000000e+00 : f32
    %882 = vector.shape_cast %881 : vector<8x1xi1> to vector<8x1xi1>
    %883 = vector.broadcast %882 : vector<8x1xi1> to vector<8x128xi1>
    %884 = vector.broadcast %cst_390 : f32 to vector<8x128xf32>
    %885 = arith.select %883, %876, %884 : vector<8x128xi1>, vector<8x128xf32>
    %886 = arith.addf %865, %885 : vector<8x128xf32>
    %c1_i32_391 = arith.constant 1 : i32
    %887 = arith.addi %0, %c1_i32_391 : i32
    %c8_i32_392 = arith.constant 8 : i32
    %888 = arith.muli %887, %c8_i32_392 : i32
    %889 = arith.addi %888, %c4_i32_378 : i32
    %890 = arith.index_cast %889 : i32 to index
    %891 = memref.load %arg1[%890] : memref<64xi32, #tpu.memory_space<smem>>
    %c1_i32_393 = arith.constant 1 : i32
    %892 = arith.subi %891, %c1_i32_393 : i32
    %c0_i32_394 = arith.constant 0 : i32
    %c7_i32_395 = arith.constant 7 : i32
    %893 = arith.maxsi %c0_i32_394, %892 : i32
    %894 = arith.minsi %c7_i32_395, %893 : i32
    %895 = arith.index_cast %894 : i32 to index
    %c0_396 = arith.constant 0 : index
    %c0_397 = arith.constant 0 : index
    %896 = vector.load %arg14[%895, %c0_396, %c0_397] : memref<8x8x128xf32, #tpu.memory_space<vmem>>, vector<1x8x128xf32>
    %897 = vector.shape_cast %896 : vector<1x8x128xf32> to vector<8x128xf32>
    %c0_i32_398 = arith.constant 0 : i32
    %898 = arith.cmpi sgt, %891, %c0_i32_398 : i32
    %c0_i32_399 = arith.constant 0 : i32
    %899 = arith.cmpi sgt, %c4_i32_378, %c0_i32_399 : i32
    %900 = arith.andi %898, %899 : i1
    %901 = vector.broadcast %900 : i1 to vector<8x1xi1>
    %902 = arith.andi %6, %901 : vector<8x1xi1>
    %cst_400 = arith.constant 0.000000e+00 : f32
    %903 = vector.shape_cast %902 : vector<8x1xi1> to vector<8x1xi1>
    %904 = vector.broadcast %903 : vector<8x1xi1> to vector<8x128xi1>
    %905 = vector.broadcast %cst_400 : f32 to vector<8x128xf32>
    %906 = arith.select %904, %897, %905 : vector<8x128xi1>, vector<8x128xf32>
    %907 = arith.addf %886, %906 : vector<8x128xf32>
    %c2_i32_401 = arith.constant 2 : i32
    %908 = arith.addi %0, %c2_i32_401 : i32
    %c8_i32_402 = arith.constant 8 : i32
    %909 = arith.muli %908, %c8_i32_402 : i32
    %910 = arith.addi %909, %c4_i32_378 : i32
    %911 = arith.index_cast %910 : i32 to index
    %912 = memref.load %arg1[%911] : memref<64xi32, #tpu.memory_space<smem>>
    %c1_i32_403 = arith.constant 1 : i32
    %913 = arith.subi %912, %c1_i32_403 : i32
    %c0_i32_404 = arith.constant 0 : i32
    %c7_i32_405 = arith.constant 7 : i32
    %914 = arith.maxsi %c0_i32_404, %913 : i32
    %915 = arith.minsi %c7_i32_405, %914 : i32
    %916 = arith.index_cast %915 : i32 to index
    %c0_406 = arith.constant 0 : index
    %c0_407 = arith.constant 0 : index
    %917 = vector.load %arg14[%916, %c0_406, %c0_407] : memref<8x8x128xf32, #tpu.memory_space<vmem>>, vector<1x8x128xf32>
    %918 = vector.shape_cast %917 : vector<1x8x128xf32> to vector<8x128xf32>
    %c0_i32_408 = arith.constant 0 : i32
    %919 = arith.cmpi sgt, %912, %c0_i32_408 : i32
    %c0_i32_409 = arith.constant 0 : i32
    %920 = arith.cmpi sgt, %c4_i32_378, %c0_i32_409 : i32
    %921 = arith.andi %919, %920 : i1
    %922 = vector.broadcast %921 : i1 to vector<8x1xi1>
    %923 = arith.andi %9, %922 : vector<8x1xi1>
    %cst_410 = arith.constant 0.000000e+00 : f32
    %924 = vector.shape_cast %923 : vector<8x1xi1> to vector<8x1xi1>
    %925 = vector.broadcast %924 : vector<8x1xi1> to vector<8x128xi1>
    %926 = vector.broadcast %cst_410 : f32 to vector<8x128xf32>
    %927 = arith.select %925, %918, %926 : vector<8x128xi1>, vector<8x128xf32>
    %928 = arith.addf %907, %927 : vector<8x128xf32>
    %c3_i32_411 = arith.constant 3 : i32
    %929 = arith.addi %0, %c3_i32_411 : i32
    %c8_i32_412 = arith.constant 8 : i32
    %930 = arith.muli %929, %c8_i32_412 : i32
    %931 = arith.addi %930, %c4_i32_378 : i32
    %932 = arith.index_cast %931 : i32 to index
    %933 = memref.load %arg1[%932] : memref<64xi32, #tpu.memory_space<smem>>
    %c1_i32_413 = arith.constant 1 : i32
    %934 = arith.subi %933, %c1_i32_413 : i32
    %c0_i32_414 = arith.constant 0 : i32
    %c7_i32_415 = arith.constant 7 : i32
    %935 = arith.maxsi %c0_i32_414, %934 : i32
    %936 = arith.minsi %c7_i32_415, %935 : i32
    %937 = arith.index_cast %936 : i32 to index
    %c0_416 = arith.constant 0 : index
    %c0_417 = arith.constant 0 : index
    %938 = vector.load %arg14[%937, %c0_416, %c0_417] : memref<8x8x128xf32, #tpu.memory_space<vmem>>, vector<1x8x128xf32>
    %939 = vector.shape_cast %938 : vector<1x8x128xf32> to vector<8x128xf32>
    %c0_i32_418 = arith.constant 0 : i32
    %940 = arith.cmpi sgt, %933, %c0_i32_418 : i32
    %c0_i32_419 = arith.constant 0 : i32
    %941 = arith.cmpi sgt, %c4_i32_378, %c0_i32_419 : i32
    %942 = arith.andi %940, %941 : i1
    %943 = vector.broadcast %942 : i1 to vector<8x1xi1>
    %944 = arith.andi %12, %943 : vector<8x1xi1>
    %cst_420 = arith.constant 0.000000e+00 : f32
    %945 = vector.shape_cast %944 : vector<8x1xi1> to vector<8x1xi1>
    %946 = vector.broadcast %945 : vector<8x1xi1> to vector<8x128xi1>
    %947 = vector.broadcast %cst_420 : f32 to vector<8x128xf32>
    %948 = arith.select %946, %939, %947 : vector<8x128xi1>, vector<8x128xf32>
    %949 = arith.addf %928, %948 : vector<8x128xf32>
    %c4_i32_421 = arith.constant 4 : i32
    %950 = arith.addi %0, %c4_i32_421 : i32
    %c8_i32_422 = arith.constant 8 : i32
    %951 = arith.muli %950, %c8_i32_422 : i32
    %952 = arith.addi %951, %c4_i32_378 : i32
    %953 = arith.index_cast %952 : i32 to index
    %954 = memref.load %arg1[%953] : memref<64xi32, #tpu.memory_space<smem>>
    %c1_i32_423 = arith.constant 1 : i32
    %955 = arith.subi %954, %c1_i32_423 : i32
    %c0_i32_424 = arith.constant 0 : i32
    %c7_i32_425 = arith.constant 7 : i32
    %956 = arith.maxsi %c0_i32_424, %955 : i32
    %957 = arith.minsi %c7_i32_425, %956 : i32
    %958 = arith.index_cast %957 : i32 to index
    %c0_426 = arith.constant 0 : index
    %c0_427 = arith.constant 0 : index
    %959 = vector.load %arg14[%958, %c0_426, %c0_427] : memref<8x8x128xf32, #tpu.memory_space<vmem>>, vector<1x8x128xf32>
    %960 = vector.shape_cast %959 : vector<1x8x128xf32> to vector<8x128xf32>
    %c0_i32_428 = arith.constant 0 : i32
    %961 = arith.cmpi sgt, %954, %c0_i32_428 : i32
    %c0_i32_429 = arith.constant 0 : i32
    %962 = arith.cmpi sgt, %c4_i32_378, %c0_i32_429 : i32
    %963 = arith.andi %961, %962 : i1
    %964 = vector.broadcast %963 : i1 to vector<8x1xi1>
    %965 = arith.andi %15, %964 : vector<8x1xi1>
    %cst_430 = arith.constant 0.000000e+00 : f32
    %966 = vector.shape_cast %965 : vector<8x1xi1> to vector<8x1xi1>
    %967 = vector.broadcast %966 : vector<8x1xi1> to vector<8x128xi1>
    %968 = vector.broadcast %cst_430 : f32 to vector<8x128xf32>
    %969 = arith.select %967, %960, %968 : vector<8x128xi1>, vector<8x128xf32>
    %970 = arith.addf %949, %969 : vector<8x128xf32>
    %c5_i32_431 = arith.constant 5 : i32
    %971 = arith.addi %0, %c5_i32_431 : i32
    %c8_i32_432 = arith.constant 8 : i32
    %972 = arith.muli %971, %c8_i32_432 : i32
    %973 = arith.addi %972, %c4_i32_378 : i32
    %974 = arith.index_cast %973 : i32 to index
    %975 = memref.load %arg1[%974] : memref<64xi32, #tpu.memory_space<smem>>
    %c1_i32_433 = arith.constant 1 : i32
    %976 = arith.subi %975, %c1_i32_433 : i32
    %c0_i32_434 = arith.constant 0 : i32
    %c7_i32_435 = arith.constant 7 : i32
    %977 = arith.maxsi %c0_i32_434, %976 : i32
    %978 = arith.minsi %c7_i32_435, %977 : i32
    %979 = arith.index_cast %978 : i32 to index
    %c0_436 = arith.constant 0 : index
    %c0_437 = arith.constant 0 : index
    %980 = vector.load %arg14[%979, %c0_436, %c0_437] : memref<8x8x128xf32, #tpu.memory_space<vmem>>, vector<1x8x128xf32>
    %981 = vector.shape_cast %980 : vector<1x8x128xf32> to vector<8x128xf32>
    %c0_i32_438 = arith.constant 0 : i32
    %982 = arith.cmpi sgt, %975, %c0_i32_438 : i32
    %c0_i32_439 = arith.constant 0 : i32
    %983 = arith.cmpi sgt, %c4_i32_378, %c0_i32_439 : i32
    %984 = arith.andi %982, %983 : i1
    %985 = vector.broadcast %984 : i1 to vector<8x1xi1>
    %986 = arith.andi %18, %985 : vector<8x1xi1>
    %cst_440 = arith.constant 0.000000e+00 : f32
    %987 = vector.shape_cast %986 : vector<8x1xi1> to vector<8x1xi1>
    %988 = vector.broadcast %987 : vector<8x1xi1> to vector<8x128xi1>
    %989 = vector.broadcast %cst_440 : f32 to vector<8x128xf32>
    %990 = arith.select %988, %981, %989 : vector<8x128xi1>, vector<8x128xf32>
    %991 = arith.addf %970, %990 : vector<8x128xf32>
    %c6_i32_441 = arith.constant 6 : i32
    %992 = arith.addi %0, %c6_i32_441 : i32
    %c8_i32_442 = arith.constant 8 : i32
    %993 = arith.muli %992, %c8_i32_442 : i32
    %994 = arith.addi %993, %c4_i32_378 : i32
    %995 = arith.index_cast %994 : i32 to index
    %996 = memref.load %arg1[%995] : memref<64xi32, #tpu.memory_space<smem>>
    %c1_i32_443 = arith.constant 1 : i32
    %997 = arith.subi %996, %c1_i32_443 : i32
    %c0_i32_444 = arith.constant 0 : i32
    %c7_i32_445 = arith.constant 7 : i32
    %998 = arith.maxsi %c0_i32_444, %997 : i32
    %999 = arith.minsi %c7_i32_445, %998 : i32
    %1000 = arith.index_cast %999 : i32 to index
    %c0_446 = arith.constant 0 : index
    %c0_447 = arith.constant 0 : index
    %1001 = vector.load %arg14[%1000, %c0_446, %c0_447] : memref<8x8x128xf32, #tpu.memory_space<vmem>>, vector<1x8x128xf32>
    %1002 = vector.shape_cast %1001 : vector<1x8x128xf32> to vector<8x128xf32>
    %c0_i32_448 = arith.constant 0 : i32
    %1003 = arith.cmpi sgt, %996, %c0_i32_448 : i32
    %c0_i32_449 = arith.constant 0 : i32
    %1004 = arith.cmpi sgt, %c4_i32_378, %c0_i32_449 : i32
    %1005 = arith.andi %1003, %1004 : i1
    %1006 = vector.broadcast %1005 : i1 to vector<8x1xi1>
    %1007 = arith.andi %21, %1006 : vector<8x1xi1>
    %cst_450 = arith.constant 0.000000e+00 : f32
    %1008 = vector.shape_cast %1007 : vector<8x1xi1> to vector<8x1xi1>
    %1009 = vector.broadcast %1008 : vector<8x1xi1> to vector<8x128xi1>
    %1010 = vector.broadcast %cst_450 : f32 to vector<8x128xf32>
    %1011 = arith.select %1009, %1002, %1010 : vector<8x128xi1>, vector<8x128xf32>
    %1012 = arith.addf %991, %1011 : vector<8x128xf32>
    %c7_i32_451 = arith.constant 7 : i32
    %1013 = arith.addi %0, %c7_i32_451 : i32
    %c8_i32_452 = arith.constant 8 : i32
    %1014 = arith.muli %1013, %c8_i32_452 : i32
    %1015 = arith.addi %1014, %c4_i32_378 : i32
    %1016 = arith.index_cast %1015 : i32 to index
    %1017 = memref.load %arg1[%1016] : memref<64xi32, #tpu.memory_space<smem>>
    %c1_i32_453 = arith.constant 1 : i32
    %1018 = arith.subi %1017, %c1_i32_453 : i32
    %c0_i32_454 = arith.constant 0 : i32
    %c7_i32_455 = arith.constant 7 : i32
    %1019 = arith.maxsi %c0_i32_454, %1018 : i32
    %1020 = arith.minsi %c7_i32_455, %1019 : i32
    %1021 = arith.index_cast %1020 : i32 to index
    %c0_456 = arith.constant 0 : index
    %c0_457 = arith.constant 0 : index
    %1022 = vector.load %arg14[%1021, %c0_456, %c0_457] : memref<8x8x128xf32, #tpu.memory_space<vmem>>, vector<1x8x128xf32>
    %1023 = vector.shape_cast %1022 : vector<1x8x128xf32> to vector<8x128xf32>
    %c0_i32_458 = arith.constant 0 : i32
    %1024 = arith.cmpi sgt, %1017, %c0_i32_458 : i32
    %c0_i32_459 = arith.constant 0 : i32
    %1025 = arith.cmpi sgt, %c4_i32_378, %c0_i32_459 : i32
    %1026 = arith.andi %1024, %1025 : i1
    %1027 = vector.broadcast %1026 : i1 to vector<8x1xi1>
    %1028 = arith.andi %24, %1027 : vector<8x1xi1>
    %cst_460 = arith.constant 0.000000e+00 : f32
    %1029 = vector.shape_cast %1028 : vector<8x1xi1> to vector<8x1xi1>
    %1030 = vector.broadcast %1029 : vector<8x1xi1> to vector<8x128xi1>
    %1031 = vector.broadcast %cst_460 : f32 to vector<8x128xf32>
    %1032 = arith.select %1030, %1023, %1031 : vector<8x128xi1>, vector<8x128xf32>
    %1033 = arith.addf %1012, %1032 : vector<8x128xf32>
    %cst_461 = arith.constant dense<0.000000e+00> : vector<8x128xf32>
    %1034 = tpu.matmul %862, %48, %cst_461 {dimension_numbers = #tpu.dot_dimension_numbers<[1], [0], [0], [1], [0, 0, 1, 1], [], []>} : vector<8x32xbf16>, vector<32x128xbf16>, vector<8x128xf32> -> vector<8x128xf32>
    %1035 = arith.addf %1033, %1034 : vector<8x128xf32>
    %1036 = vector.extract_strided_slice %1035 {offsets = [0, 0], sizes = [8, 32], strides = [1, 1]} : vector<8x128xf32> to vector<8x32xf32>
    %1037 = arith.negf %1036 : vector<8x32xf32>
    %1038 = math.exp %1037 : vector<8x32xf32>
    %cst_462 = arith.constant 1.000000e+00 : f32
    %1039 = vector.broadcast %cst_462 : f32 to vector<8x32xf32>
    %1040 = arith.addf %1039, %1038 : vector<8x32xf32>
    %1041 = arith.divf %1039, %1040 : vector<8x32xf32>
    %1042 = vector.extract_strided_slice %1035 {offsets = [0, 32], sizes = [8, 32], strides = [1, 1]} : vector<8x128xf32> to vector<8x32xf32>
    %1043 = arith.negf %1042 : vector<8x32xf32>
    %1044 = math.exp %1043 : vector<8x32xf32>
    %cst_463 = arith.constant 1.000000e+00 : f32
    %1045 = vector.broadcast %cst_463 : f32 to vector<8x32xf32>
    %1046 = arith.addf %1045, %1044 : vector<8x32xf32>
    %1047 = arith.divf %1045, %1046 : vector<8x32xf32>
    %1048 = vector.extract_strided_slice %1035 {offsets = [0, 64], sizes = [8, 32], strides = [1, 1]} : vector<8x128xf32> to vector<8x32xf32>
    %1049 = math.tanh %1048 : vector<8x32xf32>
    %1050 = vector.extract_strided_slice %1035 {offsets = [0, 96], sizes = [8, 32], strides = [1, 1]} : vector<8x128xf32> to vector<8x32xf32>
    %1051 = arith.negf %1050 : vector<8x32xf32>
    %1052 = math.exp %1051 : vector<8x32xf32>
    %cst_464 = arith.constant 1.000000e+00 : f32
    %1053 = vector.broadcast %cst_464 : f32 to vector<8x32xf32>
    %1054 = arith.addf %1053, %1052 : vector<8x32xf32>
    %1055 = arith.divf %1053, %1054 : vector<8x32xf32>
    %1056 = arith.mulf %1047, %855 : vector<8x32xf32>
    %1057 = arith.mulf %1041, %1049 : vector<8x32xf32>
    %1058 = arith.addf %1056, %1057 : vector<8x32xf32>
    %1059 = math.tanh %1058 : vector<8x32xf32>
    %1060 = arith.mulf %1055, %1059 : vector<8x32xf32>
    %1061 = arith.index_cast %c4_i32_378 : i32 to index
    %c0_465 = arith.constant 0 : index
    %c0_466 = arith.constant 0 : index
    %1062 = vector.load %arg12[%1061, %c0_465, %c0_466] : memref<8x8x32xf32, #tpu.memory_space<vmem>>, vector<1x8x32xf32>
    %1063 = vector.shape_cast %1062 : vector<1x8x32xf32> to vector<8x32xf32>
    %1064 = vector.shape_cast %1060 : vector<8x32xf32> to vector<1x8x32xf32>
    tpu.vector_store %arg12[%1061, %c0_465, %c0_466], %1064 {strides = array<i32>} : memref<8x8x32xf32, #tpu.memory_space<vmem>>, vector<1x8x32xf32>,
    %1065 = arith.truncf %1060 : vector<8x32xf32> to vector<8x32xbf16>
    %c5_i32_467 = arith.constant 5 : i32
    %1066 = arith.index_cast %c5_i32_467 : i32 to index
    %c0_468 = arith.constant 0 : index
    %c0_469 = arith.constant 0 : index
    %1067 = vector.load %arg13[%1066, %c0_468, %c0_469] : memref<8x8x128xf32, #tpu.memory_space<vmem>>, vector<1x8x128xf32>
    %1068 = vector.shape_cast %1067 : vector<1x8x128xf32> to vector<8x128xf32>
    %c0_i32_470 = arith.constant 0 : i32
    %1069 = arith.addi %0, %c0_i32_470 : i32
    %c8_i32_471 = arith.constant 8 : i32
    %1070 = arith.muli %1069, %c8_i32_471 : i32
    %1071 = arith.addi %1070, %c5_i32_467 : i32
    %1072 = arith.index_cast %1071 : i32 to index
    %1073 = memref.load %arg1[%1072] : memref<64xi32, #tpu.memory_space<smem>>
    %c1_i32_472 = arith.constant 1 : i32
    %1074 = arith.subi %1073, %c1_i32_472 : i32
    %c0_i32_473 = arith.constant 0 : i32
    %c7_i32_474 = arith.constant 7 : i32
    %1075 = arith.maxsi %c0_i32_473, %1074 : i32
    %1076 = arith.minsi %c7_i32_474, %1075 : i32
    %1077 = arith.index_cast %1076 : i32 to index
    %c0_475 = arith.constant 0 : index
    %c0_476 = arith.constant 0 : index
    %1078 = vector.load %arg14[%1077, %c0_475, %c0_476] : memref<8x8x128xf32, #tpu.memory_space<vmem>>, vector<1x8x128xf32>
    %1079 = vector.shape_cast %1078 : vector<1x8x128xf32> to vector<8x128xf32>
    %c0_i32_477 = arith.constant 0 : i32
    %1080 = arith.cmpi sgt, %1073, %c0_i32_477 : i32
    %c0_i32_478 = arith.constant 0 : i32
    %1081 = arith.cmpi sgt, %c5_i32_467, %c0_i32_478 : i32
    %1082 = arith.andi %1080, %1081 : i1
    %1083 = vector.broadcast %1082 : i1 to vector<8x1xi1>
    %1084 = arith.andi %3, %1083 : vector<8x1xi1>
    %cst_479 = arith.constant 0.000000e+00 : f32
    %1085 = vector.shape_cast %1084 : vector<8x1xi1> to vector<8x1xi1>
    %1086 = vector.broadcast %1085 : vector<8x1xi1> to vector<8x128xi1>
    %1087 = vector.broadcast %cst_479 : f32 to vector<8x128xf32>
    %1088 = arith.select %1086, %1079, %1087 : vector<8x128xi1>, vector<8x128xf32>
    %1089 = arith.addf %1068, %1088 : vector<8x128xf32>
    %c1_i32_480 = arith.constant 1 : i32
    %1090 = arith.addi %0, %c1_i32_480 : i32
    %c8_i32_481 = arith.constant 8 : i32
    %1091 = arith.muli %1090, %c8_i32_481 : i32
    %1092 = arith.addi %1091, %c5_i32_467 : i32
    %1093 = arith.index_cast %1092 : i32 to index
    %1094 = memref.load %arg1[%1093] : memref<64xi32, #tpu.memory_space<smem>>
    %c1_i32_482 = arith.constant 1 : i32
    %1095 = arith.subi %1094, %c1_i32_482 : i32
    %c0_i32_483 = arith.constant 0 : i32
    %c7_i32_484 = arith.constant 7 : i32
    %1096 = arith.maxsi %c0_i32_483, %1095 : i32
    %1097 = arith.minsi %c7_i32_484, %1096 : i32
    %1098 = arith.index_cast %1097 : i32 to index
    %c0_485 = arith.constant 0 : index
    %c0_486 = arith.constant 0 : index
    %1099 = vector.load %arg14[%1098, %c0_485, %c0_486] : memref<8x8x128xf32, #tpu.memory_space<vmem>>, vector<1x8x128xf32>
    %1100 = vector.shape_cast %1099 : vector<1x8x128xf32> to vector<8x128xf32>
    %c0_i32_487 = arith.constant 0 : i32
    %1101 = arith.cmpi sgt, %1094, %c0_i32_487 : i32
    %c0_i32_488 = arith.constant 0 : i32
    %1102 = arith.cmpi sgt, %c5_i32_467, %c0_i32_488 : i32
    %1103 = arith.andi %1101, %1102 : i1
    %1104 = vector.broadcast %1103 : i1 to vector<8x1xi1>
    %1105 = arith.andi %6, %1104 : vector<8x1xi1>
    %cst_489 = arith.constant 0.000000e+00 : f32
    %1106 = vector.shape_cast %1105 : vector<8x1xi1> to vector<8x1xi1>
    %1107 = vector.broadcast %1106 : vector<8x1xi1> to vector<8x128xi1>
    %1108 = vector.broadcast %cst_489 : f32 to vector<8x128xf32>
    %1109 = arith.select %1107, %1100, %1108 : vector<8x128xi1>, vector<8x128xf32>
    %1110 = arith.addf %1089, %1109 : vector<8x128xf32>
    %c2_i32_490 = arith.constant 2 : i32
    %1111 = arith.addi %0, %c2_i32_490 : i32
    %c8_i32_491 = arith.constant 8 : i32
    %1112 = arith.muli %1111, %c8_i32_491 : i32
    %1113 = arith.addi %1112, %c5_i32_467 : i32
    %1114 = arith.index_cast %1113 : i32 to index
    %1115 = memref.load %arg1[%1114] : memref<64xi32, #tpu.memory_space<smem>>
    %c1_i32_492 = arith.constant 1 : i32
    %1116 = arith.subi %1115, %c1_i32_492 : i32
    %c0_i32_493 = arith.constant 0 : i32
    %c7_i32_494 = arith.constant 7 : i32
    %1117 = arith.maxsi %c0_i32_493, %1116 : i32
    %1118 = arith.minsi %c7_i32_494, %1117 : i32
    %1119 = arith.index_cast %1118 : i32 to index
    %c0_495 = arith.constant 0 : index
    %c0_496 = arith.constant 0 : index
    %1120 = vector.load %arg14[%1119, %c0_495, %c0_496] : memref<8x8x128xf32, #tpu.memory_space<vmem>>, vector<1x8x128xf32>
    %1121 = vector.shape_cast %1120 : vector<1x8x128xf32> to vector<8x128xf32>
    %c0_i32_497 = arith.constant 0 : i32
    %1122 = arith.cmpi sgt, %1115, %c0_i32_497 : i32
    %c0_i32_498 = arith.constant 0 : i32
    %1123 = arith.cmpi sgt, %c5_i32_467, %c0_i32_498 : i32
    %1124 = arith.andi %1122, %1123 : i1
    %1125 = vector.broadcast %1124 : i1 to vector<8x1xi1>
    %1126 = arith.andi %9, %1125 : vector<8x1xi1>
    %cst_499 = arith.constant 0.000000e+00 : f32
    %1127 = vector.shape_cast %1126 : vector<8x1xi1> to vector<8x1xi1>
    %1128 = vector.broadcast %1127 : vector<8x1xi1> to vector<8x128xi1>
    %1129 = vector.broadcast %cst_499 : f32 to vector<8x128xf32>
    %1130 = arith.select %1128, %1121, %1129 : vector<8x128xi1>, vector<8x128xf32>
    %1131 = arith.addf %1110, %1130 : vector<8x128xf32>
    %c3_i32_500 = arith.constant 3 : i32
    %1132 = arith.addi %0, %c3_i32_500 : i32
    %c8_i32_501 = arith.constant 8 : i32
    %1133 = arith.muli %1132, %c8_i32_501 : i32
    %1134 = arith.addi %1133, %c5_i32_467 : i32
    %1135 = arith.index_cast %1134 : i32 to index
    %1136 = memref.load %arg1[%1135] : memref<64xi32, #tpu.memory_space<smem>>
    %c1_i32_502 = arith.constant 1 : i32
    %1137 = arith.subi %1136, %c1_i32_502 : i32
    %c0_i32_503 = arith.constant 0 : i32
    %c7_i32_504 = arith.constant 7 : i32
    %1138 = arith.maxsi %c0_i32_503, %1137 : i32
    %1139 = arith.minsi %c7_i32_504, %1138 : i32
    %1140 = arith.index_cast %1139 : i32 to index
    %c0_505 = arith.constant 0 : index
    %c0_506 = arith.constant 0 : index
    %1141 = vector.load %arg14[%1140, %c0_505, %c0_506] : memref<8x8x128xf32, #tpu.memory_space<vmem>>, vector<1x8x128xf32>
    %1142 = vector.shape_cast %1141 : vector<1x8x128xf32> to vector<8x128xf32>
    %c0_i32_507 = arith.constant 0 : i32
    %1143 = arith.cmpi sgt, %1136, %c0_i32_507 : i32
    %c0_i32_508 = arith.constant 0 : i32
    %1144 = arith.cmpi sgt, %c5_i32_467, %c0_i32_508 : i32
    %1145 = arith.andi %1143, %1144 : i1
    %1146 = vector.broadcast %1145 : i1 to vector<8x1xi1>
    %1147 = arith.andi %12, %1146 : vector<8x1xi1>
    %cst_509 = arith.constant 0.000000e+00 : f32
    %1148 = vector.shape_cast %1147 : vector<8x1xi1> to vector<8x1xi1>
    %1149 = vector.broadcast %1148 : vector<8x1xi1> to vector<8x128xi1>
    %1150 = vector.broadcast %cst_509 : f32 to vector<8x128xf32>
    %1151 = arith.select %1149, %1142, %1150 : vector<8x128xi1>, vector<8x128xf32>
    %1152 = arith.addf %1131, %1151 : vector<8x128xf32>
    %c4_i32_510 = arith.constant 4 : i32
    %1153 = arith.addi %0, %c4_i32_510 : i32
    %c8_i32_511 = arith.constant 8 : i32
    %1154 = arith.muli %1153, %c8_i32_511 : i32
    %1155 = arith.addi %1154, %c5_i32_467 : i32
    %1156 = arith.index_cast %1155 : i32 to index
    %1157 = memref.load %arg1[%1156] : memref<64xi32, #tpu.memory_space<smem>>
    %c1_i32_512 = arith.constant 1 : i32
    %1158 = arith.subi %1157, %c1_i32_512 : i32
    %c0_i32_513 = arith.constant 0 : i32
    %c7_i32_514 = arith.constant 7 : i32
    %1159 = arith.maxsi %c0_i32_513, %1158 : i32
    %1160 = arith.minsi %c7_i32_514, %1159 : i32
    %1161 = arith.index_cast %1160 : i32 to index
    %c0_515 = arith.constant 0 : index
    %c0_516 = arith.constant 0 : index
    %1162 = vector.load %arg14[%1161, %c0_515, %c0_516] : memref<8x8x128xf32, #tpu.memory_space<vmem>>, vector<1x8x128xf32>
    %1163 = vector.shape_cast %1162 : vector<1x8x128xf32> to vector<8x128xf32>
    %c0_i32_517 = arith.constant 0 : i32
    %1164 = arith.cmpi sgt, %1157, %c0_i32_517 : i32
    %c0_i32_518 = arith.constant 0 : i32
    %1165 = arith.cmpi sgt, %c5_i32_467, %c0_i32_518 : i32
    %1166 = arith.andi %1164, %1165 : i1
    %1167 = vector.broadcast %1166 : i1 to vector<8x1xi1>
    %1168 = arith.andi %15, %1167 : vector<8x1xi1>
    %cst_519 = arith.constant 0.000000e+00 : f32
    %1169 = vector.shape_cast %1168 : vector<8x1xi1> to vector<8x1xi1>
    %1170 = vector.broadcast %1169 : vector<8x1xi1> to vector<8x128xi1>
    %1171 = vector.broadcast %cst_519 : f32 to vector<8x128xf32>
    %1172 = arith.select %1170, %1163, %1171 : vector<8x128xi1>, vector<8x128xf32>
    %1173 = arith.addf %1152, %1172 : vector<8x128xf32>
    %c5_i32_520 = arith.constant 5 : i32
    %1174 = arith.addi %0, %c5_i32_520 : i32
    %c8_i32_521 = arith.constant 8 : i32
    %1175 = arith.muli %1174, %c8_i32_521 : i32
    %1176 = arith.addi %1175, %c5_i32_467 : i32
    %1177 = arith.index_cast %1176 : i32 to index
    %1178 = memref.load %arg1[%1177] : memref<64xi32, #tpu.memory_space<smem>>
    %c1_i32_522 = arith.constant 1 : i32
    %1179 = arith.subi %1178, %c1_i32_522 : i32
    %c0_i32_523 = arith.constant 0 : i32
    %c7_i32_524 = arith.constant 7 : i32
    %1180 = arith.maxsi %c0_i32_523, %1179 : i32
    %1181 = arith.minsi %c7_i32_524, %1180 : i32
    %1182 = arith.index_cast %1181 : i32 to index
    %c0_525 = arith.constant 0 : index
    %c0_526 = arith.constant 0 : index
    %1183 = vector.load %arg14[%1182, %c0_525, %c0_526] : memref<8x8x128xf32, #tpu.memory_space<vmem>>, vector<1x8x128xf32>
    %1184 = vector.shape_cast %1183 : vector<1x8x128xf32> to vector<8x128xf32>
    %c0_i32_527 = arith.constant 0 : i32
    %1185 = arith.cmpi sgt, %1178, %c0_i32_527 : i32
    %c0_i32_528 = arith.constant 0 : i32
    %1186 = arith.cmpi sgt, %c5_i32_467, %c0_i32_528 : i32
    %1187 = arith.andi %1185, %1186 : i1
    %1188 = vector.broadcast %1187 : i1 to vector<8x1xi1>
    %1189 = arith.andi %18, %1188 : vector<8x1xi1>
    %cst_529 = arith.constant 0.000000e+00 : f32
    %1190 = vector.shape_cast %1189 : vector<8x1xi1> to vector<8x1xi1>
    %1191 = vector.broadcast %1190 : vector<8x1xi1> to vector<8x128xi1>
    %1192 = vector.broadcast %cst_529 : f32 to vector<8x128xf32>
    %1193 = arith.select %1191, %1184, %1192 : vector<8x128xi1>, vector<8x128xf32>
    %1194 = arith.addf %1173, %1193 : vector<8x128xf32>
    %c6_i32_530 = arith.constant 6 : i32
    %1195 = arith.addi %0, %c6_i32_530 : i32
    %c8_i32_531 = arith.constant 8 : i32
    %1196 = arith.muli %1195, %c8_i32_531 : i32
    %1197 = arith.addi %1196, %c5_i32_467 : i32
    %1198 = arith.index_cast %1197 : i32 to index
    %1199 = memref.load %arg1[%1198] : memref<64xi32, #tpu.memory_space<smem>>
    %c1_i32_532 = arith.constant 1 : i32
    %1200 = arith.subi %1199, %c1_i32_532 : i32
    %c0_i32_533 = arith.constant 0 : i32
    %c7_i32_534 = arith.constant 7 : i32
    %1201 = arith.maxsi %c0_i32_533, %1200 : i32
    %1202 = arith.minsi %c7_i32_534, %1201 : i32
    %1203 = arith.index_cast %1202 : i32 to index
    %c0_535 = arith.constant 0 : index
    %c0_536 = arith.constant 0 : index
    %1204 = vector.load %arg14[%1203, %c0_535, %c0_536] : memref<8x8x128xf32, #tpu.memory_space<vmem>>, vector<1x8x128xf32>
    %1205 = vector.shape_cast %1204 : vector<1x8x128xf32> to vector<8x128xf32>
    %c0_i32_537 = arith.constant 0 : i32
    %1206 = arith.cmpi sgt, %1199, %c0_i32_537 : i32
    %c0_i32_538 = arith.constant 0 : i32
    %1207 = arith.cmpi sgt, %c5_i32_467, %c0_i32_538 : i32
    %1208 = arith.andi %1206, %1207 : i1
    %1209 = vector.broadcast %1208 : i1 to vector<8x1xi1>
    %1210 = arith.andi %21, %1209 : vector<8x1xi1>
    %cst_539 = arith.constant 0.000000e+00 : f32
    %1211 = vector.shape_cast %1210 : vector<8x1xi1> to vector<8x1xi1>
    %1212 = vector.broadcast %1211 : vector<8x1xi1> to vector<8x128xi1>
    %1213 = vector.broadcast %cst_539 : f32 to vector<8x128xf32>
    %1214 = arith.select %1212, %1205, %1213 : vector<8x128xi1>, vector<8x128xf32>
    %1215 = arith.addf %1194, %1214 : vector<8x128xf32>
    %c7_i32_540 = arith.constant 7 : i32
    %1216 = arith.addi %0, %c7_i32_540 : i32
    %c8_i32_541 = arith.constant 8 : i32
    %1217 = arith.muli %1216, %c8_i32_541 : i32
    %1218 = arith.addi %1217, %c5_i32_467 : i32
    %1219 = arith.index_cast %1218 : i32 to index
    %1220 = memref.load %arg1[%1219] : memref<64xi32, #tpu.memory_space<smem>>
    %c1_i32_542 = arith.constant 1 : i32
    %1221 = arith.subi %1220, %c1_i32_542 : i32
    %c0_i32_543 = arith.constant 0 : i32
    %c7_i32_544 = arith.constant 7 : i32
    %1222 = arith.maxsi %c0_i32_543, %1221 : i32
    %1223 = arith.minsi %c7_i32_544, %1222 : i32
    %1224 = arith.index_cast %1223 : i32 to index
    %c0_545 = arith.constant 0 : index
    %c0_546 = arith.constant 0 : index
    %1225 = vector.load %arg14[%1224, %c0_545, %c0_546] : memref<8x8x128xf32, #tpu.memory_space<vmem>>, vector<1x8x128xf32>
    %1226 = vector.shape_cast %1225 : vector<1x8x128xf32> to vector<8x128xf32>
    %c0_i32_547 = arith.constant 0 : i32
    %1227 = arith.cmpi sgt, %1220, %c0_i32_547 : i32
    %c0_i32_548 = arith.constant 0 : i32
    %1228 = arith.cmpi sgt, %c5_i32_467, %c0_i32_548 : i32
    %1229 = arith.andi %1227, %1228 : i1
    %1230 = vector.broadcast %1229 : i1 to vector<8x1xi1>
    %1231 = arith.andi %24, %1230 : vector<8x1xi1>
    %cst_549 = arith.constant 0.000000e+00 : f32
    %1232 = vector.shape_cast %1231 : vector<8x1xi1> to vector<8x1xi1>
    %1233 = vector.broadcast %1232 : vector<8x1xi1> to vector<8x128xi1>
    %1234 = vector.broadcast %cst_549 : f32 to vector<8x128xf32>
    %1235 = arith.select %1233, %1226, %1234 : vector<8x128xi1>, vector<8x128xf32>
    %1236 = arith.addf %1215, %1235 : vector<8x128xf32>
    %cst_550 = arith.constant dense<0.000000e+00> : vector<8x128xf32>
    %1237 = tpu.matmul %1065, %48, %cst_550 {dimension_numbers = #tpu.dot_dimension_numbers<[1], [0], [0], [1], [0, 0, 1, 1], [], []>} : vector<8x32xbf16>, vector<32x128xbf16>, vector<8x128xf32> -> vector<8x128xf32>
    %1238 = arith.addf %1236, %1237 : vector<8x128xf32>
    %1239 = vector.extract_strided_slice %1238 {offsets = [0, 0], sizes = [8, 32], strides = [1, 1]} : vector<8x128xf32> to vector<8x32xf32>
    %1240 = arith.negf %1239 : vector<8x32xf32>
    %1241 = math.exp %1240 : vector<8x32xf32>
    %cst_551 = arith.constant 1.000000e+00 : f32
    %1242 = vector.broadcast %cst_551 : f32 to vector<8x32xf32>
    %1243 = arith.addf %1242, %1241 : vector<8x32xf32>
    %1244 = arith.divf %1242, %1243 : vector<8x32xf32>
    %1245 = vector.extract_strided_slice %1238 {offsets = [0, 32], sizes = [8, 32], strides = [1, 1]} : vector<8x128xf32> to vector<8x32xf32>
    %1246 = arith.negf %1245 : vector<8x32xf32>
    %1247 = math.exp %1246 : vector<8x32xf32>
    %cst_552 = arith.constant 1.000000e+00 : f32
    %1248 = vector.broadcast %cst_552 : f32 to vector<8x32xf32>
    %1249 = arith.addf %1248, %1247 : vector<8x32xf32>
    %1250 = arith.divf %1248, %1249 : vector<8x32xf32>
    %1251 = vector.extract_strided_slice %1238 {offsets = [0, 64], sizes = [8, 32], strides = [1, 1]} : vector<8x128xf32> to vector<8x32xf32>
    %1252 = math.tanh %1251 : vector<8x32xf32>
    %1253 = vector.extract_strided_slice %1238 {offsets = [0, 96], sizes = [8, 32], strides = [1, 1]} : vector<8x128xf32> to vector<8x32xf32>
    %1254 = arith.negf %1253 : vector<8x32xf32>
    %1255 = math.exp %1254 : vector<8x32xf32>
    %cst_553 = arith.constant 1.000000e+00 : f32
    %1256 = vector.broadcast %cst_553 : f32 to vector<8x32xf32>
    %1257 = arith.addf %1256, %1255 : vector<8x32xf32>
    %1258 = arith.divf %1256, %1257 : vector<8x32xf32>
    %1259 = arith.mulf %1250, %1058 : vector<8x32xf32>
    %1260 = arith.mulf %1244, %1252 : vector<8x32xf32>
    %1261 = arith.addf %1259, %1260 : vector<8x32xf32>
    %1262 = math.tanh %1261 : vector<8x32xf32>
    %1263 = arith.mulf %1258, %1262 : vector<8x32xf32>
    %1264 = arith.index_cast %c5_i32_467 : i32 to index
    %c0_554 = arith.constant 0 : index
    %c0_555 = arith.constant 0 : index
    %1265 = vector.load %arg12[%1264, %c0_554, %c0_555] : memref<8x8x32xf32, #tpu.memory_space<vmem>>, vector<1x8x32xf32>
    %1266 = vector.shape_cast %1265 : vector<1x8x32xf32> to vector<8x32xf32>
    %1267 = vector.shape_cast %1263 : vector<8x32xf32> to vector<1x8x32xf32>
    tpu.vector_store %arg12[%1264, %c0_554, %c0_555], %1267 {strides = array<i32>} : memref<8x8x32xf32, #tpu.memory_space<vmem>>, vector<1x8x32xf32>,
    %1268 = arith.truncf %1263 : vector<8x32xf32> to vector<8x32xbf16>
    %c6_i32_556 = arith.constant 6 : i32
    %1269 = arith.index_cast %c6_i32_556 : i32 to index
    %c0_557 = arith.constant 0 : index
    %c0_558 = arith.constant 0 : index
    %1270 = vector.load %arg13[%1269, %c0_557, %c0_558] : memref<8x8x128xf32, #tpu.memory_space<vmem>>, vector<1x8x128xf32>
    %1271 = vector.shape_cast %1270 : vector<1x8x128xf32> to vector<8x128xf32>
    %c0_i32_559 = arith.constant 0 : i32
    %1272 = arith.addi %0, %c0_i32_559 : i32
    %c8_i32_560 = arith.constant 8 : i32
    %1273 = arith.muli %1272, %c8_i32_560 : i32
    %1274 = arith.addi %1273, %c6_i32_556 : i32
    %1275 = arith.index_cast %1274 : i32 to index
    %1276 = memref.load %arg1[%1275] : memref<64xi32, #tpu.memory_space<smem>>
    %c1_i32_561 = arith.constant 1 : i32
    %1277 = arith.subi %1276, %c1_i32_561 : i32
    %c0_i32_562 = arith.constant 0 : i32
    %c7_i32_563 = arith.constant 7 : i32
    %1278 = arith.maxsi %c0_i32_562, %1277 : i32
    %1279 = arith.minsi %c7_i32_563, %1278 : i32
    %1280 = arith.index_cast %1279 : i32 to index
    %c0_564 = arith.constant 0 : index
    %c0_565 = arith.constant 0 : index
    %1281 = vector.load %arg14[%1280, %c0_564, %c0_565] : memref<8x8x128xf32, #tpu.memory_space<vmem>>, vector<1x8x128xf32>
    %1282 = vector.shape_cast %1281 : vector<1x8x128xf32> to vector<8x128xf32>
    %c0_i32_566 = arith.constant 0 : i32
    %1283 = arith.cmpi sgt, %1276, %c0_i32_566 : i32
    %c0_i32_567 = arith.constant 0 : i32
    %1284 = arith.cmpi sgt, %c6_i32_556, %c0_i32_567 : i32
    %1285 = arith.andi %1283, %1284 : i1
    %1286 = vector.broadcast %1285 : i1 to vector<8x1xi1>
    %1287 = arith.andi %3, %1286 : vector<8x1xi1>
    %cst_568 = arith.constant 0.000000e+00 : f32
    %1288 = vector.shape_cast %1287 : vector<8x1xi1> to vector<8x1xi1>
    %1289 = vector.broadcast %1288 : vector<8x1xi1> to vector<8x128xi1>
    %1290 = vector.broadcast %cst_568 : f32 to vector<8x128xf32>
    %1291 = arith.select %1289, %1282, %1290 : vector<8x128xi1>, vector<8x128xf32>
    %1292 = arith.addf %1271, %1291 : vector<8x128xf32>
    %c1_i32_569 = arith.constant 1 : i32
    %1293 = arith.addi %0, %c1_i32_569 : i32
    %c8_i32_570 = arith.constant 8 : i32
    %1294 = arith.muli %1293, %c8_i32_570 : i32
    %1295 = arith.addi %1294, %c6_i32_556 : i32
    %1296 = arith.index_cast %1295 : i32 to index
    %1297 = memref.load %arg1[%1296] : memref<64xi32, #tpu.memory_space<smem>>
    %c1_i32_571 = arith.constant 1 : i32
    %1298 = arith.subi %1297, %c1_i32_571 : i32
    %c0_i32_572 = arith.constant 0 : i32
    %c7_i32_573 = arith.constant 7 : i32
    %1299 = arith.maxsi %c0_i32_572, %1298 : i32
    %1300 = arith.minsi %c7_i32_573, %1299 : i32
    %1301 = arith.index_cast %1300 : i32 to index
    %c0_574 = arith.constant 0 : index
    %c0_575 = arith.constant 0 : index
    %1302 = vector.load %arg14[%1301, %c0_574, %c0_575] : memref<8x8x128xf32, #tpu.memory_space<vmem>>, vector<1x8x128xf32>
    %1303 = vector.shape_cast %1302 : vector<1x8x128xf32> to vector<8x128xf32>
    %c0_i32_576 = arith.constant 0 : i32
    %1304 = arith.cmpi sgt, %1297, %c0_i32_576 : i32
    %c0_i32_577 = arith.constant 0 : i32
    %1305 = arith.cmpi sgt, %c6_i32_556, %c0_i32_577 : i32
    %1306 = arith.andi %1304, %1305 : i1
    %1307 = vector.broadcast %1306 : i1 to vector<8x1xi1>
    %1308 = arith.andi %6, %1307 : vector<8x1xi1>
    %cst_578 = arith.constant 0.000000e+00 : f32
    %1309 = vector.shape_cast %1308 : vector<8x1xi1> to vector<8x1xi1>
    %1310 = vector.broadcast %1309 : vector<8x1xi1> to vector<8x128xi1>
    %1311 = vector.broadcast %cst_578 : f32 to vector<8x128xf32>
    %1312 = arith.select %1310, %1303, %1311 : vector<8x128xi1>, vector<8x128xf32>
    %1313 = arith.addf %1292, %1312 : vector<8x128xf32>
    %c2_i32_579 = arith.constant 2 : i32
    %1314 = arith.addi %0, %c2_i32_579 : i32
    %c8_i32_580 = arith.constant 8 : i32
    %1315 = arith.muli %1314, %c8_i32_580 : i32
    %1316 = arith.addi %1315, %c6_i32_556 : i32
    %1317 = arith.index_cast %1316 : i32 to index
    %1318 = memref.load %arg1[%1317] : memref<64xi32, #tpu.memory_space<smem>>
    %c1_i32_581 = arith.constant 1 : i32
    %1319 = arith.subi %1318, %c1_i32_581 : i32
    %c0_i32_582 = arith.constant 0 : i32
    %c7_i32_583 = arith.constant 7 : i32
    %1320 = arith.maxsi %c0_i32_582, %1319 : i32
    %1321 = arith.minsi %c7_i32_583, %1320 : i32
    %1322 = arith.index_cast %1321 : i32 to index
    %c0_584 = arith.constant 0 : index
    %c0_585 = arith.constant 0 : index
    %1323 = vector.load %arg14[%1322, %c0_584, %c0_585] : memref<8x8x128xf32, #tpu.memory_space<vmem>>, vector<1x8x128xf32>
    %1324 = vector.shape_cast %1323 : vector<1x8x128xf32> to vector<8x128xf32>
    %c0_i32_586 = arith.constant 0 : i32
    %1325 = arith.cmpi sgt, %1318, %c0_i32_586 : i32
    %c0_i32_587 = arith.constant 0 : i32
    %1326 = arith.cmpi sgt, %c6_i32_556, %c0_i32_587 : i32
    %1327 = arith.andi %1325, %1326 : i1
    %1328 = vector.broadcast %1327 : i1 to vector<8x1xi1>
    %1329 = arith.andi %9, %1328 : vector<8x1xi1>
    %cst_588 = arith.constant 0.000000e+00 : f32
    %1330 = vector.shape_cast %1329 : vector<8x1xi1> to vector<8x1xi1>
    %1331 = vector.broadcast %1330 : vector<8x1xi1> to vector<8x128xi1>
    %1332 = vector.broadcast %cst_588 : f32 to vector<8x128xf32>
    %1333 = arith.select %1331, %1324, %1332 : vector<8x128xi1>, vector<8x128xf32>
    %1334 = arith.addf %1313, %1333 : vector<8x128xf32>
    %c3_i32_589 = arith.constant 3 : i32
    %1335 = arith.addi %0, %c3_i32_589 : i32
    %c8_i32_590 = arith.constant 8 : i32
    %1336 = arith.muli %1335, %c8_i32_590 : i32
    %1337 = arith.addi %1336, %c6_i32_556 : i32
    %1338 = arith.index_cast %1337 : i32 to index
    %1339 = memref.load %arg1[%1338] : memref<64xi32, #tpu.memory_space<smem>>
    %c1_i32_591 = arith.constant 1 : i32
    %1340 = arith.subi %1339, %c1_i32_591 : i32
    %c0_i32_592 = arith.constant 0 : i32
    %c7_i32_593 = arith.constant 7 : i32
    %1341 = arith.maxsi %c0_i32_592, %1340 : i32
    %1342 = arith.minsi %c7_i32_593, %1341 : i32
    %1343 = arith.index_cast %1342 : i32 to index
    %c0_594 = arith.constant 0 : index
    %c0_595 = arith.constant 0 : index
    %1344 = vector.load %arg14[%1343, %c0_594, %c0_595] : memref<8x8x128xf32, #tpu.memory_space<vmem>>, vector<1x8x128xf32>
    %1345 = vector.shape_cast %1344 : vector<1x8x128xf32> to vector<8x128xf32>
    %c0_i32_596 = arith.constant 0 : i32
    %1346 = arith.cmpi sgt, %1339, %c0_i32_596 : i32
    %c0_i32_597 = arith.constant 0 : i32
    %1347 = arith.cmpi sgt, %c6_i32_556, %c0_i32_597 : i32
    %1348 = arith.andi %1346, %1347 : i1
    %1349 = vector.broadcast %1348 : i1 to vector<8x1xi1>
    %1350 = arith.andi %12, %1349 : vector<8x1xi1>
    %cst_598 = arith.constant 0.000000e+00 : f32
    %1351 = vector.shape_cast %1350 : vector<8x1xi1> to vector<8x1xi1>
    %1352 = vector.broadcast %1351 : vector<8x1xi1> to vector<8x128xi1>
    %1353 = vector.broadcast %cst_598 : f32 to vector<8x128xf32>
    %1354 = arith.select %1352, %1345, %1353 : vector<8x128xi1>, vector<8x128xf32>
    %1355 = arith.addf %1334, %1354 : vector<8x128xf32>
    %c4_i32_599 = arith.constant 4 : i32
    %1356 = arith.addi %0, %c4_i32_599 : i32
    %c8_i32_600 = arith.constant 8 : i32
    %1357 = arith.muli %1356, %c8_i32_600 : i32
    %1358 = arith.addi %1357, %c6_i32_556 : i32
    %1359 = arith.index_cast %1358 : i32 to index
    %1360 = memref.load %arg1[%1359] : memref<64xi32, #tpu.memory_space<smem>>
    %c1_i32_601 = arith.constant 1 : i32
    %1361 = arith.subi %1360, %c1_i32_601 : i32
    %c0_i32_602 = arith.constant 0 : i32
    %c7_i32_603 = arith.constant 7 : i32
    %1362 = arith.maxsi %c0_i32_602, %1361 : i32
    %1363 = arith.minsi %c7_i32_603, %1362 : i32
    %1364 = arith.index_cast %1363 : i32 to index
    %c0_604 = arith.constant 0 : index
    %c0_605 = arith.constant 0 : index
    %1365 = vector.load %arg14[%1364, %c0_604, %c0_605] : memref<8x8x128xf32, #tpu.memory_space<vmem>>, vector<1x8x128xf32>
    %1366 = vector.shape_cast %1365 : vector<1x8x128xf32> to vector<8x128xf32>
    %c0_i32_606 = arith.constant 0 : i32
    %1367 = arith.cmpi sgt, %1360, %c0_i32_606 : i32
    %c0_i32_607 = arith.constant 0 : i32
    %1368 = arith.cmpi sgt, %c6_i32_556, %c0_i32_607 : i32
    %1369 = arith.andi %1367, %1368 : i1
    %1370 = vector.broadcast %1369 : i1 to vector<8x1xi1>
    %1371 = arith.andi %15, %1370 : vector<8x1xi1>
    %cst_608 = arith.constant 0.000000e+00 : f32
    %1372 = vector.shape_cast %1371 : vector<8x1xi1> to vector<8x1xi1>
    %1373 = vector.broadcast %1372 : vector<8x1xi1> to vector<8x128xi1>
    %1374 = vector.broadcast %cst_608 : f32 to vector<8x128xf32>
    %1375 = arith.select %1373, %1366, %1374 : vector<8x128xi1>, vector<8x128xf32>
    %1376 = arith.addf %1355, %1375 : vector<8x128xf32>
    %c5_i32_609 = arith.constant 5 : i32
    %1377 = arith.addi %0, %c5_i32_609 : i32
    %c8_i32_610 = arith.constant 8 : i32
    %1378 = arith.muli %1377, %c8_i32_610 : i32
    %1379 = arith.addi %1378, %c6_i32_556 : i32
    %1380 = arith.index_cast %1379 : i32 to index
    %1381 = memref.load %arg1[%1380] : memref<64xi32, #tpu.memory_space<smem>>
    %c1_i32_611 = arith.constant 1 : i32
    %1382 = arith.subi %1381, %c1_i32_611 : i32
    %c0_i32_612 = arith.constant 0 : i32
    %c7_i32_613 = arith.constant 7 : i32
    %1383 = arith.maxsi %c0_i32_612, %1382 : i32
    %1384 = arith.minsi %c7_i32_613, %1383 : i32
    %1385 = arith.index_cast %1384 : i32 to index
    %c0_614 = arith.constant 0 : index
    %c0_615 = arith.constant 0 : index
    %1386 = vector.load %arg14[%1385, %c0_614, %c0_615] : memref<8x8x128xf32, #tpu.memory_space<vmem>>, vector<1x8x128xf32>
    %1387 = vector.shape_cast %1386 : vector<1x8x128xf32> to vector<8x128xf32>
    %c0_i32_616 = arith.constant 0 : i32
    %1388 = arith.cmpi sgt, %1381, %c0_i32_616 : i32
    %c0_i32_617 = arith.constant 0 : i32
    %1389 = arith.cmpi sgt, %c6_i32_556, %c0_i32_617 : i32
    %1390 = arith.andi %1388, %1389 : i1
    %1391 = vector.broadcast %1390 : i1 to vector<8x1xi1>
    %1392 = arith.andi %18, %1391 : vector<8x1xi1>
    %cst_618 = arith.constant 0.000000e+00 : f32
    %1393 = vector.shape_cast %1392 : vector<8x1xi1> to vector<8x1xi1>
    %1394 = vector.broadcast %1393 : vector<8x1xi1> to vector<8x128xi1>
    %1395 = vector.broadcast %cst_618 : f32 to vector<8x128xf32>
    %1396 = arith.select %1394, %1387, %1395 : vector<8x128xi1>, vector<8x128xf32>
    %1397 = arith.addf %1376, %1396 : vector<8x128xf32>
    %c6_i32_619 = arith.constant 6 : i32
    %1398 = arith.addi %0, %c6_i32_619 : i32
    %c8_i32_620 = arith.constant 8 : i32
    %1399 = arith.muli %1398, %c8_i32_620 : i32
    %1400 = arith.addi %1399, %c6_i32_556 : i32
    %1401 = arith.index_cast %1400 : i32 to index
    %1402 = memref.load %arg1[%1401] : memref<64xi32, #tpu.memory_space<smem>>
    %c1_i32_621 = arith.constant 1 : i32
    %1403 = arith.subi %1402, %c1_i32_621 : i32
    %c0_i32_622 = arith.constant 0 : i32
    %c7_i32_623 = arith.constant 7 : i32
    %1404 = arith.maxsi %c0_i32_622, %1403 : i32
    %1405 = arith.minsi %c7_i32_623, %1404 : i32
    %1406 = arith.index_cast %1405 : i32 to index
    %c0_624 = arith.constant 0 : index
    %c0_625 = arith.constant 0 : index
    %1407 = vector.load %arg14[%1406, %c0_624, %c0_625] : memref<8x8x128xf32, #tpu.memory_space<vmem>>, vector<1x8x128xf32>
    %1408 = vector.shape_cast %1407 : vector<1x8x128xf32> to vector<8x128xf32>
    %c0_i32_626 = arith.constant 0 : i32
    %1409 = arith.cmpi sgt, %1402, %c0_i32_626 : i32
    %c0_i32_627 = arith.constant 0 : i32
    %1410 = arith.cmpi sgt, %c6_i32_556, %c0_i32_627 : i32
    %1411 = arith.andi %1409, %1410 : i1
    %1412 = vector.broadcast %1411 : i1 to vector<8x1xi1>
    %1413 = arith.andi %21, %1412 : vector<8x1xi1>
    %cst_628 = arith.constant 0.000000e+00 : f32
    %1414 = vector.shape_cast %1413 : vector<8x1xi1> to vector<8x1xi1>
    %1415 = vector.broadcast %1414 : vector<8x1xi1> to vector<8x128xi1>
    %1416 = vector.broadcast %cst_628 : f32 to vector<8x128xf32>
    %1417 = arith.select %1415, %1408, %1416 : vector<8x128xi1>, vector<8x128xf32>
    %1418 = arith.addf %1397, %1417 : vector<8x128xf32>
    %c7_i32_629 = arith.constant 7 : i32
    %1419 = arith.addi %0, %c7_i32_629 : i32
    %c8_i32_630 = arith.constant 8 : i32
    %1420 = arith.muli %1419, %c8_i32_630 : i32
    %1421 = arith.addi %1420, %c6_i32_556 : i32
    %1422 = arith.index_cast %1421 : i32 to index
    %1423 = memref.load %arg1[%1422] : memref<64xi32, #tpu.memory_space<smem>>
    %c1_i32_631 = arith.constant 1 : i32
    %1424 = arith.subi %1423, %c1_i32_631 : i32
    %c0_i32_632 = arith.constant 0 : i32
    %c7_i32_633 = arith.constant 7 : i32
    %1425 = arith.maxsi %c0_i32_632, %1424 : i32
    %1426 = arith.minsi %c7_i32_633, %1425 : i32
    %1427 = arith.index_cast %1426 : i32 to index
    %c0_634 = arith.constant 0 : index
    %c0_635 = arith.constant 0 : index
    %1428 = vector.load %arg14[%1427, %c0_634, %c0_635] : memref<8x8x128xf32, #tpu.memory_space<vmem>>, vector<1x8x128xf32>
    %1429 = vector.shape_cast %1428 : vector<1x8x128xf32> to vector<8x128xf32>
    %c0_i32_636 = arith.constant 0 : i32
    %1430 = arith.cmpi sgt, %1423, %c0_i32_636 : i32
    %c0_i32_637 = arith.constant 0 : i32
    %1431 = arith.cmpi sgt, %c6_i32_556, %c0_i32_637 : i32
    %1432 = arith.andi %1430, %1431 : i1
    %1433 = vector.broadcast %1432 : i1 to vector<8x1xi1>
    %1434 = arith.andi %24, %1433 : vector<8x1xi1>
    %cst_638 = arith.constant 0.000000e+00 : f32
    %1435 = vector.shape_cast %1434 : vector<8x1xi1> to vector<8x1xi1>
    %1436 = vector.broadcast %1435 : vector<8x1xi1> to vector<8x128xi1>
    %1437 = vector.broadcast %cst_638 : f32 to vector<8x128xf32>
    %1438 = arith.select %1436, %1429, %1437 : vector<8x128xi1>, vector<8x128xf32>
    %1439 = arith.addf %1418, %1438 : vector<8x128xf32>
    %cst_639 = arith.constant dense<0.000000e+00> : vector<8x128xf32>
    %1440 = tpu.matmul %1268, %48, %cst_639 {dimension_numbers = #tpu.dot_dimension_numbers<[1], [0], [0], [1], [0, 0, 1, 1], [], []>} : vector<8x32xbf16>, vector<32x128xbf16>, vector<8x128xf32> -> vector<8x128xf32>
    %1441 = arith.addf %1439, %1440 : vector<8x128xf32>
    %1442 = vector.extract_strided_slice %1441 {offsets = [0, 0], sizes = [8, 32], strides = [1, 1]} : vector<8x128xf32> to vector<8x32xf32>
    %1443 = arith.negf %1442 : vector<8x32xf32>
    %1444 = math.exp %1443 : vector<8x32xf32>
    %cst_640 = arith.constant 1.000000e+00 : f32
    %1445 = vector.broadcast %cst_640 : f32 to vector<8x32xf32>
    %1446 = arith.addf %1445, %1444 : vector<8x32xf32>
    %1447 = arith.divf %1445, %1446 : vector<8x32xf32>
    %1448 = vector.extract_strided_slice %1441 {offsets = [0, 32], sizes = [8, 32], strides = [1, 1]} : vector<8x128xf32> to vector<8x32xf32>
    %1449 = arith.negf %1448 : vector<8x32xf32>
    %1450 = math.exp %1449 : vector<8x32xf32>
    %cst_641 = arith.constant 1.000000e+00 : f32
    %1451 = vector.broadcast %cst_641 : f32 to vector<8x32xf32>
    %1452 = arith.addf %1451, %1450 : vector<8x32xf32>
    %1453 = arith.divf %1451, %1452 : vector<8x32xf32>
    %1454 = vector.extract_strided_slice %1441 {offsets = [0, 64], sizes = [8, 32], strides = [1, 1]} : vector<8x128xf32> to vector<8x32xf32>
    %1455 = math.tanh %1454 : vector<8x32xf32>
    %1456 = vector.extract_strided_slice %1441 {offsets = [0, 96], sizes = [8, 32], strides = [1, 1]} : vector<8x128xf32> to vector<8x32xf32>
    %1457 = arith.negf %1456 : vector<8x32xf32>
    %1458 = math.exp %1457 : vector<8x32xf32>
    %cst_642 = arith.constant 1.000000e+00 : f32
    %1459 = vector.broadcast %cst_642 : f32 to vector<8x32xf32>
    %1460 = arith.addf %1459, %1458 : vector<8x32xf32>
    %1461 = arith.divf %1459, %1460 : vector<8x32xf32>
    %1462 = arith.mulf %1453, %1261 : vector<8x32xf32>
    %1463 = arith.mulf %1447, %1455 : vector<8x32xf32>
    %1464 = arith.addf %1462, %1463 : vector<8x32xf32>
    %1465 = math.tanh %1464 : vector<8x32xf32>
    %1466 = arith.mulf %1461, %1465 : vector<8x32xf32>
    %1467 = arith.index_cast %c6_i32_556 : i32 to index
    %c0_643 = arith.constant 0 : index
    %c0_644 = arith.constant 0 : index
    %1468 = vector.load %arg12[%1467, %c0_643, %c0_644] : memref<8x8x32xf32, #tpu.memory_space<vmem>>, vector<1x8x32xf32>
    %1469 = vector.shape_cast %1468 : vector<1x8x32xf32> to vector<8x32xf32>
    %1470 = vector.shape_cast %1466 : vector<8x32xf32> to vector<1x8x32xf32>
    tpu.vector_store %arg12[%1467, %c0_643, %c0_644], %1470 {strides = array<i32>} : memref<8x8x32xf32, #tpu.memory_space<vmem>>, vector<1x8x32xf32>,
    %1471 = arith.truncf %1466 : vector<8x32xf32> to vector<8x32xbf16>
    %c7_i32_645 = arith.constant 7 : i32
    %1472 = arith.index_cast %c7_i32_645 : i32 to index
    %c0_646 = arith.constant 0 : index
    %c0_647 = arith.constant 0 : index
    %1473 = vector.load %arg13[%1472, %c0_646, %c0_647] : memref<8x8x128xf32, #tpu.memory_space<vmem>>, vector<1x8x128xf32>
    %1474 = vector.shape_cast %1473 : vector<1x8x128xf32> to vector<8x128xf32>
    %c0_i32_648 = arith.constant 0 : i32
    %1475 = arith.addi %0, %c0_i32_648 : i32
    %c8_i32_649 = arith.constant 8 : i32
    %1476 = arith.muli %1475, %c8_i32_649 : i32
    %1477 = arith.addi %1476, %c7_i32_645 : i32
    %1478 = arith.index_cast %1477 : i32 to index
    %1479 = memref.load %arg1[%1478] : memref<64xi32, #tpu.memory_space<smem>>
    %c1_i32_650 = arith.constant 1 : i32
    %1480 = arith.subi %1479, %c1_i32_650 : i32
    %c0_i32_651 = arith.constant 0 : i32
    %c7_i32_652 = arith.constant 7 : i32
    %1481 = arith.maxsi %c0_i32_651, %1480 : i32
    %1482 = arith.minsi %c7_i32_652, %1481 : i32
    %1483 = arith.index_cast %1482 : i32 to index
    %c0_653 = arith.constant 0 : index
    %c0_654 = arith.constant 0 : index
    %1484 = vector.load %arg14[%1483, %c0_653, %c0_654] : memref<8x8x128xf32, #tpu.memory_space<vmem>>, vector<1x8x128xf32>
    %1485 = vector.shape_cast %1484 : vector<1x8x128xf32> to vector<8x128xf32>
    %c0_i32_655 = arith.constant 0 : i32
    %1486 = arith.cmpi sgt, %1479, %c0_i32_655 : i32
    %c0_i32_656 = arith.constant 0 : i32
    %1487 = arith.cmpi sgt, %c7_i32_645, %c0_i32_656 : i32
    %1488 = arith.andi %1486, %1487 : i1
    %1489 = vector.broadcast %1488 : i1 to vector<8x1xi1>
    %1490 = arith.andi %3, %1489 : vector<8x1xi1>
    %cst_657 = arith.constant 0.000000e+00 : f32
    %1491 = vector.shape_cast %1490 : vector<8x1xi1> to vector<8x1xi1>
    %1492 = vector.broadcast %1491 : vector<8x1xi1> to vector<8x128xi1>
    %1493 = vector.broadcast %cst_657 : f32 to vector<8x128xf32>
    %1494 = arith.select %1492, %1485, %1493 : vector<8x128xi1>, vector<8x128xf32>
    %1495 = arith.addf %1474, %1494 : vector<8x128xf32>
    %c1_i32_658 = arith.constant 1 : i32
    %1496 = arith.addi %0, %c1_i32_658 : i32
    %c8_i32_659 = arith.constant 8 : i32
    %1497 = arith.muli %1496, %c8_i32_659 : i32
    %1498 = arith.addi %1497, %c7_i32_645 : i32
    %1499 = arith.index_cast %1498 : i32 to index
    %1500 = memref.load %arg1[%1499] : memref<64xi32, #tpu.memory_space<smem>>
    %c1_i32_660 = arith.constant 1 : i32
    %1501 = arith.subi %1500, %c1_i32_660 : i32
    %c0_i32_661 = arith.constant 0 : i32
    %c7_i32_662 = arith.constant 7 : i32
    %1502 = arith.maxsi %c0_i32_661, %1501 : i32
    %1503 = arith.minsi %c7_i32_662, %1502 : i32
    %1504 = arith.index_cast %1503 : i32 to index
    %c0_663 = arith.constant 0 : index
    %c0_664 = arith.constant 0 : index
    %1505 = vector.load %arg14[%1504, %c0_663, %c0_664] : memref<8x8x128xf32, #tpu.memory_space<vmem>>, vector<1x8x128xf32>
    %1506 = vector.shape_cast %1505 : vector<1x8x128xf32> to vector<8x128xf32>
    %c0_i32_665 = arith.constant 0 : i32
    %1507 = arith.cmpi sgt, %1500, %c0_i32_665 : i32
    %c0_i32_666 = arith.constant 0 : i32
    %1508 = arith.cmpi sgt, %c7_i32_645, %c0_i32_666 : i32
    %1509 = arith.andi %1507, %1508 : i1
    %1510 = vector.broadcast %1509 : i1 to vector<8x1xi1>
    %1511 = arith.andi %6, %1510 : vector<8x1xi1>
    %cst_667 = arith.constant 0.000000e+00 : f32
    %1512 = vector.shape_cast %1511 : vector<8x1xi1> to vector<8x1xi1>
    %1513 = vector.broadcast %1512 : vector<8x1xi1> to vector<8x128xi1>
    %1514 = vector.broadcast %cst_667 : f32 to vector<8x128xf32>
    %1515 = arith.select %1513, %1506, %1514 : vector<8x128xi1>, vector<8x128xf32>
    %1516 = arith.addf %1495, %1515 : vector<8x128xf32>
    %c2_i32_668 = arith.constant 2 : i32
    %1517 = arith.addi %0, %c2_i32_668 : i32
    %c8_i32_669 = arith.constant 8 : i32
    %1518 = arith.muli %1517, %c8_i32_669 : i32
    %1519 = arith.addi %1518, %c7_i32_645 : i32
    %1520 = arith.index_cast %1519 : i32 to index
    %1521 = memref.load %arg1[%1520] : memref<64xi32, #tpu.memory_space<smem>>
    %c1_i32_670 = arith.constant 1 : i32
    %1522 = arith.subi %1521, %c1_i32_670 : i32
    %c0_i32_671 = arith.constant 0 : i32
    %c7_i32_672 = arith.constant 7 : i32
    %1523 = arith.maxsi %c0_i32_671, %1522 : i32
    %1524 = arith.minsi %c7_i32_672, %1523 : i32
    %1525 = arith.index_cast %1524 : i32 to index
    %c0_673 = arith.constant 0 : index
    %c0_674 = arith.constant 0 : index
    %1526 = vector.load %arg14[%1525, %c0_673, %c0_674] : memref<8x8x128xf32, #tpu.memory_space<vmem>>, vector<1x8x128xf32>
    %1527 = vector.shape_cast %1526 : vector<1x8x128xf32> to vector<8x128xf32>
    %c0_i32_675 = arith.constant 0 : i32
    %1528 = arith.cmpi sgt, %1521, %c0_i32_675 : i32
    %c0_i32_676 = arith.constant 0 : i32
    %1529 = arith.cmpi sgt, %c7_i32_645, %c0_i32_676 : i32
    %1530 = arith.andi %1528, %1529 : i1
    %1531 = vector.broadcast %1530 : i1 to vector<8x1xi1>
    %1532 = arith.andi %9, %1531 : vector<8x1xi1>
    %cst_677 = arith.constant 0.000000e+00 : f32
    %1533 = vector.shape_cast %1532 : vector<8x1xi1> to vector<8x1xi1>
    %1534 = vector.broadcast %1533 : vector<8x1xi1> to vector<8x128xi1>
    %1535 = vector.broadcast %cst_677 : f32 to vector<8x128xf32>
    %1536 = arith.select %1534, %1527, %1535 : vector<8x128xi1>, vector<8x128xf32>
    %1537 = arith.addf %1516, %1536 : vector<8x128xf32>
    %c3_i32_678 = arith.constant 3 : i32
    %1538 = arith.addi %0, %c3_i32_678 : i32
    %c8_i32_679 = arith.constant 8 : i32
    %1539 = arith.muli %1538, %c8_i32_679 : i32
    %1540 = arith.addi %1539, %c7_i32_645 : i32
    %1541 = arith.index_cast %1540 : i32 to index
    %1542 = memref.load %arg1[%1541] : memref<64xi32, #tpu.memory_space<smem>>
    %c1_i32_680 = arith.constant 1 : i32
    %1543 = arith.subi %1542, %c1_i32_680 : i32
    %c0_i32_681 = arith.constant 0 : i32
    %c7_i32_682 = arith.constant 7 : i32
    %1544 = arith.maxsi %c0_i32_681, %1543 : i32
    %1545 = arith.minsi %c7_i32_682, %1544 : i32
    %1546 = arith.index_cast %1545 : i32 to index
    %c0_683 = arith.constant 0 : index
    %c0_684 = arith.constant 0 : index
    %1547 = vector.load %arg14[%1546, %c0_683, %c0_684] : memref<8x8x128xf32, #tpu.memory_space<vmem>>, vector<1x8x128xf32>
    %1548 = vector.shape_cast %1547 : vector<1x8x128xf32> to vector<8x128xf32>
    %c0_i32_685 = arith.constant 0 : i32
    %1549 = arith.cmpi sgt, %1542, %c0_i32_685 : i32
    %c0_i32_686 = arith.constant 0 : i32
    %1550 = arith.cmpi sgt, %c7_i32_645, %c0_i32_686 : i32
    %1551 = arith.andi %1549, %1550 : i1
    %1552 = vector.broadcast %1551 : i1 to vector<8x1xi1>
    %1553 = arith.andi %12, %1552 : vector<8x1xi1>
    %cst_687 = arith.constant 0.000000e+00 : f32
    %1554 = vector.shape_cast %1553 : vector<8x1xi1> to vector<8x1xi1>
    %1555 = vector.broadcast %1554 : vector<8x1xi1> to vector<8x128xi1>
    %1556 = vector.broadcast %cst_687 : f32 to vector<8x128xf32>
    %1557 = arith.select %1555, %1548, %1556 : vector<8x128xi1>, vector<8x128xf32>
    %1558 = arith.addf %1537, %1557 : vector<8x128xf32>
    %c4_i32_688 = arith.constant 4 : i32
    %1559 = arith.addi %0, %c4_i32_688 : i32
    %c8_i32_689 = arith.constant 8 : i32
    %1560 = arith.muli %1559, %c8_i32_689 : i32
    %1561 = arith.addi %1560, %c7_i32_645 : i32
    %1562 = arith.index_cast %1561 : i32 to index
    %1563 = memref.load %arg1[%1562] : memref<64xi32, #tpu.memory_space<smem>>
    %c1_i32_690 = arith.constant 1 : i32
    %1564 = arith.subi %1563, %c1_i32_690 : i32
    %c0_i32_691 = arith.constant 0 : i32
    %c7_i32_692 = arith.constant 7 : i32
    %1565 = arith.maxsi %c0_i32_691, %1564 : i32
    %1566 = arith.minsi %c7_i32_692, %1565 : i32
    %1567 = arith.index_cast %1566 : i32 to index
    %c0_693 = arith.constant 0 : index
    %c0_694 = arith.constant 0 : index
    %1568 = vector.load %arg14[%1567, %c0_693, %c0_694] : memref<8x8x128xf32, #tpu.memory_space<vmem>>, vector<1x8x128xf32>
    %1569 = vector.shape_cast %1568 : vector<1x8x128xf32> to vector<8x128xf32>
    %c0_i32_695 = arith.constant 0 : i32
    %1570 = arith.cmpi sgt, %1563, %c0_i32_695 : i32
    %c0_i32_696 = arith.constant 0 : i32
    %1571 = arith.cmpi sgt, %c7_i32_645, %c0_i32_696 : i32
    %1572 = arith.andi %1570, %1571 : i1
    %1573 = vector.broadcast %1572 : i1 to vector<8x1xi1>
    %1574 = arith.andi %15, %1573 : vector<8x1xi1>
    %cst_697 = arith.constant 0.000000e+00 : f32
    %1575 = vector.shape_cast %1574 : vector<8x1xi1> to vector<8x1xi1>
    %1576 = vector.broadcast %1575 : vector<8x1xi1> to vector<8x128xi1>
    %1577 = vector.broadcast %cst_697 : f32 to vector<8x128xf32>
    %1578 = arith.select %1576, %1569, %1577 : vector<8x128xi1>, vector<8x128xf32>
    %1579 = arith.addf %1558, %1578 : vector<8x128xf32>
    %c5_i32_698 = arith.constant 5 : i32
    %1580 = arith.addi %0, %c5_i32_698 : i32
    %c8_i32_699 = arith.constant 8 : i32
    %1581 = arith.muli %1580, %c8_i32_699 : i32
    %1582 = arith.addi %1581, %c7_i32_645 : i32
    %1583 = arith.index_cast %1582 : i32 to index
    %1584 = memref.load %arg1[%1583] : memref<64xi32, #tpu.memory_space<smem>>
    %c1_i32_700 = arith.constant 1 : i32
    %1585 = arith.subi %1584, %c1_i32_700 : i32
    %c0_i32_701 = arith.constant 0 : i32
    %c7_i32_702 = arith.constant 7 : i32
    %1586 = arith.maxsi %c0_i32_701, %1585 : i32
    %1587 = arith.minsi %c7_i32_702, %1586 : i32
    %1588 = arith.index_cast %1587 : i32 to index
    %c0_703 = arith.constant 0 : index
    %c0_704 = arith.constant 0 : index
    %1589 = vector.load %arg14[%1588, %c0_703, %c0_704] : memref<8x8x128xf32, #tpu.memory_space<vmem>>, vector<1x8x128xf32>
    %1590 = vector.shape_cast %1589 : vector<1x8x128xf32> to vector<8x128xf32>
    %c0_i32_705 = arith.constant 0 : i32
    %1591 = arith.cmpi sgt, %1584, %c0_i32_705 : i32
    %c0_i32_706 = arith.constant 0 : i32
    %1592 = arith.cmpi sgt, %c7_i32_645, %c0_i32_706 : i32
    %1593 = arith.andi %1591, %1592 : i1
    %1594 = vector.broadcast %1593 : i1 to vector<8x1xi1>
    %1595 = arith.andi %18, %1594 : vector<8x1xi1>
    %cst_707 = arith.constant 0.000000e+00 : f32
    %1596 = vector.shape_cast %1595 : vector<8x1xi1> to vector<8x1xi1>
    %1597 = vector.broadcast %1596 : vector<8x1xi1> to vector<8x128xi1>
    %1598 = vector.broadcast %cst_707 : f32 to vector<8x128xf32>
    %1599 = arith.select %1597, %1590, %1598 : vector<8x128xi1>, vector<8x128xf32>
    %1600 = arith.addf %1579, %1599 : vector<8x128xf32>
    %c6_i32_708 = arith.constant 6 : i32
    %1601 = arith.addi %0, %c6_i32_708 : i32
    %c8_i32_709 = arith.constant 8 : i32
    %1602 = arith.muli %1601, %c8_i32_709 : i32
    %1603 = arith.addi %1602, %c7_i32_645 : i32
    %1604 = arith.index_cast %1603 : i32 to index
    %1605 = memref.load %arg1[%1604] : memref<64xi32, #tpu.memory_space<smem>>
    %c1_i32_710 = arith.constant 1 : i32
    %1606 = arith.subi %1605, %c1_i32_710 : i32
    %c0_i32_711 = arith.constant 0 : i32
    %c7_i32_712 = arith.constant 7 : i32
    %1607 = arith.maxsi %c0_i32_711, %1606 : i32
    %1608 = arith.minsi %c7_i32_712, %1607 : i32
    %1609 = arith.index_cast %1608 : i32 to index
    %c0_713 = arith.constant 0 : index
    %c0_714 = arith.constant 0 : index
    %1610 = vector.load %arg14[%1609, %c0_713, %c0_714] : memref<8x8x128xf32, #tpu.memory_space<vmem>>, vector<1x8x128xf32>
    %1611 = vector.shape_cast %1610 : vector<1x8x128xf32> to vector<8x128xf32>
    %c0_i32_715 = arith.constant 0 : i32
    %1612 = arith.cmpi sgt, %1605, %c0_i32_715 : i32
    %c0_i32_716 = arith.constant 0 : i32
    %1613 = arith.cmpi sgt, %c7_i32_645, %c0_i32_716 : i32
    %1614 = arith.andi %1612, %1613 : i1
    %1615 = vector.broadcast %1614 : i1 to vector<8x1xi1>
    %1616 = arith.andi %21, %1615 : vector<8x1xi1>
    %cst_717 = arith.constant 0.000000e+00 : f32
    %1617 = vector.shape_cast %1616 : vector<8x1xi1> to vector<8x1xi1>
    %1618 = vector.broadcast %1617 : vector<8x1xi1> to vector<8x128xi1>
    %1619 = vector.broadcast %cst_717 : f32 to vector<8x128xf32>
    %1620 = arith.select %1618, %1611, %1619 : vector<8x128xi1>, vector<8x128xf32>
    %1621 = arith.addf %1600, %1620 : vector<8x128xf32>
    %c7_i32_718 = arith.constant 7 : i32
    %1622 = arith.addi %0, %c7_i32_718 : i32
    %c8_i32_719 = arith.constant 8 : i32
    %1623 = arith.muli %1622, %c8_i32_719 : i32
    %1624 = arith.addi %1623, %c7_i32_645 : i32
    %1625 = arith.index_cast %1624 : i32 to index
    %1626 = memref.load %arg1[%1625] : memref<64xi32, #tpu.memory_space<smem>>
    %c1_i32_720 = arith.constant 1 : i32
    %1627 = arith.subi %1626, %c1_i32_720 : i32
    %c0_i32_721 = arith.constant 0 : i32
    %c7_i32_722 = arith.constant 7 : i32
    %1628 = arith.maxsi %c0_i32_721, %1627 : i32
    %1629 = arith.minsi %c7_i32_722, %1628 : i32
    %1630 = arith.index_cast %1629 : i32 to index
    %c0_723 = arith.constant 0 : index
    %c0_724 = arith.constant 0 : index
    %1631 = vector.load %arg14[%1630, %c0_723, %c0_724] : memref<8x8x128xf32, #tpu.memory_space<vmem>>, vector<1x8x128xf32>
    %1632 = vector.shape_cast %1631 : vector<1x8x128xf32> to vector<8x128xf32>
    %c0_i32_725 = arith.constant 0 : i32
    %1633 = arith.cmpi sgt, %1626, %c0_i32_725 : i32
    %c0_i32_726 = arith.constant 0 : i32
    %1634 = arith.cmpi sgt, %c7_i32_645, %c0_i32_726 : i32
    %1635 = arith.andi %1633, %1634 : i1
    %1636 = vector.broadcast %1635 : i1 to vector<8x1xi1>
    %1637 = arith.andi %24, %1636 : vector<8x1xi1>
    %cst_727 = arith.constant 0.000000e+00 : f32
    %1638 = vector.shape_cast %1637 : vector<8x1xi1> to vector<8x1xi1>
    %1639 = vector.broadcast %1638 : vector<8x1xi1> to vector<8x128xi1>
    %1640 = vector.broadcast %cst_727 : f32 to vector<8x128xf32>
    %1641 = arith.select %1639, %1632, %1640 : vector<8x128xi1>, vector<8x128xf32>
    %1642 = arith.addf %1621, %1641 : vector<8x128xf32>
    %cst_728 = arith.constant dense<0.000000e+00> : vector<8x128xf32>
    %1643 = tpu.matmul %1471, %48, %cst_728 {dimension_numbers = #tpu.dot_dimension_numbers<[1], [0], [0], [1], [0, 0, 1, 1], [], []>} : vector<8x32xbf16>, vector<32x128xbf16>, vector<8x128xf32> -> vector<8x128xf32>
    %1644 = arith.addf %1642, %1643 : vector<8x128xf32>
    %1645 = vector.extract_strided_slice %1644 {offsets = [0, 0], sizes = [8, 32], strides = [1, 1]} : vector<8x128xf32> to vector<8x32xf32>
    %1646 = arith.negf %1645 : vector<8x32xf32>
    %1647 = math.exp %1646 : vector<8x32xf32>
    %cst_729 = arith.constant 1.000000e+00 : f32
    %1648 = vector.broadcast %cst_729 : f32 to vector<8x32xf32>
    %1649 = arith.addf %1648, %1647 : vector<8x32xf32>
    %1650 = arith.divf %1648, %1649 : vector<8x32xf32>
    %1651 = vector.extract_strided_slice %1644 {offsets = [0, 32], sizes = [8, 32], strides = [1, 1]} : vector<8x128xf32> to vector<8x32xf32>
    %1652 = arith.negf %1651 : vector<8x32xf32>
    %1653 = math.exp %1652 : vector<8x32xf32>
    %cst_730 = arith.constant 1.000000e+00 : f32
    %1654 = vector.broadcast %cst_730 : f32 to vector<8x32xf32>
    %1655 = arith.addf %1654, %1653 : vector<8x32xf32>
    %1656 = arith.divf %1654, %1655 : vector<8x32xf32>
    %1657 = vector.extract_strided_slice %1644 {offsets = [0, 64], sizes = [8, 32], strides = [1, 1]} : vector<8x128xf32> to vector<8x32xf32>
    %1658 = math.tanh %1657 : vector<8x32xf32>
    %1659 = vector.extract_strided_slice %1644 {offsets = [0, 96], sizes = [8, 32], strides = [1, 1]} : vector<8x128xf32> to vector<8x32xf32>
    %1660 = arith.negf %1659 : vector<8x32xf32>
    %1661 = math.exp %1660 : vector<8x32xf32>
    %cst_731 = arith.constant 1.000000e+00 : f32
    %1662 = vector.broadcast %cst_731 : f32 to vector<8x32xf32>
    %1663 = arith.addf %1662, %1661 : vector<8x32xf32>
    %1664 = arith.divf %1662, %1663 : vector<8x32xf32>
    %1665 = arith.mulf %1656, %1464 : vector<8x32xf32>
    %1666 = arith.mulf %1650, %1658 : vector<8x32xf32>
    %1667 = arith.addf %1665, %1666 : vector<8x32xf32>
    %1668 = math.tanh %1667 : vector<8x32xf32>
    %1669 = arith.mulf %1664, %1668 : vector<8x32xf32>
    %1670 = arith.index_cast %c7_i32_645 : i32 to index
    %c0_732 = arith.constant 0 : index
    %c0_733 = arith.constant 0 : index
    %1671 = vector.load %arg12[%1670, %c0_732, %c0_733] : memref<8x8x32xf32, #tpu.memory_space<vmem>>, vector<1x8x32xf32>
    %1672 = vector.shape_cast %1671 : vector<1x8x32xf32> to vector<8x32xf32>
    %1673 = vector.shape_cast %1669 : vector<8x32xf32> to vector<1x8x32xf32>
    tpu.vector_store %arg12[%1670, %c0_732, %c0_733], %1673 {strides = array<i32>} : memref<8x8x32xf32, #tpu.memory_space<vmem>>, vector<1x8x32xf32>,
    %1674 = arith.truncf %1669 : vector<8x32xf32> to vector<8x32xbf16>
    %c8_i32_734 = arith.constant 8 : i32
    %c0_735 = arith.constant 0 : index
    %c0_736 = arith.constant 0 : index
    %c0_737 = arith.constant 0 : index
    %1675 = vector.load %arg12[%c0_735, %c0_736, %c0_737] : memref<8x8x32xf32, #tpu.memory_space<vmem>>, vector<8x8x32xf32>
    %c0_738 = arith.constant 0 : index
    %c0_739 = arith.constant 0 : index
    %c0_740 = arith.constant 0 : index
    %1676 = vector.load %arg7[%c0_738, %c0_739, %c0_740] : memref<1x32x256xbf16, #tpu.memory_space<vmem>>, vector<1x32x256xbf16>
    %1677 = vector.shape_cast %1676 : vector<1x32x256xbf16> to vector<32x256xbf16>
    %1678 = vector.shape_cast %1675 : vector<8x8x32xf32> to vector<64x32xf32>
    %1679 = arith.truncf %1678 : vector<64x32xf32> to vector<64x32xbf16>
    %cst_741 = arith.constant dense<0.000000e+00> : vector<64x256xf32>
    %1680 = tpu.matmul %1679, %1677, %cst_741 {dimension_numbers = #tpu.dot_dimension_numbers<[1], [0], [0], [1], [0, 0, 1, 1], [], []>} : vector<64x32xbf16>, vector<32x256xbf16>, vector<64x256xf32> -> vector<64x256xf32>
    %1681 = vector.extract_strided_slice %31 {offsets = [0, 128], sizes = [8, 128], strides = [1, 1]} : vector<8x256xf32> to vector<8x128xf32>
    %1682 = vector.extract_strided_slice %1680 {offsets = [0, 0], sizes = [64, 128], strides = [1, 1]} : vector<64x256xf32> to vector<64x128xf32>
    %1683 = vector.shape_cast %1682 : vector<64x128xf32> to vector<8x8x128xf32>
    %1684 = vector.shape_cast %1681 : vector<8x128xf32> to vector<1x8x128xf32>
    %1685 = vector.broadcast %1684 : vector<1x8x128xf32> to vector<8x8x128xf32>
    %1686 = arith.addf %1683, %1685 : vector<8x8x128xf32>
    %c0_742 = arith.constant 0 : index
    %c0_743 = arith.constant 0 : index
    %c0_744 = arith.constant 0 : index
    %1687 = vector.load %arg13[%c0_742, %c0_743, %c0_744] : memref<8x8x128xf32, #tpu.memory_space<vmem>>, vector<8x8x128xf32>
    tpu.vector_store %arg13[%c0_742, %c0_743, %c0_744], %1686 {strides = array<i32>} : memref<8x8x128xf32, #tpu.memory_space<vmem>>, vector<8x8x128xf32>,
    %1688 = vector.extract_strided_slice %1680 {offsets = [0, 128], sizes = [64, 128], strides = [1, 1]} : vector<64x256xf32> to vector<64x128xf32>
    %1689 = vector.shape_cast %1688 : vector<64x128xf32> to vector<8x8x128xf32>
    %c0_745 = arith.constant 0 : index
    %c0_746 = arith.constant 0 : index
    %c0_747 = arith.constant 0 : index
    %1690 = vector.load %arg14[%c0_745, %c0_746, %c0_747] : memref<8x8x128xf32, #tpu.memory_space<vmem>>, vector<8x8x128xf32>
    tpu.vector_store %arg14[%c0_745, %c0_746, %c0_747], %1689 {strides = array<i32>} : memref<8x8x128xf32, #tpu.memory_space<vmem>>, vector<8x8x128xf32>,
    %c1 = arith.constant 1 : index
    %c0_748 = arith.constant 0 : index
    %c0_749 = arith.constant 0 : index
    %1691 = vector.load %arg8[%c1, %c0_748, %c0_749] : memref<2x32x128xbf16, #tpu.memory_space<vmem>>, vector<1x32x128xbf16>
    %1692 = vector.shape_cast %1691 : vector<1x32x128xbf16> to vector<32x128xbf16>
    %cst_750 = arith.constant 0.000000e+00 : bf16
    %1693 = vector.broadcast %cst_750 : bf16 to vector<8x32xbf16>
    %cst_751 = arith.constant 0.000000e+00 : f32
    %1694 = vector.broadcast %cst_751 : f32 to vector<8x32xf32>
    %c0_i32_752 = arith.constant 0 : i32
    %1695 = arith.index_cast %c0_i32_752 : i32 to index
    %c0_753 = arith.constant 0 : index
    %c0_754 = arith.constant 0 : index
    %1696 = vector.load %arg13[%1695, %c0_753, %c0_754] : memref<8x8x128xf32, #tpu.memory_space<vmem>>, vector<1x8x128xf32>
    %1697 = vector.shape_cast %1696 : vector<1x8x128xf32> to vector<8x128xf32>
    %c0_i32_755 = arith.constant 0 : i32
    %1698 = arith.addi %0, %c0_i32_755 : i32
    %c8_i32_756 = arith.constant 8 : i32
    %1699 = arith.muli %1698, %c8_i32_756 : i32
    %1700 = arith.addi %1699, %c0_i32_752 : i32
    %1701 = arith.index_cast %1700 : i32 to index
    %1702 = memref.load %arg1[%1701] : memref<64xi32, #tpu.memory_space<smem>>
    %c1_i32_757 = arith.constant 1 : i32
    %1703 = arith.subi %1702, %c1_i32_757 : i32
    %c0_i32_758 = arith.constant 0 : i32
    %c7_i32_759 = arith.constant 7 : i32
    %1704 = arith.maxsi %c0_i32_758, %1703 : i32
    %1705 = arith.minsi %c7_i32_759, %1704 : i32
    %1706 = arith.index_cast %1705 : i32 to index
    %c0_760 = arith.constant 0 : index
    %c0_761 = arith.constant 0 : index
    %1707 = vector.load %arg14[%1706, %c0_760, %c0_761] : memref<8x8x128xf32, #tpu.memory_space<vmem>>, vector<1x8x128xf32>
    %1708 = vector.shape_cast %1707 : vector<1x8x128xf32> to vector<8x128xf32>
    %c0_i32_762 = arith.constant 0 : i32
    %1709 = arith.cmpi sgt, %1702, %c0_i32_762 : i32
    %c0_i32_763 = arith.constant 0 : i32
    %1710 = arith.cmpi sgt, %c0_i32_752, %c0_i32_763 : i32
    %1711 = arith.andi %1709, %1710 : i1
    %1712 = vector.broadcast %1711 : i1 to vector<8x1xi1>
    %1713 = arith.andi %3, %1712 : vector<8x1xi1>
    %cst_764 = arith.constant 0.000000e+00 : f32
    %1714 = vector.shape_cast %1713 : vector<8x1xi1> to vector<8x1xi1>
    %1715 = vector.broadcast %1714 : vector<8x1xi1> to vector<8x128xi1>
    %1716 = vector.broadcast %cst_764 : f32 to vector<8x128xf32>
    %1717 = arith.select %1715, %1708, %1716 : vector<8x128xi1>, vector<8x128xf32>
    %1718 = arith.addf %1697, %1717 : vector<8x128xf32>
    %c1_i32_765 = arith.constant 1 : i32
    %1719 = arith.addi %0, %c1_i32_765 : i32
    %c8_i32_766 = arith.constant 8 : i32
    %1720 = arith.muli %1719, %c8_i32_766 : i32
    %1721 = arith.addi %1720, %c0_i32_752 : i32
    %1722 = arith.index_cast %1721 : i32 to index
    %1723 = memref.load %arg1[%1722] : memref<64xi32, #tpu.memory_space<smem>>
    %c1_i32_767 = arith.constant 1 : i32
    %1724 = arith.subi %1723, %c1_i32_767 : i32
    %c0_i32_768 = arith.constant 0 : i32
    %c7_i32_769 = arith.constant 7 : i32
    %1725 = arith.maxsi %c0_i32_768, %1724 : i32
    %1726 = arith.minsi %c7_i32_769, %1725 : i32
    %1727 = arith.index_cast %1726 : i32 to index
    %c0_770 = arith.constant 0 : index
    %c0_771 = arith.constant 0 : index
    %1728 = vector.load %arg14[%1727, %c0_770, %c0_771] : memref<8x8x128xf32, #tpu.memory_space<vmem>>, vector<1x8x128xf32>
    %1729 = vector.shape_cast %1728 : vector<1x8x128xf32> to vector<8x128xf32>
    %c0_i32_772 = arith.constant 0 : i32
    %1730 = arith.cmpi sgt, %1723, %c0_i32_772 : i32
    %c0_i32_773 = arith.constant 0 : i32
    %1731 = arith.cmpi sgt, %c0_i32_752, %c0_i32_773 : i32
    %1732 = arith.andi %1730, %1731 : i1
    %1733 = vector.broadcast %1732 : i1 to vector<8x1xi1>
    %1734 = arith.andi %6, %1733 : vector<8x1xi1>
    %cst_774 = arith.constant 0.000000e+00 : f32
    %1735 = vector.shape_cast %1734 : vector<8x1xi1> to vector<8x1xi1>
    %1736 = vector.broadcast %1735 : vector<8x1xi1> to vector<8x128xi1>
    %1737 = vector.broadcast %cst_774 : f32 to vector<8x128xf32>
    %1738 = arith.select %1736, %1729, %1737 : vector<8x128xi1>, vector<8x128xf32>
    %1739 = arith.addf %1718, %1738 : vector<8x128xf32>
    %c2_i32_775 = arith.constant 2 : i32
    %1740 = arith.addi %0, %c2_i32_775 : i32
    %c8_i32_776 = arith.constant 8 : i32
    %1741 = arith.muli %1740, %c8_i32_776 : i32
    %1742 = arith.addi %1741, %c0_i32_752 : i32
    %1743 = arith.index_cast %1742 : i32 to index
    %1744 = memref.load %arg1[%1743] : memref<64xi32, #tpu.memory_space<smem>>
    %c1_i32_777 = arith.constant 1 : i32
    %1745 = arith.subi %1744, %c1_i32_777 : i32
    %c0_i32_778 = arith.constant 0 : i32
    %c7_i32_779 = arith.constant 7 : i32
    %1746 = arith.maxsi %c0_i32_778, %1745 : i32
    %1747 = arith.minsi %c7_i32_779, %1746 : i32
    %1748 = arith.index_cast %1747 : i32 to index
    %c0_780 = arith.constant 0 : index
    %c0_781 = arith.constant 0 : index
    %1749 = vector.load %arg14[%1748, %c0_780, %c0_781] : memref<8x8x128xf32, #tpu.memory_space<vmem>>, vector<1x8x128xf32>
    %1750 = vector.shape_cast %1749 : vector<1x8x128xf32> to vector<8x128xf32>
    %c0_i32_782 = arith.constant 0 : i32
    %1751 = arith.cmpi sgt, %1744, %c0_i32_782 : i32
    %c0_i32_783 = arith.constant 0 : i32
    %1752 = arith.cmpi sgt, %c0_i32_752, %c0_i32_783 : i32
    %1753 = arith.andi %1751, %1752 : i1
    %1754 = vector.broadcast %1753 : i1 to vector<8x1xi1>
    %1755 = arith.andi %9, %1754 : vector<8x1xi1>
    %cst_784 = arith.constant 0.000000e+00 : f32
    %1756 = vector.shape_cast %1755 : vector<8x1xi1> to vector<8x1xi1>
    %1757 = vector.broadcast %1756 : vector<8x1xi1> to vector<8x128xi1>
    %1758 = vector.broadcast %cst_784 : f32 to vector<8x128xf32>
    %1759 = arith.select %1757, %1750, %1758 : vector<8x128xi1>, vector<8x128xf32>
    %1760 = arith.addf %1739, %1759 : vector<8x128xf32>
    %c3_i32_785 = arith.constant 3 : i32
    %1761 = arith.addi %0, %c3_i32_785 : i32
    %c8_i32_786 = arith.constant 8 : i32
    %1762 = arith.muli %1761, %c8_i32_786 : i32
    %1763 = arith.addi %1762, %c0_i32_752 : i32
    %1764 = arith.index_cast %1763 : i32 to index
    %1765 = memref.load %arg1[%1764] : memref<64xi32, #tpu.memory_space<smem>>
    %c1_i32_787 = arith.constant 1 : i32
    %1766 = arith.subi %1765, %c1_i32_787 : i32
    %c0_i32_788 = arith.constant 0 : i32
    %c7_i32_789 = arith.constant 7 : i32
    %1767 = arith.maxsi %c0_i32_788, %1766 : i32
    %1768 = arith.minsi %c7_i32_789, %1767 : i32
    %1769 = arith.index_cast %1768 : i32 to index
    %c0_790 = arith.constant 0 : index
    %c0_791 = arith.constant 0 : index
    %1770 = vector.load %arg14[%1769, %c0_790, %c0_791] : memref<8x8x128xf32, #tpu.memory_space<vmem>>, vector<1x8x128xf32>
    %1771 = vector.shape_cast %1770 : vector<1x8x128xf32> to vector<8x128xf32>
    %c0_i32_792 = arith.constant 0 : i32
    %1772 = arith.cmpi sgt, %1765, %c0_i32_792 : i32
    %c0_i32_793 = arith.constant 0 : i32
    %1773 = arith.cmpi sgt, %c0_i32_752, %c0_i32_793 : i32
    %1774 = arith.andi %1772, %1773 : i1
    %1775 = vector.broadcast %1774 : i1 to vector<8x1xi1>
    %1776 = arith.andi %12, %1775 : vector<8x1xi1>
    %cst_794 = arith.constant 0.000000e+00 : f32
    %1777 = vector.shape_cast %1776 : vector<8x1xi1> to vector<8x1xi1>
    %1778 = vector.broadcast %1777 : vector<8x1xi1> to vector<8x128xi1>
    %1779 = vector.broadcast %cst_794 : f32 to vector<8x128xf32>
    %1780 = arith.select %1778, %1771, %1779 : vector<8x128xi1>, vector<8x128xf32>
    %1781 = arith.addf %1760, %1780 : vector<8x128xf32>
    %c4_i32_795 = arith.constant 4 : i32
    %1782 = arith.addi %0, %c4_i32_795 : i32
    %c8_i32_796 = arith.constant 8 : i32
    %1783 = arith.muli %1782, %c8_i32_796 : i32
    %1784 = arith.addi %1783, %c0_i32_752 : i32
    %1785 = arith.index_cast %1784 : i32 to index
    %1786 = memref.load %arg1[%1785] : memref<64xi32, #tpu.memory_space<smem>>
    %c1_i32_797 = arith.constant 1 : i32
    %1787 = arith.subi %1786, %c1_i32_797 : i32
    %c0_i32_798 = arith.constant 0 : i32
    %c7_i32_799 = arith.constant 7 : i32
    %1788 = arith.maxsi %c0_i32_798, %1787 : i32
    %1789 = arith.minsi %c7_i32_799, %1788 : i32
    %1790 = arith.index_cast %1789 : i32 to index
    %c0_800 = arith.constant 0 : index
    %c0_801 = arith.constant 0 : index
    %1791 = vector.load %arg14[%1790, %c0_800, %c0_801] : memref<8x8x128xf32, #tpu.memory_space<vmem>>, vector<1x8x128xf32>
    %1792 = vector.shape_cast %1791 : vector<1x8x128xf32> to vector<8x128xf32>
    %c0_i32_802 = arith.constant 0 : i32
    %1793 = arith.cmpi sgt, %1786, %c0_i32_802 : i32
    %c0_i32_803 = arith.constant 0 : i32
    %1794 = arith.cmpi sgt, %c0_i32_752, %c0_i32_803 : i32
    %1795 = arith.andi %1793, %1794 : i1
    %1796 = vector.broadcast %1795 : i1 to vector<8x1xi1>
    %1797 = arith.andi %15, %1796 : vector<8x1xi1>
    %cst_804 = arith.constant 0.000000e+00 : f32
    %1798 = vector.shape_cast %1797 : vector<8x1xi1> to vector<8x1xi1>
    %1799 = vector.broadcast %1798 : vector<8x1xi1> to vector<8x128xi1>
    %1800 = vector.broadcast %cst_804 : f32 to vector<8x128xf32>
    %1801 = arith.select %1799, %1792, %1800 : vector<8x128xi1>, vector<8x128xf32>
    %1802 = arith.addf %1781, %1801 : vector<8x128xf32>
    %c5_i32_805 = arith.constant 5 : i32
    %1803 = arith.addi %0, %c5_i32_805 : i32
    %c8_i32_806 = arith.constant 8 : i32
    %1804 = arith.muli %1803, %c8_i32_806 : i32
    %1805 = arith.addi %1804, %c0_i32_752 : i32
    %1806 = arith.index_cast %1805 : i32 to index
    %1807 = memref.load %arg1[%1806] : memref<64xi32, #tpu.memory_space<smem>>
    %c1_i32_807 = arith.constant 1 : i32
    %1808 = arith.subi %1807, %c1_i32_807 : i32
    %c0_i32_808 = arith.constant 0 : i32
    %c7_i32_809 = arith.constant 7 : i32
    %1809 = arith.maxsi %c0_i32_808, %1808 : i32
    %1810 = arith.minsi %c7_i32_809, %1809 : i32
    %1811 = arith.index_cast %1810 : i32 to index
    %c0_810 = arith.constant 0 : index
    %c0_811 = arith.constant 0 : index
    %1812 = vector.load %arg14[%1811, %c0_810, %c0_811] : memref<8x8x128xf32, #tpu.memory_space<vmem>>, vector<1x8x128xf32>
    %1813 = vector.shape_cast %1812 : vector<1x8x128xf32> to vector<8x128xf32>
    %c0_i32_812 = arith.constant 0 : i32
    %1814 = arith.cmpi sgt, %1807, %c0_i32_812 : i32
    %c0_i32_813 = arith.constant 0 : i32
    %1815 = arith.cmpi sgt, %c0_i32_752, %c0_i32_813 : i32
    %1816 = arith.andi %1814, %1815 : i1
    %1817 = vector.broadcast %1816 : i1 to vector<8x1xi1>
    %1818 = arith.andi %18, %1817 : vector<8x1xi1>
    %cst_814 = arith.constant 0.000000e+00 : f32
    %1819 = vector.shape_cast %1818 : vector<8x1xi1> to vector<8x1xi1>
    %1820 = vector.broadcast %1819 : vector<8x1xi1> to vector<8x128xi1>
    %1821 = vector.broadcast %cst_814 : f32 to vector<8x128xf32>
    %1822 = arith.select %1820, %1813, %1821 : vector<8x128xi1>, vector<8x128xf32>
    %1823 = arith.addf %1802, %1822 : vector<8x128xf32>
    %c6_i32_815 = arith.constant 6 : i32
    %1824 = arith.addi %0, %c6_i32_815 : i32
    %c8_i32_816 = arith.constant 8 : i32
    %1825 = arith.muli %1824, %c8_i32_816 : i32
    %1826 = arith.addi %1825, %c0_i32_752 : i32
    %1827 = arith.index_cast %1826 : i32 to index
    %1828 = memref.load %arg1[%1827] : memref<64xi32, #tpu.memory_space<smem>>
    %c1_i32_817 = arith.constant 1 : i32
    %1829 = arith.subi %1828, %c1_i32_817 : i32
    %c0_i32_818 = arith.constant 0 : i32
    %c7_i32_819 = arith.constant 7 : i32
    %1830 = arith.maxsi %c0_i32_818, %1829 : i32
    %1831 = arith.minsi %c7_i32_819, %1830 : i32
    %1832 = arith.index_cast %1831 : i32 to index
    %c0_820 = arith.constant 0 : index
    %c0_821 = arith.constant 0 : index
    %1833 = vector.load %arg14[%1832, %c0_820, %c0_821] : memref<8x8x128xf32, #tpu.memory_space<vmem>>, vector<1x8x128xf32>
    %1834 = vector.shape_cast %1833 : vector<1x8x128xf32> to vector<8x128xf32>
    %c0_i32_822 = arith.constant 0 : i32
    %1835 = arith.cmpi sgt, %1828, %c0_i32_822 : i32
    %c0_i32_823 = arith.constant 0 : i32
    %1836 = arith.cmpi sgt, %c0_i32_752, %c0_i32_823 : i32
    %1837 = arith.andi %1835, %1836 : i1
    %1838 = vector.broadcast %1837 : i1 to vector<8x1xi1>
    %1839 = arith.andi %21, %1838 : vector<8x1xi1>
    %cst_824 = arith.constant 0.000000e+00 : f32
    %1840 = vector.shape_cast %1839 : vector<8x1xi1> to vector<8x1xi1>
    %1841 = vector.broadcast %1840 : vector<8x1xi1> to vector<8x128xi1>
    %1842 = vector.broadcast %cst_824 : f32 to vector<8x128xf32>
    %1843 = arith.select %1841, %1834, %1842 : vector<8x128xi1>, vector<8x128xf32>
    %1844 = arith.addf %1823, %1843 : vector<8x128xf32>
    %c7_i32_825 = arith.constant 7 : i32
    %1845 = arith.addi %0, %c7_i32_825 : i32
    %c8_i32_826 = arith.constant 8 : i32
    %1846 = arith.muli %1845, %c8_i32_826 : i32
    %1847 = arith.addi %1846, %c0_i32_752 : i32
    %1848 = arith.index_cast %1847 : i32 to index
    %1849 = memref.load %arg1[%1848] : memref<64xi32, #tpu.memory_space<smem>>
    %c1_i32_827 = arith.constant 1 : i32
    %1850 = arith.subi %1849, %c1_i32_827 : i32
    %c0_i32_828 = arith.constant 0 : i32
    %c7_i32_829 = arith.constant 7 : i32
    %1851 = arith.maxsi %c0_i32_828, %1850 : i32
    %1852 = arith.minsi %c7_i32_829, %1851 : i32
    %1853 = arith.index_cast %1852 : i32 to index
    %c0_830 = arith.constant 0 : index
    %c0_831 = arith.constant 0 : index
    %1854 = vector.load %arg14[%1853, %c0_830, %c0_831] : memref<8x8x128xf32, #tpu.memory_space<vmem>>, vector<1x8x128xf32>
    %1855 = vector.shape_cast %1854 : vector<1x8x128xf32> to vector<8x128xf32>
    %c0_i32_832 = arith.constant 0 : i32
    %1856 = arith.cmpi sgt, %1849, %c0_i32_832 : i32
    %c0_i32_833 = arith.constant 0 : i32
    %1857 = arith.cmpi sgt, %c0_i32_752, %c0_i32_833 : i32
    %1858 = arith.andi %1856, %1857 : i1
    %1859 = vector.broadcast %1858 : i1 to vector<8x1xi1>
    %1860 = arith.andi %24, %1859 : vector<8x1xi1>
    %cst_834 = arith.constant 0.000000e+00 : f32
    %1861 = vector.shape_cast %1860 : vector<8x1xi1> to vector<8x1xi1>
    %1862 = vector.broadcast %1861 : vector<8x1xi1> to vector<8x128xi1>
    %1863 = vector.broadcast %cst_834 : f32 to vector<8x128xf32>
    %1864 = arith.select %1862, %1855, %1863 : vector<8x128xi1>, vector<8x128xf32>
    %1865 = arith.addf %1844, %1864 : vector<8x128xf32>
    %cst_835 = arith.constant dense<0.000000e+00> : vector<8x128xf32>
    %1866 = tpu.matmul %1693, %1692, %cst_835 {dimension_numbers = #tpu.dot_dimension_numbers<[1], [0], [0], [1], [0, 0, 1, 1], [], []>} : vector<8x32xbf16>, vector<32x128xbf16>, vector<8x128xf32> -> vector<8x128xf32>
    %1867 = arith.addf %1865, %1866 : vector<8x128xf32>
    %1868 = vector.extract_strided_slice %1867 {offsets = [0, 0], sizes = [8, 32], strides = [1, 1]} : vector<8x128xf32> to vector<8x32xf32>
    %1869 = arith.negf %1868 : vector<8x32xf32>
    %1870 = math.exp %1869 : vector<8x32xf32>
    %cst_836 = arith.constant 1.000000e+00 : f32
    %1871 = vector.broadcast %cst_836 : f32 to vector<8x32xf32>
    %1872 = arith.addf %1871, %1870 : vector<8x32xf32>
    %1873 = arith.divf %1871, %1872 : vector<8x32xf32>
    %1874 = vector.extract_strided_slice %1867 {offsets = [0, 32], sizes = [8, 32], strides = [1, 1]} : vector<8x128xf32> to vector<8x32xf32>
    %1875 = arith.negf %1874 : vector<8x32xf32>
    %1876 = math.exp %1875 : vector<8x32xf32>
    %cst_837 = arith.constant 1.000000e+00 : f32
    %1877 = vector.broadcast %cst_837 : f32 to vector<8x32xf32>
    %1878 = arith.addf %1877, %1876 : vector<8x32xf32>
    %1879 = arith.divf %1877, %1878 : vector<8x32xf32>
    %1880 = vector.extract_strided_slice %1867 {offsets = [0, 64], sizes = [8, 32], strides = [1, 1]} : vector<8x128xf32> to vector<8x32xf32>
    %1881 = math.tanh %1880 : vector<8x32xf32>
    %1882 = vector.extract_strided_slice %1867 {offsets = [0, 96], sizes = [8, 32], strides = [1, 1]} : vector<8x128xf32> to vector<8x32xf32>
    %1883 = arith.negf %1882 : vector<8x32xf32>
    %1884 = math.exp %1883 : vector<8x32xf32>
    %cst_838 = arith.constant 1.000000e+00 : f32
    %1885 = vector.broadcast %cst_838 : f32 to vector<8x32xf32>
    %1886 = arith.addf %1885, %1884 : vector<8x32xf32>
    %1887 = arith.divf %1885, %1886 : vector<8x32xf32>
    %1888 = arith.mulf %1879, %1694 : vector<8x32xf32>
    %1889 = arith.mulf %1873, %1881 : vector<8x32xf32>
    %1890 = arith.addf %1888, %1889 : vector<8x32xf32>
    %1891 = math.tanh %1890 : vector<8x32xf32>
    %1892 = arith.mulf %1887, %1891 : vector<8x32xf32>
    %1893 = arith.index_cast %c0_i32_752 : i32 to index
    %c0_839 = arith.constant 0 : index
    %c0_840 = arith.constant 0 : index
    %1894 = vector.load %arg12[%1893, %c0_839, %c0_840] : memref<8x8x32xf32, #tpu.memory_space<vmem>>, vector<1x8x32xf32>
    %1895 = vector.shape_cast %1894 : vector<1x8x32xf32> to vector<8x32xf32>
    %1896 = vector.shape_cast %1892 : vector<8x32xf32> to vector<1x8x32xf32>
    tpu.vector_store %arg12[%1893, %c0_839, %c0_840], %1896 {strides = array<i32>} : memref<8x8x32xf32, #tpu.memory_space<vmem>>, vector<1x8x32xf32>,
    %1897 = arith.truncf %1892 : vector<8x32xf32> to vector<8x32xbf16>
    %c1_i32_841 = arith.constant 1 : i32
    %1898 = arith.index_cast %c1_i32_841 : i32 to index
    %c0_842 = arith.constant 0 : index
    %c0_843 = arith.constant 0 : index
    %1899 = vector.load %arg13[%1898, %c0_842, %c0_843] : memref<8x8x128xf32, #tpu.memory_space<vmem>>, vector<1x8x128xf32>
    %1900 = vector.shape_cast %1899 : vector<1x8x128xf32> to vector<8x128xf32>
    %c0_i32_844 = arith.constant 0 : i32
    %1901 = arith.addi %0, %c0_i32_844 : i32
    %c8_i32_845 = arith.constant 8 : i32
    %1902 = arith.muli %1901, %c8_i32_845 : i32
    %1903 = arith.addi %1902, %c1_i32_841 : i32
    %1904 = arith.index_cast %1903 : i32 to index
    %1905 = memref.load %arg1[%1904] : memref<64xi32, #tpu.memory_space<smem>>
    %c1_i32_846 = arith.constant 1 : i32
    %1906 = arith.subi %1905, %c1_i32_846 : i32
    %c0_i32_847 = arith.constant 0 : i32
    %c7_i32_848 = arith.constant 7 : i32
    %1907 = arith.maxsi %c0_i32_847, %1906 : i32
    %1908 = arith.minsi %c7_i32_848, %1907 : i32
    %1909 = arith.index_cast %1908 : i32 to index
    %c0_849 = arith.constant 0 : index
    %c0_850 = arith.constant 0 : index
    %1910 = vector.load %arg14[%1909, %c0_849, %c0_850] : memref<8x8x128xf32, #tpu.memory_space<vmem>>, vector<1x8x128xf32>
    %1911 = vector.shape_cast %1910 : vector<1x8x128xf32> to vector<8x128xf32>
    %c0_i32_851 = arith.constant 0 : i32
    %1912 = arith.cmpi sgt, %1905, %c0_i32_851 : i32
    %c0_i32_852 = arith.constant 0 : i32
    %1913 = arith.cmpi sgt, %c1_i32_841, %c0_i32_852 : i32
    %1914 = arith.andi %1912, %1913 : i1
    %1915 = vector.broadcast %1914 : i1 to vector<8x1xi1>
    %1916 = arith.andi %3, %1915 : vector<8x1xi1>
    %cst_853 = arith.constant 0.000000e+00 : f32
    %1917 = vector.shape_cast %1916 : vector<8x1xi1> to vector<8x1xi1>
    %1918 = vector.broadcast %1917 : vector<8x1xi1> to vector<8x128xi1>
    %1919 = vector.broadcast %cst_853 : f32 to vector<8x128xf32>
    %1920 = arith.select %1918, %1911, %1919 : vector<8x128xi1>, vector<8x128xf32>
    %1921 = arith.addf %1900, %1920 : vector<8x128xf32>
    %c1_i32_854 = arith.constant 1 : i32
    %1922 = arith.addi %0, %c1_i32_854 : i32
    %c8_i32_855 = arith.constant 8 : i32
    %1923 = arith.muli %1922, %c8_i32_855 : i32
    %1924 = arith.addi %1923, %c1_i32_841 : i32
    %1925 = arith.index_cast %1924 : i32 to index
    %1926 = memref.load %arg1[%1925] : memref<64xi32, #tpu.memory_space<smem>>
    %c1_i32_856 = arith.constant 1 : i32
    %1927 = arith.subi %1926, %c1_i32_856 : i32
    %c0_i32_857 = arith.constant 0 : i32
    %c7_i32_858 = arith.constant 7 : i32
    %1928 = arith.maxsi %c0_i32_857, %1927 : i32
    %1929 = arith.minsi %c7_i32_858, %1928 : i32
    %1930 = arith.index_cast %1929 : i32 to index
    %c0_859 = arith.constant 0 : index
    %c0_860 = arith.constant 0 : index
    %1931 = vector.load %arg14[%1930, %c0_859, %c0_860] : memref<8x8x128xf32, #tpu.memory_space<vmem>>, vector<1x8x128xf32>
    %1932 = vector.shape_cast %1931 : vector<1x8x128xf32> to vector<8x128xf32>
    %c0_i32_861 = arith.constant 0 : i32
    %1933 = arith.cmpi sgt, %1926, %c0_i32_861 : i32
    %c0_i32_862 = arith.constant 0 : i32
    %1934 = arith.cmpi sgt, %c1_i32_841, %c0_i32_862 : i32
    %1935 = arith.andi %1933, %1934 : i1
    %1936 = vector.broadcast %1935 : i1 to vector<8x1xi1>
    %1937 = arith.andi %6, %1936 : vector<8x1xi1>
    %cst_863 = arith.constant 0.000000e+00 : f32
    %1938 = vector.shape_cast %1937 : vector<8x1xi1> to vector<8x1xi1>
    %1939 = vector.broadcast %1938 : vector<8x1xi1> to vector<8x128xi1>
    %1940 = vector.broadcast %cst_863 : f32 to vector<8x128xf32>
    %1941 = arith.select %1939, %1932, %1940 : vector<8x128xi1>, vector<8x128xf32>
    %1942 = arith.addf %1921, %1941 : vector<8x128xf32>
    %c2_i32_864 = arith.constant 2 : i32
    %1943 = arith.addi %0, %c2_i32_864 : i32
    %c8_i32_865 = arith.constant 8 : i32
    %1944 = arith.muli %1943, %c8_i32_865 : i32
    %1945 = arith.addi %1944, %c1_i32_841 : i32
    %1946 = arith.index_cast %1945 : i32 to index
    %1947 = memref.load %arg1[%1946] : memref<64xi32, #tpu.memory_space<smem>>
    %c1_i32_866 = arith.constant 1 : i32
    %1948 = arith.subi %1947, %c1_i32_866 : i32
    %c0_i32_867 = arith.constant 0 : i32
    %c7_i32_868 = arith.constant 7 : i32
    %1949 = arith.maxsi %c0_i32_867, %1948 : i32
    %1950 = arith.minsi %c7_i32_868, %1949 : i32
    %1951 = arith.index_cast %1950 : i32 to index
    %c0_869 = arith.constant 0 : index
    %c0_870 = arith.constant 0 : index
    %1952 = vector.load %arg14[%1951, %c0_869, %c0_870] : memref<8x8x128xf32, #tpu.memory_space<vmem>>, vector<1x8x128xf32>
    %1953 = vector.shape_cast %1952 : vector<1x8x128xf32> to vector<8x128xf32>
    %c0_i32_871 = arith.constant 0 : i32
    %1954 = arith.cmpi sgt, %1947, %c0_i32_871 : i32
    %c0_i32_872 = arith.constant 0 : i32
    %1955 = arith.cmpi sgt, %c1_i32_841, %c0_i32_872 : i32
    %1956 = arith.andi %1954, %1955 : i1
    %1957 = vector.broadcast %1956 : i1 to vector<8x1xi1>
    %1958 = arith.andi %9, %1957 : vector<8x1xi1>
    %cst_873 = arith.constant 0.000000e+00 : f32
    %1959 = vector.shape_cast %1958 : vector<8x1xi1> to vector<8x1xi1>
    %1960 = vector.broadcast %1959 : vector<8x1xi1> to vector<8x128xi1>
    %1961 = vector.broadcast %cst_873 : f32 to vector<8x128xf32>
    %1962 = arith.select %1960, %1953, %1961 : vector<8x128xi1>, vector<8x128xf32>
    %1963 = arith.addf %1942, %1962 : vector<8x128xf32>
    %c3_i32_874 = arith.constant 3 : i32
    %1964 = arith.addi %0, %c3_i32_874 : i32
    %c8_i32_875 = arith.constant 8 : i32
    %1965 = arith.muli %1964, %c8_i32_875 : i32
    %1966 = arith.addi %1965, %c1_i32_841 : i32
    %1967 = arith.index_cast %1966 : i32 to index
    %1968 = memref.load %arg1[%1967] : memref<64xi32, #tpu.memory_space<smem>>
    %c1_i32_876 = arith.constant 1 : i32
    %1969 = arith.subi %1968, %c1_i32_876 : i32
    %c0_i32_877 = arith.constant 0 : i32
    %c7_i32_878 = arith.constant 7 : i32
    %1970 = arith.maxsi %c0_i32_877, %1969 : i32
    %1971 = arith.minsi %c7_i32_878, %1970 : i32
    %1972 = arith.index_cast %1971 : i32 to index
    %c0_879 = arith.constant 0 : index
    %c0_880 = arith.constant 0 : index
    %1973 = vector.load %arg14[%1972, %c0_879, %c0_880] : memref<8x8x128xf32, #tpu.memory_space<vmem>>, vector<1x8x128xf32>
    %1974 = vector.shape_cast %1973 : vector<1x8x128xf32> to vector<8x128xf32>
    %c0_i32_881 = arith.constant 0 : i32
    %1975 = arith.cmpi sgt, %1968, %c0_i32_881 : i32
    %c0_i32_882 = arith.constant 0 : i32
    %1976 = arith.cmpi sgt, %c1_i32_841, %c0_i32_882 : i32
    %1977 = arith.andi %1975, %1976 : i1
    %1978 = vector.broadcast %1977 : i1 to vector<8x1xi1>
    %1979 = arith.andi %12, %1978 : vector<8x1xi1>
    %cst_883 = arith.constant 0.000000e+00 : f32
    %1980 = vector.shape_cast %1979 : vector<8x1xi1> to vector<8x1xi1>
    %1981 = vector.broadcast %1980 : vector<8x1xi1> to vector<8x128xi1>
    %1982 = vector.broadcast %cst_883 : f32 to vector<8x128xf32>
    %1983 = arith.select %1981, %1974, %1982 : vector<8x128xi1>, vector<8x128xf32>
    %1984 = arith.addf %1963, %1983 : vector<8x128xf32>
    %c4_i32_884 = arith.constant 4 : i32
    %1985 = arith.addi %0, %c4_i32_884 : i32
    %c8_i32_885 = arith.constant 8 : i32
    %1986 = arith.muli %1985, %c8_i32_885 : i32
    %1987 = arith.addi %1986, %c1_i32_841 : i32
    %1988 = arith.index_cast %1987 : i32 to index
    %1989 = memref.load %arg1[%1988] : memref<64xi32, #tpu.memory_space<smem>>
    %c1_i32_886 = arith.constant 1 : i32
    %1990 = arith.subi %1989, %c1_i32_886 : i32
    %c0_i32_887 = arith.constant 0 : i32
    %c7_i32_888 = arith.constant 7 : i32
    %1991 = arith.maxsi %c0_i32_887, %1990 : i32
    %1992 = arith.minsi %c7_i32_888, %1991 : i32
    %1993 = arith.index_cast %1992 : i32 to index
    %c0_889 = arith.constant 0 : index
    %c0_890 = arith.constant 0 : index
    %1994 = vector.load %arg14[%1993, %c0_889, %c0_890] : memref<8x8x128xf32, #tpu.memory_space<vmem>>, vector<1x8x128xf32>
    %1995 = vector.shape_cast %1994 : vector<1x8x128xf32> to vector<8x128xf32>
    %c0_i32_891 = arith.constant 0 : i32
    %1996 = arith.cmpi sgt, %1989, %c0_i32_891 : i32
    %c0_i32_892 = arith.constant 0 : i32
    %1997 = arith.cmpi sgt, %c1_i32_841, %c0_i32_892 : i32
    %1998 = arith.andi %1996, %1997 : i1
    %1999 = vector.broadcast %1998 : i1 to vector<8x1xi1>
    %2000 = arith.andi %15, %1999 : vector<8x1xi1>
    %cst_893 = arith.constant 0.000000e+00 : f32
    %2001 = vector.shape_cast %2000 : vector<8x1xi1> to vector<8x1xi1>
    %2002 = vector.broadcast %2001 : vector<8x1xi1> to vector<8x128xi1>
    %2003 = vector.broadcast %cst_893 : f32 to vector<8x128xf32>
    %2004 = arith.select %2002, %1995, %2003 : vector<8x128xi1>, vector<8x128xf32>
    %2005 = arith.addf %1984, %2004 : vector<8x128xf32>
    %c5_i32_894 = arith.constant 5 : i32
    %2006 = arith.addi %0, %c5_i32_894 : i32
    %c8_i32_895 = arith.constant 8 : i32
    %2007 = arith.muli %2006, %c8_i32_895 : i32
    %2008 = arith.addi %2007, %c1_i32_841 : i32
    %2009 = arith.index_cast %2008 : i32 to index
    %2010 = memref.load %arg1[%2009] : memref<64xi32, #tpu.memory_space<smem>>
    %c1_i32_896 = arith.constant 1 : i32
    %2011 = arith.subi %2010, %c1_i32_896 : i32
    %c0_i32_897 = arith.constant 0 : i32
    %c7_i32_898 = arith.constant 7 : i32
    %2012 = arith.maxsi %c0_i32_897, %2011 : i32
    %2013 = arith.minsi %c7_i32_898, %2012 : i32
    %2014 = arith.index_cast %2013 : i32 to index
    %c0_899 = arith.constant 0 : index
    %c0_900 = arith.constant 0 : index
    %2015 = vector.load %arg14[%2014, %c0_899, %c0_900] : memref<8x8x128xf32, #tpu.memory_space<vmem>>, vector<1x8x128xf32>
    %2016 = vector.shape_cast %2015 : vector<1x8x128xf32> to vector<8x128xf32>
    %c0_i32_901 = arith.constant 0 : i32
    %2017 = arith.cmpi sgt, %2010, %c0_i32_901 : i32
    %c0_i32_902 = arith.constant 0 : i32
    %2018 = arith.cmpi sgt, %c1_i32_841, %c0_i32_902 : i32
    %2019 = arith.andi %2017, %2018 : i1
    %2020 = vector.broadcast %2019 : i1 to vector<8x1xi1>
    %2021 = arith.andi %18, %2020 : vector<8x1xi1>
    %cst_903 = arith.constant 0.000000e+00 : f32
    %2022 = vector.shape_cast %2021 : vector<8x1xi1> to vector<8x1xi1>
    %2023 = vector.broadcast %2022 : vector<8x1xi1> to vector<8x128xi1>
    %2024 = vector.broadcast %cst_903 : f32 to vector<8x128xf32>
    %2025 = arith.select %2023, %2016, %2024 : vector<8x128xi1>, vector<8x128xf32>
    %2026 = arith.addf %2005, %2025 : vector<8x128xf32>
    %c6_i32_904 = arith.constant 6 : i32
    %2027 = arith.addi %0, %c6_i32_904 : i32
    %c8_i32_905 = arith.constant 8 : i32
    %2028 = arith.muli %2027, %c8_i32_905 : i32
    %2029 = arith.addi %2028, %c1_i32_841 : i32
    %2030 = arith.index_cast %2029 : i32 to index
    %2031 = memref.load %arg1[%2030] : memref<64xi32, #tpu.memory_space<smem>>
    %c1_i32_906 = arith.constant 1 : i32
    %2032 = arith.subi %2031, %c1_i32_906 : i32
    %c0_i32_907 = arith.constant 0 : i32
    %c7_i32_908 = arith.constant 7 : i32
    %2033 = arith.maxsi %c0_i32_907, %2032 : i32
    %2034 = arith.minsi %c7_i32_908, %2033 : i32
    %2035 = arith.index_cast %2034 : i32 to index
    %c0_909 = arith.constant 0 : index
    %c0_910 = arith.constant 0 : index
    %2036 = vector.load %arg14[%2035, %c0_909, %c0_910] : memref<8x8x128xf32, #tpu.memory_space<vmem>>, vector<1x8x128xf32>
    %2037 = vector.shape_cast %2036 : vector<1x8x128xf32> to vector<8x128xf32>
    %c0_i32_911 = arith.constant 0 : i32
    %2038 = arith.cmpi sgt, %2031, %c0_i32_911 : i32
    %c0_i32_912 = arith.constant 0 : i32
    %2039 = arith.cmpi sgt, %c1_i32_841, %c0_i32_912 : i32
    %2040 = arith.andi %2038, %2039 : i1
    %2041 = vector.broadcast %2040 : i1 to vector<8x1xi1>
    %2042 = arith.andi %21, %2041 : vector<8x1xi1>
    %cst_913 = arith.constant 0.000000e+00 : f32
    %2043 = vector.shape_cast %2042 : vector<8x1xi1> to vector<8x1xi1>
    %2044 = vector.broadcast %2043 : vector<8x1xi1> to vector<8x128xi1>
    %2045 = vector.broadcast %cst_913 : f32 to vector<8x128xf32>
    %2046 = arith.select %2044, %2037, %2045 : vector<8x128xi1>, vector<8x128xf32>
    %2047 = arith.addf %2026, %2046 : vector<8x128xf32>
    %c7_i32_914 = arith.constant 7 : i32
    %2048 = arith.addi %0, %c7_i32_914 : i32
    %c8_i32_915 = arith.constant 8 : i32
    %2049 = arith.muli %2048, %c8_i32_915 : i32
    %2050 = arith.addi %2049, %c1_i32_841 : i32
    %2051 = arith.index_cast %2050 : i32 to index
    %2052 = memref.load %arg1[%2051] : memref<64xi32, #tpu.memory_space<smem>>
    %c1_i32_916 = arith.constant 1 : i32
    %2053 = arith.subi %2052, %c1_i32_916 : i32
    %c0_i32_917 = arith.constant 0 : i32
    %c7_i32_918 = arith.constant 7 : i32
    %2054 = arith.maxsi %c0_i32_917, %2053 : i32
    %2055 = arith.minsi %c7_i32_918, %2054 : i32
    %2056 = arith.index_cast %2055 : i32 to index
    %c0_919 = arith.constant 0 : index
    %c0_920 = arith.constant 0 : index
    %2057 = vector.load %arg14[%2056, %c0_919, %c0_920] : memref<8x8x128xf32, #tpu.memory_space<vmem>>, vector<1x8x128xf32>
    %2058 = vector.shape_cast %2057 : vector<1x8x128xf32> to vector<8x128xf32>
    %c0_i32_921 = arith.constant 0 : i32
    %2059 = arith.cmpi sgt, %2052, %c0_i32_921 : i32
    %c0_i32_922 = arith.constant 0 : i32
    %2060 = arith.cmpi sgt, %c1_i32_841, %c0_i32_922 : i32
    %2061 = arith.andi %2059, %2060 : i1
    %2062 = vector.broadcast %2061 : i1 to vector<8x1xi1>
    %2063 = arith.andi %24, %2062 : vector<8x1xi1>
    %cst_923 = arith.constant 0.000000e+00 : f32
    %2064 = vector.shape_cast %2063 : vector<8x1xi1> to vector<8x1xi1>
    %2065 = vector.broadcast %2064 : vector<8x1xi1> to vector<8x128xi1>
    %2066 = vector.broadcast %cst_923 : f32 to vector<8x128xf32>
    %2067 = arith.select %2065, %2058, %2066 : vector<8x128xi1>, vector<8x128xf32>
    %2068 = arith.addf %2047, %2067 : vector<8x128xf32>
    %cst_924 = arith.constant dense<0.000000e+00> : vector<8x128xf32>
    %2069 = tpu.matmul %1897, %1692, %cst_924 {dimension_numbers = #tpu.dot_dimension_numbers<[1], [0], [0], [1], [0, 0, 1, 1], [], []>} : vector<8x32xbf16>, vector<32x128xbf16>, vector<8x128xf32> -> vector<8x128xf32>
    %2070 = arith.addf %2068, %2069 : vector<8x128xf32>
    %2071 = vector.extract_strided_slice %2070 {offsets = [0, 0], sizes = [8, 32], strides = [1, 1]} : vector<8x128xf32> to vector<8x32xf32>
    %2072 = arith.negf %2071 : vector<8x32xf32>
    %2073 = math.exp %2072 : vector<8x32xf32>
    %cst_925 = arith.constant 1.000000e+00 : f32
    %2074 = vector.broadcast %cst_925 : f32 to vector<8x32xf32>
    %2075 = arith.addf %2074, %2073 : vector<8x32xf32>
    %2076 = arith.divf %2074, %2075 : vector<8x32xf32>
    %2077 = vector.extract_strided_slice %2070 {offsets = [0, 32], sizes = [8, 32], strides = [1, 1]} : vector<8x128xf32> to vector<8x32xf32>
    %2078 = arith.negf %2077 : vector<8x32xf32>
    %2079 = math.exp %2078 : vector<8x32xf32>
    %cst_926 = arith.constant 1.000000e+00 : f32
    %2080 = vector.broadcast %cst_926 : f32 to vector<8x32xf32>
    %2081 = arith.addf %2080, %2079 : vector<8x32xf32>
    %2082 = arith.divf %2080, %2081 : vector<8x32xf32>
    %2083 = vector.extract_strided_slice %2070 {offsets = [0, 64], sizes = [8, 32], strides = [1, 1]} : vector<8x128xf32> to vector<8x32xf32>
    %2084 = math.tanh %2083 : vector<8x32xf32>
    %2085 = vector.extract_strided_slice %2070 {offsets = [0, 96], sizes = [8, 32], strides = [1, 1]} : vector<8x128xf32> to vector<8x32xf32>
    %2086 = arith.negf %2085 : vector<8x32xf32>
    %2087 = math.exp %2086 : vector<8x32xf32>
    %cst_927 = arith.constant 1.000000e+00 : f32
    %2088 = vector.broadcast %cst_927 : f32 to vector<8x32xf32>
    %2089 = arith.addf %2088, %2087 : vector<8x32xf32>
    %2090 = arith.divf %2088, %2089 : vector<8x32xf32>
    %2091 = arith.mulf %2082, %1890 : vector<8x32xf32>
    %2092 = arith.mulf %2076, %2084 : vector<8x32xf32>
    %2093 = arith.addf %2091, %2092 : vector<8x32xf32>
    %2094 = math.tanh %2093 : vector<8x32xf32>
    %2095 = arith.mulf %2090, %2094 : vector<8x32xf32>
    %2096 = arith.index_cast %c1_i32_841 : i32 to index
    %c0_928 = arith.constant 0 : index
    %c0_929 = arith.constant 0 : index
    %2097 = vector.load %arg12[%2096, %c0_928, %c0_929] : memref<8x8x32xf32, #tpu.memory_space<vmem>>, vector<1x8x32xf32>
    %2098 = vector.shape_cast %2097 : vector<1x8x32xf32> to vector<8x32xf32>
    %2099 = vector.shape_cast %2095 : vector<8x32xf32> to vector<1x8x32xf32>
    tpu.vector_store %arg12[%2096, %c0_928, %c0_929], %2099 {strides = array<i32>} : memref<8x8x32xf32, #tpu.memory_space<vmem>>, vector<1x8x32xf32>,
    %2100 = arith.truncf %2095 : vector<8x32xf32> to vector<8x32xbf16>
    %c2_i32_930 = arith.constant 2 : i32
    %2101 = arith.index_cast %c2_i32_930 : i32 to index
    %c0_931 = arith.constant 0 : index
    %c0_932 = arith.constant 0 : index
    %2102 = vector.load %arg13[%2101, %c0_931, %c0_932] : memref<8x8x128xf32, #tpu.memory_space<vmem>>, vector<1x8x128xf32>
    %2103 = vector.shape_cast %2102 : vector<1x8x128xf32> to vector<8x128xf32>
    %c0_i32_933 = arith.constant 0 : i32
    %2104 = arith.addi %0, %c0_i32_933 : i32
    %c8_i32_934 = arith.constant 8 : i32
    %2105 = arith.muli %2104, %c8_i32_934 : i32
    %2106 = arith.addi %2105, %c2_i32_930 : i32
    %2107 = arith.index_cast %2106 : i32 to index
    %2108 = memref.load %arg1[%2107] : memref<64xi32, #tpu.memory_space<smem>>
    %c1_i32_935 = arith.constant 1 : i32
    %2109 = arith.subi %2108, %c1_i32_935 : i32
    %c0_i32_936 = arith.constant 0 : i32
    %c7_i32_937 = arith.constant 7 : i32
    %2110 = arith.maxsi %c0_i32_936, %2109 : i32
    %2111 = arith.minsi %c7_i32_937, %2110 : i32
    %2112 = arith.index_cast %2111 : i32 to index
    %c0_938 = arith.constant 0 : index
    %c0_939 = arith.constant 0 : index
    %2113 = vector.load %arg14[%2112, %c0_938, %c0_939] : memref<8x8x128xf32, #tpu.memory_space<vmem>>, vector<1x8x128xf32>
    %2114 = vector.shape_cast %2113 : vector<1x8x128xf32> to vector<8x128xf32>
    %c0_i32_940 = arith.constant 0 : i32
    %2115 = arith.cmpi sgt, %2108, %c0_i32_940 : i32
    %c0_i32_941 = arith.constant 0 : i32
    %2116 = arith.cmpi sgt, %c2_i32_930, %c0_i32_941 : i32
    %2117 = arith.andi %2115, %2116 : i1
    %2118 = vector.broadcast %2117 : i1 to vector<8x1xi1>
    %2119 = arith.andi %3, %2118 : vector<8x1xi1>
    %cst_942 = arith.constant 0.000000e+00 : f32
    %2120 = vector.shape_cast %2119 : vector<8x1xi1> to vector<8x1xi1>
    %2121 = vector.broadcast %2120 : vector<8x1xi1> to vector<8x128xi1>
    %2122 = vector.broadcast %cst_942 : f32 to vector<8x128xf32>
    %2123 = arith.select %2121, %2114, %2122 : vector<8x128xi1>, vector<8x128xf32>
    %2124 = arith.addf %2103, %2123 : vector<8x128xf32>
    %c1_i32_943 = arith.constant 1 : i32
    %2125 = arith.addi %0, %c1_i32_943 : i32
    %c8_i32_944 = arith.constant 8 : i32
    %2126 = arith.muli %2125, %c8_i32_944 : i32
    %2127 = arith.addi %2126, %c2_i32_930 : i32
    %2128 = arith.index_cast %2127 : i32 to index
    %2129 = memref.load %arg1[%2128] : memref<64xi32, #tpu.memory_space<smem>>
    %c1_i32_945 = arith.constant 1 : i32
    %2130 = arith.subi %2129, %c1_i32_945 : i32
    %c0_i32_946 = arith.constant 0 : i32
    %c7_i32_947 = arith.constant 7 : i32
    %2131 = arith.maxsi %c0_i32_946, %2130 : i32
    %2132 = arith.minsi %c7_i32_947, %2131 : i32
    %2133 = arith.index_cast %2132 : i32 to index
    %c0_948 = arith.constant 0 : index
    %c0_949 = arith.constant 0 : index
    %2134 = vector.load %arg14[%2133, %c0_948, %c0_949] : memref<8x8x128xf32, #tpu.memory_space<vmem>>, vector<1x8x128xf32>
    %2135 = vector.shape_cast %2134 : vector<1x8x128xf32> to vector<8x128xf32>
    %c0_i32_950 = arith.constant 0 : i32
    %2136 = arith.cmpi sgt, %2129, %c0_i32_950 : i32
    %c0_i32_951 = arith.constant 0 : i32
    %2137 = arith.cmpi sgt, %c2_i32_930, %c0_i32_951 : i32
    %2138 = arith.andi %2136, %2137 : i1
    %2139 = vector.broadcast %2138 : i1 to vector<8x1xi1>
    %2140 = arith.andi %6, %2139 : vector<8x1xi1>
    %cst_952 = arith.constant 0.000000e+00 : f32
    %2141 = vector.shape_cast %2140 : vector<8x1xi1> to vector<8x1xi1>
    %2142 = vector.broadcast %2141 : vector<8x1xi1> to vector<8x128xi1>
    %2143 = vector.broadcast %cst_952 : f32 to vector<8x128xf32>
    %2144 = arith.select %2142, %2135, %2143 : vector<8x128xi1>, vector<8x128xf32>
    %2145 = arith.addf %2124, %2144 : vector<8x128xf32>
    %c2_i32_953 = arith.constant 2 : i32
    %2146 = arith.addi %0, %c2_i32_953 : i32
    %c8_i32_954 = arith.constant 8 : i32
    %2147 = arith.muli %2146, %c8_i32_954 : i32
    %2148 = arith.addi %2147, %c2_i32_930 : i32
    %2149 = arith.index_cast %2148 : i32 to index
    %2150 = memref.load %arg1[%2149] : memref<64xi32, #tpu.memory_space<smem>>
    %c1_i32_955 = arith.constant 1 : i32
    %2151 = arith.subi %2150, %c1_i32_955 : i32
    %c0_i32_956 = arith.constant 0 : i32
    %c7_i32_957 = arith.constant 7 : i32
    %2152 = arith.maxsi %c0_i32_956, %2151 : i32
    %2153 = arith.minsi %c7_i32_957, %2152 : i32
    %2154 = arith.index_cast %2153 : i32 to index
    %c0_958 = arith.constant 0 : index
    %c0_959 = arith.constant 0 : index
    %2155 = vector.load %arg14[%2154, %c0_958, %c0_959] : memref<8x8x128xf32, #tpu.memory_space<vmem>>, vector<1x8x128xf32>
    %2156 = vector.shape_cast %2155 : vector<1x8x128xf32> to vector<8x128xf32>
    %c0_i32_960 = arith.constant 0 : i32
    %2157 = arith.cmpi sgt, %2150, %c0_i32_960 : i32
    %c0_i32_961 = arith.constant 0 : i32
    %2158 = arith.cmpi sgt, %c2_i32_930, %c0_i32_961 : i32
    %2159 = arith.andi %2157, %2158 : i1
    %2160 = vector.broadcast %2159 : i1 to vector<8x1xi1>
    %2161 = arith.andi %9, %2160 : vector<8x1xi1>
    %cst_962 = arith.constant 0.000000e+00 : f32
    %2162 = vector.shape_cast %2161 : vector<8x1xi1> to vector<8x1xi1>
    %2163 = vector.broadcast %2162 : vector<8x1xi1> to vector<8x128xi1>
    %2164 = vector.broadcast %cst_962 : f32 to vector<8x128xf32>
    %2165 = arith.select %2163, %2156, %2164 : vector<8x128xi1>, vector<8x128xf32>
    %2166 = arith.addf %2145, %2165 : vector<8x128xf32>
    %c3_i32_963 = arith.constant 3 : i32
    %2167 = arith.addi %0, %c3_i32_963 : i32
    %c8_i32_964 = arith.constant 8 : i32
    %2168 = arith.muli %2167, %c8_i32_964 : i32
    %2169 = arith.addi %2168, %c2_i32_930 : i32
    %2170 = arith.index_cast %2169 : i32 to index
    %2171 = memref.load %arg1[%2170] : memref<64xi32, #tpu.memory_space<smem>>
    %c1_i32_965 = arith.constant 1 : i32
    %2172 = arith.subi %2171, %c1_i32_965 : i32
    %c0_i32_966 = arith.constant 0 : i32
    %c7_i32_967 = arith.constant 7 : i32
    %2173 = arith.maxsi %c0_i32_966, %2172 : i32
    %2174 = arith.minsi %c7_i32_967, %2173 : i32
    %2175 = arith.index_cast %2174 : i32 to index
    %c0_968 = arith.constant 0 : index
    %c0_969 = arith.constant 0 : index
    %2176 = vector.load %arg14[%2175, %c0_968, %c0_969] : memref<8x8x128xf32, #tpu.memory_space<vmem>>, vector<1x8x128xf32>
    %2177 = vector.shape_cast %2176 : vector<1x8x128xf32> to vector<8x128xf32>
    %c0_i32_970 = arith.constant 0 : i32
    %2178 = arith.cmpi sgt, %2171, %c0_i32_970 : i32
    %c0_i32_971 = arith.constant 0 : i32
    %2179 = arith.cmpi sgt, %c2_i32_930, %c0_i32_971 : i32
    %2180 = arith.andi %2178, %2179 : i1
    %2181 = vector.broadcast %2180 : i1 to vector<8x1xi1>
    %2182 = arith.andi %12, %2181 : vector<8x1xi1>
    %cst_972 = arith.constant 0.000000e+00 : f32
    %2183 = vector.shape_cast %2182 : vector<8x1xi1> to vector<8x1xi1>
    %2184 = vector.broadcast %2183 : vector<8x1xi1> to vector<8x128xi1>
    %2185 = vector.broadcast %cst_972 : f32 to vector<8x128xf32>
    %2186 = arith.select %2184, %2177, %2185 : vector<8x128xi1>, vector<8x128xf32>
    %2187 = arith.addf %2166, %2186 : vector<8x128xf32>
    %c4_i32_973 = arith.constant 4 : i32
    %2188 = arith.addi %0, %c4_i32_973 : i32
    %c8_i32_974 = arith.constant 8 : i32
    %2189 = arith.muli %2188, %c8_i32_974 : i32
    %2190 = arith.addi %2189, %c2_i32_930 : i32
    %2191 = arith.index_cast %2190 : i32 to index
    %2192 = memref.load %arg1[%2191] : memref<64xi32, #tpu.memory_space<smem>>
    %c1_i32_975 = arith.constant 1 : i32
    %2193 = arith.subi %2192, %c1_i32_975 : i32
    %c0_i32_976 = arith.constant 0 : i32
    %c7_i32_977 = arith.constant 7 : i32
    %2194 = arith.maxsi %c0_i32_976, %2193 : i32
    %2195 = arith.minsi %c7_i32_977, %2194 : i32
    %2196 = arith.index_cast %2195 : i32 to index
    %c0_978 = arith.constant 0 : index
    %c0_979 = arith.constant 0 : index
    %2197 = vector.load %arg14[%2196, %c0_978, %c0_979] : memref<8x8x128xf32, #tpu.memory_space<vmem>>, vector<1x8x128xf32>
    %2198 = vector.shape_cast %2197 : vector<1x8x128xf32> to vector<8x128xf32>
    %c0_i32_980 = arith.constant 0 : i32
    %2199 = arith.cmpi sgt, %2192, %c0_i32_980 : i32
    %c0_i32_981 = arith.constant 0 : i32
    %2200 = arith.cmpi sgt, %c2_i32_930, %c0_i32_981 : i32
    %2201 = arith.andi %2199, %2200 : i1
    %2202 = vector.broadcast %2201 : i1 to vector<8x1xi1>
    %2203 = arith.andi %15, %2202 : vector<8x1xi1>
    %cst_982 = arith.constant 0.000000e+00 : f32
    %2204 = vector.shape_cast %2203 : vector<8x1xi1> to vector<8x1xi1>
    %2205 = vector.broadcast %2204 : vector<8x1xi1> to vector<8x128xi1>
    %2206 = vector.broadcast %cst_982 : f32 to vector<8x128xf32>
    %2207 = arith.select %2205, %2198, %2206 : vector<8x128xi1>, vector<8x128xf32>
    %2208 = arith.addf %2187, %2207 : vector<8x128xf32>
    %c5_i32_983 = arith.constant 5 : i32
    %2209 = arith.addi %0, %c5_i32_983 : i32
    %c8_i32_984 = arith.constant 8 : i32
    %2210 = arith.muli %2209, %c8_i32_984 : i32
    %2211 = arith.addi %2210, %c2_i32_930 : i32
    %2212 = arith.index_cast %2211 : i32 to index
    %2213 = memref.load %arg1[%2212] : memref<64xi32, #tpu.memory_space<smem>>
    %c1_i32_985 = arith.constant 1 : i32
    %2214 = arith.subi %2213, %c1_i32_985 : i32
    %c0_i32_986 = arith.constant 0 : i32
    %c7_i32_987 = arith.constant 7 : i32
    %2215 = arith.maxsi %c0_i32_986, %2214 : i32
    %2216 = arith.minsi %c7_i32_987, %2215 : i32
    %2217 = arith.index_cast %2216 : i32 to index
    %c0_988 = arith.constant 0 : index
    %c0_989 = arith.constant 0 : index
    %2218 = vector.load %arg14[%2217, %c0_988, %c0_989] : memref<8x8x128xf32, #tpu.memory_space<vmem>>, vector<1x8x128xf32>
    %2219 = vector.shape_cast %2218 : vector<1x8x128xf32> to vector<8x128xf32>
    %c0_i32_990 = arith.constant 0 : i32
    %2220 = arith.cmpi sgt, %2213, %c0_i32_990 : i32
    %c0_i32_991 = arith.constant 0 : i32
    %2221 = arith.cmpi sgt, %c2_i32_930, %c0_i32_991 : i32
    %2222 = arith.andi %2220, %2221 : i1
    %2223 = vector.broadcast %2222 : i1 to vector<8x1xi1>
    %2224 = arith.andi %18, %2223 : vector<8x1xi1>
    %cst_992 = arith.constant 0.000000e+00 : f32
    %2225 = vector.shape_cast %2224 : vector<8x1xi1> to vector<8x1xi1>
    %2226 = vector.broadcast %2225 : vector<8x1xi1> to vector<8x128xi1>
    %2227 = vector.broadcast %cst_992 : f32 to vector<8x128xf32>
    %2228 = arith.select %2226, %2219, %2227 : vector<8x128xi1>, vector<8x128xf32>
    %2229 = arith.addf %2208, %2228 : vector<8x128xf32>
    %c6_i32_993 = arith.constant 6 : i32
    %2230 = arith.addi %0, %c6_i32_993 : i32
    %c8_i32_994 = arith.constant 8 : i32
    %2231 = arith.muli %2230, %c8_i32_994 : i32
    %2232 = arith.addi %2231, %c2_i32_930 : i32
    %2233 = arith.index_cast %2232 : i32 to index
    %2234 = memref.load %arg1[%2233] : memref<64xi32, #tpu.memory_space<smem>>
    %c1_i32_995 = arith.constant 1 : i32
    %2235 = arith.subi %2234, %c1_i32_995 : i32
    %c0_i32_996 = arith.constant 0 : i32
    %c7_i32_997 = arith.constant 7 : i32
    %2236 = arith.maxsi %c0_i32_996, %2235 : i32
    %2237 = arith.minsi %c7_i32_997, %2236 : i32
    %2238 = arith.index_cast %2237 : i32 to index
    %c0_998 = arith.constant 0 : index
    %c0_999 = arith.constant 0 : index
    %2239 = vector.load %arg14[%2238, %c0_998, %c0_999] : memref<8x8x128xf32, #tpu.memory_space<vmem>>, vector<1x8x128xf32>
    %2240 = vector.shape_cast %2239 : vector<1x8x128xf32> to vector<8x128xf32>
    %c0_i32_1000 = arith.constant 0 : i32
    %2241 = arith.cmpi sgt, %2234, %c0_i32_1000 : i32
    %c0_i32_1001 = arith.constant 0 : i32
    %2242 = arith.cmpi sgt, %c2_i32_930, %c0_i32_1001 : i32
    %2243 = arith.andi %2241, %2242 : i1
    %2244 = vector.broadcast %2243 : i1 to vector<8x1xi1>
    %2245 = arith.andi %21, %2244 : vector<8x1xi1>
    %cst_1002 = arith.constant 0.000000e+00 : f32
    %2246 = vector.shape_cast %2245 : vector<8x1xi1> to vector<8x1xi1>
    %2247 = vector.broadcast %2246 : vector<8x1xi1> to vector<8x128xi1>
    %2248 = vector.broadcast %cst_1002 : f32 to vector<8x128xf32>
    %2249 = arith.select %2247, %2240, %2248 : vector<8x128xi1>, vector<8x128xf32>
    %2250 = arith.addf %2229, %2249 : vector<8x128xf32>
    %c7_i32_1003 = arith.constant 7 : i32
    %2251 = arith.addi %0, %c7_i32_1003 : i32
    %c8_i32_1004 = arith.constant 8 : i32
    %2252 = arith.muli %2251, %c8_i32_1004 : i32
    %2253 = arith.addi %2252, %c2_i32_930 : i32
    %2254 = arith.index_cast %2253 : i32 to index
    %2255 = memref.load %arg1[%2254] : memref<64xi32, #tpu.memory_space<smem>>
    %c1_i32_1005 = arith.constant 1 : i32
    %2256 = arith.subi %2255, %c1_i32_1005 : i32
    %c0_i32_1006 = arith.constant 0 : i32
    %c7_i32_1007 = arith.constant 7 : i32
    %2257 = arith.maxsi %c0_i32_1006, %2256 : i32
    %2258 = arith.minsi %c7_i32_1007, %2257 : i32
    %2259 = arith.index_cast %2258 : i32 to index
    %c0_1008 = arith.constant 0 : index
    %c0_1009 = arith.constant 0 : index
    %2260 = vector.load %arg14[%2259, %c0_1008, %c0_1009] : memref<8x8x128xf32, #tpu.memory_space<vmem>>, vector<1x8x128xf32>
    %2261 = vector.shape_cast %2260 : vector<1x8x128xf32> to vector<8x128xf32>
    %c0_i32_1010 = arith.constant 0 : i32
    %2262 = arith.cmpi sgt, %2255, %c0_i32_1010 : i32
    %c0_i32_1011 = arith.constant 0 : i32
    %2263 = arith.cmpi sgt, %c2_i32_930, %c0_i32_1011 : i32
    %2264 = arith.andi %2262, %2263 : i1
    %2265 = vector.broadcast %2264 : i1 to vector<8x1xi1>
    %2266 = arith.andi %24, %2265 : vector<8x1xi1>
    %cst_1012 = arith.constant 0.000000e+00 : f32
    %2267 = vector.shape_cast %2266 : vector<8x1xi1> to vector<8x1xi1>
    %2268 = vector.broadcast %2267 : vector<8x1xi1> to vector<8x128xi1>
    %2269 = vector.broadcast %cst_1012 : f32 to vector<8x128xf32>
    %2270 = arith.select %2268, %2261, %2269 : vector<8x128xi1>, vector<8x128xf32>
    %2271 = arith.addf %2250, %2270 : vector<8x128xf32>
    %cst_1013 = arith.constant dense<0.000000e+00> : vector<8x128xf32>
    %2272 = tpu.matmul %2100, %1692, %cst_1013 {dimension_numbers = #tpu.dot_dimension_numbers<[1], [0], [0], [1], [0, 0, 1, 1], [], []>} : vector<8x32xbf16>, vector<32x128xbf16>, vector<8x128xf32> -> vector<8x128xf32>
    %2273 = arith.addf %2271, %2272 : vector<8x128xf32>
    %2274 = vector.extract_strided_slice %2273 {offsets = [0, 0], sizes = [8, 32], strides = [1, 1]} : vector<8x128xf32> to vector<8x32xf32>
    %2275 = arith.negf %2274 : vector<8x32xf32>
    %2276 = math.exp %2275 : vector<8x32xf32>
    %cst_1014 = arith.constant 1.000000e+00 : f32
    %2277 = vector.broadcast %cst_1014 : f32 to vector<8x32xf32>
    %2278 = arith.addf %2277, %2276 : vector<8x32xf32>
    %2279 = arith.divf %2277, %2278 : vector<8x32xf32>
    %2280 = vector.extract_strided_slice %2273 {offsets = [0, 32], sizes = [8, 32], strides = [1, 1]} : vector<8x128xf32> to vector<8x32xf32>
    %2281 = arith.negf %2280 : vector<8x32xf32>
    %2282 = math.exp %2281 : vector<8x32xf32>
    %cst_1015 = arith.constant 1.000000e+00 : f32
    %2283 = vector.broadcast %cst_1015 : f32 to vector<8x32xf32>
    %2284 = arith.addf %2283, %2282 : vector<8x32xf32>
    %2285 = arith.divf %2283, %2284 : vector<8x32xf32>
    %2286 = vector.extract_strided_slice %2273 {offsets = [0, 64], sizes = [8, 32], strides = [1, 1]} : vector<8x128xf32> to vector<8x32xf32>
    %2287 = math.tanh %2286 : vector<8x32xf32>
    %2288 = vector.extract_strided_slice %2273 {offsets = [0, 96], sizes = [8, 32], strides = [1, 1]} : vector<8x128xf32> to vector<8x32xf32>
    %2289 = arith.negf %2288 : vector<8x32xf32>
    %2290 = math.exp %2289 : vector<8x32xf32>
    %cst_1016 = arith.constant 1.000000e+00 : f32
    %2291 = vector.broadcast %cst_1016 : f32 to vector<8x32xf32>
    %2292 = arith.addf %2291, %2290 : vector<8x32xf32>
    %2293 = arith.divf %2291, %2292 : vector<8x32xf32>
    %2294 = arith.mulf %2285, %2093 : vector<8x32xf32>
    %2295 = arith.mulf %2279, %2287 : vector<8x32xf32>
    %2296 = arith.addf %2294, %2295 : vector<8x32xf32>
    %2297 = math.tanh %2296 : vector<8x32xf32>
    %2298 = arith.mulf %2293, %2297 : vector<8x32xf32>
    %2299 = arith.index_cast %c2_i32_930 : i32 to index
    %c0_1017 = arith.constant 0 : index
    %c0_1018 = arith.constant 0 : index
    %2300 = vector.load %arg12[%2299, %c0_1017, %c0_1018] : memref<8x8x32xf32, #tpu.memory_space<vmem>>, vector<1x8x32xf32>
    %2301 = vector.shape_cast %2300 : vector<1x8x32xf32> to vector<8x32xf32>
    %2302 = vector.shape_cast %2298 : vector<8x32xf32> to vector<1x8x32xf32>
    tpu.vector_store %arg12[%2299, %c0_1017, %c0_1018], %2302 {strides = array<i32>} : memref<8x8x32xf32, #tpu.memory_space<vmem>>, vector<1x8x32xf32>,
    %2303 = arith.truncf %2298 : vector<8x32xf32> to vector<8x32xbf16>
    %c3_i32_1019 = arith.constant 3 : i32
    %2304 = arith.index_cast %c3_i32_1019 : i32 to index
    %c0_1020 = arith.constant 0 : index
    %c0_1021 = arith.constant 0 : index
    %2305 = vector.load %arg13[%2304, %c0_1020, %c0_1021] : memref<8x8x128xf32, #tpu.memory_space<vmem>>, vector<1x8x128xf32>
    %2306 = vector.shape_cast %2305 : vector<1x8x128xf32> to vector<8x128xf32>
    %c0_i32_1022 = arith.constant 0 : i32
    %2307 = arith.addi %0, %c0_i32_1022 : i32
    %c8_i32_1023 = arith.constant 8 : i32
    %2308 = arith.muli %2307, %c8_i32_1023 : i32
    %2309 = arith.addi %2308, %c3_i32_1019 : i32
    %2310 = arith.index_cast %2309 : i32 to index
    %2311 = memref.load %arg1[%2310] : memref<64xi32, #tpu.memory_space<smem>>
    %c1_i32_1024 = arith.constant 1 : i32
    %2312 = arith.subi %2311, %c1_i32_1024 : i32
    %c0_i32_1025 = arith.constant 0 : i32
    %c7_i32_1026 = arith.constant 7 : i32
    %2313 = arith.maxsi %c0_i32_1025, %2312 : i32
    %2314 = arith.minsi %c7_i32_1026, %2313 : i32
    %2315 = arith.index_cast %2314 : i32 to index
    %c0_1027 = arith.constant 0 : index
    %c0_1028 = arith.constant 0 : index
    %2316 = vector.load %arg14[%2315, %c0_1027, %c0_1028] : memref<8x8x128xf32, #tpu.memory_space<vmem>>, vector<1x8x128xf32>
    %2317 = vector.shape_cast %2316 : vector<1x8x128xf32> to vector<8x128xf32>
    %c0_i32_1029 = arith.constant 0 : i32
    %2318 = arith.cmpi sgt, %2311, %c0_i32_1029 : i32
    %c0_i32_1030 = arith.constant 0 : i32
    %2319 = arith.cmpi sgt, %c3_i32_1019, %c0_i32_1030 : i32
    %2320 = arith.andi %2318, %2319 : i1
    %2321 = vector.broadcast %2320 : i1 to vector<8x1xi1>
    %2322 = arith.andi %3, %2321 : vector<8x1xi1>
    %cst_1031 = arith.constant 0.000000e+00 : f32
    %2323 = vector.shape_cast %2322 : vector<8x1xi1> to vector<8x1xi1>
    %2324 = vector.broadcast %2323 : vector<8x1xi1> to vector<8x128xi1>
    %2325 = vector.broadcast %cst_1031 : f32 to vector<8x128xf32>
    %2326 = arith.select %2324, %2317, %2325 : vector<8x128xi1>, vector<8x128xf32>
    %2327 = arith.addf %2306, %2326 : vector<8x128xf32>
    %c1_i32_1032 = arith.constant 1 : i32
    %2328 = arith.addi %0, %c1_i32_1032 : i32
    %c8_i32_1033 = arith.constant 8 : i32
    %2329 = arith.muli %2328, %c8_i32_1033 : i32
    %2330 = arith.addi %2329, %c3_i32_1019 : i32
    %2331 = arith.index_cast %2330 : i32 to index
    %2332 = memref.load %arg1[%2331] : memref<64xi32, #tpu.memory_space<smem>>
    %c1_i32_1034 = arith.constant 1 : i32
    %2333 = arith.subi %2332, %c1_i32_1034 : i32
    %c0_i32_1035 = arith.constant 0 : i32
    %c7_i32_1036 = arith.constant 7 : i32
    %2334 = arith.maxsi %c0_i32_1035, %2333 : i32
    %2335 = arith.minsi %c7_i32_1036, %2334 : i32
    %2336 = arith.index_cast %2335 : i32 to index
    %c0_1037 = arith.constant 0 : index
    %c0_1038 = arith.constant 0 : index
    %2337 = vector.load %arg14[%2336, %c0_1037, %c0_1038] : memref<8x8x128xf32, #tpu.memory_space<vmem>>, vector<1x8x128xf32>
    %2338 = vector.shape_cast %2337 : vector<1x8x128xf32> to vector<8x128xf32>
    %c0_i32_1039 = arith.constant 0 : i32
    %2339 = arith.cmpi sgt, %2332, %c0_i32_1039 : i32
    %c0_i32_1040 = arith.constant 0 : i32
    %2340 = arith.cmpi sgt, %c3_i32_1019, %c0_i32_1040 : i32
    %2341 = arith.andi %2339, %2340 : i1
    %2342 = vector.broadcast %2341 : i1 to vector<8x1xi1>
    %2343 = arith.andi %6, %2342 : vector<8x1xi1>
    %cst_1041 = arith.constant 0.000000e+00 : f32
    %2344 = vector.shape_cast %2343 : vector<8x1xi1> to vector<8x1xi1>
    %2345 = vector.broadcast %2344 : vector<8x1xi1> to vector<8x128xi1>
    %2346 = vector.broadcast %cst_1041 : f32 to vector<8x128xf32>
    %2347 = arith.select %2345, %2338, %2346 : vector<8x128xi1>, vector<8x128xf32>
    %2348 = arith.addf %2327, %2347 : vector<8x128xf32>
    %c2_i32_1042 = arith.constant 2 : i32
    %2349 = arith.addi %0, %c2_i32_1042 : i32
    %c8_i32_1043 = arith.constant 8 : i32
    %2350 = arith.muli %2349, %c8_i32_1043 : i32
    %2351 = arith.addi %2350, %c3_i32_1019 : i32
    %2352 = arith.index_cast %2351 : i32 to index
    %2353 = memref.load %arg1[%2352] : memref<64xi32, #tpu.memory_space<smem>>
    %c1_i32_1044 = arith.constant 1 : i32
    %2354 = arith.subi %2353, %c1_i32_1044 : i32
    %c0_i32_1045 = arith.constant 0 : i32
    %c7_i32_1046 = arith.constant 7 : i32
    %2355 = arith.maxsi %c0_i32_1045, %2354 : i32
    %2356 = arith.minsi %c7_i32_1046, %2355 : i32
    %2357 = arith.index_cast %2356 : i32 to index
    %c0_1047 = arith.constant 0 : index
    %c0_1048 = arith.constant 0 : index
    %2358 = vector.load %arg14[%2357, %c0_1047, %c0_1048] : memref<8x8x128xf32, #tpu.memory_space<vmem>>, vector<1x8x128xf32>
    %2359 = vector.shape_cast %2358 : vector<1x8x128xf32> to vector<8x128xf32>
    %c0_i32_1049 = arith.constant 0 : i32
    %2360 = arith.cmpi sgt, %2353, %c0_i32_1049 : i32
    %c0_i32_1050 = arith.constant 0 : i32
    %2361 = arith.cmpi sgt, %c3_i32_1019, %c0_i32_1050 : i32
    %2362 = arith.andi %2360, %2361 : i1
    %2363 = vector.broadcast %2362 : i1 to vector<8x1xi1>
    %2364 = arith.andi %9, %2363 : vector<8x1xi1>
    %cst_1051 = arith.constant 0.000000e+00 : f32
    %2365 = vector.shape_cast %2364 : vector<8x1xi1> to vector<8x1xi1>
    %2366 = vector.broadcast %2365 : vector<8x1xi1> to vector<8x128xi1>
    %2367 = vector.broadcast %cst_1051 : f32 to vector<8x128xf32>
    %2368 = arith.select %2366, %2359, %2367 : vector<8x128xi1>, vector<8x128xf32>
    %2369 = arith.addf %2348, %2368 : vector<8x128xf32>
    %c3_i32_1052 = arith.constant 3 : i32
    %2370 = arith.addi %0, %c3_i32_1052 : i32
    %c8_i32_1053 = arith.constant 8 : i32
    %2371 = arith.muli %2370, %c8_i32_1053 : i32
    %2372 = arith.addi %2371, %c3_i32_1019 : i32
    %2373 = arith.index_cast %2372 : i32 to index
    %2374 = memref.load %arg1[%2373] : memref<64xi32, #tpu.memory_space<smem>>
    %c1_i32_1054 = arith.constant 1 : i32
    %2375 = arith.subi %2374, %c1_i32_1054 : i32
    %c0_i32_1055 = arith.constant 0 : i32
    %c7_i32_1056 = arith.constant 7 : i32
    %2376 = arith.maxsi %c0_i32_1055, %2375 : i32
    %2377 = arith.minsi %c7_i32_1056, %2376 : i32
    %2378 = arith.index_cast %2377 : i32 to index
    %c0_1057 = arith.constant 0 : index
    %c0_1058 = arith.constant 0 : index
    %2379 = vector.load %arg14[%2378, %c0_1057, %c0_1058] : memref<8x8x128xf32, #tpu.memory_space<vmem>>, vector<1x8x128xf32>
    %2380 = vector.shape_cast %2379 : vector<1x8x128xf32> to vector<8x128xf32>
    %c0_i32_1059 = arith.constant 0 : i32
    %2381 = arith.cmpi sgt, %2374, %c0_i32_1059 : i32
    %c0_i32_1060 = arith.constant 0 : i32
    %2382 = arith.cmpi sgt, %c3_i32_1019, %c0_i32_1060 : i32
    %2383 = arith.andi %2381, %2382 : i1
    %2384 = vector.broadcast %2383 : i1 to vector<8x1xi1>
    %2385 = arith.andi %12, %2384 : vector<8x1xi1>
    %cst_1061 = arith.constant 0.000000e+00 : f32
    %2386 = vector.shape_cast %2385 : vector<8x1xi1> to vector<8x1xi1>
    %2387 = vector.broadcast %2386 : vector<8x1xi1> to vector<8x128xi1>
    %2388 = vector.broadcast %cst_1061 : f32 to vector<8x128xf32>
    %2389 = arith.select %2387, %2380, %2388 : vector<8x128xi1>, vector<8x128xf32>
    %2390 = arith.addf %2369, %2389 : vector<8x128xf32>
    %c4_i32_1062 = arith.constant 4 : i32
    %2391 = arith.addi %0, %c4_i32_1062 : i32
    %c8_i32_1063 = arith.constant 8 : i32
    %2392 = arith.muli %2391, %c8_i32_1063 : i32
    %2393 = arith.addi %2392, %c3_i32_1019 : i32
    %2394 = arith.index_cast %2393 : i32 to index
    %2395 = memref.load %arg1[%2394] : memref<64xi32, #tpu.memory_space<smem>>
    %c1_i32_1064 = arith.constant 1 : i32
    %2396 = arith.subi %2395, %c1_i32_1064 : i32
    %c0_i32_1065 = arith.constant 0 : i32
    %c7_i32_1066 = arith.constant 7 : i32
    %2397 = arith.maxsi %c0_i32_1065, %2396 : i32
    %2398 = arith.minsi %c7_i32_1066, %2397 : i32
    %2399 = arith.index_cast %2398 : i32 to index
    %c0_1067 = arith.constant 0 : index
    %c0_1068 = arith.constant 0 : index
    %2400 = vector.load %arg14[%2399, %c0_1067, %c0_1068] : memref<8x8x128xf32, #tpu.memory_space<vmem>>, vector<1x8x128xf32>
    %2401 = vector.shape_cast %2400 : vector<1x8x128xf32> to vector<8x128xf32>
    %c0_i32_1069 = arith.constant 0 : i32
    %2402 = arith.cmpi sgt, %2395, %c0_i32_1069 : i32
    %c0_i32_1070 = arith.constant 0 : i32
    %2403 = arith.cmpi sgt, %c3_i32_1019, %c0_i32_1070 : i32
    %2404 = arith.andi %2402, %2403 : i1
    %2405 = vector.broadcast %2404 : i1 to vector<8x1xi1>
    %2406 = arith.andi %15, %2405 : vector<8x1xi1>
    %cst_1071 = arith.constant 0.000000e+00 : f32
    %2407 = vector.shape_cast %2406 : vector<8x1xi1> to vector<8x1xi1>
    %2408 = vector.broadcast %2407 : vector<8x1xi1> to vector<8x128xi1>
    %2409 = vector.broadcast %cst_1071 : f32 to vector<8x128xf32>
    %2410 = arith.select %2408, %2401, %2409 : vector<8x128xi1>, vector<8x128xf32>
    %2411 = arith.addf %2390, %2410 : vector<8x128xf32>
    %c5_i32_1072 = arith.constant 5 : i32
    %2412 = arith.addi %0, %c5_i32_1072 : i32
    %c8_i32_1073 = arith.constant 8 : i32
    %2413 = arith.muli %2412, %c8_i32_1073 : i32
    %2414 = arith.addi %2413, %c3_i32_1019 : i32
    %2415 = arith.index_cast %2414 : i32 to index
    %2416 = memref.load %arg1[%2415] : memref<64xi32, #tpu.memory_space<smem>>
    %c1_i32_1074 = arith.constant 1 : i32
    %2417 = arith.subi %2416, %c1_i32_1074 : i32
    %c0_i32_1075 = arith.constant 0 : i32
    %c7_i32_1076 = arith.constant 7 : i32
    %2418 = arith.maxsi %c0_i32_1075, %2417 : i32
    %2419 = arith.minsi %c7_i32_1076, %2418 : i32
    %2420 = arith.index_cast %2419 : i32 to index
    %c0_1077 = arith.constant 0 : index
    %c0_1078 = arith.constant 0 : index
    %2421 = vector.load %arg14[%2420, %c0_1077, %c0_1078] : memref<8x8x128xf32, #tpu.memory_space<vmem>>, vector<1x8x128xf32>
    %2422 = vector.shape_cast %2421 : vector<1x8x128xf32> to vector<8x128xf32>
    %c0_i32_1079 = arith.constant 0 : i32
    %2423 = arith.cmpi sgt, %2416, %c0_i32_1079 : i32
    %c0_i32_1080 = arith.constant 0 : i32
    %2424 = arith.cmpi sgt, %c3_i32_1019, %c0_i32_1080 : i32
    %2425 = arith.andi %2423, %2424 : i1
    %2426 = vector.broadcast %2425 : i1 to vector<8x1xi1>
    %2427 = arith.andi %18, %2426 : vector<8x1xi1>
    %cst_1081 = arith.constant 0.000000e+00 : f32
    %2428 = vector.shape_cast %2427 : vector<8x1xi1> to vector<8x1xi1>
    %2429 = vector.broadcast %2428 : vector<8x1xi1> to vector<8x128xi1>
    %2430 = vector.broadcast %cst_1081 : f32 to vector<8x128xf32>
    %2431 = arith.select %2429, %2422, %2430 : vector<8x128xi1>, vector<8x128xf32>
    %2432 = arith.addf %2411, %2431 : vector<8x128xf32>
    %c6_i32_1082 = arith.constant 6 : i32
    %2433 = arith.addi %0, %c6_i32_1082 : i32
    %c8_i32_1083 = arith.constant 8 : i32
    %2434 = arith.muli %2433, %c8_i32_1083 : i32
    %2435 = arith.addi %2434, %c3_i32_1019 : i32
    %2436 = arith.index_cast %2435 : i32 to index
    %2437 = memref.load %arg1[%2436] : memref<64xi32, #tpu.memory_space<smem>>
    %c1_i32_1084 = arith.constant 1 : i32
    %2438 = arith.subi %2437, %c1_i32_1084 : i32
    %c0_i32_1085 = arith.constant 0 : i32
    %c7_i32_1086 = arith.constant 7 : i32
    %2439 = arith.maxsi %c0_i32_1085, %2438 : i32
    %2440 = arith.minsi %c7_i32_1086, %2439 : i32
    %2441 = arith.index_cast %2440 : i32 to index
    %c0_1087 = arith.constant 0 : index
    %c0_1088 = arith.constant 0 : index
    %2442 = vector.load %arg14[%2441, %c0_1087, %c0_1088] : memref<8x8x128xf32, #tpu.memory_space<vmem>>, vector<1x8x128xf32>
    %2443 = vector.shape_cast %2442 : vector<1x8x128xf32> to vector<8x128xf32>
    %c0_i32_1089 = arith.constant 0 : i32
    %2444 = arith.cmpi sgt, %2437, %c0_i32_1089 : i32
    %c0_i32_1090 = arith.constant 0 : i32
    %2445 = arith.cmpi sgt, %c3_i32_1019, %c0_i32_1090 : i32
    %2446 = arith.andi %2444, %2445 : i1
    %2447 = vector.broadcast %2446 : i1 to vector<8x1xi1>
    %2448 = arith.andi %21, %2447 : vector<8x1xi1>
    %cst_1091 = arith.constant 0.000000e+00 : f32
    %2449 = vector.shape_cast %2448 : vector<8x1xi1> to vector<8x1xi1>
    %2450 = vector.broadcast %2449 : vector<8x1xi1> to vector<8x128xi1>
    %2451 = vector.broadcast %cst_1091 : f32 to vector<8x128xf32>
    %2452 = arith.select %2450, %2443, %2451 : vector<8x128xi1>, vector<8x128xf32>
    %2453 = arith.addf %2432, %2452 : vector<8x128xf32>
    %c7_i32_1092 = arith.constant 7 : i32
    %2454 = arith.addi %0, %c7_i32_1092 : i32
    %c8_i32_1093 = arith.constant 8 : i32
    %2455 = arith.muli %2454, %c8_i32_1093 : i32
    %2456 = arith.addi %2455, %c3_i32_1019 : i32
    %2457 = arith.index_cast %2456 : i32 to index
    %2458 = memref.load %arg1[%2457] : memref<64xi32, #tpu.memory_space<smem>>
    %c1_i32_1094 = arith.constant 1 : i32
    %2459 = arith.subi %2458, %c1_i32_1094 : i32
    %c0_i32_1095 = arith.constant 0 : i32
    %c7_i32_1096 = arith.constant 7 : i32
    %2460 = arith.maxsi %c0_i32_1095, %2459 : i32
    %2461 = arith.minsi %c7_i32_1096, %2460 : i32
    %2462 = arith.index_cast %2461 : i32 to index
    %c0_1097 = arith.constant 0 : index
    %c0_1098 = arith.constant 0 : index
    %2463 = vector.load %arg14[%2462, %c0_1097, %c0_1098] : memref<8x8x128xf32, #tpu.memory_space<vmem>>, vector<1x8x128xf32>
    %2464 = vector.shape_cast %2463 : vector<1x8x128xf32> to vector<8x128xf32>
    %c0_i32_1099 = arith.constant 0 : i32
    %2465 = arith.cmpi sgt, %2458, %c0_i32_1099 : i32
    %c0_i32_1100 = arith.constant 0 : i32
    %2466 = arith.cmpi sgt, %c3_i32_1019, %c0_i32_1100 : i32
    %2467 = arith.andi %2465, %2466 : i1
    %2468 = vector.broadcast %2467 : i1 to vector<8x1xi1>
    %2469 = arith.andi %24, %2468 : vector<8x1xi1>
    %cst_1101 = arith.constant 0.000000e+00 : f32
    %2470 = vector.shape_cast %2469 : vector<8x1xi1> to vector<8x1xi1>
    %2471 = vector.broadcast %2470 : vector<8x1xi1> to vector<8x128xi1>
    %2472 = vector.broadcast %cst_1101 : f32 to vector<8x128xf32>
    %2473 = arith.select %2471, %2464, %2472 : vector<8x128xi1>, vector<8x128xf32>
    %2474 = arith.addf %2453, %2473 : vector<8x128xf32>
    %cst_1102 = arith.constant dense<0.000000e+00> : vector<8x128xf32>
    %2475 = tpu.matmul %2303, %1692, %cst_1102 {dimension_numbers = #tpu.dot_dimension_numbers<[1], [0], [0], [1], [0, 0, 1, 1], [], []>} : vector<8x32xbf16>, vector<32x128xbf16>, vector<8x128xf32> -> vector<8x128xf32>
    %2476 = arith.addf %2474, %2475 : vector<8x128xf32>
    %2477 = vector.extract_strided_slice %2476 {offsets = [0, 0], sizes = [8, 32], strides = [1, 1]} : vector<8x128xf32> to vector<8x32xf32>
    %2478 = arith.negf %2477 : vector<8x32xf32>
    %2479 = math.exp %2478 : vector<8x32xf32>
    %cst_1103 = arith.constant 1.000000e+00 : f32
    %2480 = vector.broadcast %cst_1103 : f32 to vector<8x32xf32>
    %2481 = arith.addf %2480, %2479 : vector<8x32xf32>
    %2482 = arith.divf %2480, %2481 : vector<8x32xf32>
    %2483 = vector.extract_strided_slice %2476 {offsets = [0, 32], sizes = [8, 32], strides = [1, 1]} : vector<8x128xf32> to vector<8x32xf32>
    %2484 = arith.negf %2483 : vector<8x32xf32>
    %2485 = math.exp %2484 : vector<8x32xf32>
    %cst_1104 = arith.constant 1.000000e+00 : f32
    %2486 = vector.broadcast %cst_1104 : f32 to vector<8x32xf32>
    %2487 = arith.addf %2486, %2485 : vector<8x32xf32>
    %2488 = arith.divf %2486, %2487 : vector<8x32xf32>
    %2489 = vector.extract_strided_slice %2476 {offsets = [0, 64], sizes = [8, 32], strides = [1, 1]} : vector<8x128xf32> to vector<8x32xf32>
    %2490 = math.tanh %2489 : vector<8x32xf32>
    %2491 = vector.extract_strided_slice %2476 {offsets = [0, 96], sizes = [8, 32], strides = [1, 1]} : vector<8x128xf32> to vector<8x32xf32>
    %2492 = arith.negf %2491 : vector<8x32xf32>
    %2493 = math.exp %2492 : vector<8x32xf32>
    %cst_1105 = arith.constant 1.000000e+00 : f32
    %2494 = vector.broadcast %cst_1105 : f32 to vector<8x32xf32>
    %2495 = arith.addf %2494, %2493 : vector<8x32xf32>
    %2496 = arith.divf %2494, %2495 : vector<8x32xf32>
    %2497 = arith.mulf %2488, %2296 : vector<8x32xf32>
    %2498 = arith.mulf %2482, %2490 : vector<8x32xf32>
    %2499 = arith.addf %2497, %2498 : vector<8x32xf32>
    %2500 = math.tanh %2499 : vector<8x32xf32>
    %2501 = arith.mulf %2496, %2500 : vector<8x32xf32>
    %2502 = arith.index_cast %c3_i32_1019 : i32 to index
    %c0_1106 = arith.constant 0 : index
    %c0_1107 = arith.constant 0 : index
    %2503 = vector.load %arg12[%2502, %c0_1106, %c0_1107] : memref<8x8x32xf32, #tpu.memory_space<vmem>>, vector<1x8x32xf32>
    %2504 = vector.shape_cast %2503 : vector<1x8x32xf32> to vector<8x32xf32>
    %2505 = vector.shape_cast %2501 : vector<8x32xf32> to vector<1x8x32xf32>
    tpu.vector_store %arg12[%2502, %c0_1106, %c0_1107], %2505 {strides = array<i32>} : memref<8x8x32xf32, #tpu.memory_space<vmem>>, vector<1x8x32xf32>,
    %2506 = arith.truncf %2501 : vector<8x32xf32> to vector<8x32xbf16>
    %c4_i32_1108 = arith.constant 4 : i32
    %2507 = arith.index_cast %c4_i32_1108 : i32 to index
    %c0_1109 = arith.constant 0 : index
    %c0_1110 = arith.constant 0 : index
    %2508 = vector.load %arg13[%2507, %c0_1109, %c0_1110] : memref<8x8x128xf32, #tpu.memory_space<vmem>>, vector<1x8x128xf32>
    %2509 = vector.shape_cast %2508 : vector<1x8x128xf32> to vector<8x128xf32>
    %c0_i32_1111 = arith.constant 0 : i32
    %2510 = arith.addi %0, %c0_i32_1111 : i32
    %c8_i32_1112 = arith.constant 8 : i32
    %2511 = arith.muli %2510, %c8_i32_1112 : i32
    %2512 = arith.addi %2511, %c4_i32_1108 : i32
    %2513 = arith.index_cast %2512 : i32 to index
    %2514 = memref.load %arg1[%2513] : memref<64xi32, #tpu.memory_space<smem>>
    %c1_i32_1113 = arith.constant 1 : i32
    %2515 = arith.subi %2514, %c1_i32_1113 : i32
    %c0_i32_1114 = arith.constant 0 : i32
    %c7_i32_1115 = arith.constant 7 : i32
    %2516 = arith.maxsi %c0_i32_1114, %2515 : i32
    %2517 = arith.minsi %c7_i32_1115, %2516 : i32
    %2518 = arith.index_cast %2517 : i32 to index
    %c0_1116 = arith.constant 0 : index
    %c0_1117 = arith.constant 0 : index
    %2519 = vector.load %arg14[%2518, %c0_1116, %c0_1117] : memref<8x8x128xf32, #tpu.memory_space<vmem>>, vector<1x8x128xf32>
    %2520 = vector.shape_cast %2519 : vector<1x8x128xf32> to vector<8x128xf32>
    %c0_i32_1118 = arith.constant 0 : i32
    %2521 = arith.cmpi sgt, %2514, %c0_i32_1118 : i32
    %c0_i32_1119 = arith.constant 0 : i32
    %2522 = arith.cmpi sgt, %c4_i32_1108, %c0_i32_1119 : i32
    %2523 = arith.andi %2521, %2522 : i1
    %2524 = vector.broadcast %2523 : i1 to vector<8x1xi1>
    %2525 = arith.andi %3, %2524 : vector<8x1xi1>
    %cst_1120 = arith.constant 0.000000e+00 : f32
    %2526 = vector.shape_cast %2525 : vector<8x1xi1> to vector<8x1xi1>
    %2527 = vector.broadcast %2526 : vector<8x1xi1> to vector<8x128xi1>
    %2528 = vector.broadcast %cst_1120 : f32 to vector<8x128xf32>
    %2529 = arith.select %2527, %2520, %2528 : vector<8x128xi1>, vector<8x128xf32>
    %2530 = arith.addf %2509, %2529 : vector<8x128xf32>
    %c1_i32_1121 = arith.constant 1 : i32
    %2531 = arith.addi %0, %c1_i32_1121 : i32
    %c8_i32_1122 = arith.constant 8 : i32
    %2532 = arith.muli %2531, %c8_i32_1122 : i32
    %2533 = arith.addi %2532, %c4_i32_1108 : i32
    %2534 = arith.index_cast %2533 : i32 to index
    %2535 = memref.load %arg1[%2534] : memref<64xi32, #tpu.memory_space<smem>>
    %c1_i32_1123 = arith.constant 1 : i32
    %2536 = arith.subi %2535, %c1_i32_1123 : i32
    %c0_i32_1124 = arith.constant 0 : i32
    %c7_i32_1125 = arith.constant 7 : i32
    %2537 = arith.maxsi %c0_i32_1124, %2536 : i32
    %2538 = arith.minsi %c7_i32_1125, %2537 : i32
    %2539 = arith.index_cast %2538 : i32 to index
    %c0_1126 = arith.constant 0 : index
    %c0_1127 = arith.constant 0 : index
    %2540 = vector.load %arg14[%2539, %c0_1126, %c0_1127] : memref<8x8x128xf32, #tpu.memory_space<vmem>>, vector<1x8x128xf32>
    %2541 = vector.shape_cast %2540 : vector<1x8x128xf32> to vector<8x128xf32>
    %c0_i32_1128 = arith.constant 0 : i32
    %2542 = arith.cmpi sgt, %2535, %c0_i32_1128 : i32
    %c0_i32_1129 = arith.constant 0 : i32
    %2543 = arith.cmpi sgt, %c4_i32_1108, %c0_i32_1129 : i32
    %2544 = arith.andi %2542, %2543 : i1
    %2545 = vector.broadcast %2544 : i1 to vector<8x1xi1>
    %2546 = arith.andi %6, %2545 : vector<8x1xi1>
    %cst_1130 = arith.constant 0.000000e+00 : f32
    %2547 = vector.shape_cast %2546 : vector<8x1xi1> to vector<8x1xi1>
    %2548 = vector.broadcast %2547 : vector<8x1xi1> to vector<8x128xi1>
    %2549 = vector.broadcast %cst_1130 : f32 to vector<8x128xf32>
    %2550 = arith.select %2548, %2541, %2549 : vector<8x128xi1>, vector<8x128xf32>
    %2551 = arith.addf %2530, %2550 : vector<8x128xf32>
    %c2_i32_1131 = arith.constant 2 : i32
    %2552 = arith.addi %0, %c2_i32_1131 : i32
    %c8_i32_1132 = arith.constant 8 : i32
    %2553 = arith.muli %2552, %c8_i32_1132 : i32
    %2554 = arith.addi %2553, %c4_i32_1108 : i32
    %2555 = arith.index_cast %2554 : i32 to index
    %2556 = memref.load %arg1[%2555] : memref<64xi32, #tpu.memory_space<smem>>
    %c1_i32_1133 = arith.constant 1 : i32
    %2557 = arith.subi %2556, %c1_i32_1133 : i32
    %c0_i32_1134 = arith.constant 0 : i32
    %c7_i32_1135 = arith.constant 7 : i32
    %2558 = arith.maxsi %c0_i32_1134, %2557 : i32
    %2559 = arith.minsi %c7_i32_1135, %2558 : i32
    %2560 = arith.index_cast %2559 : i32 to index
    %c0_1136 = arith.constant 0 : index
    %c0_1137 = arith.constant 0 : index
    %2561 = vector.load %arg14[%2560, %c0_1136, %c0_1137] : memref<8x8x128xf32, #tpu.memory_space<vmem>>, vector<1x8x128xf32>
    %2562 = vector.shape_cast %2561 : vector<1x8x128xf32> to vector<8x128xf32>
    %c0_i32_1138 = arith.constant 0 : i32
    %2563 = arith.cmpi sgt, %2556, %c0_i32_1138 : i32
    %c0_i32_1139 = arith.constant 0 : i32
    %2564 = arith.cmpi sgt, %c4_i32_1108, %c0_i32_1139 : i32
    %2565 = arith.andi %2563, %2564 : i1
    %2566 = vector.broadcast %2565 : i1 to vector<8x1xi1>
    %2567 = arith.andi %9, %2566 : vector<8x1xi1>
    %cst_1140 = arith.constant 0.000000e+00 : f32
    %2568 = vector.shape_cast %2567 : vector<8x1xi1> to vector<8x1xi1>
    %2569 = vector.broadcast %2568 : vector<8x1xi1> to vector<8x128xi1>
    %2570 = vector.broadcast %cst_1140 : f32 to vector<8x128xf32>
    %2571 = arith.select %2569, %2562, %2570 : vector<8x128xi1>, vector<8x128xf32>
    %2572 = arith.addf %2551, %2571 : vector<8x128xf32>
    %c3_i32_1141 = arith.constant 3 : i32
    %2573 = arith.addi %0, %c3_i32_1141 : i32
    %c8_i32_1142 = arith.constant 8 : i32
    %2574 = arith.muli %2573, %c8_i32_1142 : i32
    %2575 = arith.addi %2574, %c4_i32_1108 : i32
    %2576 = arith.index_cast %2575 : i32 to index
    %2577 = memref.load %arg1[%2576] : memref<64xi32, #tpu.memory_space<smem>>
    %c1_i32_1143 = arith.constant 1 : i32
    %2578 = arith.subi %2577, %c1_i32_1143 : i32
    %c0_i32_1144 = arith.constant 0 : i32
    %c7_i32_1145 = arith.constant 7 : i32
    %2579 = arith.maxsi %c0_i32_1144, %2578 : i32
    %2580 = arith.minsi %c7_i32_1145, %2579 : i32
    %2581 = arith.index_cast %2580 : i32 to index
    %c0_1146 = arith.constant 0 : index
    %c0_1147 = arith.constant 0 : index
    %2582 = vector.load %arg14[%2581, %c0_1146, %c0_1147] : memref<8x8x128xf32, #tpu.memory_space<vmem>>, vector<1x8x128xf32>
    %2583 = vector.shape_cast %2582 : vector<1x8x128xf32> to vector<8x128xf32>
    %c0_i32_1148 = arith.constant 0 : i32
    %2584 = arith.cmpi sgt, %2577, %c0_i32_1148 : i32
    %c0_i32_1149 = arith.constant 0 : i32
    %2585 = arith.cmpi sgt, %c4_i32_1108, %c0_i32_1149 : i32
    %2586 = arith.andi %2584, %2585 : i1
    %2587 = vector.broadcast %2586 : i1 to vector<8x1xi1>
    %2588 = arith.andi %12, %2587 : vector<8x1xi1>
    %cst_1150 = arith.constant 0.000000e+00 : f32
    %2589 = vector.shape_cast %2588 : vector<8x1xi1> to vector<8x1xi1>
    %2590 = vector.broadcast %2589 : vector<8x1xi1> to vector<8x128xi1>
    %2591 = vector.broadcast %cst_1150 : f32 to vector<8x128xf32>
    %2592 = arith.select %2590, %2583, %2591 : vector<8x128xi1>, vector<8x128xf32>
    %2593 = arith.addf %2572, %2592 : vector<8x128xf32>
    %c4_i32_1151 = arith.constant 4 : i32
    %2594 = arith.addi %0, %c4_i32_1151 : i32
    %c8_i32_1152 = arith.constant 8 : i32
    %2595 = arith.muli %2594, %c8_i32_1152 : i32
    %2596 = arith.addi %2595, %c4_i32_1108 : i32
    %2597 = arith.index_cast %2596 : i32 to index
    %2598 = memref.load %arg1[%2597] : memref<64xi32, #tpu.memory_space<smem>>
    %c1_i32_1153 = arith.constant 1 : i32
    %2599 = arith.subi %2598, %c1_i32_1153 : i32
    %c0_i32_1154 = arith.constant 0 : i32
    %c7_i32_1155 = arith.constant 7 : i32
    %2600 = arith.maxsi %c0_i32_1154, %2599 : i32
    %2601 = arith.minsi %c7_i32_1155, %2600 : i32
    %2602 = arith.index_cast %2601 : i32 to index
    %c0_1156 = arith.constant 0 : index
    %c0_1157 = arith.constant 0 : index
    %2603 = vector.load %arg14[%2602, %c0_1156, %c0_1157] : memref<8x8x128xf32, #tpu.memory_space<vmem>>, vector<1x8x128xf32>
    %2604 = vector.shape_cast %2603 : vector<1x8x128xf32> to vector<8x128xf32>
    %c0_i32_1158 = arith.constant 0 : i32
    %2605 = arith.cmpi sgt, %2598, %c0_i32_1158 : i32
    %c0_i32_1159 = arith.constant 0 : i32
    %2606 = arith.cmpi sgt, %c4_i32_1108, %c0_i32_1159 : i32
    %2607 = arith.andi %2605, %2606 : i1
    %2608 = vector.broadcast %2607 : i1 to vector<8x1xi1>
    %2609 = arith.andi %15, %2608 : vector<8x1xi1>
    %cst_1160 = arith.constant 0.000000e+00 : f32
    %2610 = vector.shape_cast %2609 : vector<8x1xi1> to vector<8x1xi1>
    %2611 = vector.broadcast %2610 : vector<8x1xi1> to vector<8x128xi1>
    %2612 = vector.broadcast %cst_1160 : f32 to vector<8x128xf32>
    %2613 = arith.select %2611, %2604, %2612 : vector<8x128xi1>, vector<8x128xf32>
    %2614 = arith.addf %2593, %2613 : vector<8x128xf32>
    %c5_i32_1161 = arith.constant 5 : i32
    %2615 = arith.addi %0, %c5_i32_1161 : i32
    %c8_i32_1162 = arith.constant 8 : i32
    %2616 = arith.muli %2615, %c8_i32_1162 : i32
    %2617 = arith.addi %2616, %c4_i32_1108 : i32
    %2618 = arith.index_cast %2617 : i32 to index
    %2619 = memref.load %arg1[%2618] : memref<64xi32, #tpu.memory_space<smem>>
    %c1_i32_1163 = arith.constant 1 : i32
    %2620 = arith.subi %2619, %c1_i32_1163 : i32
    %c0_i32_1164 = arith.constant 0 : i32
    %c7_i32_1165 = arith.constant 7 : i32
    %2621 = arith.maxsi %c0_i32_1164, %2620 : i32
    %2622 = arith.minsi %c7_i32_1165, %2621 : i32
    %2623 = arith.index_cast %2622 : i32 to index
    %c0_1166 = arith.constant 0 : index
    %c0_1167 = arith.constant 0 : index
    %2624 = vector.load %arg14[%2623, %c0_1166, %c0_1167] : memref<8x8x128xf32, #tpu.memory_space<vmem>>, vector<1x8x128xf32>
    %2625 = vector.shape_cast %2624 : vector<1x8x128xf32> to vector<8x128xf32>
    %c0_i32_1168 = arith.constant 0 : i32
    %2626 = arith.cmpi sgt, %2619, %c0_i32_1168 : i32
    %c0_i32_1169 = arith.constant 0 : i32
    %2627 = arith.cmpi sgt, %c4_i32_1108, %c0_i32_1169 : i32
    %2628 = arith.andi %2626, %2627 : i1
    %2629 = vector.broadcast %2628 : i1 to vector<8x1xi1>
    %2630 = arith.andi %18, %2629 : vector<8x1xi1>
    %cst_1170 = arith.constant 0.000000e+00 : f32
    %2631 = vector.shape_cast %2630 : vector<8x1xi1> to vector<8x1xi1>
    %2632 = vector.broadcast %2631 : vector<8x1xi1> to vector<8x128xi1>
    %2633 = vector.broadcast %cst_1170 : f32 to vector<8x128xf32>
    %2634 = arith.select %2632, %2625, %2633 : vector<8x128xi1>, vector<8x128xf32>
    %2635 = arith.addf %2614, %2634 : vector<8x128xf32>
    %c6_i32_1171 = arith.constant 6 : i32
    %2636 = arith.addi %0, %c6_i32_1171 : i32
    %c8_i32_1172 = arith.constant 8 : i32
    %2637 = arith.muli %2636, %c8_i32_1172 : i32
    %2638 = arith.addi %2637, %c4_i32_1108 : i32
    %2639 = arith.index_cast %2638 : i32 to index
    %2640 = memref.load %arg1[%2639] : memref<64xi32, #tpu.memory_space<smem>>
    %c1_i32_1173 = arith.constant 1 : i32
    %2641 = arith.subi %2640, %c1_i32_1173 : i32
    %c0_i32_1174 = arith.constant 0 : i32
    %c7_i32_1175 = arith.constant 7 : i32
    %2642 = arith.maxsi %c0_i32_1174, %2641 : i32
    %2643 = arith.minsi %c7_i32_1175, %2642 : i32
    %2644 = arith.index_cast %2643 : i32 to index
    %c0_1176 = arith.constant 0 : index
    %c0_1177 = arith.constant 0 : index
    %2645 = vector.load %arg14[%2644, %c0_1176, %c0_1177] : memref<8x8x128xf32, #tpu.memory_space<vmem>>, vector<1x8x128xf32>
    %2646 = vector.shape_cast %2645 : vector<1x8x128xf32> to vector<8x128xf32>
    %c0_i32_1178 = arith.constant 0 : i32
    %2647 = arith.cmpi sgt, %2640, %c0_i32_1178 : i32
    %c0_i32_1179 = arith.constant 0 : i32
    %2648 = arith.cmpi sgt, %c4_i32_1108, %c0_i32_1179 : i32
    %2649 = arith.andi %2647, %2648 : i1
    %2650 = vector.broadcast %2649 : i1 to vector<8x1xi1>
    %2651 = arith.andi %21, %2650 : vector<8x1xi1>
    %cst_1180 = arith.constant 0.000000e+00 : f32
    %2652 = vector.shape_cast %2651 : vector<8x1xi1> to vector<8x1xi1>
    %2653 = vector.broadcast %2652 : vector<8x1xi1> to vector<8x128xi1>
    %2654 = vector.broadcast %cst_1180 : f32 to vector<8x128xf32>
    %2655 = arith.select %2653, %2646, %2654 : vector<8x128xi1>, vector<8x128xf32>
    %2656 = arith.addf %2635, %2655 : vector<8x128xf32>
    %c7_i32_1181 = arith.constant 7 : i32
    %2657 = arith.addi %0, %c7_i32_1181 : i32
    %c8_i32_1182 = arith.constant 8 : i32
    %2658 = arith.muli %2657, %c8_i32_1182 : i32
    %2659 = arith.addi %2658, %c4_i32_1108 : i32
    %2660 = arith.index_cast %2659 : i32 to index
    %2661 = memref.load %arg1[%2660] : memref<64xi32, #tpu.memory_space<smem>>
    %c1_i32_1183 = arith.constant 1 : i32
    %2662 = arith.subi %2661, %c1_i32_1183 : i32
    %c0_i32_1184 = arith.constant 0 : i32
    %c7_i32_1185 = arith.constant 7 : i32
    %2663 = arith.maxsi %c0_i32_1184, %2662 : i32
    %2664 = arith.minsi %c7_i32_1185, %2663 : i32
    %2665 = arith.index_cast %2664 : i32 to index
    %c0_1186 = arith.constant 0 : index
    %c0_1187 = arith.constant 0 : index
    %2666 = vector.load %arg14[%2665, %c0_1186, %c0_1187] : memref<8x8x128xf32, #tpu.memory_space<vmem>>, vector<1x8x128xf32>
    %2667 = vector.shape_cast %2666 : vector<1x8x128xf32> to vector<8x128xf32>
    %c0_i32_1188 = arith.constant 0 : i32
    %2668 = arith.cmpi sgt, %2661, %c0_i32_1188 : i32
    %c0_i32_1189 = arith.constant 0 : i32
    %2669 = arith.cmpi sgt, %c4_i32_1108, %c0_i32_1189 : i32
    %2670 = arith.andi %2668, %2669 : i1
    %2671 = vector.broadcast %2670 : i1 to vector<8x1xi1>
    %2672 = arith.andi %24, %2671 : vector<8x1xi1>
    %cst_1190 = arith.constant 0.000000e+00 : f32
    %2673 = vector.shape_cast %2672 : vector<8x1xi1> to vector<8x1xi1>
    %2674 = vector.broadcast %2673 : vector<8x1xi1> to vector<8x128xi1>
    %2675 = vector.broadcast %cst_1190 : f32 to vector<8x128xf32>
    %2676 = arith.select %2674, %2667, %2675 : vector<8x128xi1>, vector<8x128xf32>
    %2677 = arith.addf %2656, %2676 : vector<8x128xf32>
    %cst_1191 = arith.constant dense<0.000000e+00> : vector<8x128xf32>
    %2678 = tpu.matmul %2506, %1692, %cst_1191 {dimension_numbers = #tpu.dot_dimension_numbers<[1], [0], [0], [1], [0, 0, 1, 1], [], []>} : vector<8x32xbf16>, vector<32x128xbf16>, vector<8x128xf32> -> vector<8x128xf32>
    %2679 = arith.addf %2677, %2678 : vector<8x128xf32>
    %2680 = vector.extract_strided_slice %2679 {offsets = [0, 0], sizes = [8, 32], strides = [1, 1]} : vector<8x128xf32> to vector<8x32xf32>
    %2681 = arith.negf %2680 : vector<8x32xf32>
    %2682 = math.exp %2681 : vector<8x32xf32>
    %cst_1192 = arith.constant 1.000000e+00 : f32
    %2683 = vector.broadcast %cst_1192 : f32 to vector<8x32xf32>
    %2684 = arith.addf %2683, %2682 : vector<8x32xf32>
    %2685 = arith.divf %2683, %2684 : vector<8x32xf32>
    %2686 = vector.extract_strided_slice %2679 {offsets = [0, 32], sizes = [8, 32], strides = [1, 1]} : vector<8x128xf32> to vector<8x32xf32>
    %2687 = arith.negf %2686 : vector<8x32xf32>
    %2688 = math.exp %2687 : vector<8x32xf32>
    %cst_1193 = arith.constant 1.000000e+00 : f32
    %2689 = vector.broadcast %cst_1193 : f32 to vector<8x32xf32>
    %2690 = arith.addf %2689, %2688 : vector<8x32xf32>
    %2691 = arith.divf %2689, %2690 : vector<8x32xf32>
    %2692 = vector.extract_strided_slice %2679 {offsets = [0, 64], sizes = [8, 32], strides = [1, 1]} : vector<8x128xf32> to vector<8x32xf32>
    %2693 = math.tanh %2692 : vector<8x32xf32>
    %2694 = vector.extract_strided_slice %2679 {offsets = [0, 96], sizes = [8, 32], strides = [1, 1]} : vector<8x128xf32> to vector<8x32xf32>
    %2695 = arith.negf %2694 : vector<8x32xf32>
    %2696 = math.exp %2695 : vector<8x32xf32>
    %cst_1194 = arith.constant 1.000000e+00 : f32
    %2697 = vector.broadcast %cst_1194 : f32 to vector<8x32xf32>
    %2698 = arith.addf %2697, %2696 : vector<8x32xf32>
    %2699 = arith.divf %2697, %2698 : vector<8x32xf32>
    %2700 = arith.mulf %2691, %2499 : vector<8x32xf32>
    %2701 = arith.mulf %2685, %2693 : vector<8x32xf32>
    %2702 = arith.addf %2700, %2701 : vector<8x32xf32>
    %2703 = math.tanh %2702 : vector<8x32xf32>
    %2704 = arith.mulf %2699, %2703 : vector<8x32xf32>
    %2705 = arith.index_cast %c4_i32_1108 : i32 to index
    %c0_1195 = arith.constant 0 : index
    %c0_1196 = arith.constant 0 : index
    %2706 = vector.load %arg12[%2705, %c0_1195, %c0_1196] : memref<8x8x32xf32, #tpu.memory_space<vmem>>, vector<1x8x32xf32>
    %2707 = vector.shape_cast %2706 : vector<1x8x32xf32> to vector<8x32xf32>
    %2708 = vector.shape_cast %2704 : vector<8x32xf32> to vector<1x8x32xf32>
    tpu.vector_store %arg12[%2705, %c0_1195, %c0_1196], %2708 {strides = array<i32>} : memref<8x8x32xf32, #tpu.memory_space<vmem>>, vector<1x8x32xf32>,
    %2709 = arith.truncf %2704 : vector<8x32xf32> to vector<8x32xbf16>
    %c5_i32_1197 = arith.constant 5 : i32
    %2710 = arith.index_cast %c5_i32_1197 : i32 to index
    %c0_1198 = arith.constant 0 : index
    %c0_1199 = arith.constant 0 : index
    %2711 = vector.load %arg13[%2710, %c0_1198, %c0_1199] : memref<8x8x128xf32, #tpu.memory_space<vmem>>, vector<1x8x128xf32>
    %2712 = vector.shape_cast %2711 : vector<1x8x128xf32> to vector<8x128xf32>
    %c0_i32_1200 = arith.constant 0 : i32
    %2713 = arith.addi %0, %c0_i32_1200 : i32
    %c8_i32_1201 = arith.constant 8 : i32
    %2714 = arith.muli %2713, %c8_i32_1201 : i32
    %2715 = arith.addi %2714, %c5_i32_1197 : i32
    %2716 = arith.index_cast %2715 : i32 to index
    %2717 = memref.load %arg1[%2716] : memref<64xi32, #tpu.memory_space<smem>>
    %c1_i32_1202 = arith.constant 1 : i32
    %2718 = arith.subi %2717, %c1_i32_1202 : i32
    %c0_i32_1203 = arith.constant 0 : i32
    %c7_i32_1204 = arith.constant 7 : i32
    %2719 = arith.maxsi %c0_i32_1203, %2718 : i32
    %2720 = arith.minsi %c7_i32_1204, %2719 : i32
    %2721 = arith.index_cast %2720 : i32 to index
    %c0_1205 = arith.constant 0 : index
    %c0_1206 = arith.constant 0 : index
    %2722 = vector.load %arg14[%2721, %c0_1205, %c0_1206] : memref<8x8x128xf32, #tpu.memory_space<vmem>>, vector<1x8x128xf32>
    %2723 = vector.shape_cast %2722 : vector<1x8x128xf32> to vector<8x128xf32>
    %c0_i32_1207 = arith.constant 0 : i32
    %2724 = arith.cmpi sgt, %2717, %c0_i32_1207 : i32
    %c0_i32_1208 = arith.constant 0 : i32
    %2725 = arith.cmpi sgt, %c5_i32_1197, %c0_i32_1208 : i32
    %2726 = arith.andi %2724, %2725 : i1
    %2727 = vector.broadcast %2726 : i1 to vector<8x1xi1>
    %2728 = arith.andi %3, %2727 : vector<8x1xi1>
    %cst_1209 = arith.constant 0.000000e+00 : f32
    %2729 = vector.shape_cast %2728 : vector<8x1xi1> to vector<8x1xi1>
    %2730 = vector.broadcast %2729 : vector<8x1xi1> to vector<8x128xi1>
    %2731 = vector.broadcast %cst_1209 : f32 to vector<8x128xf32>
    %2732 = arith.select %2730, %2723, %2731 : vector<8x128xi1>, vector<8x128xf32>
    %2733 = arith.addf %2712, %2732 : vector<8x128xf32>
    %c1_i32_1210 = arith.constant 1 : i32
    %2734 = arith.addi %0, %c1_i32_1210 : i32
    %c8_i32_1211 = arith.constant 8 : i32
    %2735 = arith.muli %2734, %c8_i32_1211 : i32
    %2736 = arith.addi %2735, %c5_i32_1197 : i32
    %2737 = arith.index_cast %2736 : i32 to index
    %2738 = memref.load %arg1[%2737] : memref<64xi32, #tpu.memory_space<smem>>
    %c1_i32_1212 = arith.constant 1 : i32
    %2739 = arith.subi %2738, %c1_i32_1212 : i32
    %c0_i32_1213 = arith.constant 0 : i32
    %c7_i32_1214 = arith.constant 7 : i32
    %2740 = arith.maxsi %c0_i32_1213, %2739 : i32
    %2741 = arith.minsi %c7_i32_1214, %2740 : i32
    %2742 = arith.index_cast %2741 : i32 to index
    %c0_1215 = arith.constant 0 : index
    %c0_1216 = arith.constant 0 : index
    %2743 = vector.load %arg14[%2742, %c0_1215, %c0_1216] : memref<8x8x128xf32, #tpu.memory_space<vmem>>, vector<1x8x128xf32>
    %2744 = vector.shape_cast %2743 : vector<1x8x128xf32> to vector<8x128xf32>
    %c0_i32_1217 = arith.constant 0 : i32
    %2745 = arith.cmpi sgt, %2738, %c0_i32_1217 : i32
    %c0_i32_1218 = arith.constant 0 : i32
    %2746 = arith.cmpi sgt, %c5_i32_1197, %c0_i32_1218 : i32
    %2747 = arith.andi %2745, %2746 : i1
    %2748 = vector.broadcast %2747 : i1 to vector<8x1xi1>
    %2749 = arith.andi %6, %2748 : vector<8x1xi1>
    %cst_1219 = arith.constant 0.000000e+00 : f32
    %2750 = vector.shape_cast %2749 : vector<8x1xi1> to vector<8x1xi1>
    %2751 = vector.broadcast %2750 : vector<8x1xi1> to vector<8x128xi1>
    %2752 = vector.broadcast %cst_1219 : f32 to vector<8x128xf32>
    %2753 = arith.select %2751, %2744, %2752 : vector<8x128xi1>, vector<8x128xf32>
    %2754 = arith.addf %2733, %2753 : vector<8x128xf32>
    %c2_i32_1220 = arith.constant 2 : i32
    %2755 = arith.addi %0, %c2_i32_1220 : i32
    %c8_i32_1221 = arith.constant 8 : i32
    %2756 = arith.muli %2755, %c8_i32_1221 : i32
    %2757 = arith.addi %2756, %c5_i32_1197 : i32
    %2758 = arith.index_cast %2757 : i32 to index
    %2759 = memref.load %arg1[%2758] : memref<64xi32, #tpu.memory_space<smem>>
    %c1_i32_1222 = arith.constant 1 : i32
    %2760 = arith.subi %2759, %c1_i32_1222 : i32
    %c0_i32_1223 = arith.constant 0 : i32
    %c7_i32_1224 = arith.constant 7 : i32
    %2761 = arith.maxsi %c0_i32_1223, %2760 : i32
    %2762 = arith.minsi %c7_i32_1224, %2761 : i32
    %2763 = arith.index_cast %2762 : i32 to index
    %c0_1225 = arith.constant 0 : index
    %c0_1226 = arith.constant 0 : index
    %2764 = vector.load %arg14[%2763, %c0_1225, %c0_1226] : memref<8x8x128xf32, #tpu.memory_space<vmem>>, vector<1x8x128xf32>
    %2765 = vector.shape_cast %2764 : vector<1x8x128xf32> to vector<8x128xf32>
    %c0_i32_1227 = arith.constant 0 : i32
    %2766 = arith.cmpi sgt, %2759, %c0_i32_1227 : i32
    %c0_i32_1228 = arith.constant 0 : i32
    %2767 = arith.cmpi sgt, %c5_i32_1197, %c0_i32_1228 : i32
    %2768 = arith.andi %2766, %2767 : i1
    %2769 = vector.broadcast %2768 : i1 to vector<8x1xi1>
    %2770 = arith.andi %9, %2769 : vector<8x1xi1>
    %cst_1229 = arith.constant 0.000000e+00 : f32
    %2771 = vector.shape_cast %2770 : vector<8x1xi1> to vector<8x1xi1>
    %2772 = vector.broadcast %2771 : vector<8x1xi1> to vector<8x128xi1>
    %2773 = vector.broadcast %cst_1229 : f32 to vector<8x128xf32>
    %2774 = arith.select %2772, %2765, %2773 : vector<8x128xi1>, vector<8x128xf32>
    %2775 = arith.addf %2754, %2774 : vector<8x128xf32>
    %c3_i32_1230 = arith.constant 3 : i32
    %2776 = arith.addi %0, %c3_i32_1230 : i32
    %c8_i32_1231 = arith.constant 8 : i32
    %2777 = arith.muli %2776, %c8_i32_1231 : i32
    %2778 = arith.addi %2777, %c5_i32_1197 : i32
    %2779 = arith.index_cast %2778 : i32 to index
    %2780 = memref.load %arg1[%2779] : memref<64xi32, #tpu.memory_space<smem>>
    %c1_i32_1232 = arith.constant 1 : i32
    %2781 = arith.subi %2780, %c1_i32_1232 : i32
    %c0_i32_1233 = arith.constant 0 : i32
    %c7_i32_1234 = arith.constant 7 : i32
    %2782 = arith.maxsi %c0_i32_1233, %2781 : i32
    %2783 = arith.minsi %c7_i32_1234, %2782 : i32
    %2784 = arith.index_cast %2783 : i32 to index
    %c0_1235 = arith.constant 0 : index
    %c0_1236 = arith.constant 0 : index
    %2785 = vector.load %arg14[%2784, %c0_1235, %c0_1236] : memref<8x8x128xf32, #tpu.memory_space<vmem>>, vector<1x8x128xf32>
    %2786 = vector.shape_cast %2785 : vector<1x8x128xf32> to vector<8x128xf32>
    %c0_i32_1237 = arith.constant 0 : i32
    %2787 = arith.cmpi sgt, %2780, %c0_i32_1237 : i32
    %c0_i32_1238 = arith.constant 0 : i32
    %2788 = arith.cmpi sgt, %c5_i32_1197, %c0_i32_1238 : i32
    %2789 = arith.andi %2787, %2788 : i1
    %2790 = vector.broadcast %2789 : i1 to vector<8x1xi1>
    %2791 = arith.andi %12, %2790 : vector<8x1xi1>
    %cst_1239 = arith.constant 0.000000e+00 : f32
    %2792 = vector.shape_cast %2791 : vector<8x1xi1> to vector<8x1xi1>
    %2793 = vector.broadcast %2792 : vector<8x1xi1> to vector<8x128xi1>
    %2794 = vector.broadcast %cst_1239 : f32 to vector<8x128xf32>
    %2795 = arith.select %2793, %2786, %2794 : vector<8x128xi1>, vector<8x128xf32>
    %2796 = arith.addf %2775, %2795 : vector<8x128xf32>
    %c4_i32_1240 = arith.constant 4 : i32
    %2797 = arith.addi %0, %c4_i32_1240 : i32
    %c8_i32_1241 = arith.constant 8 : i32
    %2798 = arith.muli %2797, %c8_i32_1241 : i32
    %2799 = arith.addi %2798, %c5_i32_1197 : i32
    %2800 = arith.index_cast %2799 : i32 to index
    %2801 = memref.load %arg1[%2800] : memref<64xi32, #tpu.memory_space<smem>>
    %c1_i32_1242 = arith.constant 1 : i32
    %2802 = arith.subi %2801, %c1_i32_1242 : i32
    %c0_i32_1243 = arith.constant 0 : i32
    %c7_i32_1244 = arith.constant 7 : i32
    %2803 = arith.maxsi %c0_i32_1243, %2802 : i32
    %2804 = arith.minsi %c7_i32_1244, %2803 : i32
    %2805 = arith.index_cast %2804 : i32 to index
    %c0_1245 = arith.constant 0 : index
    %c0_1246 = arith.constant 0 : index
    %2806 = vector.load %arg14[%2805, %c0_1245, %c0_1246] : memref<8x8x128xf32, #tpu.memory_space<vmem>>, vector<1x8x128xf32>
    %2807 = vector.shape_cast %2806 : vector<1x8x128xf32> to vector<8x128xf32>
    %c0_i32_1247 = arith.constant 0 : i32
    %2808 = arith.cmpi sgt, %2801, %c0_i32_1247 : i32
    %c0_i32_1248 = arith.constant 0 : i32
    %2809 = arith.cmpi sgt, %c5_i32_1197, %c0_i32_1248 : i32
    %2810 = arith.andi %2808, %2809 : i1
    %2811 = vector.broadcast %2810 : i1 to vector<8x1xi1>
    %2812 = arith.andi %15, %2811 : vector<8x1xi1>
    %cst_1249 = arith.constant 0.000000e+00 : f32
    %2813 = vector.shape_cast %2812 : vector<8x1xi1> to vector<8x1xi1>
    %2814 = vector.broadcast %2813 : vector<8x1xi1> to vector<8x128xi1>
    %2815 = vector.broadcast %cst_1249 : f32 to vector<8x128xf32>
    %2816 = arith.select %2814, %2807, %2815 : vector<8x128xi1>, vector<8x128xf32>
    %2817 = arith.addf %2796, %2816 : vector<8x128xf32>
    %c5_i32_1250 = arith.constant 5 : i32
    %2818 = arith.addi %0, %c5_i32_1250 : i32
    %c8_i32_1251 = arith.constant 8 : i32
    %2819 = arith.muli %2818, %c8_i32_1251 : i32
    %2820 = arith.addi %2819, %c5_i32_1197 : i32
    %2821 = arith.index_cast %2820 : i32 to index
    %2822 = memref.load %arg1[%2821] : memref<64xi32, #tpu.memory_space<smem>>
    %c1_i32_1252 = arith.constant 1 : i32
    %2823 = arith.subi %2822, %c1_i32_1252 : i32
    %c0_i32_1253 = arith.constant 0 : i32
    %c7_i32_1254 = arith.constant 7 : i32
    %2824 = arith.maxsi %c0_i32_1253, %2823 : i32
    %2825 = arith.minsi %c7_i32_1254, %2824 : i32
    %2826 = arith.index_cast %2825 : i32 to index
    %c0_1255 = arith.constant 0 : index
    %c0_1256 = arith.constant 0 : index
    %2827 = vector.load %arg14[%2826, %c0_1255, %c0_1256] : memref<8x8x128xf32, #tpu.memory_space<vmem>>, vector<1x8x128xf32>
    %2828 = vector.shape_cast %2827 : vector<1x8x128xf32> to vector<8x128xf32>
    %c0_i32_1257 = arith.constant 0 : i32
    %2829 = arith.cmpi sgt, %2822, %c0_i32_1257 : i32
    %c0_i32_1258 = arith.constant 0 : i32
    %2830 = arith.cmpi sgt, %c5_i32_1197, %c0_i32_1258 : i32
    %2831 = arith.andi %2829, %2830 : i1
    %2832 = vector.broadcast %2831 : i1 to vector<8x1xi1>
    %2833 = arith.andi %18, %2832 : vector<8x1xi1>
    %cst_1259 = arith.constant 0.000000e+00 : f32
    %2834 = vector.shape_cast %2833 : vector<8x1xi1> to vector<8x1xi1>
    %2835 = vector.broadcast %2834 : vector<8x1xi1> to vector<8x128xi1>
    %2836 = vector.broadcast %cst_1259 : f32 to vector<8x128xf32>
    %2837 = arith.select %2835, %2828, %2836 : vector<8x128xi1>, vector<8x128xf32>
    %2838 = arith.addf %2817, %2837 : vector<8x128xf32>
    %c6_i32_1260 = arith.constant 6 : i32
    %2839 = arith.addi %0, %c6_i32_1260 : i32
    %c8_i32_1261 = arith.constant 8 : i32
    %2840 = arith.muli %2839, %c8_i32_1261 : i32
    %2841 = arith.addi %2840, %c5_i32_1197 : i32
    %2842 = arith.index_cast %2841 : i32 to index
    %2843 = memref.load %arg1[%2842] : memref<64xi32, #tpu.memory_space<smem>>
    %c1_i32_1262 = arith.constant 1 : i32
    %2844 = arith.subi %2843, %c1_i32_1262 : i32
    %c0_i32_1263 = arith.constant 0 : i32
    %c7_i32_1264 = arith.constant 7 : i32
    %2845 = arith.maxsi %c0_i32_1263, %2844 : i32
    %2846 = arith.minsi %c7_i32_1264, %2845 : i32
    %2847 = arith.index_cast %2846 : i32 to index
    %c0_1265 = arith.constant 0 : index
    %c0_1266 = arith.constant 0 : index
    %2848 = vector.load %arg14[%2847, %c0_1265, %c0_1266] : memref<8x8x128xf32, #tpu.memory_space<vmem>>, vector<1x8x128xf32>
    %2849 = vector.shape_cast %2848 : vector<1x8x128xf32> to vector<8x128xf32>
    %c0_i32_1267 = arith.constant 0 : i32
    %2850 = arith.cmpi sgt, %2843, %c0_i32_1267 : i32
    %c0_i32_1268 = arith.constant 0 : i32
    %2851 = arith.cmpi sgt, %c5_i32_1197, %c0_i32_1268 : i32
    %2852 = arith.andi %2850, %2851 : i1
    %2853 = vector.broadcast %2852 : i1 to vector<8x1xi1>
    %2854 = arith.andi %21, %2853 : vector<8x1xi1>
    %cst_1269 = arith.constant 0.000000e+00 : f32
    %2855 = vector.shape_cast %2854 : vector<8x1xi1> to vector<8x1xi1>
    %2856 = vector.broadcast %2855 : vector<8x1xi1> to vector<8x128xi1>
    %2857 = vector.broadcast %cst_1269 : f32 to vector<8x128xf32>
    %2858 = arith.select %2856, %2849, %2857 : vector<8x128xi1>, vector<8x128xf32>
    %2859 = arith.addf %2838, %2858 : vector<8x128xf32>
    %c7_i32_1270 = arith.constant 7 : i32
    %2860 = arith.addi %0, %c7_i32_1270 : i32
    %c8_i32_1271 = arith.constant 8 : i32
    %2861 = arith.muli %2860, %c8_i32_1271 : i32
    %2862 = arith.addi %2861, %c5_i32_1197 : i32
    %2863 = arith.index_cast %2862 : i32 to index
    %2864 = memref.load %arg1[%2863] : memref<64xi32, #tpu.memory_space<smem>>
    %c1_i32_1272 = arith.constant 1 : i32
    %2865 = arith.subi %2864, %c1_i32_1272 : i32
    %c0_i32_1273 = arith.constant 0 : i32
    %c7_i32_1274 = arith.constant 7 : i32
    %2866 = arith.maxsi %c0_i32_1273, %2865 : i32
    %2867 = arith.minsi %c7_i32_1274, %2866 : i32
    %2868 = arith.index_cast %2867 : i32 to index
    %c0_1275 = arith.constant 0 : index
    %c0_1276 = arith.constant 0 : index
    %2869 = vector.load %arg14[%2868, %c0_1275, %c0_1276] : memref<8x8x128xf32, #tpu.memory_space<vmem>>, vector<1x8x128xf32>
    %2870 = vector.shape_cast %2869 : vector<1x8x128xf32> to vector<8x128xf32>
    %c0_i32_1277 = arith.constant 0 : i32
    %2871 = arith.cmpi sgt, %2864, %c0_i32_1277 : i32
    %c0_i32_1278 = arith.constant 0 : i32
    %2872 = arith.cmpi sgt, %c5_i32_1197, %c0_i32_1278 : i32
    %2873 = arith.andi %2871, %2872 : i1
    %2874 = vector.broadcast %2873 : i1 to vector<8x1xi1>
    %2875 = arith.andi %24, %2874 : vector<8x1xi1>
    %cst_1279 = arith.constant 0.000000e+00 : f32
    %2876 = vector.shape_cast %2875 : vector<8x1xi1> to vector<8x1xi1>
    %2877 = vector.broadcast %2876 : vector<8x1xi1> to vector<8x128xi1>
    %2878 = vector.broadcast %cst_1279 : f32 to vector<8x128xf32>
    %2879 = arith.select %2877, %2870, %2878 : vector<8x128xi1>, vector<8x128xf32>
    %2880 = arith.addf %2859, %2879 : vector<8x128xf32>
    %cst_1280 = arith.constant dense<0.000000e+00> : vector<8x128xf32>
    %2881 = tpu.matmul %2709, %1692, %cst_1280 {dimension_numbers = #tpu.dot_dimension_numbers<[1], [0], [0], [1], [0, 0, 1, 1], [], []>} : vector<8x32xbf16>, vector<32x128xbf16>, vector<8x128xf32> -> vector<8x128xf32>
    %2882 = arith.addf %2880, %2881 : vector<8x128xf32>
    %2883 = vector.extract_strided_slice %2882 {offsets = [0, 0], sizes = [8, 32], strides = [1, 1]} : vector<8x128xf32> to vector<8x32xf32>
    %2884 = arith.negf %2883 : vector<8x32xf32>
    %2885 = math.exp %2884 : vector<8x32xf32>
    %cst_1281 = arith.constant 1.000000e+00 : f32
    %2886 = vector.broadcast %cst_1281 : f32 to vector<8x32xf32>
    %2887 = arith.addf %2886, %2885 : vector<8x32xf32>
    %2888 = arith.divf %2886, %2887 : vector<8x32xf32>
    %2889 = vector.extract_strided_slice %2882 {offsets = [0, 32], sizes = [8, 32], strides = [1, 1]} : vector<8x128xf32> to vector<8x32xf32>
    %2890 = arith.negf %2889 : vector<8x32xf32>
    %2891 = math.exp %2890 : vector<8x32xf32>
    %cst_1282 = arith.constant 1.000000e+00 : f32
    %2892 = vector.broadcast %cst_1282 : f32 to vector<8x32xf32>
    %2893 = arith.addf %2892, %2891 : vector<8x32xf32>
    %2894 = arith.divf %2892, %2893 : vector<8x32xf32>
    %2895 = vector.extract_strided_slice %2882 {offsets = [0, 64], sizes = [8, 32], strides = [1, 1]} : vector<8x128xf32> to vector<8x32xf32>
    %2896 = math.tanh %2895 : vector<8x32xf32>
    %2897 = vector.extract_strided_slice %2882 {offsets = [0, 96], sizes = [8, 32], strides = [1, 1]} : vector<8x128xf32> to vector<8x32xf32>
    %2898 = arith.negf %2897 : vector<8x32xf32>
    %2899 = math.exp %2898 : vector<8x32xf32>
    %cst_1283 = arith.constant 1.000000e+00 : f32
    %2900 = vector.broadcast %cst_1283 : f32 to vector<8x32xf32>
    %2901 = arith.addf %2900, %2899 : vector<8x32xf32>
    %2902 = arith.divf %2900, %2901 : vector<8x32xf32>
    %2903 = arith.mulf %2894, %2702 : vector<8x32xf32>
    %2904 = arith.mulf %2888, %2896 : vector<8x32xf32>
    %2905 = arith.addf %2903, %2904 : vector<8x32xf32>
    %2906 = math.tanh %2905 : vector<8x32xf32>
    %2907 = arith.mulf %2902, %2906 : vector<8x32xf32>
    %2908 = arith.index_cast %c5_i32_1197 : i32 to index
    %c0_1284 = arith.constant 0 : index
    %c0_1285 = arith.constant 0 : index
    %2909 = vector.load %arg12[%2908, %c0_1284, %c0_1285] : memref<8x8x32xf32, #tpu.memory_space<vmem>>, vector<1x8x32xf32>
    %2910 = vector.shape_cast %2909 : vector<1x8x32xf32> to vector<8x32xf32>
    %2911 = vector.shape_cast %2907 : vector<8x32xf32> to vector<1x8x32xf32>
    tpu.vector_store %arg12[%2908, %c0_1284, %c0_1285], %2911 {strides = array<i32>} : memref<8x8x32xf32, #tpu.memory_space<vmem>>, vector<1x8x32xf32>,
    %2912 = arith.truncf %2907 : vector<8x32xf32> to vector<8x32xbf16>
    %c6_i32_1286 = arith.constant 6 : i32
    %2913 = arith.index_cast %c6_i32_1286 : i32 to index
    %c0_1287 = arith.constant 0 : index
    %c0_1288 = arith.constant 0 : index
    %2914 = vector.load %arg13[%2913, %c0_1287, %c0_1288] : memref<8x8x128xf32, #tpu.memory_space<vmem>>, vector<1x8x128xf32>
    %2915 = vector.shape_cast %2914 : vector<1x8x128xf32> to vector<8x128xf32>
    %c0_i32_1289 = arith.constant 0 : i32
    %2916 = arith.addi %0, %c0_i32_1289 : i32
    %c8_i32_1290 = arith.constant 8 : i32
    %2917 = arith.muli %2916, %c8_i32_1290 : i32
    %2918 = arith.addi %2917, %c6_i32_1286 : i32
    %2919 = arith.index_cast %2918 : i32 to index
    %2920 = memref.load %arg1[%2919] : memref<64xi32, #tpu.memory_space<smem>>
    %c1_i32_1291 = arith.constant 1 : i32
    %2921 = arith.subi %2920, %c1_i32_1291 : i32
    %c0_i32_1292 = arith.constant 0 : i32
    %c7_i32_1293 = arith.constant 7 : i32
    %2922 = arith.maxsi %c0_i32_1292, %2921 : i32
    %2923 = arith.minsi %c7_i32_1293, %2922 : i32
    %2924 = arith.index_cast %2923 : i32 to index
    %c0_1294 = arith.constant 0 : index
    %c0_1295 = arith.constant 0 : index
    %2925 = vector.load %arg14[%2924, %c0_1294, %c0_1295] : memref<8x8x128xf32, #tpu.memory_space<vmem>>, vector<1x8x128xf32>
    %2926 = vector.shape_cast %2925 : vector<1x8x128xf32> to vector<8x128xf32>
    %c0_i32_1296 = arith.constant 0 : i32
    %2927 = arith.cmpi sgt, %2920, %c0_i32_1296 : i32
    %c0_i32_1297 = arith.constant 0 : i32
    %2928 = arith.cmpi sgt, %c6_i32_1286, %c0_i32_1297 : i32
    %2929 = arith.andi %2927, %2928 : i1
    %2930 = vector.broadcast %2929 : i1 to vector<8x1xi1>
    %2931 = arith.andi %3, %2930 : vector<8x1xi1>
    %cst_1298 = arith.constant 0.000000e+00 : f32
    %2932 = vector.shape_cast %2931 : vector<8x1xi1> to vector<8x1xi1>
    %2933 = vector.broadcast %2932 : vector<8x1xi1> to vector<8x128xi1>
    %2934 = vector.broadcast %cst_1298 : f32 to vector<8x128xf32>
    %2935 = arith.select %2933, %2926, %2934 : vector<8x128xi1>, vector<8x128xf32>
    %2936 = arith.addf %2915, %2935 : vector<8x128xf32>
    %c1_i32_1299 = arith.constant 1 : i32
    %2937 = arith.addi %0, %c1_i32_1299 : i32
    %c8_i32_1300 = arith.constant 8 : i32
    %2938 = arith.muli %2937, %c8_i32_1300 : i32
    %2939 = arith.addi %2938, %c6_i32_1286 : i32
    %2940 = arith.index_cast %2939 : i32 to index
    %2941 = memref.load %arg1[%2940] : memref<64xi32, #tpu.memory_space<smem>>
    %c1_i32_1301 = arith.constant 1 : i32
    %2942 = arith.subi %2941, %c1_i32_1301 : i32
    %c0_i32_1302 = arith.constant 0 : i32
    %c7_i32_1303 = arith.constant 7 : i32
    %2943 = arith.maxsi %c0_i32_1302, %2942 : i32
    %2944 = arith.minsi %c7_i32_1303, %2943 : i32
    %2945 = arith.index_cast %2944 : i32 to index
    %c0_1304 = arith.constant 0 : index
    %c0_1305 = arith.constant 0 : index
    %2946 = vector.load %arg14[%2945, %c0_1304, %c0_1305] : memref<8x8x128xf32, #tpu.memory_space<vmem>>, vector<1x8x128xf32>
    %2947 = vector.shape_cast %2946 : vector<1x8x128xf32> to vector<8x128xf32>
    %c0_i32_1306 = arith.constant 0 : i32
    %2948 = arith.cmpi sgt, %2941, %c0_i32_1306 : i32
    %c0_i32_1307 = arith.constant 0 : i32
    %2949 = arith.cmpi sgt, %c6_i32_1286, %c0_i32_1307 : i32
    %2950 = arith.andi %2948, %2949 : i1
    %2951 = vector.broadcast %2950 : i1 to vector<8x1xi1>
    %2952 = arith.andi %6, %2951 : vector<8x1xi1>
    %cst_1308 = arith.constant 0.000000e+00 : f32
    %2953 = vector.shape_cast %2952 : vector<8x1xi1> to vector<8x1xi1>
    %2954 = vector.broadcast %2953 : vector<8x1xi1> to vector<8x128xi1>
    %2955 = vector.broadcast %cst_1308 : f32 to vector<8x128xf32>
    %2956 = arith.select %2954, %2947, %2955 : vector<8x128xi1>, vector<8x128xf32>
    %2957 = arith.addf %2936, %2956 : vector<8x128xf32>
    %c2_i32_1309 = arith.constant 2 : i32
    %2958 = arith.addi %0, %c2_i32_1309 : i32
    %c8_i32_1310 = arith.constant 8 : i32
    %2959 = arith.muli %2958, %c8_i32_1310 : i32
    %2960 = arith.addi %2959, %c6_i32_1286 : i32
    %2961 = arith.index_cast %2960 : i32 to index
    %2962 = memref.load %arg1[%2961] : memref<64xi32, #tpu.memory_space<smem>>
    %c1_i32_1311 = arith.constant 1 : i32
    %2963 = arith.subi %2962, %c1_i32_1311 : i32
    %c0_i32_1312 = arith.constant 0 : i32
    %c7_i32_1313 = arith.constant 7 : i32
    %2964 = arith.maxsi %c0_i32_1312, %2963 : i32
    %2965 = arith.minsi %c7_i32_1313, %2964 : i32
    %2966 = arith.index_cast %2965 : i32 to index
    %c0_1314 = arith.constant 0 : index
    %c0_1315 = arith.constant 0 : index
    %2967 = vector.load %arg14[%2966, %c0_1314, %c0_1315] : memref<8x8x128xf32, #tpu.memory_space<vmem>>, vector<1x8x128xf32>
    %2968 = vector.shape_cast %2967 : vector<1x8x128xf32> to vector<8x128xf32>
    %c0_i32_1316 = arith.constant 0 : i32
    %2969 = arith.cmpi sgt, %2962, %c0_i32_1316 : i32
    %c0_i32_1317 = arith.constant 0 : i32
    %2970 = arith.cmpi sgt, %c6_i32_1286, %c0_i32_1317 : i32
    %2971 = arith.andi %2969, %2970 : i1
    %2972 = vector.broadcast %2971 : i1 to vector<8x1xi1>
    %2973 = arith.andi %9, %2972 : vector<8x1xi1>
    %cst_1318 = arith.constant 0.000000e+00 : f32
    %2974 = vector.shape_cast %2973 : vector<8x1xi1> to vector<8x1xi1>
    %2975 = vector.broadcast %2974 : vector<8x1xi1> to vector<8x128xi1>
    %2976 = vector.broadcast %cst_1318 : f32 to vector<8x128xf32>
    %2977 = arith.select %2975, %2968, %2976 : vector<8x128xi1>, vector<8x128xf32>
    %2978 = arith.addf %2957, %2977 : vector<8x128xf32>
    %c3_i32_1319 = arith.constant 3 : i32
    %2979 = arith.addi %0, %c3_i32_1319 : i32
    %c8_i32_1320 = arith.constant 8 : i32
    %2980 = arith.muli %2979, %c8_i32_1320 : i32
    %2981 = arith.addi %2980, %c6_i32_1286 : i32
    %2982 = arith.index_cast %2981 : i32 to index
    %2983 = memref.load %arg1[%2982] : memref<64xi32, #tpu.memory_space<smem>>
    %c1_i32_1321 = arith.constant 1 : i32
    %2984 = arith.subi %2983, %c1_i32_1321 : i32
    %c0_i32_1322 = arith.constant 0 : i32
    %c7_i32_1323 = arith.constant 7 : i32
    %2985 = arith.maxsi %c0_i32_1322, %2984 : i32
    %2986 = arith.minsi %c7_i32_1323, %2985 : i32
    %2987 = arith.index_cast %2986 : i32 to index
    %c0_1324 = arith.constant 0 : index
    %c0_1325 = arith.constant 0 : index
    %2988 = vector.load %arg14[%2987, %c0_1324, %c0_1325] : memref<8x8x128xf32, #tpu.memory_space<vmem>>, vector<1x8x128xf32>
    %2989 = vector.shape_cast %2988 : vector<1x8x128xf32> to vector<8x128xf32>
    %c0_i32_1326 = arith.constant 0 : i32
    %2990 = arith.cmpi sgt, %2983, %c0_i32_1326 : i32
    %c0_i32_1327 = arith.constant 0 : i32
    %2991 = arith.cmpi sgt, %c6_i32_1286, %c0_i32_1327 : i32
    %2992 = arith.andi %2990, %2991 : i1
    %2993 = vector.broadcast %2992 : i1 to vector<8x1xi1>
    %2994 = arith.andi %12, %2993 : vector<8x1xi1>
    %cst_1328 = arith.constant 0.000000e+00 : f32
    %2995 = vector.shape_cast %2994 : vector<8x1xi1> to vector<8x1xi1>
    %2996 = vector.broadcast %2995 : vector<8x1xi1> to vector<8x128xi1>
    %2997 = vector.broadcast %cst_1328 : f32 to vector<8x128xf32>
    %2998 = arith.select %2996, %2989, %2997 : vector<8x128xi1>, vector<8x128xf32>
    %2999 = arith.addf %2978, %2998 : vector<8x128xf32>
    %c4_i32_1329 = arith.constant 4 : i32
    %3000 = arith.addi %0, %c4_i32_1329 : i32
    %c8_i32_1330 = arith.constant 8 : i32
    %3001 = arith.muli %3000, %c8_i32_1330 : i32
    %3002 = arith.addi %3001, %c6_i32_1286 : i32
    %3003 = arith.index_cast %3002 : i32 to index
    %3004 = memref.load %arg1[%3003] : memref<64xi32, #tpu.memory_space<smem>>
    %c1_i32_1331 = arith.constant 1 : i32
    %3005 = arith.subi %3004, %c1_i32_1331 : i32
    %c0_i32_1332 = arith.constant 0 : i32
    %c7_i32_1333 = arith.constant 7 : i32
    %3006 = arith.maxsi %c0_i32_1332, %3005 : i32
    %3007 = arith.minsi %c7_i32_1333, %3006 : i32
    %3008 = arith.index_cast %3007 : i32 to index
    %c0_1334 = arith.constant 0 : index
    %c0_1335 = arith.constant 0 : index
    %3009 = vector.load %arg14[%3008, %c0_1334, %c0_1335] : memref<8x8x128xf32, #tpu.memory_space<vmem>>, vector<1x8x128xf32>
    %3010 = vector.shape_cast %3009 : vector<1x8x128xf32> to vector<8x128xf32>
    %c0_i32_1336 = arith.constant 0 : i32
    %3011 = arith.cmpi sgt, %3004, %c0_i32_1336 : i32
    %c0_i32_1337 = arith.constant 0 : i32
    %3012 = arith.cmpi sgt, %c6_i32_1286, %c0_i32_1337 : i32
    %3013 = arith.andi %3011, %3012 : i1
    %3014 = vector.broadcast %3013 : i1 to vector<8x1xi1>
    %3015 = arith.andi %15, %3014 : vector<8x1xi1>
    %cst_1338 = arith.constant 0.000000e+00 : f32
    %3016 = vector.shape_cast %3015 : vector<8x1xi1> to vector<8x1xi1>
    %3017 = vector.broadcast %3016 : vector<8x1xi1> to vector<8x128xi1>
    %3018 = vector.broadcast %cst_1338 : f32 to vector<8x128xf32>
    %3019 = arith.select %3017, %3010, %3018 : vector<8x128xi1>, vector<8x128xf32>
    %3020 = arith.addf %2999, %3019 : vector<8x128xf32>
    %c5_i32_1339 = arith.constant 5 : i32
    %3021 = arith.addi %0, %c5_i32_1339 : i32
    %c8_i32_1340 = arith.constant 8 : i32
    %3022 = arith.muli %3021, %c8_i32_1340 : i32
    %3023 = arith.addi %3022, %c6_i32_1286 : i32
    %3024 = arith.index_cast %3023 : i32 to index
    %3025 = memref.load %arg1[%3024] : memref<64xi32, #tpu.memory_space<smem>>
    %c1_i32_1341 = arith.constant 1 : i32
    %3026 = arith.subi %3025, %c1_i32_1341 : i32
    %c0_i32_1342 = arith.constant 0 : i32
    %c7_i32_1343 = arith.constant 7 : i32
    %3027 = arith.maxsi %c0_i32_1342, %3026 : i32
    %3028 = arith.minsi %c7_i32_1343, %3027 : i32
    %3029 = arith.index_cast %3028 : i32 to index
    %c0_1344 = arith.constant 0 : index
    %c0_1345 = arith.constant 0 : index
    %3030 = vector.load %arg14[%3029, %c0_1344, %c0_1345] : memref<8x8x128xf32, #tpu.memory_space<vmem>>, vector<1x8x128xf32>
    %3031 = vector.shape_cast %3030 : vector<1x8x128xf32> to vector<8x128xf32>
    %c0_i32_1346 = arith.constant 0 : i32
    %3032 = arith.cmpi sgt, %3025, %c0_i32_1346 : i32
    %c0_i32_1347 = arith.constant 0 : i32
    %3033 = arith.cmpi sgt, %c6_i32_1286, %c0_i32_1347 : i32
    %3034 = arith.andi %3032, %3033 : i1
    %3035 = vector.broadcast %3034 : i1 to vector<8x1xi1>
    %3036 = arith.andi %18, %3035 : vector<8x1xi1>
    %cst_1348 = arith.constant 0.000000e+00 : f32
    %3037 = vector.shape_cast %3036 : vector<8x1xi1> to vector<8x1xi1>
    %3038 = vector.broadcast %3037 : vector<8x1xi1> to vector<8x128xi1>
    %3039 = vector.broadcast %cst_1348 : f32 to vector<8x128xf32>
    %3040 = arith.select %3038, %3031, %3039 : vector<8x128xi1>, vector<8x128xf32>
    %3041 = arith.addf %3020, %3040 : vector<8x128xf32>
    %c6_i32_1349 = arith.constant 6 : i32
    %3042 = arith.addi %0, %c6_i32_1349 : i32
    %c8_i32_1350 = arith.constant 8 : i32
    %3043 = arith.muli %3042, %c8_i32_1350 : i32
    %3044 = arith.addi %3043, %c6_i32_1286 : i32
    %3045 = arith.index_cast %3044 : i32 to index
    %3046 = memref.load %arg1[%3045] : memref<64xi32, #tpu.memory_space<smem>>
    %c1_i32_1351 = arith.constant 1 : i32
    %3047 = arith.subi %3046, %c1_i32_1351 : i32
    %c0_i32_1352 = arith.constant 0 : i32
    %c7_i32_1353 = arith.constant 7 : i32
    %3048 = arith.maxsi %c0_i32_1352, %3047 : i32
    %3049 = arith.minsi %c7_i32_1353, %3048 : i32
    %3050 = arith.index_cast %3049 : i32 to index
    %c0_1354 = arith.constant 0 : index
    %c0_1355 = arith.constant 0 : index
    %3051 = vector.load %arg14[%3050, %c0_1354, %c0_1355] : memref<8x8x128xf32, #tpu.memory_space<vmem>>, vector<1x8x128xf32>
    %3052 = vector.shape_cast %3051 : vector<1x8x128xf32> to vector<8x128xf32>
    %c0_i32_1356 = arith.constant 0 : i32
    %3053 = arith.cmpi sgt, %3046, %c0_i32_1356 : i32
    %c0_i32_1357 = arith.constant 0 : i32
    %3054 = arith.cmpi sgt, %c6_i32_1286, %c0_i32_1357 : i32
    %3055 = arith.andi %3053, %3054 : i1
    %3056 = vector.broadcast %3055 : i1 to vector<8x1xi1>
    %3057 = arith.andi %21, %3056 : vector<8x1xi1>
    %cst_1358 = arith.constant 0.000000e+00 : f32
    %3058 = vector.shape_cast %3057 : vector<8x1xi1> to vector<8x1xi1>
    %3059 = vector.broadcast %3058 : vector<8x1xi1> to vector<8x128xi1>
    %3060 = vector.broadcast %cst_1358 : f32 to vector<8x128xf32>
    %3061 = arith.select %3059, %3052, %3060 : vector<8x128xi1>, vector<8x128xf32>
    %3062 = arith.addf %3041, %3061 : vector<8x128xf32>
    %c7_i32_1359 = arith.constant 7 : i32
    %3063 = arith.addi %0, %c7_i32_1359 : i32
    %c8_i32_1360 = arith.constant 8 : i32
    %3064 = arith.muli %3063, %c8_i32_1360 : i32
    %3065 = arith.addi %3064, %c6_i32_1286 : i32
    %3066 = arith.index_cast %3065 : i32 to index
    %3067 = memref.load %arg1[%3066] : memref<64xi32, #tpu.memory_space<smem>>
    %c1_i32_1361 = arith.constant 1 : i32
    %3068 = arith.subi %3067, %c1_i32_1361 : i32
    %c0_i32_1362 = arith.constant 0 : i32
    %c7_i32_1363 = arith.constant 7 : i32
    %3069 = arith.maxsi %c0_i32_1362, %3068 : i32
    %3070 = arith.minsi %c7_i32_1363, %3069 : i32
    %3071 = arith.index_cast %3070 : i32 to index
    %c0_1364 = arith.constant 0 : index
    %c0_1365 = arith.constant 0 : index
    %3072 = vector.load %arg14[%3071, %c0_1364, %c0_1365] : memref<8x8x128xf32, #tpu.memory_space<vmem>>, vector<1x8x128xf32>
    %3073 = vector.shape_cast %3072 : vector<1x8x128xf32> to vector<8x128xf32>
    %c0_i32_1366 = arith.constant 0 : i32
    %3074 = arith.cmpi sgt, %3067, %c0_i32_1366 : i32
    %c0_i32_1367 = arith.constant 0 : i32
    %3075 = arith.cmpi sgt, %c6_i32_1286, %c0_i32_1367 : i32
    %3076 = arith.andi %3074, %3075 : i1
    %3077 = vector.broadcast %3076 : i1 to vector<8x1xi1>
    %3078 = arith.andi %24, %3077 : vector<8x1xi1>
    %cst_1368 = arith.constant 0.000000e+00 : f32
    %3079 = vector.shape_cast %3078 : vector<8x1xi1> to vector<8x1xi1>
    %3080 = vector.broadcast %3079 : vector<8x1xi1> to vector<8x128xi1>
    %3081 = vector.broadcast %cst_1368 : f32 to vector<8x128xf32>
    %3082 = arith.select %3080, %3073, %3081 : vector<8x128xi1>, vector<8x128xf32>
    %3083 = arith.addf %3062, %3082 : vector<8x128xf32>
    %cst_1369 = arith.constant dense<0.000000e+00> : vector<8x128xf32>
    %3084 = tpu.matmul %2912, %1692, %cst_1369 {dimension_numbers = #tpu.dot_dimension_numbers<[1], [0], [0], [1], [0, 0, 1, 1], [], []>} : vector<8x32xbf16>, vector<32x128xbf16>, vector<8x128xf32> -> vector<8x128xf32>
    %3085 = arith.addf %3083, %3084 : vector<8x128xf32>
    %3086 = vector.extract_strided_slice %3085 {offsets = [0, 0], sizes = [8, 32], strides = [1, 1]} : vector<8x128xf32> to vector<8x32xf32>
    %3087 = arith.negf %3086 : vector<8x32xf32>
    %3088 = math.exp %3087 : vector<8x32xf32>
    %cst_1370 = arith.constant 1.000000e+00 : f32
    %3089 = vector.broadcast %cst_1370 : f32 to vector<8x32xf32>
    %3090 = arith.addf %3089, %3088 : vector<8x32xf32>
    %3091 = arith.divf %3089, %3090 : vector<8x32xf32>
    %3092 = vector.extract_strided_slice %3085 {offsets = [0, 32], sizes = [8, 32], strides = [1, 1]} : vector<8x128xf32> to vector<8x32xf32>
    %3093 = arith.negf %3092 : vector<8x32xf32>
    %3094 = math.exp %3093 : vector<8x32xf32>
    %cst_1371 = arith.constant 1.000000e+00 : f32
    %3095 = vector.broadcast %cst_1371 : f32 to vector<8x32xf32>
    %3096 = arith.addf %3095, %3094 : vector<8x32xf32>
    %3097 = arith.divf %3095, %3096 : vector<8x32xf32>
    %3098 = vector.extract_strided_slice %3085 {offsets = [0, 64], sizes = [8, 32], strides = [1, 1]} : vector<8x128xf32> to vector<8x32xf32>
    %3099 = math.tanh %3098 : vector<8x32xf32>
    %3100 = vector.extract_strided_slice %3085 {offsets = [0, 96], sizes = [8, 32], strides = [1, 1]} : vector<8x128xf32> to vector<8x32xf32>
    %3101 = arith.negf %3100 : vector<8x32xf32>
    %3102 = math.exp %3101 : vector<8x32xf32>
    %cst_1372 = arith.constant 1.000000e+00 : f32
    %3103 = vector.broadcast %cst_1372 : f32 to vector<8x32xf32>
    %3104 = arith.addf %3103, %3102 : vector<8x32xf32>
    %3105 = arith.divf %3103, %3104 : vector<8x32xf32>
    %3106 = arith.mulf %3097, %2905 : vector<8x32xf32>
    %3107 = arith.mulf %3091, %3099 : vector<8x32xf32>
    %3108 = arith.addf %3106, %3107 : vector<8x32xf32>
    %3109 = math.tanh %3108 : vector<8x32xf32>
    %3110 = arith.mulf %3105, %3109 : vector<8x32xf32>
    %3111 = arith.index_cast %c6_i32_1286 : i32 to index
    %c0_1373 = arith.constant 0 : index
    %c0_1374 = arith.constant 0 : index
    %3112 = vector.load %arg12[%3111, %c0_1373, %c0_1374] : memref<8x8x32xf32, #tpu.memory_space<vmem>>, vector<1x8x32xf32>
    %3113 = vector.shape_cast %3112 : vector<1x8x32xf32> to vector<8x32xf32>
    %3114 = vector.shape_cast %3110 : vector<8x32xf32> to vector<1x8x32xf32>
    tpu.vector_store %arg12[%3111, %c0_1373, %c0_1374], %3114 {strides = array<i32>} : memref<8x8x32xf32, #tpu.memory_space<vmem>>, vector<1x8x32xf32>,
    %3115 = arith.truncf %3110 : vector<8x32xf32> to vector<8x32xbf16>
    %c7_i32_1375 = arith.constant 7 : i32
    %3116 = arith.index_cast %c7_i32_1375 : i32 to index
    %c0_1376 = arith.constant 0 : index
    %c0_1377 = arith.constant 0 : index
    %3117 = vector.load %arg13[%3116, %c0_1376, %c0_1377] : memref<8x8x128xf32, #tpu.memory_space<vmem>>, vector<1x8x128xf32>
    %3118 = vector.shape_cast %3117 : vector<1x8x128xf32> to vector<8x128xf32>
    %c0_i32_1378 = arith.constant 0 : i32
    %3119 = arith.addi %0, %c0_i32_1378 : i32
    %c8_i32_1379 = arith.constant 8 : i32
    %3120 = arith.muli %3119, %c8_i32_1379 : i32
    %3121 = arith.addi %3120, %c7_i32_1375 : i32
    %3122 = arith.index_cast %3121 : i32 to index
    %3123 = memref.load %arg1[%3122] : memref<64xi32, #tpu.memory_space<smem>>
    %c1_i32_1380 = arith.constant 1 : i32
    %3124 = arith.subi %3123, %c1_i32_1380 : i32
    %c0_i32_1381 = arith.constant 0 : i32
    %c7_i32_1382 = arith.constant 7 : i32
    %3125 = arith.maxsi %c0_i32_1381, %3124 : i32
    %3126 = arith.minsi %c7_i32_1382, %3125 : i32
    %3127 = arith.index_cast %3126 : i32 to index
    %c0_1383 = arith.constant 0 : index
    %c0_1384 = arith.constant 0 : index
    %3128 = vector.load %arg14[%3127, %c0_1383, %c0_1384] : memref<8x8x128xf32, #tpu.memory_space<vmem>>, vector<1x8x128xf32>
    %3129 = vector.shape_cast %3128 : vector<1x8x128xf32> to vector<8x128xf32>
    %c0_i32_1385 = arith.constant 0 : i32
    %3130 = arith.cmpi sgt, %3123, %c0_i32_1385 : i32
    %c0_i32_1386 = arith.constant 0 : i32
    %3131 = arith.cmpi sgt, %c7_i32_1375, %c0_i32_1386 : i32
    %3132 = arith.andi %3130, %3131 : i1
    %3133 = vector.broadcast %3132 : i1 to vector<8x1xi1>
    %3134 = arith.andi %3, %3133 : vector<8x1xi1>
    %cst_1387 = arith.constant 0.000000e+00 : f32
    %3135 = vector.shape_cast %3134 : vector<8x1xi1> to vector<8x1xi1>
    %3136 = vector.broadcast %3135 : vector<8x1xi1> to vector<8x128xi1>
    %3137 = vector.broadcast %cst_1387 : f32 to vector<8x128xf32>
    %3138 = arith.select %3136, %3129, %3137 : vector<8x128xi1>, vector<8x128xf32>
    %3139 = arith.addf %3118, %3138 : vector<8x128xf32>
    %c1_i32_1388 = arith.constant 1 : i32
    %3140 = arith.addi %0, %c1_i32_1388 : i32
    %c8_i32_1389 = arith.constant 8 : i32
    %3141 = arith.muli %3140, %c8_i32_1389 : i32
    %3142 = arith.addi %3141, %c7_i32_1375 : i32
    %3143 = arith.index_cast %3142 : i32 to index
    %3144 = memref.load %arg1[%3143] : memref<64xi32, #tpu.memory_space<smem>>
    %c1_i32_1390 = arith.constant 1 : i32
    %3145 = arith.subi %3144, %c1_i32_1390 : i32
    %c0_i32_1391 = arith.constant 0 : i32
    %c7_i32_1392 = arith.constant 7 : i32
    %3146 = arith.maxsi %c0_i32_1391, %3145 : i32
    %3147 = arith.minsi %c7_i32_1392, %3146 : i32
    %3148 = arith.index_cast %3147 : i32 to index
    %c0_1393 = arith.constant 0 : index
    %c0_1394 = arith.constant 0 : index
    %3149 = vector.load %arg14[%3148, %c0_1393, %c0_1394] : memref<8x8x128xf32, #tpu.memory_space<vmem>>, vector<1x8x128xf32>
    %3150 = vector.shape_cast %3149 : vector<1x8x128xf32> to vector<8x128xf32>
    %c0_i32_1395 = arith.constant 0 : i32
    %3151 = arith.cmpi sgt, %3144, %c0_i32_1395 : i32
    %c0_i32_1396 = arith.constant 0 : i32
    %3152 = arith.cmpi sgt, %c7_i32_1375, %c0_i32_1396 : i32
    %3153 = arith.andi %3151, %3152 : i1
    %3154 = vector.broadcast %3153 : i1 to vector<8x1xi1>
    %3155 = arith.andi %6, %3154 : vector<8x1xi1>
    %cst_1397 = arith.constant 0.000000e+00 : f32
    %3156 = vector.shape_cast %3155 : vector<8x1xi1> to vector<8x1xi1>
    %3157 = vector.broadcast %3156 : vector<8x1xi1> to vector<8x128xi1>
    %3158 = vector.broadcast %cst_1397 : f32 to vector<8x128xf32>
    %3159 = arith.select %3157, %3150, %3158 : vector<8x128xi1>, vector<8x128xf32>
    %3160 = arith.addf %3139, %3159 : vector<8x128xf32>
    %c2_i32_1398 = arith.constant 2 : i32
    %3161 = arith.addi %0, %c2_i32_1398 : i32
    %c8_i32_1399 = arith.constant 8 : i32
    %3162 = arith.muli %3161, %c8_i32_1399 : i32
    %3163 = arith.addi %3162, %c7_i32_1375 : i32
    %3164 = arith.index_cast %3163 : i32 to index
    %3165 = memref.load %arg1[%3164] : memref<64xi32, #tpu.memory_space<smem>>
    %c1_i32_1400 = arith.constant 1 : i32
    %3166 = arith.subi %3165, %c1_i32_1400 : i32
    %c0_i32_1401 = arith.constant 0 : i32
    %c7_i32_1402 = arith.constant 7 : i32
    %3167 = arith.maxsi %c0_i32_1401, %3166 : i32
    %3168 = arith.minsi %c7_i32_1402, %3167 : i32
    %3169 = arith.index_cast %3168 : i32 to index
    %c0_1403 = arith.constant 0 : index
    %c0_1404 = arith.constant 0 : index
    %3170 = vector.load %arg14[%3169, %c0_1403, %c0_1404] : memref<8x8x128xf32, #tpu.memory_space<vmem>>, vector<1x8x128xf32>
    %3171 = vector.shape_cast %3170 : vector<1x8x128xf32> to vector<8x128xf32>
    %c0_i32_1405 = arith.constant 0 : i32
    %3172 = arith.cmpi sgt, %3165, %c0_i32_1405 : i32
    %c0_i32_1406 = arith.constant 0 : i32
    %3173 = arith.cmpi sgt, %c7_i32_1375, %c0_i32_1406 : i32
    %3174 = arith.andi %3172, %3173 : i1
    %3175 = vector.broadcast %3174 : i1 to vector<8x1xi1>
    %3176 = arith.andi %9, %3175 : vector<8x1xi1>
    %cst_1407 = arith.constant 0.000000e+00 : f32
    %3177 = vector.shape_cast %3176 : vector<8x1xi1> to vector<8x1xi1>
    %3178 = vector.broadcast %3177 : vector<8x1xi1> to vector<8x128xi1>
    %3179 = vector.broadcast %cst_1407 : f32 to vector<8x128xf32>
    %3180 = arith.select %3178, %3171, %3179 : vector<8x128xi1>, vector<8x128xf32>
    %3181 = arith.addf %3160, %3180 : vector<8x128xf32>
    %c3_i32_1408 = arith.constant 3 : i32
    %3182 = arith.addi %0, %c3_i32_1408 : i32
    %c8_i32_1409 = arith.constant 8 : i32
    %3183 = arith.muli %3182, %c8_i32_1409 : i32
    %3184 = arith.addi %3183, %c7_i32_1375 : i32
    %3185 = arith.index_cast %3184 : i32 to index
    %3186 = memref.load %arg1[%3185] : memref<64xi32, #tpu.memory_space<smem>>
    %c1_i32_1410 = arith.constant 1 : i32
    %3187 = arith.subi %3186, %c1_i32_1410 : i32
    %c0_i32_1411 = arith.constant 0 : i32
    %c7_i32_1412 = arith.constant 7 : i32
    %3188 = arith.maxsi %c0_i32_1411, %3187 : i32
    %3189 = arith.minsi %c7_i32_1412, %3188 : i32
    %3190 = arith.index_cast %3189 : i32 to index
    %c0_1413 = arith.constant 0 : index
    %c0_1414 = arith.constant 0 : index
    %3191 = vector.load %arg14[%3190, %c0_1413, %c0_1414] : memref<8x8x128xf32, #tpu.memory_space<vmem>>, vector<1x8x128xf32>
    %3192 = vector.shape_cast %3191 : vector<1x8x128xf32> to vector<8x128xf32>
    %c0_i32_1415 = arith.constant 0 : i32
    %3193 = arith.cmpi sgt, %3186, %c0_i32_1415 : i32
    %c0_i32_1416 = arith.constant 0 : i32
    %3194 = arith.cmpi sgt, %c7_i32_1375, %c0_i32_1416 : i32
    %3195 = arith.andi %3193, %3194 : i1
    %3196 = vector.broadcast %3195 : i1 to vector<8x1xi1>
    %3197 = arith.andi %12, %3196 : vector<8x1xi1>
    %cst_1417 = arith.constant 0.000000e+00 : f32
    %3198 = vector.shape_cast %3197 : vector<8x1xi1> to vector<8x1xi1>
    %3199 = vector.broadcast %3198 : vector<8x1xi1> to vector<8x128xi1>
    %3200 = vector.broadcast %cst_1417 : f32 to vector<8x128xf32>
    %3201 = arith.select %3199, %3192, %3200 : vector<8x128xi1>, vector<8x128xf32>
    %3202 = arith.addf %3181, %3201 : vector<8x128xf32>
    %c4_i32_1418 = arith.constant 4 : i32
    %3203 = arith.addi %0, %c4_i32_1418 : i32
    %c8_i32_1419 = arith.constant 8 : i32
    %3204 = arith.muli %3203, %c8_i32_1419 : i32
    %3205 = arith.addi %3204, %c7_i32_1375 : i32
    %3206 = arith.index_cast %3205 : i32 to index
    %3207 = memref.load %arg1[%3206] : memref<64xi32, #tpu.memory_space<smem>>
    %c1_i32_1420 = arith.constant 1 : i32
    %3208 = arith.subi %3207, %c1_i32_1420 : i32
    %c0_i32_1421 = arith.constant 0 : i32
    %c7_i32_1422 = arith.constant 7 : i32
    %3209 = arith.maxsi %c0_i32_1421, %3208 : i32
    %3210 = arith.minsi %c7_i32_1422, %3209 : i32
    %3211 = arith.index_cast %3210 : i32 to index
    %c0_1423 = arith.constant 0 : index
    %c0_1424 = arith.constant 0 : index
    %3212 = vector.load %arg14[%3211, %c0_1423, %c0_1424] : memref<8x8x128xf32, #tpu.memory_space<vmem>>, vector<1x8x128xf32>
    %3213 = vector.shape_cast %3212 : vector<1x8x128xf32> to vector<8x128xf32>
    %c0_i32_1425 = arith.constant 0 : i32
    %3214 = arith.cmpi sgt, %3207, %c0_i32_1425 : i32
    %c0_i32_1426 = arith.constant 0 : i32
    %3215 = arith.cmpi sgt, %c7_i32_1375, %c0_i32_1426 : i32
    %3216 = arith.andi %3214, %3215 : i1
    %3217 = vector.broadcast %3216 : i1 to vector<8x1xi1>
    %3218 = arith.andi %15, %3217 : vector<8x1xi1>
    %cst_1427 = arith.constant 0.000000e+00 : f32
    %3219 = vector.shape_cast %3218 : vector<8x1xi1> to vector<8x1xi1>
    %3220 = vector.broadcast %3219 : vector<8x1xi1> to vector<8x128xi1>
    %3221 = vector.broadcast %cst_1427 : f32 to vector<8x128xf32>
    %3222 = arith.select %3220, %3213, %3221 : vector<8x128xi1>, vector<8x128xf32>
    %3223 = arith.addf %3202, %3222 : vector<8x128xf32>
    %c5_i32_1428 = arith.constant 5 : i32
    %3224 = arith.addi %0, %c5_i32_1428 : i32
    %c8_i32_1429 = arith.constant 8 : i32
    %3225 = arith.muli %3224, %c8_i32_1429 : i32
    %3226 = arith.addi %3225, %c7_i32_1375 : i32
    %3227 = arith.index_cast %3226 : i32 to index
    %3228 = memref.load %arg1[%3227] : memref<64xi32, #tpu.memory_space<smem>>
    %c1_i32_1430 = arith.constant 1 : i32
    %3229 = arith.subi %3228, %c1_i32_1430 : i32
    %c0_i32_1431 = arith.constant 0 : i32
    %c7_i32_1432 = arith.constant 7 : i32
    %3230 = arith.maxsi %c0_i32_1431, %3229 : i32
    %3231 = arith.minsi %c7_i32_1432, %3230 : i32
    %3232 = arith.index_cast %3231 : i32 to index
    %c0_1433 = arith.constant 0 : index
    %c0_1434 = arith.constant 0 : index
    %3233 = vector.load %arg14[%3232, %c0_1433, %c0_1434] : memref<8x8x128xf32, #tpu.memory_space<vmem>>, vector<1x8x128xf32>
    %3234 = vector.shape_cast %3233 : vector<1x8x128xf32> to vector<8x128xf32>
    %c0_i32_1435 = arith.constant 0 : i32
    %3235 = arith.cmpi sgt, %3228, %c0_i32_1435 : i32
    %c0_i32_1436 = arith.constant 0 : i32
    %3236 = arith.cmpi sgt, %c7_i32_1375, %c0_i32_1436 : i32
    %3237 = arith.andi %3235, %3236 : i1
    %3238 = vector.broadcast %3237 : i1 to vector<8x1xi1>
    %3239 = arith.andi %18, %3238 : vector<8x1xi1>
    %cst_1437 = arith.constant 0.000000e+00 : f32
    %3240 = vector.shape_cast %3239 : vector<8x1xi1> to vector<8x1xi1>
    %3241 = vector.broadcast %3240 : vector<8x1xi1> to vector<8x128xi1>
    %3242 = vector.broadcast %cst_1437 : f32 to vector<8x128xf32>
    %3243 = arith.select %3241, %3234, %3242 : vector<8x128xi1>, vector<8x128xf32>
    %3244 = arith.addf %3223, %3243 : vector<8x128xf32>
    %c6_i32_1438 = arith.constant 6 : i32
    %3245 = arith.addi %0, %c6_i32_1438 : i32
    %c8_i32_1439 = arith.constant 8 : i32
    %3246 = arith.muli %3245, %c8_i32_1439 : i32
    %3247 = arith.addi %3246, %c7_i32_1375 : i32
    %3248 = arith.index_cast %3247 : i32 to index
    %3249 = memref.load %arg1[%3248] : memref<64xi32, #tpu.memory_space<smem>>
    %c1_i32_1440 = arith.constant 1 : i32
    %3250 = arith.subi %3249, %c1_i32_1440 : i32
    %c0_i32_1441 = arith.constant 0 : i32
    %c7_i32_1442 = arith.constant 7 : i32
    %3251 = arith.maxsi %c0_i32_1441, %3250 : i32
    %3252 = arith.minsi %c7_i32_1442, %3251 : i32
    %3253 = arith.index_cast %3252 : i32 to index
    %c0_1443 = arith.constant 0 : index
    %c0_1444 = arith.constant 0 : index
    %3254 = vector.load %arg14[%3253, %c0_1443, %c0_1444] : memref<8x8x128xf32, #tpu.memory_space<vmem>>, vector<1x8x128xf32>
    %3255 = vector.shape_cast %3254 : vector<1x8x128xf32> to vector<8x128xf32>
    %c0_i32_1445 = arith.constant 0 : i32
    %3256 = arith.cmpi sgt, %3249, %c0_i32_1445 : i32
    %c0_i32_1446 = arith.constant 0 : i32
    %3257 = arith.cmpi sgt, %c7_i32_1375, %c0_i32_1446 : i32
    %3258 = arith.andi %3256, %3257 : i1
    %3259 = vector.broadcast %3258 : i1 to vector<8x1xi1>
    %3260 = arith.andi %21, %3259 : vector<8x1xi1>
    %cst_1447 = arith.constant 0.000000e+00 : f32
    %3261 = vector.shape_cast %3260 : vector<8x1xi1> to vector<8x1xi1>
    %3262 = vector.broadcast %3261 : vector<8x1xi1> to vector<8x128xi1>
    %3263 = vector.broadcast %cst_1447 : f32 to vector<8x128xf32>
    %3264 = arith.select %3262, %3255, %3263 : vector<8x128xi1>, vector<8x128xf32>
    %3265 = arith.addf %3244, %3264 : vector<8x128xf32>
    %c7_i32_1448 = arith.constant 7 : i32
    %3266 = arith.addi %0, %c7_i32_1448 : i32
    %c8_i32_1449 = arith.constant 8 : i32
    %3267 = arith.muli %3266, %c8_i32_1449 : i32
    %3268 = arith.addi %3267, %c7_i32_1375 : i32
    %3269 = arith.index_cast %3268 : i32 to index
    %3270 = memref.load %arg1[%3269] : memref<64xi32, #tpu.memory_space<smem>>
    %c1_i32_1450 = arith.constant 1 : i32
    %3271 = arith.subi %3270, %c1_i32_1450 : i32
    %c0_i32_1451 = arith.constant 0 : i32
    %c7_i32_1452 = arith.constant 7 : i32
    %3272 = arith.maxsi %c0_i32_1451, %3271 : i32
    %3273 = arith.minsi %c7_i32_1452, %3272 : i32
    %3274 = arith.index_cast %3273 : i32 to index
    %c0_1453 = arith.constant 0 : index
    %c0_1454 = arith.constant 0 : index
    %3275 = vector.load %arg14[%3274, %c0_1453, %c0_1454] : memref<8x8x128xf32, #tpu.memory_space<vmem>>, vector<1x8x128xf32>
    %3276 = vector.shape_cast %3275 : vector<1x8x128xf32> to vector<8x128xf32>
    %c0_i32_1455 = arith.constant 0 : i32
    %3277 = arith.cmpi sgt, %3270, %c0_i32_1455 : i32
    %c0_i32_1456 = arith.constant 0 : i32
    %3278 = arith.cmpi sgt, %c7_i32_1375, %c0_i32_1456 : i32
    %3279 = arith.andi %3277, %3278 : i1
    %3280 = vector.broadcast %3279 : i1 to vector<8x1xi1>
    %3281 = arith.andi %24, %3280 : vector<8x1xi1>
    %cst_1457 = arith.constant 0.000000e+00 : f32
    %3282 = vector.shape_cast %3281 : vector<8x1xi1> to vector<8x1xi1>
    %3283 = vector.broadcast %3282 : vector<8x1xi1> to vector<8x128xi1>
    %3284 = vector.broadcast %cst_1457 : f32 to vector<8x128xf32>
    %3285 = arith.select %3283, %3276, %3284 : vector<8x128xi1>, vector<8x128xf32>
    %3286 = arith.addf %3265, %3285 : vector<8x128xf32>
    %cst_1458 = arith.constant dense<0.000000e+00> : vector<8x128xf32>
    %3287 = tpu.matmul %3115, %1692, %cst_1458 {dimension_numbers = #tpu.dot_dimension_numbers<[1], [0], [0], [1], [0, 0, 1, 1], [], []>} : vector<8x32xbf16>, vector<32x128xbf16>, vector<8x128xf32> -> vector<8x128xf32>
    %3288 = arith.addf %3286, %3287 : vector<8x128xf32>
    %3289 = vector.extract_strided_slice %3288 {offsets = [0, 0], sizes = [8, 32], strides = [1, 1]} : vector<8x128xf32> to vector<8x32xf32>
    %3290 = arith.negf %3289 : vector<8x32xf32>
    %3291 = math.exp %3290 : vector<8x32xf32>
    %cst_1459 = arith.constant 1.000000e+00 : f32
    %3292 = vector.broadcast %cst_1459 : f32 to vector<8x32xf32>
    %3293 = arith.addf %3292, %3291 : vector<8x32xf32>
    %3294 = arith.divf %3292, %3293 : vector<8x32xf32>
    %3295 = vector.extract_strided_slice %3288 {offsets = [0, 32], sizes = [8, 32], strides = [1, 1]} : vector<8x128xf32> to vector<8x32xf32>
    %3296 = arith.negf %3295 : vector<8x32xf32>
    %3297 = math.exp %3296 : vector<8x32xf32>
    %cst_1460 = arith.constant 1.000000e+00 : f32
    %3298 = vector.broadcast %cst_1460 : f32 to vector<8x32xf32>
    %3299 = arith.addf %3298, %3297 : vector<8x32xf32>
    %3300 = arith.divf %3298, %3299 : vector<8x32xf32>
    %3301 = vector.extract_strided_slice %3288 {offsets = [0, 64], sizes = [8, 32], strides = [1, 1]} : vector<8x128xf32> to vector<8x32xf32>
    %3302 = math.tanh %3301 : vector<8x32xf32>
    %3303 = vector.extract_strided_slice %3288 {offsets = [0, 96], sizes = [8, 32], strides = [1, 1]} : vector<8x128xf32> to vector<8x32xf32>
    %3304 = arith.negf %3303 : vector<8x32xf32>
    %3305 = math.exp %3304 : vector<8x32xf32>
    %cst_1461 = arith.constant 1.000000e+00 : f32
    %3306 = vector.broadcast %cst_1461 : f32 to vector<8x32xf32>
    %3307 = arith.addf %3306, %3305 : vector<8x32xf32>
    %3308 = arith.divf %3306, %3307 : vector<8x32xf32>
    %3309 = arith.mulf %3300, %3108 : vector<8x32xf32>
    %3310 = arith.mulf %3294, %3302 : vector<8x32xf32>
    %3311 = arith.addf %3309, %3310 : vector<8x32xf32>
    %3312 = math.tanh %3311 : vector<8x32xf32>
    %3313 = arith.mulf %3308, %3312 : vector<8x32xf32>
    %3314 = arith.index_cast %c7_i32_1375 : i32 to index
    %c0_1462 = arith.constant 0 : index
    %c0_1463 = arith.constant 0 : index
    %3315 = vector.load %arg12[%3314, %c0_1462, %c0_1463] : memref<8x8x32xf32, #tpu.memory_space<vmem>>, vector<1x8x32xf32>
    %3316 = vector.shape_cast %3315 : vector<1x8x32xf32> to vector<8x32xf32>
    %3317 = vector.shape_cast %3313 : vector<8x32xf32> to vector<1x8x32xf32>
    tpu.vector_store %arg12[%3314, %c0_1462, %c0_1463], %3317 {strides = array<i32>} : memref<8x8x32xf32, #tpu.memory_space<vmem>>, vector<1x8x32xf32>,
    %3318 = arith.truncf %3313 : vector<8x32xf32> to vector<8x32xbf16>
    %c8_i32_1464 = arith.constant 8 : i32
    %c0_1465 = arith.constant 0 : index
    %c0_1466 = arith.constant 0 : index
    %c0_1467 = arith.constant 0 : index
    %3319 = vector.load %arg12[%c0_1465, %c0_1466, %c0_1467] : memref<8x8x32xf32, #tpu.memory_space<vmem>>, vector<8x8x32xf32>
    %3320 = vector.shape_cast %3319 : vector<8x8x32xf32> to vector<64x32xf32>
    %3321 = arith.truncf %3320 : vector<64x32xf32> to vector<64x32xbf16>
    %c0_1468 = arith.constant 0 : index
    %c0_1469 = arith.constant 0 : index
    %3322 = vector.load %arg9[%c0_1468, %c0_1469] : memref<32x8xbf16, #tpu.memory_space<vmem>>, vector<32x8xbf16>
    %cst_1470 = arith.constant dense<0.000000e+00> : vector<64x8xf32>
    %3323 = tpu.matmul %3321, %3322, %cst_1470 {dimension_numbers = #tpu.dot_dimension_numbers<[1], [0], [0], [1], [0, 0, 1, 1], [], []>} : vector<64x32xbf16>, vector<32x8xbf16>, vector<64x8xf32> -> vector<64x8xf32>
    %c0_1471 = arith.constant 0 : index
    %c0_1472 = arith.constant 0 : index
    %3324 = vector.load %arg10[%c0_1471, %c0_1472] : memref<1x8xf32, #tpu.memory_space<vmem>>, vector<1x8xf32>
    %3325 = vector.broadcast %3324 : vector<1x8xf32> to vector<64x8xf32>
    %3326 = arith.addf %3323, %3325 : vector<64x8xf32>
    %3327 = vector.shape_cast %3326 : vector<64x8xf32> to vector<8x8x8xf32>
    %c0_1473 = arith.constant 0 : index
    %c0_1474 = arith.constant 0 : index
    %c0_1475 = arith.constant 0 : index
    %3328 = vector.load %arg11[%c0_1473, %c0_1474, %c0_1475] : memref<8x8x8xf32, #tpu.memory_space<vmem>>, vector<8x8x8xf32>
    tpu.vector_store %arg11[%c0_1473, %c0_1474, %c0_1475], %3327 {strides = array<i32>} : memref<8x8x8xf32, #tpu.memory_space<vmem>>, vector<8x8x8xf32>,
    return
  }
  func.func @transform_0(%arg0: i32, %arg1: memref<64xi32, #tpu.memory_space<smem>>) -> (i32, i32, i32) {
    %c0_i32 = arith.constant 0 : i32
    %c0_i32_0 = arith.constant 0 : i32
    %c0_i32_1 = arith.constant 0 : i32
    return %c0_i32, %arg0, %c0_i32_0 : i32, i32, i32
  }
  func.func @transform_1(%arg0: i32, %arg1: memref<64xi32, #tpu.memory_space<smem>>) -> (i32, i32) {
    %c0_i32 = arith.constant 0 : i32
    %c0_i32_0 = arith.constant 0 : i32
    return %arg0, %c0_i32 : i32, i32
  }
  func.func @transform_2(%arg0: i32, %arg1: memref<64xi32, #tpu.memory_space<smem>>) -> (i32, i32) {
    %c0_i32 = arith.constant 0 : i32
    %c0_i32_0 = arith.constant 0 : i32
    %c0_i32_1 = arith.constant 0 : i32
    return %c0_i32, %c0_i32_0 : i32, i32
  }
  func.func @transform_3(%arg0: i32, %arg1: memref<64xi32, #tpu.memory_space<smem>>) -> (i32, i32) {
    %c0_i32 = arith.constant 0 : i32
    %c0_i32_0 = arith.constant 0 : i32
    %c0_i32_1 = arith.constant 0 : i32
    return %c0_i32, %c0_i32_0 : i32, i32
  }
  func.func @transform_4(%arg0: i32, %arg1: memref<64xi32, #tpu.memory_space<smem>>) -> (i32, i32) {
    %c0_i32 = arith.constant 0 : i32
    %c0_i32_0 = arith.constant 0 : i32
    %c0_i32_1 = arith.constant 0 : i32
    return %c0_i32, %c0_i32_0 : i32, i32
  }
  func.func @transform_5(%arg0: i32, %arg1: memref<64xi32, #tpu.memory_space<smem>>) -> (i32, i32, i32) {
    %c0_i32 = arith.constant 0 : i32
    %c0_i32_0 = arith.constant 0 : i32
    %c0_i32_1 = arith.constant 0 : i32
    %c0_i32_2 = arith.constant 0 : i32
    return %c0_i32, %c0_i32_0, %c0_i32_1 : i32, i32, i32
  }
  func.func @transform_6(%arg0: i32, %arg1: memref<64xi32, #tpu.memory_space<smem>>) -> (i32, i32, i32) {
    %c0_i32 = arith.constant 0 : i32
    %c0_i32_0 = arith.constant 0 : i32
    %c0_i32_1 = arith.constant 0 : i32
    %c0_i32_2 = arith.constant 0 : i32
    return %c0_i32, %c0_i32_0, %c0_i32_1 : i32, i32, i32
  }
  func.func @transform_7(%arg0: i32, %arg1: memref<64xi32, #tpu.memory_space<smem>>) -> (i32, i32) {
    %c0_i32 = arith.constant 0 : i32
    %c0_i32_0 = arith.constant 0 : i32
    %c0_i32_1 = arith.constant 0 : i32
    return %c0_i32, %c0_i32_0 : i32, i32
  }
  func.func @transform_8(%arg0: i32, %arg1: memref<64xi32, #tpu.memory_space<smem>>) -> (i32, i32) {
    %c0_i32 = arith.constant 0 : i32
    %c0_i32_0 = arith.constant 0 : i32
    %c0_i32_1 = arith.constant 0 : i32
    return %c0_i32, %c0_i32_0 : i32, i32
  }
  func.func @transform_9(%arg0: i32, %arg1: memref<64xi32, #tpu.memory_space<smem>>) -> (i32, i32, i32) {
    %c0_i32 = arith.constant 0 : i32
    %c0_i32_0 = arith.constant 0 : i32
    %c0_i32_1 = arith.constant 0 : i32
    return %c0_i32, %arg0, %c0_i32_0 : i32, i32, i32
  }
}

</mosaic_0001>

<bundles_post_ra>
// kernel: sqapcilstm_model_forward.1
= control target key start
LH: loop header
LB: loop body
LE: loop exit
PB: predicated region body
PF: predicated region fallthrough
CT: control target
= control target key end

     0   :  { %s7895_s0 = inlined_call_operand.vmem [shape: s32[64], index: 0, kind: input, shape index: {}]   ;;  %s7896_s1 = inlined_call_operand.vmem [shape: f32[8,8,32], index: 1, kind: input, shape index: {}]   ;;  %s7897_s2 = inlined_call_operand.vmem [shape: f32[8,32], index: 2, kind: input, shape index: {}]   ;;  %s7898_s3 = inlined_call_operand.vmem [shape: bf16[32,256], index: 3, kind: input, shape index: {}]   ;;  %s7899_s4 = inlined_call_operand.vmem [shape: f32[1,256], index: 4, kind: input, shape index: {}]   ;;  %s7900_s5 = inlined_call_operand.vmem [shape: bf16[32,256], index: 5, kind: input, shape index: {}]   ;;  %s7901_s6 = inlined_call_operand.vmem [shape: bf16[1,32,256], index: 6, kind: input, shape index: {}]   ;;  %s7902_s7 = inlined_call_operand.vmem [shape: bf16[2,32,128], index: 7, kind: input, shape index: {}]   ;;  %s7903_s8 = inlined_call_operand.vmem [shape: bf16[32,8], index: 8, kind: input, shape index: {}]   ;;  %s7904_s9 = inlined_call_operand.vmem [shape: f32[1,8], index: 9, kind: input, shape index: {}]   ;;  %s7905_s10 = inlined_call_operand.vmem [shape: f32[8,8,8], index: 10, kind: output, shape index: {}]  }
   0x1   :  { %s15_s15 = sshll.u32 %s7895_s0, 4  ;;  %s16_s15 = int_to_ptr.vmem [resolvable:$true] %s15_s15 }
   0x2   :  { %s5703_s16 = scalar_lea.vmem %s16_s15, 16  ;;  %p5708_p1 = scmp.lt.s32.totalorder %s16_s15, %s16_s15 }
   0x3   :  { %p5704_p0 = scmp.ne.s32.totalorder %s16_s15, %s5703_s16  ;;  %p5709_p2 = scmp.lt.s32.totalorder %s5703_s16, %s5703_s16 }
   0x5   :  { %p5710_p3 = por %p5709_p2, %p5708_p1 }
   0x7   :  { %p5711_p4 = pnand %p5710_p3, %p5704_p0 }
   0x9   :  { %5714 = shalt.err (!%p5711_p4)  }
   0xa   :  { %s5717_s17 = smov [#allocation6]  }
   0xb   :  { %18 = dma.vmem_to_smem %s16_s15, 16, %s5717_s17, [#allocation5] }
   0xc   :  { %5715 = dma.done.wait [#allocation5], 16 }
   0xd   :  { %5716 = vsyncadd [#allocation5], 4294967280 }
   0xe   :  { %20 = sfence }
   0xf   :  { %v5546_v0 = vld [vmem:[%s7898_s3 + $0x14] ss:$8 sps:$4 sm:$0xff]   ;;  %v5718_v2 = vmov 0   ;;  %v5550_v3 = vld [vmem:[%s7898_s3 + $0x10] ss:$8 sps:$4 sm:$0xff]   ;;  %v51_v9 = vld [vmem:[%s7897_s2] sm:$0xff]  ;;  %v41_v26 = vlaneseq }
  0x10   :  { %v5548_v1 = vld [vmem:[%s7900_s5 + $0x14] ss:$8 sps:$4 sm:$0xff]   ;;  %125 = vmatprep.mubr.bf16.mxu0 %v5718_v2  ;;  %214 = vmatprep.mubr.bf16.mxu1 %v5718_v2  ;;  %v5551_v4 = vld [vmem:[%s7900_s5 + $0x10] ss:$8 sps:$4 sm:$0xff]   ;;  %v5552_v5 = vld [vmem:[%s7898_s3 + $0x4] ss:$8 sps:$4 sm:$0xff]   ;;  %v52_v12 = vpack.c.bf16 %v51_v9, %v51_v9 }
  0x11   :  { %105 = vmatprep.subr.bf16.mxu0 %v5546_v0  ;;  %194 = vmatprep.subr.bf16.mxu1 %v5548_v1  ;;  %v5554_v6 = vld [vmem:[%s7900_s5 + $0x4] ss:$8 sps:$4 sm:$0xff]   ;;  %v5556_v7 = vld [vmem:[%s7898_s3] ss:$8 sps:$4 sm:$0xff]   ;;  %vm89_vm0 = vcmask 261120   ;;  %v5719_v15 = vmov 0.0  }
  0x12   :  { %106 = vmatpush1.bf16.msra.mxu0 %v5550_v3  ;;  %195 = vmatpush1.bf16.msra.mxu1 %v5551_v4  ;;  %v5557_v8 = vld [vmem:[%s7900_s5] ss:$8 sps:$4 sm:$0xff]   ;;  %v136_v17 = vld [vmem:[%s7896_s1 + $0x10] sm:$0xff]  ;;  %v137_v18 = vld [vmem:[%s7896_s1 + $0x18] sm:$0xff]  ;;  %vm5720_vm1 = vmmov 0   ;;  %v5873_v27 = vshrl.u32 %v41_v26, 7 }
  0x13   :  { %107 = vmatprep.subr.bf16.mxu0 %v5552_v5  ;;  %v134_v10 = vld [vmem:[%s7896_s1] sm:$0xff]  ;;  %196 = vmatprep.subr.bf16.mxu1 %v5554_v6  ;;  %v135_v11 = vld [vmem:[%s7896_s1 + $0x8] sm:$0xff]  ;;  %v147_v19 = vpack.c.bf16 %v137_v18, %v136_v17  ;;  %v140_v23 = vld [vmem:[%s7896_s1 + $0x30] sm:$0xff]  ;;  %s5722_s13 = smov 32   ;;  %s4176_s14 = sld [smem:[#allocation6 + $0x1]] }
  0x14   :  { %v146_v13 = vpack.c.bf16 %v135_v11, %v134_v10  ;;  %v5819_v14 = vld [vmem:[%s7902_s7 + $0x8] sm:$0xff]   ;;  %v5826_v16 = vld [vmem:[%s7902_s7] sm:$0xff]   ;;  %v141_v24 = vld [vmem:[%s7896_s1 + $0x38] sm:$0xff]  ;;  %v61_v28 = vsub.s32 0, %v5873_v27  ;;  %s4184_s15 = sld [smem:[#allocation6 + $0x9]]  ;;  %vm43_vm2 = vcmp.eq.s32.totalorder %v5873_v27, 0 }
  0x15   :  { %v138_v20 = vld [vmem:[%s7896_s1 + $0x20] sm:$0xff]  ;;  %v139_v21 = vld [vmem:[%s7896_s1 + $0x28] sm:$0xff]  ;;  %v149_v25 = vpack.c.bf16 %v141_v24, %v140_v23  ;;  %s5721_s1 = smov 64   ;;  %s5913_s17 = sld [smem:[#allocation6 + $0x11]]  ;;  %vm44_vm5 = vcmp.eq.s32.totalorder %v5873_v27, 1  ;;  %vm45_vm8 = vcmp.eq.s32.totalorder %v5873_v27, 2 }
  0x16   :  { %108 = vmatpush1.bf16.msra.mxu0 %v5556_v7  ;;  %197 = vmatpush1.bf16.msra.mxu1 %v5557_v8  ;;  %v148_v22 = vpack.c.bf16 %v139_v21, %v138_v20  ;;  %v57_v29 = vld [vmem:[%s7899_s4] sm:$0x3]  ;;  %s5917_s5 = sld [smem:[#allocation6 + $0x19]]  ;;  %vm7906_vm11 = vcmp.eq.s32.totalorder %v5873_v27, 3  ;;  %vm47_vm14 = vcmp.eq.s32.totalorder %v5873_v27, 4 }
  0x17   :  { %5400 = vmatprep.subr.bf16.mxu0 %v5719_v15  ;;  %5432 = vmatprep.subr.bf16.mxu1 %v5719_v15  ;;  %v62_v30 = vrot.slane %v57_v29, %v61_v28  ;;  %s5922_s20 = sld [smem:[#allocation6 + $0x21]] }
  0x18   :  { %s5935_s26 = sld [smem:[#allocation6 + $0x29]] }
  0x19   :  { %4164 = vmatmul.mubr.msk.bf16.vlgmr.msra.gmra.mxu0 %vm89_vm0, %v52_v12  ;;  %4169 = vmatmul.mubr.msk.bf16.vlgmr.msra.gmra.mxu1 %vm89_vm0, %v146_v13  ;;  %s4177_s16 = sadd.s32 4294967295, %s4176_s14  ;;  %p391_p5 = scmp.gt.s32.totalorder %s4176_s14, 0 }
  0x1a   :  { %5401 = vmatpush3.bf16.msra.mxu0 %v5819_v14  ;;  %224 = vmatprep.mubr.bf16.mxu1 %v5718_v2  ;;  %p384_p6 = scmp.gt.s32.totalorder %s4177_s16, 0  ;;  %s4185_s18 = sadd.s32 4294967295, %s4184_s15 }
  0x1b   :  { %5402 = vmatprep.subr.bf16.mxu0 %v5719_v15  ;;  %5404 = vmatprep.mubr.msk.bf16.mxu0 %vm5720_vm1, %v5719_v15  ;;  %s5915_s3 = scalar_select %p391_p5, 1, 0 }
  0x1c   :  { %5433 = vmatpush3.bf16.msra.mxu1 %v5819_v14  ;;  %p405_p7 = scmp.gt.s32.totalorder %s4185_s18, 0  ;;  %p4178_p8 = scmp.lt.s32.totalorder %s4177_s16, 7 }
  0x1d   :  { %5434 = vmatprep.subr.bf16.mxu1 %v5719_v15  ;;  %s385_s2 = scalar_select %p384_p6, %s4177_s16, 0  ;;  %v393_v20 = vstv %s5915_s3 }
  0x1e   :  { %5403 = vmatpush3.bf16.msra.mxu0 %v5826_v16  ;;  %s4193_s19 = sadd.s32 4294967295, %s5913_s17  ;;  %p4186_p9 = scmp.lt.s32.totalorder %s4185_s18, 7  ;;  %vm394_vm3 = vcmp.eq.s32.totalorder %v393_v20, 1 }
  0x1f   :  { %5408 = vmatprep.subr.bf16.mxu0 %v5719_v15  ;;  %s7974_s18 = smov (!%p405_p7, %s4185_s18), 0  ;;  %p426_p10 = scmp.gt.s32.totalorder %s4193_s19, 0  ;;  %vm5958_vm4 = vmand %vm43_vm2, %vm394_vm3 }
  0x20   :  { %5435 = vmatpush3.bf16.msra.mxu1 %v5826_v16  ;;  %s7976_s2 = smov (!%p4178_p8, %s385_s2), 7  ;;  %p412_p11 = scmp.gt.s32.totalorder %s4184_s15, 0 }
  0x21   :  { %4170 = vmatmul.mubr.msk.bf16.gmra.mxu1 %vm89_vm0, %v147_v19  ;;  %5405 = vmatmul.mubr.bf16.vlgmr.msra.gmra.mxu0 %v5718_v2  ;;  %s7978_s18 = smov (!%p4186_p9, %s7974_s18), 7  ;;  %p4194_p12 = scmp.lt.s32.totalorder %s4193_s19, 7 }
  0x22   :  { %234 = vmatprep.mubr.bf16.mxu1 %v5718_v2  ;;  %5409 = vmatpush3.bf16.msra.mxu0 %v5819_v14  ;;  %s427_s21 = scalar_select %p426_p10, %s4193_s19, 0 }
  0x23   :  { %5410 = vmatprep.subr.bf16.mxu0 %v5719_v15  ;;  %5412 = vmatprep.mubr.msk.bf16.mxu0 %vm5720_vm1, %v5719_v15  ;;  %s4201_s0 = sadd.s32 4294967295, %s5917_s5  ;;  %s4183_s23 = sshll.u32 %s7976_s2, 3 }
  0x24   :  { %5448 = vmatprep.subr.bf16.mxu1 %v5719_v15  ;;  %s5927_s22 = scalar_select %p412_p11, 1, 0 }
  0x25   :  { %s4191_s24 = sshll.u32 %s7978_s18, 3  ;;  %p433_p13 = scmp.gt.s32.totalorder %s5913_s17, 0 }
  0x26   :  { %5411 = vmatpush3.bf16.msra.mxu0 %v5826_v16  ;;  %p447_p0 = scmp.gt.s32.totalorder %s4201_s0, 0  ;;  %s7980_s21 = smov (!%p4194_p12, %s427_s21), 7 }
  0x27   :  { %5416 = vmatprep.subr.bf16.mxu0 %v5719_v15  ;;  %s4209_s25 = sadd.s32 4294967295, %s5922_s20  ;;  %p4202_p1 = scmp.lt.s32.totalorder %s4201_s0, 7 }
  0x28   :  { %s7982_s0 = smov (!%p447_p0, %s4201_s0), 0  ;;  %p468_p2 = scmp.gt.s32.totalorder %s4209_s25, 0 }
  0x29   :  { %4171 = vmatmul.mubr.msk.bf16.gmra.mxu1 %vm89_vm0, %v148_v22  ;;  %s5937_s27 = scalar_select %p433_p13, 1, 0  ;;  %v414_v22 = vstv %s5927_s22 }
  0x2a   :  { %244 = vmatprep.mubr.bf16.mxu1 %v5718_v2  ;;  %p454_p3 = scmp.gt.s32.totalorder %s5917_s5, 0  ;;  %s5940_s28 = sld [smem:[#allocation6 + $0x31]]  ;;  %vm415_vm6 = vcmp.eq.s32.totalorder %v414_v22, 1 }
  0x2b   :  { %s7984_s0 = smov (!%p4202_p1, %s7982_s0), 7  ;;  %p4210_p4 = scmp.lt.s32.totalorder %s4209_s25, 7  ;;  %vm5980_vm7 = vmand %vm44_vm5, %vm415_vm6 }
  0x2c   :  { %s469_s29 = scalar_select %p468_p2, %s4209_s25, 0 }
  0x2d   :  { %s5946_s30 = sadd.s32 4294967295, %s5935_s26  ;;  %s4199_s12 = sshll.u32 %s7980_s21, 3 }
  0x2e   :  { %s5949_s11 = scalar_select %p454_p3, 1, 0 }
  0x2f   :  { %s4207_s14 = sshll.u32 %s7984_s0, 3  ;;  %p489_p5 = scmp.gt.s32.totalorder %s5946_s30, 0 }
  0x30   :  { %s5954_s15 = sld [smem:[#allocation6 + $0x39]]  ;;  %s389_s16 = scalar_lea.vmem [#allocation4], %s4183_s23 }
  0x31   :  { %4172 = vmatmul.mubr.msk.bf16.gmra.mxu1 %vm89_vm0, %v149_v25  ;;  %s7986_s29 = smov (!%p4210_p4, %s469_s29), 7  ;;  %p475_p6 = scmp.gt.s32.totalorder %s5922_s20, 0  ;;  %v435_v25 = vstv %s5937_s27 }
  0x32   :  { %5436 = vmatprep.mubr.msk.bf16.mxu1 %vm5720_vm1, %v5719_v15  ;;  %s5967_s17 = sadd.s32 4294967295, %s5940_s28  ;;  %p4218_p7 = scmp.lt.s32.totalorder %s5946_s30, 7  ;;  %vm436_vm9 = vcmp.eq.s32.totalorder %v435_v25, 1 }
  0x33   :  { %s490_s3 = scalar_select %p489_p5, %s5946_s30, 0  ;;  %vm6004_vm10 = vmand %vm45_vm8, %vm436_vm9  ;;  %vm49_vm9 = vcmp.eq.s32.totalorder %v5873_v27, 6 }
  0x34   :  { %p510_p8 = scmp.gt.s32.totalorder %s5967_s17, 0  ;;  %s410_s2 = scalar_lea.vmem [#allocation4], %s4191_s24 }
  0x35   :  { %s5976_s5 = scalar_select %p475_p6, 1, 0 }
  0x36   :  { %s4215_s19 = sshll.u32 %s7986_s29, 3  ;;  %p496_p9 = scmp.gt.s32.totalorder %s5935_s26, 0 }
  0x37   :  { %s7988_s3 = smov (!%p4218_p7, %s490_s3), 7  ;;  %p4226_p10 = scmp.lt.s32.totalorder %s5967_s17, 7 }
  0x38   :  { %s511_s20 = scalar_select %p510_p8, %s5967_s17, 0 }
  0x39   :  { %s6000_s18 = sadd.s32 4294967295, %s5954_s15  ;;  %s431_s22 = scalar_lea.vmem [#allocation4], %s4199_s12 }
  0x3a   :  { %p517_p11 = scmp.gt.s32.totalorder %s5940_s28, 0  ;;  %s4223_s24 = sshll.u32 %s7988_s3, 3 }
  0x3b   :  { %s497_s23 = scalar_select %p496_p9, 1, 0 }
  0x3c   :  { %p531_p12 = scmp.gt.s32.totalorder %s6000_s18, 0  ;;  %s7990_s20 = smov (!%p4226_p10, %s511_s20), 7 }
  0x3d   :  { %s452_s21 = scalar_lea.vmem [#allocation4], %s4207_s14  ;;  %p4234_p13 = scmp.lt.s32.totalorder %s6000_s18, 7 }
  0x3e   :  { %s518_s25 = scalar_select %p517_p11, 1, 0 }
  0x3f   :  { %p538_p0 = scmp.gt.s32.totalorder %s5954_s15, 0  ;;  %s473_s27 = scalar_lea.vmem [#allocation4], %s4215_s19 }
  0x40   :  { %s532_s26 = scalar_select %p531_p12, %s6000_s18, 0 }
  0x41   :  { %s4231_s0 = sshll.u32 %s7990_s20, 3  ;;  %s494_s30 = scalar_lea.vmem [#allocation4], %s4223_s24 }
  0x42   :  { %s539_s28 = scalar_select %p538_p0, 1, 0 }
  0x43   :  { %s7992_s26 = smov (!%p4234_p13, %s532_s26), 7  ;;  %s4242_s14 = sld [smem:[#allocation6 + $0x2]] }
  0x44   :  { %s4239_s29 = sshll.u32 %s7992_s26, 3  ;;  %s4250_s15 = sld [smem:[#allocation6 + $0xa]] }
  0x45   :  { %s536_s12 = scalar_lea.vmem [#allocation4], %s4239_s29  ;;  %s4258_s3 = sld [smem:[#allocation6 + $0x12]] }
  0x49   :  { %p637_p4 = scmp.gt.s32.totalorder %s4242_s14, 0 }
  0x4a   :  { %s4251_s17 = sadd.s32 4294967295, %s4250_s15  ;;  %p656_p6 = scmp.gt.s32.totalorder %s4250_s15, 0 }
  0x4b   :  { %p649_p3 = scmp.gt.s32.totalorder %s4251_s17, 0  ;;  %p4252_p5 = scmp.lt.s32.totalorder %s4251_s17, 7 }
  0x4c   :  { %s638_s19 = scalar_select %p637_p4, 1, 0 }
  0x4d   :  { %s4259_s18 = sadd.s32 4294967295, %s4258_s3  ;;  %p675_p8 = scmp.gt.s32.totalorder %s4258_s3, 0 }
  0x4e   :  { %p668_p7 = scmp.gt.s32.totalorder %s4259_s18, 0  ;;  %p4260_p9 = scmp.lt.s32.totalorder %s4259_s18, 7 }
  0x4f   :  { %s6078_s26 = scalar_select %p675_p8, 1, 0 }
  0x50   :  { %s8000_s18 = smov (!%p668_p7, %s4259_s18), 0  ;;  %s6107_s15 = sld [smem:[#allocation6 + $0x3a]] }
  0x51   :  { %s8002_s18 = smov (!%p4260_p9, %s8000_s18), 7 }
  0xd9   :  { %v127_v31 = vpop.f32.mrf.mxu0  ;;  %v216_v32 = vpop.f32.mrf.mxu1 }
  0xda   :  { %v128_v35 = vadd.f32 %v127_v31, %v62_v30  ;;  %v456_v30 = vstv %s5949_s11  ;;  %s515_s11 = scalar_lea.vmem [#allocation4], %s4231_s0 }
  0xdb   :  { %v5879_v33 = vpop.f32.mrf.mxu0  ;;  %v218_v34 = vpop.f32.mrf.mxu1  ;;  %vm457_vm12 = vcmp.eq.s32.totalorder %v456_v30, 1  ;;  %v677_v30 = vstv %s6078_s26 }
  0xdc   :  { %271 = vst [vmem:[#allocation4] sm:$0xff] %v218_v34  ;;  %v255_v41 = vadd.f32 %v216_v32, %v128_v35  ;;  %vm458_vm13 = vmand %vm7906_vm11, %vm457_vm12 }
  0xdd   :  { %v131_v36 = vpop.f32.mrf.mxu0  ;;  %v220_v37 = vpop.f32.mrf.mxu1 }
  0xde   :  { %v5881_v38 = vadd.f32 %v220_v37, %v128_v35  ;;  %v477_v36 = vstv %s5976_s5  ;;  %s650_s5 = scalar_select %p649_p3, %s4251_s17, 0 }
  0xdf   :  { %v132_v39 = vpop.f32.mrf.mxu0  ;;  %v222_v40 = vpop.f32.mrf.mxu1  ;;  %vm478_vm15 = vcmp.eq.s32.totalorder %v477_v36, 1 }
  0xe0   :  { %272 = vst [vmem:[#allocation4 + $0x8] sm:$0xff] %v222_v40  ;;  %v498_v40 = vstv %s497_s23  ;;  %vm479_vm3 = vmand %vm47_vm14, %vm478_vm15  ;;  %s7998_s5 = smov (!%p4252_p5, %s650_s5), 7 }
  0xe1   :  { %v226_v42 = vpop.f32.mrf.mxu1  ;;  %v341_v43 = vpop.f32.mrf.mxu0  ;;  %vm499_vm6 = vcmp.eq.s32.totalorder %v498_v40, 1  ;;  %s6073_s23 = scalar_select %p656_p6, 1, 0 }
  0xe2   :  { %v5883_v44 = vadd.f32 %v226_v42, %v128_v35  ;;  %v347_v45 = vadd.f32 %v341_v43, %v255_v41 }
  0xe3   :  { %v228_v46 = vpop.f32.mrf.mxu1  ;;  %v5406_v47 = vpop.f32.mrf.mxu0  ;;  %v658_v26 = vstv %s6073_s23 }
  0xe4   :  { %5570 = vtanh.f32 %v347_v45  ;;  %273 = vst [vmem:[#allocation4 + $0x10] sm:$0xff] %v228_v46  ;;  %v4175_v3 = vmul.f32 -1.442695, %v347_v45  ;;  %v519_v45 = vstv %s518_s25  ;;  %s6076_s25 = sld [smem:[#allocation6 + $0x2a]] }
  0xe5   :  { %v230_v48 = vpop.f32.mrf.mxu1  ;;  %v344_v49 = vpop.f32.mrf.mxu0 }
  0xe6   :  { %v5885_v50 = vadd.f32 %v230_v48, %v128_v35  ;;  %5572 = vpow2.f32 %v4175_v3  ;;  %v540_v49 = vstv %s539_s28 }
  0xe7   :  { %v232_v51 = vpop.f32.mrf.mxu1  ;;  %v5407_v52 = vpop.f32.mrf.mxu0  ;;  %vm541_vm15 = vcmp.eq.s32.totalorder %v540_v49, 1 }
  0xe8   :  { %274 = vst [vmem:[#allocation4 + $0x18] sm:$0xff] %v232_v51 }
  0xe9   :  { %v236_v53 = vpop.f32.mrf.mxu1 }
  0xea   :  { %v5887_v54 = vadd.f32 %v236_v53, %v128_v35  ;;  %s6087_s29 = sadd.s32 4294967295, %s6076_s25  ;;  %p732_p4 = scmp.gt.s32.totalorder %s6076_s25, 0 }
  0xeb   :  { %v238_v55 = vpop.f32.mrf.mxu1  ;;  %p4284_p3 = scmp.lt.s32.totalorder %s6087_s29, 7 }
  0xec   :  { %275 = vst [vmem:[#allocation4 + $0x20] sm:$0xff] %v238_v55  ;;  %s733_s23 = scalar_select %p732_p4, 1, 0 }
  0xed   :  { %v240_v56 = vpop.f32.mrf.mxu1 }
  0xee   :  { %v5889_v57 = vadd.f32 %v240_v56, %v128_v35 }
  0xef   :  { %v242_v58 = vpop.f32.mrf.mxu1 }
  0xf0   :  { %276 = vst [vmem:[#allocation4 + $0x28] sm:$0xff] %v242_v58 }
  0xf1   :  { %v5571_v59 = vpop.eup %5570  ;;  %v246_v60 = vpop.f32.mrf.mxu1 }
  0xf2   :  { %v5891_v61 = vadd.f32 %v246_v60, %v128_v35  ;;  %357 = vrot.lane.b32.xlu0 %v5571_v59, %s5721_s1 }
  0xf3   :  { %v248_v62 = vpop.f32.mrf.mxu1  ;;  %v5573_v4 = vpop.eup %5572 }
  0xf4   :  { %277 = vst [vmem:[#allocation4 + $0x30] sm:$0xff] %v248_v62  ;;  %v351_v5 = vadd.f32 1.0, %v5573_v4 }
  0xf5   :  { %v250_v63 = vpop.f32.mrf.mxu1 }
  0xf6   :  { %v5894_v0 = vadd.f32 %v250_v63, %v128_v35  ;;  %5574 = vrcp.f32 %v351_v5 }
  0xf7   :  { %v252_v1 = vpop.f32.mrf.mxu1 }
  0xf8   :  { %278 = vst [vmem:[#allocation4 + $0x38] sm:$0xff] %v252_v1 }
  0xff   :  { %v390_v23 = vld [vmem:[%s389_s16] sm:$0xff]  ;;  %s4243_s16 = sadd.s32 4294967295, %s4242_s14 }
 0x100   :  { %v398_v24 = vsel %vm5958_vm4, %v390_v23, 0.0  ;;  %v411_v28 = vld [vmem:[%s410_s2] sm:$0xff]  ;;  %vm48_vm4 = vcmp.eq.s32.totalorder %v5873_v27, 5  ;;  %p630_p1 = scmp.gt.s32.totalorder %s4243_s16, 0  ;;  %p4244_p2 = scmp.lt.s32.totalorder %s4243_s16, 7 }
 0x101   :  { %v399_v29 = vadd.f32 %v398_v24, %v5881_v38  ;;  %v419_v31 = vsel %vm5980_vm7, %v411_v28, 0.0  ;;  %v432_v34 = vld [vmem:[%s431_s22] sm:$0xff]  ;;  %vm500_vm7 = vmand %vm48_vm4, %vm499_vm6  ;;  %s4266_s2 = sld [smem:[#allocation6 + $0x1a]] }
 0x102   :  { %v440_v37 = vsel %vm6004_vm10, %v432_v34, 0.0  ;;  %v453_v38 = vld [vmem:[%s452_s21] sm:$0xff]  ;;  %vm520_vm10 = vcmp.eq.s32.totalorder %v519_v45, 1  ;;  %s7994_s16 = smov (!%p630_p1, %s4243_s16), 0  ;;  %s6071_s22 = sld [smem:[#allocation6 + $0x22]] }
 0x103   :  { %v5575_v6 = vpop.eup %5574  ;;  %v420_v35 = vadd.f32 %v419_v31, %v399_v29  ;;  %v461_v41 = vsel %vm458_vm13, %v453_v38, 0.0  ;;  %v474_v43 = vld [vmem:[%s473_s27] sm:$0xff]  ;;  %vm521_vm12 = vmand %vm49_vm9, %vm520_vm10  ;;  %vm50_vm13 = vcmp.eq.s32.totalorder %v5873_v27, 7  ;;  %s7996_s16 = smov (!%p4244_p2, %s7994_s16), 7  ;;  %s4257_s21 = sshll.u32 %s7998_s5, 3  ;;  %vm659_vm10 = vcmp.eq.s32.totalorder %v658_v26, 1 }
 0x104   :  { %v355_v9 = vmul.f32 0.0, %v5575_v6  ;;  %v482_v46 = vsel %vm479_vm3, %v474_v43, 0.0  ;;  %v495_v48 = vld [vmem:[%s494_s30] sm:$0xff]  ;;  %vm542_vm3 = vmand %vm50_vm13, %vm541_vm15  ;;  %s4249_s20 = sshll.u32 %s7996_s16, 3  ;;  %s4265_s30 = sshll.u32 %s8002_s18, 3  ;;  %vm678_vm15 = vcmp.eq.s32.totalorder %v677_v30, 1 }
 0x105   :  { %v441_v39 = vadd.f32 %v440_v37, %v420_v35  ;;  %v503_v51 = vsel %vm500_vm7, %v495_v48, 0.0  ;;  %v516_v53 = vld [vmem:[%s515_s11] sm:$0xff]  ;;  %s6089_s11 = sld [smem:[#allocation6 + $0x32]]  ;;  %p725_p1 = scmp.gt.s32.totalorder %s6087_s29, 0 }
 0x106   :  { %v524_v55 = vsel %vm521_vm12, %v516_v53, 0.0  ;;  %v537_v58 = vld [vmem:[%s536_s12] sm:$0xff]  ;;  %s635_s12 = scalar_lea.vmem [#allocation4], %s4249_s20  ;;  %vm6124_vm12 = vmand %vm44_vm5, %vm659_vm10  ;;  %s6141_s5 = sadd.s32 4294967295, %s6107_s15 }
 0x107   :  { %v462_v42 = vadd.f32 %v461_v41, %v441_v39  ;;  %v545_v59 = vsel %vm542_vm3, %v537_v58, 0.0  ;;  %s4267_s24 = sadd.s32 4294967295, %s4266_s2  ;;  %p694_p11 = scmp.gt.s32.totalorder %s4266_s2, 0  ;;  %v636_v28 = vld [vmem:[%s635_s12] sm:$0xff]  ;;  %vm679_vm3 = vmand %vm45_vm8, %vm678_vm15 }
 0x108   :  { %p687_p10 = scmp.gt.s32.totalorder %s4267_s24, 0  ;;  %s4275_s27 = sadd.s32 4294967295, %s6071_s22 }
 0x109   :  { %v483_v47 = vadd.f32 %v482_v46, %v462_v42  ;;  %p4268_p12 = scmp.lt.s32.totalorder %s4267_s24, 7  ;;  %p706_p13 = scmp.gt.s32.totalorder %s4275_s27, 0  ;;  %v734_v42 = vstv %s733_s23 }
 0x10a   :  { %s688_s0 = scalar_select %p687_p10, %s4267_s24, 0  ;;  %vm735_vm15 = vcmp.eq.s32.totalorder %v734_v42, 1 }
 0x10b   :  { %v504_v52 = vadd.f32 %v503_v51, %v483_v47  ;;  %s6083_s28 = scalar_select %p694_p11, 1, 0 }
 0x10c   :  { %p4276_p0 = scmp.lt.s32.totalorder %s4275_s27, 7  ;;  %s8004_s27 = smov (!%p706_p13, %s4275_s27), 0 }
 0x10d   :  { %v525_v56 = vadd.f32 %v524_v55, %v504_v52  ;;  %s8006_s0 = smov (!%p4268_p12, %s688_s0), 7  ;;  %p713_p2 = scmp.gt.s32.totalorder %s6071_s22, 0  ;;  %v696_v35 = vstv %s6083_s28 }
 0x10e   :  { %s8008_s27 = smov (!%p4276_p0, %s8004_s27), 7  ;;  %s4273_s14 = sshll.u32 %s8006_s0, 3 }
 0x10f   :  { %v546_v60 = vadd.f32 %v545_v59, %v525_v56  ;;  %s726_s17 = scalar_select %p725_p1, %s6087_s29, 0 }
 0x110   :  { %s6114_s3 = sadd.s32 4294967295, %s6089_s11  ;;  %s4281_s2 = sshll.u32 %s8008_s27, 3 }
 0x111   :  { %s6119_s16 = scalar_select %p713_p2, 1, 0 }
 0x112   :  { %p744_p5 = scmp.gt.s32.totalorder %s6114_s3, 0  ;;  %s8010_s17 = smov (!%p4284_p3, %s726_s17), 7 }
 0x113   :  { %p751_p6 = scmp.gt.s32.totalorder %s6089_s11, 0  ;;  %p4292_p7 = scmp.lt.s32.totalorder %s6114_s3, 7  ;;  %v715_v38 = vstv %s6119_s16 }
 0x114   :  { %s673_s20 = scalar_lea.vmem [#allocation4], %s4265_s30  ;;  %s4289_s24 = sshll.u32 %s8010_s17, 3  ;;  %vm716_vm10 = vcmp.eq.s32.totalorder %v715_v38, 1 }
 0x115   :  { %s745_s22 = scalar_select %p744_p5, %s6114_s3, 0 }
 0x116   :  { %p763_p8 = scmp.gt.s32.totalorder %s6141_s5, 0  ;;  %s692_s18 = scalar_lea.vmem [#allocation4], %s4273_s14 }
 0x117   :  { %v693_v40 = vld [vmem:[%s692_s18] sm:$0xff]  ;;  %s8012_s22 = smov (!%p4292_p7, %s745_s22), 7  ;;  %p4300_p9 = scmp.lt.s32.totalorder %s6141_s5, 7 }
 0x118   :  { %p770_p10 = scmp.gt.s32.totalorder %s6107_s15, 0  ;;  %s8014_s5 = smov (!%p763_p8, %s6141_s5), 0 }
 0x119   :  { %s711_s25 = scalar_lea.vmem [#allocation4], %s4281_s2  ;;  %s4297_s26 = sshll.u32 %s8012_s22, 3 }
 0x11a   :  { %v712_v46 = vld [vmem:[%s711_s25] sm:$0xff]  ;;  %s771_s0 = scalar_select %p770_p10, 1, 0 }
 0x11b   :  { %s8016_s5 = smov (!%p4300_p9, %s8014_s5), 7  ;;  %s730_s28 = scalar_lea.vmem [#allocation4], %s4289_s24 }
 0x11c   :  { %v731_v51 = vld [vmem:[%s730_s28] sm:$0xff]  ;;  %s4305_s30 = sshll.u32 %s8016_s5, 3  ;;  %v772_v52 = vstv %s771_s0  ;;  %s749_s27 = scalar_lea.vmem [#allocation4], %s4297_s26 }
 0x11d   :  { %v750_v56 = vld [vmem:[%s749_s27] sm:$0xff]  ;;  %s768_s29 = scalar_lea.vmem [#allocation4], %s4305_s30  ;;  %s4308_s11 = sld [smem:[#allocation6 + $0x3]] }
 0x11e   :  { %s4316_s14 = sld [smem:[#allocation6 + $0xb]] }
 0x11f   :  { %s6193_s15 = sld [smem:[#allocation6 + $0x13]] }
 0x120   :  { %s4332_s2 = sld [smem:[#allocation6 + $0x1b]] }
 0x121   :  { %s6222_s27 = sld [smem:[#allocation6 + $0x33]] }
 0x123   :  { %s4309_s12 = sadd.s32 4294967295, %s4308_s11  ;;  %p869_p13 = scmp.gt.s32.totalorder %s4308_s11, 0 }
 0x124   :  { %p862_p11 = scmp.gt.s32.totalorder %s4309_s12, 0  ;;  %p4310_p12 = scmp.lt.s32.totalorder %s4309_s12, 7 }
 0x125   :  { %s4317_s3 = sadd.s32 4294967295, %s4316_s14  ;;  %s4325_s16 = sadd.s32 4294967295, %s6193_s15 }
 0x126   :  { %s863_s17 = scalar_select %p862_p11, %s4309_s12, 0 }
 0x127   :  { %p881_p0 = scmp.gt.s32.totalorder %s4317_s3, 0  ;;  %p900_p1 = scmp.gt.s32.totalorder %s4325_s16, 0 }
 0x128   :  { %s8018_s17 = smov (!%p4310_p12, %s863_s17), 7  ;;  %p4318_p2 = scmp.lt.s32.totalorder %s4317_s3, 7 }
 0x129   :  { %p888_p3 = scmp.gt.s32.totalorder %s4316_s14, 0  ;;  %s8020_s3 = smov (!%p881_p0, %s4317_s3), 0 }
 0x12a   :  { %s901_s5 = scalar_select %p900_p1, %s4325_s16, 0 }
 0x12b   :  { %p4326_p4 = scmp.lt.s32.totalorder %s4325_s16, 7  ;;  %s4333_s23 = sadd.s32 4294967295, %s4332_s2 }
 0x12c   :  { %s6200_s22 = scalar_select %p888_p3, 1, 0 }
 0x12d   :  { %s8022_s3 = smov (!%p4318_p2, %s8020_s3), 7  ;;  %s8024_s5 = smov (!%p4326_p4, %s901_s5), 7 }
 0x12e   :  { %s4315_s24 = sshll.u32 %s8018_s17, 3  ;;  %p919_p5 = scmp.gt.s32.totalorder %s4333_s23, 0 }
 0x12f   :  { %s4323_s18 = sshll.u32 %s8022_s3, 3  ;;  %p926_p7 = scmp.gt.s32.totalorder %s4332_s2, 0 }
 0x130   :  { %p4334_p8 = scmp.lt.s32.totalorder %s4333_s23, 7  ;;  %s8026_s23 = smov (!%p919_p5, %s4333_s23), 0 }
 0x131   :  { %s4331_s0 = sshll.u32 %s8024_s5, 3  ;;  %s867_s12 = scalar_lea.vmem [#allocation4], %s4315_s24 }
 0x132   :  { %s6215_s28 = scalar_select %p926_p7, 1, 0 }
 0x133   :  { %s8028_s23 = smov (!%p4334_p8, %s8026_s23), 7  ;;  %s6234_s14 = sld [smem:[#allocation6 + $0x3b]] }
 0x134   :  { %s4339_s11 = sshll.u32 %s8028_s23, 3  ;;  %s6243_s17 = sadd.s32 4294967295, %s6222_s27 }
 0x135   :  { %p976_p1 = scmp.gt.s32.totalorder %s6243_s17, 0  ;;  %p983_p2 = scmp.gt.s32.totalorder %s6222_s27, 0 }
 0x136   :  { %p4358_p3 = scmp.lt.s32.totalorder %s6243_s17, 7  ;;  %s924_s5 = scalar_lea.vmem [#allocation4], %s4339_s11 }
 0x139   :  { %s6268_s3 = sadd.s32 4294967295, %s6234_s14 }
 0x13a   :  { %p995_p4 = scmp.gt.s32.totalorder %s6268_s3, 0  ;;  %p4366_p5 = scmp.lt.s32.totalorder %s6268_s3, 7 }
 0x13c   :  { %s8036_s3 = smov (!%p995_p4, %s6268_s3), 0 }
 0x13d   :  { %s8038_s3 = smov (!%p4366_p5, %s8036_s3), 7 }
 0x164   :  { %v358_v7 = vpop.permute.xlu0 %357 }
 0x165   :  { %v360_v8 = vmul.f32 %v5575_v6, %v358_v7 }
 0x167   :  { %362 = vrot.lane.b32.xlu0 %v360_v8, %s5722_s13 }
 0x1d9   :  { %v363_v10 = vpop.permute.xlu0 %362 }
 0x1da   :  { %v5897_v11 = vadd.f32 %v363_v10, %v355_v9 }
 0x1dc   :  { %5576 = vtanh.f32 %v5897_v11 }
 0x1e9   :  { %v5577_v12 = vpop.eup %5576 }
 0x1ea   :  { %368 = vrot.lane.b32.xlu1 %v5577_v12, %s5721_s1 }
 0x25c   :  { %v369_v13 = vpop.permute.xlu1 %368 }
 0x25d   :  { %v5901_v17 = vmul.f32 %v5575_v6, %v369_v13 }
 0x25f   :  { %v377_v18 = vpack.c.bf16 %v5901_v17, %v5901_v17 }
 0x261   :  { %548 = vrot.lane.b32.xlu1 %v377_v18, %s5722_s13 }
 0x2d3   :  { %v549_v19 = vpop.permute.xlu1 %548 }
 0x2d4   :  { %5413 = vmatmul.mubr.msk.bf16.vlgmr.msra.gmra.mxu0 %vm89_vm0, %v549_v19 }
 0x2d5   :  { %5417 = vmatpush3.bf16.msra.mxu0 %v5819_v14  ;;  %5420 = vmatprep.mubr.msk.bf16.mxu0 %vm5720_vm1, %v5719_v15 }
 0x2d6   :  { %5418 = vmatprep.subr.bf16.mxu0 %v5719_v15 }
 0x2d9   :  { %5419 = vmatpush3.bf16.msra.mxu0 %v5826_v16 }
 0x2da   :  { %5424 = vmatprep.subr.bf16.mxu0 %v5719_v15 }
 0x394   :  { %v587_v62 = vpop.f32.mrf.mxu0 }
 0x395   :  { %v593_v63 = vadd.f32 %v587_v62, %v546_v60  ;;  %v769_v60 = vld [vmem:[%s768_s29] sm:$0xff] }
 0x396   :  { %v5414_v1 = vpop.f32.mrf.mxu0 }
 0x397   :  { %5578 = vtanh.f32 %v593_v63  ;;  %v4241_v6 = vmul.f32 -1.442695, %v593_v63 }
 0x398   :  { %v590_v3 = vpop.f32.mrf.mxu0 }
 0x399   :  { %5580 = vpow2.f32 %v4241_v6 }
 0x39a   :  { %v5415_v4 = vpop.f32.mrf.mxu0 }
 0x3a4   :  { %v5579_v5 = vpop.eup %5578 }
 0x3a5   :  { %603 = vrot.lane.b32.xlu0 %v5579_v5, %s5721_s1 }
 0x3a6   :  { %v5581_v7 = vpop.eup %5580 }
 0x3a7   :  { %v597_v8 = vadd.f32 1.0, %v5581_v7 }
 0x3a9   :  { %5582 = vrcp.f32 %v597_v8 }
 0x3b6   :  { %v5583_v9 = vpop.eup %5582 }
 0x3b7   :  { %v601_v13 = vmul.f32 %v5583_v9, %v5897_v11  ;;  %v639_v11 = vstv %s638_s19  ;;  %s654_s19 = scalar_lea.vmem [#allocation4], %s4257_s21 }
 0x3b8   :  { %vm640_vm6 = vcmp.eq.s32.totalorder %v639_v11, 1  ;;  %v655_v32 = vld [vmem:[%s654_s19] sm:$0xff]  ;;  %s752_s21 = scalar_select %p751_p6, 1, 0 }
 0x3b9   :  { %vm6097_vm7 = vmand %vm43_vm2, %vm640_vm6  ;;  %v663_v36 = vsel %vm6124_vm12, %v655_v32, 0.0  ;;  %vm697_vm6 = vcmp.eq.s32.totalorder %v696_v35, 1  ;;  %s870_s19 = scalar_select %p869_p13, 1, 0 }
 0x3ba   :  { %v644_v29 = vsel %vm6097_vm7, %v636_v28, 0.0  ;;  %vm698_vm7 = vmand %vm7906_vm11, %vm697_vm6  ;;  %v753_v47 = vstv %s752_s21  ;;  %p907_p6 = scmp.gt.s32.totalorder %s6193_s15, 0  ;;  %s6208_s21 = sld [smem:[#allocation6 + $0x2b]] }
 0x3bb   :  { %v645_v34 = vadd.f32 %v644_v29, %v5883_v44  ;;  %v674_v44 = vld [vmem:[%s673_s20] sm:$0xff]  ;;  %v701_v43 = vsel %vm698_vm7, %v693_v40, 0.0  ;;  %vm717_vm12 = vmand %vm47_vm14, %vm716_vm10  ;;  %vm754_vm6 = vcmp.eq.s32.totalorder %v753_v47, 1  ;;  %vm773_vm10 = vcmp.eq.s32.totalorder %v772_v52, 1  ;;  %s6198_s20 = sld [smem:[#allocation6 + $0x23]] }
 0x3bc   :  { %v682_v39 = vsel %vm679_vm3, %v674_v44, 0.0  ;;  %v720_v48 = vsel %vm717_vm12, %v712_v46, 0.0  ;;  %vm736_vm3 = vmand %vm48_vm4, %vm735_vm15  ;;  %s6212_s26 = scalar_select %p907_p6, 1, 0  ;;  %v868_v29 = vld [vmem:[%s867_s12] sm:$0xff] }
 0x3bd   :  { %v664_v37 = vadd.f32 %v663_v36, %v645_v34  ;;  %v739_v53 = vsel %vm736_vm3, %v731_v51, 0.0  ;;  %vm755_vm7 = vmand %vm49_vm9, %vm754_vm6  ;;  %v928_v36 = vstv %s6215_s28  ;;  %v925_v40 = vld [vmem:[%s924_s5] sm:$0xff]  ;;  %p1002_p6 = scmp.gt.s32.totalorder %s6234_s14, 0  ;;  %s4371_s28 = sshll.u32 %s8038_s3, 3 }
 0x3be   :  { %v758_v58 = vsel %vm755_vm7, %v750_v56, 0.0  ;;  %vm774_vm12 = vmand %vm50_vm13, %vm773_vm10  ;;  %v909_v31 = vstv %s6212_s26  ;;  %s1000_s27 = scalar_lea.vmem [#allocation4], %s4371_s28  ;;  %s6351_s28 = sld [smem:[#allocation6 + $0x2c]] }
 0x3bf   :  { %v683_v41 = vadd.f32 %v682_v39, %v664_v37  ;;  %v777_v62 = vsel %vm774_vm12, %v769_v60, 0.0  ;;  %vm910_vm10 = vcmp.eq.s32.totalorder %v909_v31, 1  ;;  %s1003_s23 = scalar_select %p1002_p6, 1, 0  ;;  %v1001_v60 = vld [vmem:[%s1000_s27] sm:$0xff] }
 0x3c0   :  { %s6220_s30 = sadd.s32 4294967295, %s6208_s21  ;;  %p964_p0 = scmp.gt.s32.totalorder %s6208_s21, 0  ;;  %vm911_vm12 = vmand %vm45_vm8, %vm910_vm10 }
 0x3c1   :  { %v702_v45 = vadd.f32 %v701_v43, %v683_v41  ;;  %s4341_s25 = sadd.s32 4294967295, %s6198_s20  ;;  %p957_p11 = scmp.gt.s32.totalorder %s6220_s30, 0  ;;  %v1004_v52 = vstv %s1003_s23 }
 0x3c2   :  { %p938_p9 = scmp.gt.s32.totalorder %s4341_s25, 0  ;;  %p4342_p10 = scmp.lt.s32.totalorder %s4341_s25, 7 }
 0x3c3   :  { %v721_v49 = vadd.f32 %v720_v48, %v702_v45  ;;  %p945_p12 = scmp.gt.s32.totalorder %s6198_s20, 0  ;;  %p4350_p13 = scmp.lt.s32.totalorder %s6220_s30, 7 }
 0x3c4   :  { %s939_s29 = scalar_select %p938_p9, %s4341_s25, 0 }
 0x3c5   :  { %v740_v55 = vadd.f32 %v739_v53, %v721_v49  ;;  %s958_s15 = scalar_select %p957_p11, %s6220_s30, 0 }
 0x3c6   :  { %s8030_s29 = smov (!%p4342_p10, %s939_s29), 7  ;;  %s905_s20 = scalar_lea.vmem [#allocation4], %s4331_s0 }
 0x3c7   :  { %v759_v59 = vadd.f32 %v758_v58, %v740_v55  ;;  %s6246_s16 = scalar_select %p945_p12, 1, 0 }
 0x3c8   :  { %s4347_s2 = sshll.u32 %s8030_s29, 3  ;;  %s8032_s15 = smov (!%p4350_p13, %s958_s15), 7 }
 0x3c9   :  { %v778_v63 = vadd.f32 %v777_v62, %v759_v59  ;;  %s965_s24 = scalar_select %p964_p0, 1, 0  ;;  %v947_v38 = vstv %s6246_s16 }
 0x3ca   :  { %s984_s25 = scalar_select %p983_p2, 1, 0 }
 0x3cb   :  { %v966_v42 = vstv %s965_s24  ;;  %s943_s21 = scalar_lea.vmem [#allocation4], %s4347_s2  ;;  %s6329_s2 = sld [smem:[#allocation6 + $0x14]] }
 0x3cc   :  { %v944_v46 = vld [vmem:[%s943_s21] sm:$0xff]  ;;  %vm967_vm10 = vcmp.eq.s32.totalorder %v966_v42, 1  ;;  %v985_v47 = vstv %s984_s25  ;;  %s6356_s27 = sld [smem:[#allocation6 + $0x34]]  ;;  %s4415_s11 = sadd.s32 4294967295, %s6351_s28 }
 0x3d1   :  { %s4391_s24 = sadd.s32 4294967295, %s6329_s2 }
 0x3d2   :  { %p1132_p12 = scmp.gt.s32.totalorder %s4391_s24, 0  ;;  %p4392_p0 = scmp.lt.s32.totalorder %s4391_s24, 7 }
 0x3d4   :  { %s1133_s25 = scalar_select %p1132_p12, %s4391_s24, 0 }
 0x3d6   :  { %s8046_s25 = smov (!%p4392_p0, %s1133_s25), 7 }
 0x3d7   :  { %s4397_s14 = sshll.u32 %s8046_s25, 3 }
 0x417   :  { %v604_v10 = vpop.permute.xlu0 %603 }
 0x418   :  { %v606_v12 = vmul.f32 %v5583_v9, %v604_v10 }
 0x41a   :  { %608 = vrot.lane.b32.xlu1 %v606_v12, %s5722_s13 }
 0x48c   :  { %v609_v18 = vpop.permute.xlu1 %608 }
 0x48d   :  { %v6050_v19 = vadd.f32 %v609_v18, %v601_v13 }
 0x48f   :  { %5584 = vtanh.f32 %v6050_v19 }
 0x49c   :  { %v5585_v20 = vpop.eup %5584 }
 0x49d   :  { %614 = vrot.lane.b32.xlu0 %v5585_v20, %s5721_s1 }
 0x50f   :  { %v615_v21 = vpop.permute.xlu0 %614 }
 0x510   :  { %v6054_v22 = vmul.f32 %v5583_v9, %v615_v21 }
 0x512   :  { %v624_v23 = vpack.c.bf16 %v6054_v22, %v6054_v22 }
 0x514   :  { %780 = vrot.lane.b32.xlu1 %v624_v23, %s5722_s13 }
 0x586   :  { %v781_v24 = vpop.permute.xlu1 %780 }
 0x587   :  { %5421 = vmatmul.mubr.msk.bf16.vlgmr.msra.gmra.mxu0 %vm89_vm0, %v781_v24 }
 0x588   :  { %5425 = vmatpush3.bf16.msra.mxu0 %v5819_v14  ;;  %5428 = vmatprep.mubr.msk.bf16.mxu0 %vm5720_vm1, %v5719_v15 }
 0x589   :  { %5426 = vmatprep.subr.bf16.mxu0 %v5719_v15 }
 0x58c   :  { %5427 = vmatpush3.bf16.msra.mxu0 %v5826_v16 }
 0x58d   :  { %5440 = vmatprep.subr.bf16.mxu0 %v5719_v15 }
 0x647   :  { %v819_v1 = vpop.f32.mrf.mxu0 }
 0x648   :  { %v825_v3 = vadd.f32 %v819_v1, %v778_v63 }
 0x649   :  { %v5422_v4 = vpop.f32.mrf.mxu0 }
 0x64a   :  { %5586 = vtanh.f32 %v825_v3  ;;  %v4307_v8 = vmul.f32 -1.442695, %v825_v3 }
 0x64b   :  { %v822_v5 = vpop.f32.mrf.mxu0 }
 0x64c   :  { %5588 = vpow2.f32 %v4307_v8 }
 0x64d   :  { %v5423_v6 = vpop.f32.mrf.mxu0 }
 0x657   :  { %v5587_v7 = vpop.eup %5586 }
 0x658   :  { %835 = vrot.lane.b32.xlu0 %v5587_v7, %s5721_s1 }
 0x659   :  { %v5589_v9 = vpop.eup %5588 }
 0x65a   :  { %v829_v10 = vadd.f32 1.0, %v5589_v9 }
 0x65c   :  { %5590 = vrcp.f32 %v829_v10 }
 0x669   :  { %v5591_v12 = vpop.eup %5590 }
 0x66a   :  { %v833_v20 = vmul.f32 %v5591_v12, %v6050_v19  ;;  %v890_v19 = vstv %s6200_s22  ;;  %s977_s22 = scalar_select %p976_p1, %s6243_s17, 0 }
 0x66b   :  { %vm891_vm6 = vcmp.eq.s32.totalorder %v890_v19, 1  ;;  %v6326_v19 = vld [vmem:[%s7902_s7] sm:$0xff]   ;;  %s4382_s17 = sld [smem:[#allocation6 + $0xc]]  ;;  %p1139_p1 = scmp.gt.s32.totalorder %s6329_s2, 0 }
 0x66c   :  { %vm6251_vm7 = vmand %vm44_vm5, %vm891_vm6  ;;  %s8034_s22 = smov (!%p4358_p3, %s977_s22), 7  ;;  %vm948_vm6 = vcmp.eq.s32.totalorder %v947_v38, 1  ;;  %s6379_s2 = sadd.s32 4294967295, %s6356_s27 }
 0x66d   :  { %s4363_s26 = sshll.u32 %s8034_s22, 3  ;;  %p4424_p12 = scmp.lt.s32.totalorder %s6379_s2, 7 }
 0x66e   :  { %s981_s30 = scalar_lea.vmem [#allocation4], %s4363_s26 }
 0x66f   :  { %v982_v56 = vld [vmem:[%s981_s30] sm:$0xff]  ;;  %s6353_s30 = scalar_select %p1139_p1, 1, 0 }
 0x671   :  { %p1120_p13 = scmp.gt.s32.totalorder %s4382_s17, 0 }
 0x673   :  { %s6343_s21 = scalar_select %p1120_p13, 1, 0 }
 0x674   :  { %p1215_p13 = scmp.gt.s32.totalorder %s6356_s27, 0 }
 0x675   :  { %v1122_v31 = vstv %s6343_s21  ;;  %s1137_s21 = scalar_lea.vmem [#allocation4], %s4397_s14  ;;  %s4440_s14 = sld [smem:[#allocation6 + $0x5]] }
 0x6ca   :  { %v836_v13 = vpop.permute.xlu0 %835 }
 0x6cb   :  { %v838_v18 = vmul.f32 %v5591_v12, %v836_v13 }
 0x6cd   :  { %840 = vrot.lane.b32.xlu1 %v838_v18, %s5722_s13 }
 0x73f   :  { %v841_v21 = vpop.permute.xlu1 %840 }
 0x740   :  { %v6177_v23 = vadd.f32 %v841_v21, %v833_v20 }
 0x742   :  { %5592 = vtanh.f32 %v6177_v23 }
 0x74f   :  { %v5593_v24 = vpop.eup %5592 }
 0x750   :  { %846 = vrot.lane.b32.xlu0 %v5593_v24, %s5721_s1 }
 0x7c2   :  { %v847_v11 = vpop.permute.xlu0 %846 }
 0x7c3   :  { %v6181_v25 = vmul.f32 %v5591_v12, %v847_v11 }
 0x7c5   :  { %v856_v26 = vpack.c.bf16 %v6181_v25, %v6181_v25 }
 0x7c7   :  { %1012 = vrot.lane.b32.xlu1 %v856_v26, %s5722_s13 }
 0x839   :  { %v1013_v28 = vpop.permute.xlu1 %1012 }
 0x83a   :  { %5429 = vmatmul.mubr.msk.bf16.vlgmr.msra.gmra.mxu0 %vm89_vm0, %v1013_v28 }
 0x83b   :  { %5441 = vmatpush3.bf16.msra.mxu0 %v5819_v14  ;;  %5444 = vmatprep.mubr.msk.bf16.mxu0 %vm5720_vm1, %v5719_v15  ;;  %v871_v14 = vstv %s870_s19  ;;  %s886_s19 = scalar_lea.vmem [#allocation4], %s4323_s18  ;;  %s4355_s18 = sshll.u32 %s8032_s15, 3 }
 0x83c   :  { %5442 = vmatprep.subr.bf16.mxu0 %v5719_v15  ;;  %vm872_vm15 = vcmp.eq.s32.totalorder %v871_v14, 1  ;;  %v887_v34 = vld [vmem:[%s886_s19] sm:$0xff]  ;;  %s962_s0 = scalar_lea.vmem [#allocation4], %s4355_s18  ;;  %s4374_s15 = sld [smem:[#allocation6 + $0x4]] }
 0x83d   :  { %vm6228_vm3 = vmand %vm43_vm2, %vm872_vm15  ;;  %v895_v44 = vsel %vm6251_vm7, %v887_v34, 0.0  ;;  %vm929_vm15 = vcmp.eq.s32.totalorder %v928_v36, 1  ;;  %v963_v51 = vld [vmem:[%s962_s0] sm:$0xff]  ;;  %s4383_s19 = sadd.s32 4294967295, %s4382_s17  ;;  %s6338_s18 = sld [smem:[#allocation6 + $0x24]] }
 0x83e   :  { %v876_v30 = vsel %vm6228_vm3, %v868_v29, 0.0  ;;  %vm930_vm3 = vmand %vm7906_vm11, %vm929_vm15  ;;  %vm986_vm15 = vcmp.eq.s32.totalorder %v985_v47, 1  ;;  %p1113_p9 = scmp.gt.s32.totalorder %s4383_s19, 0  ;;  %p4384_p11 = scmp.lt.s32.totalorder %s4383_s19, 7 }
 0x83f   :  { %5443 = vmatpush3.bf16.msra.mxu0 %v5826_v16  ;;  %v877_v35 = vadd.f32 %v876_v30, %v5885_v50  ;;  %v906_v50 = vld [vmem:[%s905_s20] sm:$0xff]  ;;  %v933_v43 = vsel %vm930_vm3, %v925_v40, 0.0  ;;  %vm949_vm7 = vmand %vm47_vm14, %vm948_vm6  ;;  %vm1005_vm6 = vcmp.eq.s32.totalorder %v1004_v52, 1  ;;  %s6333_s20 = sld [smem:[#allocation6 + $0x1c]] }
 0x840   :  { %5456 = vmatprep.subr.bf16.mxu0 %v5719_v15  ;;  %v914_v39 = vsel %vm911_vm12, %v906_v50, 0.0  ;;  %v952_v48 = vsel %vm949_vm7, %v944_v46, 0.0  ;;  %vm968_vm12 = vmand %vm48_vm4, %vm967_vm10  ;;  %s8040_s19 = smov (!%p1113_p9, %s4383_s19), 0  ;;  %s6366_s17 = sld [smem:[#allocation6 + $0x3c]] }
 0x841   :  { %v896_v37 = vadd.f32 %v895_v44, %v877_v35  ;;  %v971_v53 = vsel %vm968_vm12, %v963_v51, 0.0  ;;  %vm987_vm3 = vmand %vm49_vm9, %vm986_vm15  ;;  %s8044_s19 = smov (!%p4384_p11, %s8040_s19), 7  ;;  %p4416_p9 = scmp.lt.s32.totalorder %s4415_s11, 7  ;;  %vm1123_vm15 = vcmp.eq.s32.totalorder %v1122_v31, 1  ;;  %v1141_v35 = vstv %s6353_s30 }
 0x842   :  { %v990_v58 = vsel %vm987_vm3, %v982_v56, 0.0  ;;  %vm1006_vm7 = vmand %vm50_vm13, %vm1005_vm6  ;;  %s4375_s16 = sadd.s32 4294967295, %s4374_s15  ;;  %p1101_p7 = scmp.gt.s32.totalorder %s4374_s15, 0  ;;  %vm1142_vm6 = vcmp.eq.s32.totalorder %v1141_v35, 1 }
 0x843   :  { %v915_v41 = vadd.f32 %v914_v39, %v896_v37  ;;  %v1009_v62 = vsel %vm1006_vm7, %v1001_v60, 0.0  ;;  %p1094_p8 = scmp.gt.s32.totalorder %s4375_s16, 0  ;;  %p4376_p10 = scmp.lt.s32.totalorder %s4375_s16, 7  ;;  %vm6389_vm3 = vmand %vm44_vm5, %vm1123_vm15 }
 0x844   :  { %s6331_s3 = scalar_select %p1101_p7, 1, 0  ;;  %vm1143_vm7 = vmand %vm45_vm8, %vm1142_vm6 }
 0x845   :  { %v934_v45 = vadd.f32 %v933_v43, %v915_v41  ;;  %s1095_s22 = scalar_select %p1094_p8, %s4375_s16, 0 }
 0x846   :  { %s4399_s5 = sadd.s32 4294967295, %s6333_s20  ;;  %s4389_s23 = sshll.u32 %s8044_s19, 3  ;;  %v1103_v29 = vstv %s6331_s3 }
 0x847   :  { %v953_v49 = vadd.f32 %v952_v48, %v934_v45  ;;  %s8042_s22 = smov (!%p4376_p10, %s1095_s22), 7  ;;  %p1151_p2 = scmp.gt.s32.totalorder %s4399_s5, 0  ;;  %vm1104_vm10 = vcmp.eq.s32.totalorder %v1103_v29, 1 }
 0x848   :  { %s4381_s26 = sshll.u32 %s8042_s22, 3  ;;  %s4407_s0 = sadd.s32 4294967295, %s6338_s18  ;;  %vm6370_vm12 = vmand %vm43_vm2, %vm1104_vm10 }
 0x849   :  { %v972_v55 = vadd.f32 %v971_v53, %v953_v49  ;;  %p4400_p3 = scmp.lt.s32.totalorder %s4399_s5, 7  ;;  %s8048_s5 = smov (!%p1151_p2, %s4399_s5), 0 }
 0x84a   :  { %p1170_p4 = scmp.gt.s32.totalorder %s4407_s0, 0  ;;  %p1158_p5 = scmp.gt.s32.totalorder %s6333_s20, 0 }
 0x84b   :  { %v991_v59 = vadd.f32 %v990_v58, %v972_v55  ;;  %s8050_s5 = smov (!%p4400_p3, %s8048_s5), 7  ;;  %p4408_p6 = scmp.lt.s32.totalorder %s4407_s0, 7 }
 0x84c   :  { %s1171_s29 = scalar_select %p1170_p4, %s4407_s0, 0 }
 0x84d   :  { %v1010_v63 = vadd.f32 %v1009_v62, %v991_v59  ;;  %s6362_s12 = scalar_select %p1158_p5, 1, 0 }
 0x84e   :  { %s4405_s15 = sshll.u32 %s8050_s5, 3  ;;  %p1189_p7 = scmp.gt.s32.totalorder %s4415_s11, 0 }
 0x84f   :  { %s1099_s16 = scalar_lea.vmem [#allocation4], %s4381_s26  ;;  %s8052_s29 = smov (!%p4408_p6, %s1171_s29), 7  ;;  %v1160_v37 = vstv %s6362_s12 }
 0x850   :  { %v1100_v32 = vld [vmem:[%s1099_s16] sm:$0xff]  ;;  %p1177_p8 = scmp.gt.s32.totalorder %s6338_s18, 0  ;;  %p1208_p10 = scmp.gt.s32.totalorder %s6379_s2, 0  ;;  %vm1161_vm10 = vcmp.eq.s32.totalorder %v1160_v37, 1 }
 0x851   :  { %v1108_v34 = vsel %vm6370_vm12, %v1100_v32, 0.0  ;;  %s1190_s3 = scalar_select %p1189_p7, %s4415_s11, 0  ;;  %vm1162_vm12 = vmand %vm7906_vm11, %vm1161_vm10 }
 0x852   :  { %s6385_s20 = scalar_select %p1177_p8, 1, 0  ;;  %v1109_v50 = vadd.f32 %v1108_v34, %v5887_v54  ;;  %v1138_v54 = vld [vmem:[%s1137_s21] sm:$0xff] }
 0x853   :  { %s1118_s22 = scalar_lea.vmem [#allocation4], %s4389_s23  ;;  %s4413_s24 = sshll.u32 %s8052_s29, 3  ;;  %v1146_v41 = vsel %vm1143_vm7, %v1138_v54, 0.0 }
 0x854   :  { %v1119_v44 = vld [vmem:[%s1118_s22] sm:$0xff]  ;;  %p1196_p11 = scmp.gt.s32.totalorder %s6351_s28, 0  ;;  %s8054_s3 = smov (!%p4416_p9, %s1190_s3), 7  ;;  %v1179_v40 = vstv %s6385_s20 }
 0x855   :  { %s1209_s18 = scalar_select %p1208_p10, %s6379_s2, 0  ;;  %v1127_v38 = vsel %vm6389_vm3, %v1119_v44, 0.0  ;;  %vm1180_vm15 = vcmp.eq.s32.totalorder %v1179_v40, 1 }
 0x856   :  { %s6407_s19 = sadd.s32 4294967295, %s6366_s17  ;;  %v1128_v39 = vadd.f32 %v1127_v38, %v1109_v50  ;;  %s4421_s23 = sshll.u32 %s8054_s3, 3  ;;  %vm1181_vm3 = vmand %vm47_vm14, %vm1180_vm15 }
 0x857   :  { %s1197_s26 = scalar_select %p1196_p11, 1, 0 }
 0x858   :  { %p1227_p0 = scmp.gt.s32.totalorder %s6407_s19, 0  ;;  %s8056_s18 = smov (!%p4424_p12, %s1209_s18), 7  ;;  %v1147_v43 = vadd.f32 %v1146_v41, %v1128_v39 }
 0x859   :  { %s1156_s25 = scalar_lea.vmem [#allocation4], %s4405_s15  ;;  %p4432_p1 = scmp.lt.s32.totalorder %s6407_s19, 7  ;;  %v1198_v45 = vstv %s1197_s26 }
 0x85a   :  { %v1157_v42 = vld [vmem:[%s1156_s25] sm:$0xff]  ;;  %s1216_s0 = scalar_select %p1215_p13, 1, 0  ;;  %vm1199_vm6 = vcmp.eq.s32.totalorder %v1198_v45, 1 }
 0x85b   :  { %p1234_p2 = scmp.gt.s32.totalorder %s6366_s17, 0  ;;  %s8058_s19 = smov (!%p1227_p0, %s6407_s19), 0  ;;  %v1165_v46 = vsel %vm1162_vm12, %v1157_v42, 0.0  ;;  %vm1200_vm7 = vmand %vm48_vm4, %vm1199_vm6 }
 0x85c   :  { %v1166_v47 = vadd.f32 %v1165_v46, %v1147_v43  ;;  %s1175_s28 = scalar_lea.vmem [#allocation4], %s4413_s24  ;;  %s4429_s30 = sshll.u32 %s8056_s18, 3  ;;  %v1217_v49 = vstv %s1216_s0 }
 0x85d   :  { %v1176_v48 = vld [vmem:[%s1175_s28] sm:$0xff]  ;;  %s1235_s5 = scalar_select %p1234_p2, 1, 0  ;;  %vm1218_vm10 = vcmp.eq.s32.totalorder %v1217_v49, 1 }
 0x85e   :  { %s8060_s19 = smov (!%p4432_p1, %s8058_s19), 7  ;;  %v1184_v51 = vsel %vm1181_vm3, %v1176_v48, 0.0  ;;  %s1194_s27 = scalar_lea.vmem [#allocation4], %s4421_s23  ;;  %vm1219_vm12 = vmand %vm49_vm9, %vm1218_vm10 }
 0x85f   :  { %v1185_v52 = vadd.f32 %v1184_v51, %v1166_v47  ;;  %v1195_v53 = vld [vmem:[%s1194_s27] sm:$0xff]  ;;  %s4437_s11 = sshll.u32 %s8060_s19, 3  ;;  %v1236_v55 = vstv %s1235_s5  ;;  %s1213_s29 = scalar_lea.vmem [#allocation4], %s4429_s30 }
 0x860   :  { %v1203_v56 = vsel %vm1200_vm7, %v1195_v53, 0.0  ;;  %v1214_v59 = vld [vmem:[%s1213_s29] sm:$0xff]  ;;  %vm1237_vm15 = vcmp.eq.s32.totalorder %v1236_v55, 1  ;;  %s1232_s12 = scalar_lea.vmem [#allocation4], %s4437_s11  ;;  %s4448_s15 = sld [smem:[#allocation6 + $0xd]] }
 0x861   :  { %v1204_v58 = vadd.f32 %v1203_v56, %v1185_v52  ;;  %v1222_v60 = vsel %vm1219_vm12, %v1214_v59, 0.0  ;;  %vm1238_vm3 = vmand %vm50_vm13, %vm1237_vm15  ;;  %s4441_s17 = sadd.s32 4294967295, %s4440_s14  ;;  %s4456_s2 = sld [smem:[#allocation6 + $0x15]] }
 0x862   :  { %p1326_p3 = scmp.gt.s32.totalorder %s4441_s17, 0  ;;  %p4442_p4 = scmp.lt.s32.totalorder %s4441_s17, 7 }
 0x863   :  { %v1223_v62 = vadd.f32 %v1222_v60, %v1204_v58  ;;  %p1333_p6 = scmp.gt.s32.totalorder %s4440_s14, 0  ;;  %s4464_s20 = sld [smem:[#allocation6 + $0x1d]] }
 0x864   :  { %s8062_s17 = smov (!%p1326_p3, %s4441_s17), 0  ;;  %s6463_s19 = sld [smem:[#allocation6 + $0x25]] }
 0x865   :  { %s8064_s17 = smov (!%p4442_p4, %s8062_s17), 7  ;;  %s6468_s25 = sld [smem:[#allocation6 + $0x2d]] }
 0x866   :  { %s4449_s16 = sadd.s32 4294967295, %s4448_s15  ;;  %p1352_p8 = scmp.gt.s32.totalorder %s4448_s15, 0 }
 0x867   :  { %p1345_p5 = scmp.gt.s32.totalorder %s4449_s16, 0  ;;  %p4450_p7 = scmp.lt.s32.totalorder %s4449_s16, 7 }
 0x868   :  { %s1334_s22 = scalar_select %p1333_p6, 1, 0 }
 0x869   :  { %s1346_s3 = scalar_select %p1345_p5, %s4449_s16, 0 }
 0x86a   :  { %s4447_s24 = sshll.u32 %s8064_s17, 3  ;;  %s4457_s18 = sadd.s32 4294967295, %s4456_s2 }
 0x86b   :  { %s8066_s3 = smov (!%p4450_p7, %s1346_s3), 7  ;;  %p1364_p9 = scmp.gt.s32.totalorder %s4457_s18, 0 }
 0x86c   :  { %s6465_s21 = scalar_select %p1352_p8, 1, 0 }
 0x86d   :  { %p1371_p10 = scmp.gt.s32.totalorder %s4456_s2, 0  ;;  %s4465_s26 = sadd.s32 4294967295, %s4464_s20 }
 0x86e   :  { %s4455_s23 = sshll.u32 %s8066_s3, 3  ;;  %p4458_p11 = scmp.lt.s32.totalorder %s4457_s18, 7 }
 0x86f   :  { %s8068_s18 = smov (!%p1364_p9, %s4457_s18), 0  ;;  %p1383_p12 = scmp.gt.s32.totalorder %s4465_s26, 0 }
 0x870   :  { %s6470_s0 = scalar_select %p1371_p10, 1, 0 }
 0x871   :  { %p1390_p13 = scmp.gt.s32.totalorder %s4464_s20, 0  ;;  %s4473_s28 = sadd.s32 4294967295, %s6463_s19 }
 0x872   :  { %s8070_s18 = smov (!%p4458_p11, %s8068_s18), 7  ;;  %p4466_p0 = scmp.lt.s32.totalorder %s4465_s26, 7  ;;  %v1373_v36 = vstv %s6470_s0 }
 0x873   :  { %s1384_s30 = scalar_select %p1383_p12, %s4465_s26, 0  ;;  %vm1374_vm15 = vcmp.eq.s32.totalorder %v1373_v36, 1 }
 0x874   :  { %p1402_p1 = scmp.gt.s32.totalorder %s4473_s28, 0  ;;  %s4463_s27 = sshll.u32 %s8070_s18, 3 }
 0x875   :  { %s6475_s5 = scalar_select %p1390_p13, 1, 0 }
 0x876   :  { %p4474_p2 = scmp.lt.s32.totalorder %s4473_s28, 7  ;;  %s6479_s11 = sadd.s32 4294967295, %s6468_s25 }
 0x877   :  { %s6481_s29 = sld [smem:[#allocation6 + $0x35]]  ;;  %s8072_s28 = smov (!%p1402_p1, %s4473_s28), 0  ;;  %v1392_v38 = vstv %s6475_s5 }
 0x878   :  { %s8074_s30 = smov (!%p4466_p0, %s1384_s30), 7  ;;  %p1421_p3 = scmp.gt.s32.totalorder %s6479_s11, 0 }
 0x879   :  { %p1409_p4 = scmp.gt.s32.totalorder %s6463_s19, 0  ;;  %s8076_s28 = smov (!%p4474_p2, %s8072_s28), 7 }
 0x87a   :  { %s4471_s14 = sshll.u32 %s8074_s30, 3  ;;  %s6499_s15 = sld [smem:[#allocation6 + $0x3d]] }
 0x87b   :  { %s1422_s16 = scalar_select %p1421_p3, %s6479_s11, 0 }
 0x87c   :  { %p4482_p5 = scmp.lt.s32.totalorder %s6479_s11, 7  ;;  %s4479_s20 = sshll.u32 %s8076_s28, 3 }
 0x87d   :  { %s6506_s2 = sadd.s32 4294967295, %s6481_s29  ;;  %p1428_p6 = scmp.gt.s32.totalorder %s6468_s25, 0 }
 0x87e   :  { %s6511_s17 = scalar_select %p1409_p4, 1, 0 }
 0x87f   :  { %p1440_p7 = scmp.gt.s32.totalorder %s6506_s2, 0  ;;  %s8078_s16 = smov (!%p4482_p5, %s1422_s16), 7 }
 0x880   :  { %p1447_p8 = scmp.gt.s32.totalorder %s6481_s29, 0  ;;  %p4490_p9 = scmp.lt.s32.totalorder %s6506_s2, 7  ;;  %v1411_v40 = vstv %s6511_s17 }
 0x881   :  { %s6533_s3 = sadd.s32 4294967295, %s6499_s15  ;;  %s4487_s26 = sshll.u32 %s8078_s16, 3 }
 0x882   :  { %s1441_s19 = scalar_select %p1440_p7, %s6506_s2, 0 }
 0x883   :  { %p1459_p10 = scmp.gt.s32.totalorder %s6533_s3, 0  ;;  %s1388_s18 = scalar_lea.vmem [#allocation4], %s4471_s14 }
 0x884   :  { %v1389_v42 = vld [vmem:[%s1388_s18] sm:$0xff]  ;;  %s8080_s19 = smov (!%p4490_p9, %s1441_s19), 7  ;;  %p4498_p11 = scmp.lt.s32.totalorder %s6533_s3, 7 }
 0x885   :  { %p1466_p12 = scmp.gt.s32.totalorder %s6499_s15, 0  ;;  %s8082_s3 = smov (!%p1459_p10, %s6533_s3), 0 }
 0x886   :  { %s1407_s25 = scalar_lea.vmem [#allocation4], %s4479_s20  ;;  %s4495_s0 = sshll.u32 %s8080_s19, 3 }
 0x887   :  { %v1408_v48 = vld [vmem:[%s1407_s25] sm:$0xff]  ;;  %s1467_s30 = scalar_select %p1466_p12, 1, 0 }
 0x888   :  { %s8084_s3 = smov (!%p4498_p11, %s8082_s3), 7  ;;  %s1426_s5 = scalar_lea.vmem [#allocation4], %s4487_s26 }
 0x889   :  { %v1427_v53 = vld [vmem:[%s1426_s5] sm:$0xff]  ;;  %v1468_v55 = vstv %s1467_s30  ;;  %s1445_s28 = scalar_lea.vmem [#allocation4], %s4495_s0  ;;  %s4506_s29 = sld [smem:[#allocation6 + $0x6]] }
 0x88a   :  { %v1446_v59 = vld [vmem:[%s1445_s28] sm:$0xff]  ;;  %s4514_s14 = sld [smem:[#allocation6 + $0xe]] }
 0x88b   :  { %s6580_s15 = sld [smem:[#allocation6 + $0x16]] }
 0x88c   :  { %s4530_s20 = sld [smem:[#allocation6 + $0x1e]] }
 0x88d   :  { %s6609_s28 = sld [smem:[#allocation6 + $0x36]] }
 0x88f   :  { %p1565_p1 = scmp.gt.s32.totalorder %s4506_s29, 0 }
 0x890   :  { %s4515_s2 = sadd.s32 4294967295, %s4514_s14  ;;  %p1584_p5 = scmp.gt.s32.totalorder %s4514_s14, 0 }
 0x891   :  { %s4523_s17 = sadd.s32 4294967295, %s6580_s15  ;;  %p1577_p2 = scmp.gt.s32.totalorder %s4515_s2, 0 }
 0x892   :  { %p1596_p3 = scmp.gt.s32.totalorder %s4523_s17, 0  ;;  %p4516_p4 = scmp.lt.s32.totalorder %s4515_s2, 7 }
 0x893   :  { %s8088_s2 = smov (!%p1577_p2, %s4515_s2), 0  ;;  %p1622_p9 = scmp.gt.s32.totalorder %s4530_s20, 0 }
 0x894   :  { %s6587_s19 = scalar_select %p1584_p5, 1, 0 }
 0x895   :  { %s8090_s2 = smov (!%p4516_p4, %s8088_s2), 7  ;;  %s6621_s14 = sld [smem:[#allocation6 + $0x3e]] }
 0x896   :  { %s4521_s18 = sshll.u32 %s8090_s2, 3  ;;  %p1679_p4 = scmp.gt.s32.totalorder %s6609_s28, 0 }
 0x897   :  { %s6602_s5 = scalar_select %p1622_p9, 1, 0 }
 0x89b   :  { %s6655_s2 = sadd.s32 4294967295, %s6621_s14 }
 0x8fa   :  { %v1051_v1 = vpop.f32.mrf.mxu0 }
 0x8fb   :  { %v1057_v3 = vadd.f32 %v1051_v1, %v1010_v63  ;;  %v1233_v63 = vld [vmem:[%s1232_s12] sm:$0xff]  ;;  %s1331_s12 = scalar_lea.vmem [#allocation4], %s4447_s24  ;;  %s1369_s24 = scalar_lea.vmem [#allocation4], %s4463_s27 }
 0x8fc   :  { %v5430_v4 = vpop.f32.mrf.mxu0  ;;  %v1241_v1 = vsel %vm1238_vm3, %v1233_v63, 0.0  ;;  %v1332_v34 = vld [vmem:[%s1331_s12] sm:$0xff]  ;;  %vm1375_vm3 = vmand %vm45_vm8, %vm1374_vm15  ;;  %s4503_s27 = sshll.u32 %s8084_s3, 3  ;;  %s4507_s12 = sadd.s32 4294967295, %s4506_s29 }
 0x8fd   :  { %5594 = vtanh.f32 %v1057_v3  ;;  %v4373_v8 = vmul.f32 -1.442695, %v1057_v3  ;;  %v1242_v3 = vadd.f32 %v1241_v1, %v1223_v62  ;;  %s1464_s11 = scalar_lea.vmem [#allocation4], %s4503_s27  ;;  %p1558_p13 = scmp.gt.s32.totalorder %s4507_s12, 0 }
 0x8fe   :  { %v1054_v5 = vpop.f32.mrf.mxu0  ;;  %v1465_v63 = vld [vmem:[%s1464_s11] sm:$0xff]  ;;  %p4508_p0 = scmp.lt.s32.totalorder %s4507_s12, 7 }
 0x8ff   :  { %5596 = vpow2.f32 %v4373_v8  ;;  %s1559_s16 = scalar_select %p1558_p13, %s4507_s12, 0 }
 0x900   :  { %v5431_v6 = vpop.f32.mrf.mxu0  ;;  %s1597_s3 = scalar_select %p1596_p3, %s4523_s17, 0 }
 0x901   :  { %s8086_s16 = smov (!%p4508_p0, %s1559_s16), 7 }
 0x902   :  { %s4513_s26 = sshll.u32 %s8086_s16, 3  ;;  %s6630_s16 = sadd.s32 4294967295, %s6609_s28 }
 0x903   :  { %s1563_s12 = scalar_lea.vmem [#allocation4], %s4513_s26  ;;  %p1672_p3 = scmp.gt.s32.totalorder %s6630_s16, 0 }
 0x904   :  { %p4556_p5 = scmp.lt.s32.totalorder %s6630_s16, 7 }
 0x90a   :  { %v5595_v7 = vpop.eup %5594 }
 0x90b   :  { %1067 = vrot.lane.b32.xlu0 %v5595_v7, %s5721_s1 }
 0x90c   :  { %v5597_v9 = vpop.eup %5596 }
 0x90d   :  { %v1061_v10 = vadd.f32 1.0, %v5597_v9 }
 0x90f   :  { %5598 = vrcp.f32 %v1061_v10 }
 0x91c   :  { %v5599_v12 = vpop.eup %5598 }
 0x91d   :  { %v1065_v20 = vmul.f32 %v5599_v12, %v6177_v23  ;;  %v6317_v23 = vld [vmem:[%s7902_s7 + $0x8] sm:$0xff]  }
 0x97d   :  { %v1068_v13 = vpop.permute.xlu0 %1067 }
 0x97e   :  { %v1070_v18 = vmul.f32 %v5599_v12, %v1068_v13 }
 0x980   :  { %1072 = vrot.lane.b32.xlu1 %v1070_v18, %s5722_s13 }
 0x9f2   :  { %v1073_v21 = vpop.permute.xlu1 %1072 }
 0x9f3   :  { %v6304_v24 = vadd.f32 %v1073_v21, %v1065_v20 }
 0x9f5   :  { %5600 = vtanh.f32 %v6304_v24 }
 0xa02   :  { %v5601_v11 = vpop.eup %5600 }
 0xa03   :  { %1078 = vrot.lane.b32.xlu0 %v5601_v11, %s5721_s1 }
 0xa75   :  { %v1079_v26 = vpop.permute.xlu0 %1078 }
 0xa76   :  { %v6308_v28 = vmul.f32 %v5599_v12, %v1079_v26 }
 0xa78   :  { %v1088_v14 = vpack.c.bf16 %v6308_v28, %v6308_v28 }
 0xa7a   :  { %1244 = vrot.lane.b32.xlu1 %v1088_v14, %s5722_s13 }
 0xaec   :  { %v1245_v16 = vpop.permute.xlu1 %1244 }
 0xaed   :  { %5437 = vmatmul.mubr.msk.bf16.vlgmr.msra.gmra.mxu1 %vm89_vm0, %v1245_v16 }
 0xaee   :  { %5449 = vmatpush3.bf16.msra.mxu1 %v6317_v23  ;;  %5452 = vmatprep.mubr.msk.bf16.mxu1 %vm5720_vm1, %v5719_v15 }
 0xaef   :  { %5450 = vmatprep.subr.bf16.mxu1 %v5719_v15 }
 0xaf2   :  { %5451 = vmatpush3.bf16.msra.mxu1 %v6326_v19 }
 0xbad   :  { %v1283_v4 = vpop.f32.mrf.mxu1 }
 0xbae   :  { %v1289_v5 = vadd.f32 %v1283_v4, %v1242_v3 }
 0xbaf   :  { %v5438_v6 = vpop.f32.mrf.mxu1 }
 0xbb0   :  { %5602 = vtanh.f32 %v1289_v5  ;;  %v4439_v10 = vmul.f32 -1.442695, %v1289_v5 }
 0xbb1   :  { %v1286_v7 = vpop.f32.mrf.mxu1 }
 0xbb2   :  { %5604 = vpow2.f32 %v4439_v10 }
 0xbb3   :  { %v5439_v8 = vpop.f32.mrf.mxu1 }
 0xbbd   :  { %v5603_v9 = vpop.eup %5602 }
 0xbbe   :  { %1299 = vrot.lane.b32.xlu0 %v5603_v9, %s5721_s1 }
 0xbbf   :  { %v5605_v12 = vpop.eup %5604 }
 0xbc0   :  { %v1293_v13 = vadd.f32 1.0, %v5605_v12 }
 0xbc2   :  { %5606 = vrcp.f32 %v1293_v13 }
 0xbcf   :  { %v5607_v18 = vpop.eup %5606 }
 0xbd0   :  { %v1297_v11 = vmul.f32 %v5607_v18, %v6304_v24  ;;  %v1335_v24 = vstv %s1334_s22  ;;  %s1350_s22 = scalar_lea.vmem [#allocation4], %s4455_s23 }
 0xbd1   :  { %vm1336_vm6 = vcmp.eq.s32.totalorder %v1335_v24, 1  ;;  %v1351_v50 = vld [vmem:[%s1350_s22] sm:$0xff]  ;;  %s1448_s23 = scalar_select %p1447_p8, 1, 0 }
 0xbd2   :  { %vm6489_vm7 = vmand %vm43_vm2, %vm1336_vm6  ;;  %vm1393_vm6 = vcmp.eq.s32.totalorder %v1392_v38, 1  ;;  %s1566_s22 = scalar_select %p1565_p1, 1, 0 }
 0xbd3   :  { %v1340_v35 = vsel %vm6489_vm7, %v1332_v34, 0.0  ;;  %vm1394_vm7 = vmand %vm7906_vm11, %vm1393_vm6  ;;  %v1449_v49 = vstv %s1448_s23  ;;  %p1603_p8 = scmp.gt.s32.totalorder %s6580_s15, 0  ;;  %s6595_s23 = sld [smem:[#allocation6 + $0x2e]]  ;;  %v1586_v34 = vstv %s6587_s19 }
 0xbd4   :  { %v1341_v37 = vadd.f32 %v1340_v35, %v5889_v57  ;;  %v1370_v57 = vld [vmem:[%s1369_s24] sm:$0xff]  ;;  %v1397_v46 = vsel %vm1394_vm7, %v1389_v42, 0.0  ;;  %vm1450_vm6 = vcmp.eq.s32.totalorder %v1449_v49, 1  ;;  %s6585_s24 = sld [smem:[#allocation6 + $0x26]] }
 0xbd5   :  { %v1378_v41 = vsel %vm1375_vm3, %v1370_v57, 0.0  ;;  %vm1451_vm7 = vmand %vm49_vm9, %vm1450_vm6  ;;  %s6599_s0 = scalar_select %p1603_p8, 1, 0  ;;  %v1564_v35 = vld [vmem:[%s1563_s12] sm:$0xff]  ;;  %vm1587_vm6 = vcmp.eq.s32.totalorder %v1586_v34, 1 }
 0xbd6   :  { %v1454_v60 = vsel %vm1451_vm7, %v1446_v59, 0.0  ;;  %vm6638_vm7 = vmand %vm44_vm5, %vm1587_vm6  ;;  %s1673_s19 = scalar_select %p1672_p3, %s6630_s16, 0 }
 0xbd7   :  { %v1605_v44 = vstv %s6599_s0  ;;  %p1698_p8 = scmp.gt.s32.totalorder %s6621_s14, 0 }
 0xbd8   :  { %s8102_s19 = smov (!%p4556_p5, %s1673_s19), 7 }
 0xbd9   :  { %s6607_s27 = sadd.s32 4294967295, %s6595_s23  ;;  %p1660_p2 = scmp.gt.s32.totalorder %s6595_s23, 0 }
 0xbda   :  { %s4539_s25 = sadd.s32 4294967295, %s6585_s24  ;;  %p1653_p13 = scmp.gt.s32.totalorder %s6607_s27, 0 }
 0xbdb   :  { %p1634_p11 = scmp.gt.s32.totalorder %s4539_s25, 0  ;;  %p4540_p12 = scmp.lt.s32.totalorder %s4539_s25, 7 }
 0xbdc   :  { %p1641_p0 = scmp.gt.s32.totalorder %s6585_s24, 0  ;;  %p4548_p1 = scmp.lt.s32.totalorder %s6607_s27, 7 }
 0xbdd   :  { %s1635_s11 = scalar_select %p1634_p11, %s4539_s25, 0 }
 0xbde   :  { %s1654_s15 = scalar_select %p1653_p13, %s6607_s27, 0 }
 0xbdf   :  { %s8098_s11 = smov (!%p4540_p12, %s1635_s11), 7  ;;  %s4561_s0 = sshll.u32 %s8102_s19, 3 }
 0xbe0   :  { %s8100_s15 = smov (!%p4548_p1, %s1654_s15), 7  ;;  %s1677_s27 = scalar_lea.vmem [#allocation4], %s4561_s0 }
 0xbe1   :  { %s1661_s26 = scalar_select %p1660_p2, 1, 0  ;;  %v1678_v59 = vld [vmem:[%s1677_s27] sm:$0xff] }
 0xbe2   :  { %s1680_s25 = scalar_select %p1679_p4, 1, 0 }
 0xbe3   :  { %s4572_s19 = sld [smem:[#allocation6 + $0x7]] }
 0xbe4   :  { %v1681_v49 = vstv %s1680_s25  ;;  %s6749_s25 = sld [smem:[#allocation6 + $0x17]] }
 0xbe5   :  { %s6753_s0 = sld [smem:[#allocation6 + $0x1f]] }
 0xbe9   :  { %p1797_p9 = scmp.gt.s32.totalorder %s4572_s19, 0 }
 0xbea   :  { %p1835_p3 = scmp.gt.s32.totalorder %s6749_s25, 0 }
 0xbec   :  { %s6773_s16 = scalar_select %p1835_p3, 1, 0 }
 0xc30   :  { %v1300_v20 = vpop.permute.xlu0 %1299 }
 0xc31   :  { %v1302_v21 = vmul.f32 %v5607_v18, %v1300_v20 }
 0xc33   :  { %1304 = vrot.lane.b32.xlu1 %v1302_v21, %s5722_s13 }
 0xca5   :  { %v1305_v26 = vpop.permute.xlu1 %1304 }
 0xca6   :  { %v6442_v14 = vadd.f32 %v1305_v26, %v1297_v11 }
 0xca8   :  { %5608 = vtanh.f32 %v6442_v14 }
 0xcb5   :  { %v5609_v16 = vpop.eup %5608 }
 0xcb6   :  { %1310 = vrot.lane.b32.xlu0 %v5609_v16, %s5721_s1 }
 0xd28   :  { %v1311_v29 = vpop.permute.xlu0 %1310 }
 0xd29   :  { %v6446_v30 = vmul.f32 %v5607_v18, %v1311_v29 }
 0xd2b   :  { %v1320_v31 = vpack.c.bf16 %v6446_v30, %v6446_v30 }
 0xd2d   :  { %1476 = vrot.lane.b32.xlu1 %v1320_v31, %s5722_s13 }
 0xd9f   :  { %v1477_v32 = vpop.permute.xlu1 %1476 }
 0xda0   :  { %5445 = vmatmul.mubr.msk.bf16.vlgmr.msra.gmra.mxu0 %vm89_vm0, %v1477_v32 }
 0xda1   :  { %5457 = vmatpush3.bf16.msra.mxu0 %v6317_v23  ;;  %5460 = vmatprep.mubr.msk.bf16.mxu0 %vm5720_vm1, %v5719_v15 }
 0xda2   :  { %5458 = vmatprep.subr.bf16.mxu0 %v5719_v15 }
 0xda5   :  { %5459 = vmatpush3.bf16.msra.mxu0 %v6326_v19  ;;  %v1354_v19 = vstv %s6465_s21  ;;  %s1429_s21 = scalar_select %p1428_p6, 1, 0 }
 0xda6   :  { %5464 = vmatprep.subr.bf16.mxu0 %v5719_v15  ;;  %vm1355_vm10 = vcmp.eq.s32.totalorder %v1354_v19, 1  ;;  %p4524_p6 = scmp.lt.s32.totalorder %s4523_s17, 7 }
 0xda7   :  { %vm6516_vm12 = vmand %vm44_vm5, %vm1355_vm10  ;;  %vm1412_vm10 = vcmp.eq.s32.totalorder %v1411_v40, 1  ;;  %v1430_v45 = vstv %s1429_s21  ;;  %s4531_s21 = sadd.s32 4294967295, %s4530_s20  ;;  %s4545_s20 = sshll.u32 %s8098_s11, 3 }
 0xda8   :  { %v1359_v54 = vsel %vm6516_vm12, %v1351_v50, 0.0  ;;  %vm1413_vm12 = vmand %vm47_vm14, %vm1412_vm10  ;;  %vm1431_vm15 = vcmp.eq.s32.totalorder %v1430_v45, 1  ;;  %vm1469_vm10 = vcmp.eq.s32.totalorder %v1468_v55, 1  ;;  %s8092_s3 = smov (!%p4524_p6, %s1597_s3), 7  ;;  %p1615_p7 = scmp.gt.s32.totalorder %s4531_s21, 0  ;;  %v1662_v45 = vstv %s1661_s26  ;;  %v6728_v50 = vld [vmem:[%s7902_s7 + $0x10] sm:$0xff]  }
 0xda9   :  { %v1360_v39 = vadd.f32 %v1359_v54, %v1341_v37  ;;  %v1416_v51 = vsel %vm1413_vm12, %v1408_v48, 0.0  ;;  %vm1432_vm3 = vmand %vm48_vm4, %vm1431_vm15  ;;  %p4532_p10 = scmp.lt.s32.totalorder %s4531_s21, 7  ;;  %s4529_s30 = sshll.u32 %s8092_s3, 3  ;;  %v1624_v54 = vstv %s6602_s5 }
 0xdaa   :  { %v1435_v56 = vsel %vm1432_vm3, %v1427_v53, 0.0  ;;  %vm1470_vm12 = vmand %vm50_vm13, %vm1469_vm10  ;;  %s8094_s21 = smov (!%p1615_p7, %s4531_s21), 0  ;;  %vm1606_vm10 = vcmp.eq.s32.totalorder %v1605_v44, 1  ;;  %s1601_s24 = scalar_lea.vmem [#allocation4], %s4529_s30 }
 0xdab   :  { %v1379_v43 = vadd.f32 %v1378_v41, %v1360_v39  ;;  %v1473_v1 = vsel %vm1470_vm12, %v1465_v63, 0.0  ;;  %s8096_s21 = smov (!%p4532_p10, %s8094_s21), 7  ;;  %vm1607_vm12 = vmand %vm45_vm8, %vm1606_vm10  ;;  %p1691_p6 = scmp.gt.s32.totalorder %s6655_s2, 0  ;;  %vm1663_vm10 = vcmp.eq.s32.totalorder %v1662_v45, 1 }
 0xdac   :  { %s4537_s29 = sshll.u32 %s8096_s21, 3  ;;  %p4564_p7 = scmp.lt.s32.totalorder %s6655_s2, 7 }
 0xdad   :  { %v1398_v47 = vadd.f32 %v1397_v46, %v1379_v43  ;;  %s6633_s17 = scalar_select %p1641_p0, 1, 0 }
 0xdae   :  { %s1620_s3 = scalar_lea.vmem [#allocation4], %s4537_s29  ;;  %s8104_s2 = smov (!%p1691_p6, %s6655_s2), 0 }
 0xdaf   :  { %v1417_v52 = vadd.f32 %v1416_v51, %v1398_v47  ;;  %v1643_v40 = vstv %s6633_s17  ;;  %v1621_v42 = vld [vmem:[%s1620_s3] sm:$0xff]  ;;  %s1639_s23 = scalar_lea.vmem [#allocation4], %s4545_s20  ;;  %s8106_s2 = smov (!%p4564_p7, %s8104_s2), 7 }
 0xdb0   :  { %vm1644_vm6 = vcmp.eq.s32.totalorder %v1643_v40, 1  ;;  %v1640_v48 = vld [vmem:[%s1639_s23] sm:$0xff]  ;;  %s1699_s21 = scalar_select %p1698_p8, 1, 0 }
 0xdb1   :  { %v1436_v58 = vadd.f32 %v1435_v56, %v1417_v52  ;;  %s4569_s5 = sshll.u32 %s8106_s2, 3  ;;  %s4580_s26 = sld [smem:[#allocation6 + $0xf]] }
 0xdb2   :  { %v1700_v55 = vstv %s1699_s21  ;;  %s1696_s28 = scalar_lea.vmem [#allocation4], %s4569_s5  ;;  %s6758_s5 = sld [smem:[#allocation6 + $0x27]] }
 0xdb3   :  { %v1455_v62 = vadd.f32 %v1454_v60, %v1436_v58  ;;  %v1697_v63 = vld [vmem:[%s1696_s28] sm:$0xff]  ;;  %s6751_s23 = scalar_select %p1797_p9, 1, 0 }
 0xdb4   :  { %s4597_s28 = sadd.s32 4294967295, %s6753_s0  ;;  %p1854_p7 = scmp.gt.s32.totalorder %s6753_s0, 0 }
 0xdb5   :  { %v1474_v3 = vadd.f32 %v1473_v1, %v1455_v62  ;;  %p1847_p4 = scmp.gt.s32.totalorder %s4597_s28, 0  ;;  %p4598_p5 = scmp.lt.s32.totalorder %s4597_s28, 7 }
 0xdb6   :  { %s6776_s17 = sld [smem:[#allocation6 + $0x37]] }
 0xdb7   :  { %s4581_s3 = sadd.s32 4294967295, %s4580_s26  ;;  %p1816_p1 = scmp.gt.s32.totalorder %s4580_s26, 0 }
 0xdb8   :  { %p1809_p11 = scmp.gt.s32.totalorder %s4581_s3, 0  ;;  %p4582_p13 = scmp.lt.s32.totalorder %s4581_s3, 7 }
 0xdb9   :  { %s6763_s11 = scalar_select %p1816_p1, 1, 0 }
 0xdba   :  { %s8108_s3 = smov (!%p1809_p11, %s4581_s3), 0  ;;  %s4605_s14 = sadd.s32 4294967295, %s6758_s5 }
 0xdbb   :  { %s8112_s3 = smov (!%p4582_p13, %s8108_s3), 7  ;;  %s8116_s28 = smov (!%p1847_p4, %s4597_s28), 0 }
 0xdbc   :  { %s4587_s12 = sshll.u32 %s8112_s3, 3  ;;  %p1866_p6 = scmp.gt.s32.totalorder %s4605_s14, 0 }
 0xdbd   :  { %s8118_s28 = smov (!%p4598_p5, %s8116_s28), 7  ;;  %p4606_p8 = scmp.lt.s32.totalorder %s4605_s14, 7 }
 0xdbe   :  { %s1867_s20 = scalar_select %p1866_p6, %s4605_s14, 0 }
 0xdbf   :  { %s1814_s0 = scalar_lea.vmem [#allocation4], %s4587_s12  ;;  %p1911_p1 = scmp.gt.s32.totalorder %s6776_s17, 0 }
 0xdc0   :  { %s8120_s20 = smov (!%p4606_p8, %s1867_s20), 7  ;;  %v1815_v45 = vld [vmem:[%s1814_s0] sm:$0xff] }
 0xdc1   :  { %s1912_s12 = scalar_select %p1911_p1, 1, 0 }
 0xe60   :  { %v1515_v4 = vpop.f32.mrf.mxu0 }
 0xe61   :  { %v1521_v5 = vadd.f32 %v1515_v4, %v1474_v3 }
 0xe62   :  { %v5446_v6 = vpop.f32.mrf.mxu0 }
 0xe63   :  { %5610 = vtanh.f32 %v1521_v5  ;;  %v4505_v10 = vmul.f32 -1.442695, %v1521_v5 }
 0xe64   :  { %v1518_v7 = vpop.f32.mrf.mxu0 }
 0xe65   :  { %5612 = vpow2.f32 %v4505_v10 }
 0xe66   :  { %v5447_v8 = vpop.f32.mrf.mxu0 }
 0xe70   :  { %v5611_v9 = vpop.eup %5610 }
 0xe71   :  { %1531 = vrot.lane.b32.xlu0 %v5611_v9, %s5721_s1 }
 0xe72   :  { %v5613_v12 = vpop.eup %5612 }
 0xe73   :  { %v1525_v13 = vadd.f32 1.0, %v5613_v12 }
 0xe75   :  { %5614 = vrcp.f32 %v1525_v13 }
 0xe82   :  { %v5615_v18 = vpop.eup %5614 }
 0xe83   :  { %v1529_v11 = vmul.f32 %v5615_v18, %v6442_v14  ;;  %v1567_v14 = vstv %s1566_s22  ;;  %s1582_s22 = scalar_lea.vmem [#allocation4], %s4521_s18  ;;  %s4553_s18 = sshll.u32 %s8100_s15, 3 }
 0xe84   :  { %vm1568_vm15 = vcmp.eq.s32.totalorder %v1567_v14, 1  ;;  %v1583_v37 = vld [vmem:[%s1582_s22] sm:$0xff]  ;;  %s1658_s30 = scalar_lea.vmem [#allocation4], %s4553_s18  ;;  %s4573_s18 = sadd.s32 4294967295, %s4572_s19 }
 0xe85   :  { %vm6615_vm3 = vmand %vm43_vm2, %vm1568_vm15  ;;  %v1591_v57 = vsel %vm6638_vm7, %v1583_v37, 0.0  ;;  %vm1625_vm15 = vcmp.eq.s32.totalorder %v1624_v54, 1  ;;  %v1659_v53 = vld [vmem:[%s1658_s30] sm:$0xff]  ;;  %p1790_p10 = scmp.gt.s32.totalorder %s4573_s18, 0  ;;  %p4574_p12 = scmp.lt.s32.totalorder %s4573_s18, 7 }
 0xe86   :  { %v1572_v36 = vsel %vm6615_vm3, %v1564_v35, 0.0  ;;  %vm1626_vm3 = vmand %vm7906_vm11, %vm1625_vm15  ;;  %vm1682_vm15 = vcmp.eq.s32.totalorder %v1681_v49, 1  ;;  %v5564_v14 = vld [vmem:[%s7901_s6] ss:$8 sps:$4 sm:$0xff]   ;;  %s4589_s30 = sadd.s32 4294967295, %s6749_s25  ;;  %s6771_s15 = sld [smem:[#allocation6 + $0x2f]] }
 0xe87   :  { %v1573_v38 = vadd.f32 %v1572_v36, %v5891_v61  ;;  %v1602_v61 = vld [vmem:[%s1601_s24] sm:$0xff]  ;;  %v1629_v46 = vsel %vm1626_vm3, %v1621_v42, 0.0  ;;  %vm1645_vm7 = vmand %vm47_vm14, %vm1644_vm6  ;;  %vm1701_vm6 = vcmp.eq.s32.totalorder %v1700_v55, 1  ;;  %v6721_v36 = vld [vmem:[%s7902_s7 + $0x18] sm:$0xff]   ;;  %s1791_s21 = scalar_select %p1790_p10, %s4573_s18, 0  ;;  %v1837_v42 = vstv %s6773_s16 }
 0xe88   :  { %v1610_v41 = vsel %vm1607_vm12, %v1602_v61, 0.0  ;;  %v1648_v51 = vsel %vm1645_vm7, %v1640_v48, 0.0  ;;  %vm1664_vm12 = vmand %vm48_vm4, %vm1663_vm10  ;;  %p1828_p0 = scmp.gt.s32.totalorder %s4589_s30, 0  ;;  %p4590_p2 = scmp.lt.s32.totalorder %s4589_s30, 7 }
 0xe89   :  { %v1592_v39 = vadd.f32 %v1591_v57, %v1573_v38  ;;  %v1667_v56 = vsel %vm1664_vm12, %v1659_v53, 0.0  ;;  %vm1683_vm3 = vmand %vm49_vm9, %vm1682_vm15  ;;  %s8110_s21 = smov (!%p4574_p12, %s1791_s21), 7  ;;  %v1799_v57 = vstv %s6751_s23  ;;  %s4603_s24 = sshll.u32 %s8118_s28, 3 }
 0xe8a   :  { %v1686_v60 = vsel %vm1683_vm3, %v1678_v59, 0.0  ;;  %vm1702_vm7 = vmand %vm50_vm13, %vm1701_vm6  ;;  %s1829_s27 = scalar_select %p1828_p0, %s4589_s30, 0  ;;  %vm1800_vm10 = vcmp.eq.s32.totalorder %v1799_v57, 1  ;;  %vm1838_vm6 = vcmp.eq.s32.totalorder %v1837_v42, 1 }
 0xe8b   :  { %v1611_v43 = vadd.f32 %v1610_v41, %v1592_v39  ;;  %v1705_v1 = vsel %vm1702_vm7, %v1697_v63, 0.0  ;;  %s4579_s29 = sshll.u32 %s8110_s21, 3  ;;  %s6786_s19 = sld [smem:[#allocation6 + $0x3f]]  ;;  %vm6790_vm12 = vmand %vm43_vm2, %vm1800_vm10  ;;  %v1818_v39 = vstv %s6763_s11 }
 0xe8c   :  { %s8114_s27 = smov (!%p4590_p2, %s1829_s27), 7  ;;  %s4613_s22 = sadd.s32 4294967295, %s6771_s15  ;;  %vm1819_vm15 = vcmp.eq.s32.totalorder %v1818_v39, 1  ;;  %vm1839_vm7 = vmand %vm45_vm8, %vm1838_vm6 }
 0xe8d   :  { %v1630_v47 = vadd.f32 %v1629_v46, %v1611_v43  ;;  %s4595_s2 = sshll.u32 %s8114_s27, 3  ;;  %p1885_p9 = scmp.gt.s32.totalorder %s4613_s22, 0  ;;  %vm6809_vm3 = vmand %vm44_vm5, %vm1819_vm15 }
 0xe8e   :  { %s1795_s26 = scalar_lea.vmem [#allocation4], %s4579_s29  ;;  %p1873_p10 = scmp.gt.s32.totalorder %s6758_s5, 0  ;;  %v1823_v48 = vsel %vm6809_vm3, %v1815_v45, 0.0 }
 0xe8f   :  { %v1649_v52 = vadd.f32 %v1648_v51, %v1630_v47  ;;  %v1796_v40 = vld [vmem:[%s1795_s26] sm:$0xff]  ;;  %s6799_s18 = sadd.s32 4294967295, %s6776_s17  ;;  %p4614_p11 = scmp.lt.s32.totalorder %s4613_s22, 7 }
 0xe90   :  { %v1804_v41 = vsel %vm6790_vm12, %v1796_v40, 0.0  ;;  %s1886_s25 = scalar_select %p1885_p9, %s4613_s22, 0 }
 0xe91   :  { %v1668_v58 = vadd.f32 %v1667_v56, %v1649_v52  ;;  %p1904_p12 = scmp.gt.s32.totalorder %s6799_s18, 0  ;;  %v1805_v46 = vadd.f32 %v1804_v41, %v5894_v0  ;;  %s4611_s21 = sshll.u32 %s8120_s20, 3 }
 0xe92   :  { %s6805_s23 = scalar_select %p1873_p10, 1, 0 }
 0xe93   :  { %v1687_v62 = vadd.f32 %v1686_v60, %v1668_v58  ;;  %p1892_p13 = scmp.gt.s32.totalorder %s6771_s15, 0  ;;  %s8122_s25 = smov (!%p4614_p11, %s1886_s25), 7  ;;  %v1824_v49 = vadd.f32 %v1823_v48, %v1805_v46 }
 0xe94   :  { %s1905_s30 = scalar_select %p1904_p12, %s6799_s18, 0  ;;  %v1875_v51 = vstv %s6805_s23 }
 0xe95   :  { %v1706_v3 = vadd.f32 %v1705_v1, %v1687_v62  ;;  %p4622_p0 = scmp.lt.s32.totalorder %s6799_s18, 7  ;;  %s6827_s3 = sadd.s32 4294967295, %s6786_s19  ;;  %vm1876_vm15 = vcmp.eq.s32.totalorder %v1875_v51, 1  ;;  %v1913_v62 = vstv %s1912_s12 }
 0xe96   :  { %s1833_s5 = scalar_lea.vmem [#allocation4], %s4595_s2  ;;  %s4619_s29 = sshll.u32 %s8122_s25, 3  ;;  %vm1877_vm3 = vmand %vm47_vm14, %vm1876_vm15 }
 0xe97   :  { %v1834_v0 = vld [vmem:[%s1833_s5] sm:$0xff]  ;;  %s1893_s11 = scalar_select %p1892_p13, 1, 0 }
 0xe98   :  { %p1923_p2 = scmp.gt.s32.totalorder %s6827_s3, 0  ;;  %v1842_v52 = vsel %vm1839_vm7, %v1834_v0, 0.0  ;;  %s8124_s30 = smov (!%p4622_p0, %s1905_s30), 7 }
 0xe99   :  { %s1852_s27 = scalar_lea.vmem [#allocation4], %s4603_s24  ;;  %v1843_v55 = vadd.f32 %v1842_v52, %v1824_v49  ;;  %p4630_p3 = scmp.lt.s32.totalorder %s6827_s3, 7  ;;  %v1894_v56 = vstv %s1893_s11 }
 0xe9a   :  { %v1853_v53 = vld [vmem:[%s1852_s27] sm:$0xff]  ;;  %p1930_p4 = scmp.gt.s32.totalorder %s6786_s19, 0  ;;  %s8126_s3 = smov (!%p1923_p2, %s6827_s3), 0  ;;  %vm1895_vm6 = vcmp.eq.s32.totalorder %v1894_v56, 1 }
 0xe9b   :  { %s1871_s14 = scalar_lea.vmem [#allocation4], %s4611_s21  ;;  %s4627_s15 = sshll.u32 %s8124_s30, 3  ;;  %vm1896_vm7 = vmand %vm48_vm4, %vm1895_vm6 }
 0xe9c   :  { %v1872_v60 = vld [vmem:[%s1871_s14] sm:$0xff]  ;;  %s1931_s28 = scalar_select %p1930_p4, 1, 0 }
 0xe9d   :  { %s8128_s3 = smov (!%p4630_p3, %s8126_s3), 7  ;;  %v1880_v63 = vsel %vm1877_vm3, %v1872_v60, 0.0  ;;  %s1890_s16 = scalar_lea.vmem [#allocation4], %s4619_s29 }
 0xe9e   :  { %s4635_s17 = sshll.u32 %s8128_s3, 3  ;;  %s1909_s20 = scalar_lea.vmem [#allocation4], %s4627_s15 }
 0xe9f   :  { %s1928_s22 = scalar_lea.vmem [#allocation4], %s4635_s17  ;;  %s4661_s19 = sld [smem:[#allocation6 + $0x9]] }
 0xea0   :  { %s6923_s26 = sld [smem:[#allocation6 + $0x11]] }
 0xea1   :  { %s4677_s23 = sld [smem:[#allocation6 + $0x19]] }
 0xea2   :  { %s6930_s5 = sld [smem:[#allocation6 + $0x21]] }
 0xea3   :  { %s6939_s29 = sld [smem:[#allocation6 + $0x29]] }
 0xea4   :  { %s6954_s2 = sld [smem:[#allocation6 + $0x39]] }
 0xea5   :  { %s4662_s25 = sadd.s32 4294967295, %s4661_s19  ;;  %p2286_p11 = scmp.gt.s32.totalorder %s4661_s19, 0 }
 0xea6   :  { %s4670_s0 = sadd.s32 4294967295, %s6923_s26  ;;  %p2279_p8 = scmp.gt.s32.totalorder %s4662_s25, 0 }
 0xea7   :  { %p2297_p9 = scmp.gt.s32.totalorder %s4670_s0, 0  ;;  %p4663_p10 = scmp.lt.s32.totalorder %s4662_s25, 7 }
 0xea8   :  { %s8132_s25 = smov (!%p2279_p8, %s4662_s25), 0  ;;  %p4671_p12 = scmp.lt.s32.totalorder %s4670_s0, 7 }
 0xea9   :  { %s2298_s30 = scalar_select %p2297_p9, %s4670_s0, 0 }
 0xeaa   :  { %s4678_s3 = sadd.s32 4294967295, %s4677_s23  ;;  %s8134_s25 = smov (!%p4663_p10, %s8132_s25), 7 }
 0xeab   :  { %s6932_s11 = scalar_select %p2286_p11, 1, 0 }
 0xeac   :  { %p2315_p13 = scmp.gt.s32.totalorder %s4678_s3, 0  ;;  %s8136_s30 = smov (!%p4671_p12, %s2298_s30), 7 }
 0xead   :  { %p2304_p0 = scmp.gt.s32.totalorder %s6923_s26, 0  ;;  %p2322_p1 = scmp.gt.s32.totalorder %s4677_s23, 0 }
 0xeae   :  { %s2316_s12 = scalar_select %p2315_p13, %s4678_s3, 0 }
 0xeaf   :  { %p4679_p2 = scmp.lt.s32.totalorder %s4678_s3, 7  ;;  %s4686_s14 = sadd.s32 4294967295, %s6930_s5 }
 0xeb0   :  { %s6943_s15 = scalar_select %p2304_p0, 1, 0 }
 0xeb1   :  { %p2333_p3 = scmp.gt.s32.totalorder %s4686_s14, 0  ;;  %s8138_s12 = smov (!%p4679_p2, %s2316_s12), 7 }
 0xeb2   :  { %s4694_s17 = sadd.s32 4294967295, %s6939_s29  ;;  %p2358_p8 = scmp.gt.s32.totalorder %s6939_s29, 0 }
 0xeb3   :  { %p2351_p4 = scmp.gt.s32.totalorder %s4694_s17, 0  ;;  %s6973_s26 = sadd.s32 4294967295, %s6954_s2 }
 0xeb4   :  { %s6978_s0 = scalar_select %p2358_p8, 1, 0 }
 0xeb5   :  { %p2387_p11 = scmp.gt.s32.totalorder %s6973_s26, 0  ;;  %p4711_p13 = scmp.lt.s32.totalorder %s6973_s26, 7 }
 0xeb6   :  { %p2394_p0 = scmp.gt.s32.totalorder %s6954_s2, 0  ;;  %s4735_s2 = sld [smem:[#allocation6 + $0x12]] }
 0xee3   :  { %v1532_v20 = vpop.permute.xlu0 %1531 }
 0xee4   :  { %v1534_v21 = vmul.f32 %v5615_v18, %v1532_v20 }
 0xee6   :  { %1536 = vrot.lane.b32.xlu1 %v1534_v21, %s5722_s13 }
 0xf58   :  { %v1537_v26 = vpop.permute.xlu1 %1536 }
 0xf59   :  { %v6569_v16 = vadd.f32 %v1537_v26, %v1529_v11 }
 0xf5b   :  { %5616 = vtanh.f32 %v6569_v16 }
 0xf68   :  { %v5617_v29 = vpop.eup %5616 }
 0xf69   :  { %1542 = vrot.lane.b32.xlu0 %v5617_v29, %s5721_s1 }
 0xfdb   :  { %v1543_v31 = vpop.permute.xlu0 %1542 }
 0xfdc   :  { %v6573_v32 = vmul.f32 %v5615_v18, %v1543_v31 }
 0xfde   :  { %v1552_v24 = vpack.c.bf16 %v6573_v32, %v6573_v32 }
 0xfe0   :  { %1708 = vrot.lane.b32.xlu1 %v1552_v24, %s5722_s13  ;;  %v5560_v24 = vld [vmem:[%s7901_s6 + $0x10] ss:$8 sps:$4 sm:$0xff]  }
0x1052   :  { %v1709_v23 = vpop.permute.xlu1 %1708 }
0x1053   :  { %5453 = vmatmul.mubr.msk.bf16.vlgmr.msra.gmra.mxu1 %vm89_vm0, %v1709_v23  ;;  %v5562_v23 = vld [vmem:[%s7901_s6 + $0x14] ss:$8 sps:$4 sm:$0xff]  }
0x1054   :  { %2096 = vmatprep.mubr.bf16.mxu1 %v5718_v2  ;;  %2076 = vmatprep.subr.bf16.mxu1 %v5562_v23  ;;  %v5700_v23 = vld [vmem:[%s7899_s4] sm:$0x3]  ;;  %s4653_s4 = sld [smem:[#allocation6 + $0x1]] }
0x1055   :  { %2077 = vmatpush1.bf16.msra.mxu1 %v5560_v24 }
0x105a   :  { %s4654_s24 = sadd.s32 4294967295, %s4653_s4  ;;  %p2268_p6 = scmp.gt.s32.totalorder %s4653_s4, 0 }
0x105b   :  { %p2261_p5 = scmp.gt.s32.totalorder %s4654_s24, 0  ;;  %s4684_s4 = sshll.u32 %s8138_s12, 3 }
0x105c   :  { %s6926_s21 = scalar_select %p2268_p6, 1, 0 }
0x105d   :  { %s2262_s18 = scalar_select %p2261_p5, %s4654_s24, 0 }
0x105e   :  { %p4687_p5 = scmp.lt.s32.totalorder %s4686_s14, 7  ;;  %p2340_p6 = scmp.gt.s32.totalorder %s6930_s5, 0 }
0x105f   :  { %s2388_s5 = scalar_select %p2387_p11, %s6973_s26, 0 }
0x1060   :  { %s4736_s26 = sadd.s32 4294967295, %s4735_s2 }
0x1061   :  { %s8148_s5 = smov (!%p4711_p13, %s2388_s5), 7  ;;  %p4737_p8 = scmp.lt.s32.totalorder %s4736_s26, 7 }
0x1113   :  { %v1747_v4 = vpop.f32.mrf.mxu1 }
0x1114   :  { %v1753_v5 = vadd.f32 %v1747_v4, %v1706_v3  ;;  %v1891_v3 = vld [vmem:[%s1890_s16] sm:$0xff]  ;;  %v1932_v4 = vstv %s1931_s28  ;;  %s6945_s28 = scalar_select %p2322_p1, 1, 0 }
0x1115   :  { %v5454_v6 = vpop.f32.mrf.mxu1  ;;  %vm1933_vm15 = vcmp.eq.s32.totalorder %v1932_v4, 1  ;;  %s4668_s16 = sshll.u32 %s8134_s25, 3 }
0x1116   :  { %5618 = vtanh.f32 %v1753_v5  ;;  %v4571_v10 = vmul.f32 -1.442695, %v1753_v5  ;;  %v1899_v5 = vsel %vm1896_vm7, %v1891_v3, 0.0  ;;  %vm1934_vm3 = vmand %vm50_vm13, %vm1933_vm15 }
0x1117   :  { %v1750_v7 = vpop.f32.mrf.mxu1 }
0x1118   :  { %5620 = vpow2.f32 %v4571_v10  ;;  %v1910_v7 = vld [vmem:[%s1909_s20] sm:$0xff]  ;;  %s4676_s20 = sshll.u32 %s8136_s30, 3  ;;  %s2320_s30 = scalar_lea.vmem [#allocation4], %s4684_s4 }
0x1119   :  { %v5455_v8 = vpop.f32.mrf.mxu1  ;;  %v1929_v10 = vld [vmem:[%s1928_s22] sm:$0xff]  ;;  %s6952_s22 = sld [smem:[#allocation6 + $0x31]]  ;;  %s2302_s25 = scalar_lea.vmem [#allocation4], %s4676_s20 }
0x111f   :  { %s6966_s19 = sadd.s32 4294967295, %s6952_s22  ;;  %p2376_p10 = scmp.gt.s32.totalorder %s6952_s22, 0 }
0x1120   :  { %p2369_p9 = scmp.gt.s32.totalorder %s6966_s19, 0  ;;  %p4703_p12 = scmp.lt.s32.totalorder %s6966_s19, 7 }
0x1123   :  { %v5619_v9 = vpop.eup %5618 }
0x1124   :  { %1763 = vrot.lane.b32.xlu0 %v5619_v9, %s5721_s1 }
0x1125   :  { %v5621_v12 = vpop.eup %5620 }
0x1126   :  { %v1757_v13 = vadd.f32 1.0, %v5621_v12  ;;  %v1937_v12 = vsel %vm1934_vm3, %v1929_v10, 0.0 }
0x1128   :  { %5622 = vrcp.f32 %v1757_v13 }
0x1135   :  { %v5623_v18 = vpop.eup %5622 }
0x1136   :  { %v1761_v11 = vmul.f32 %v5623_v18, %v6569_v16  ;;  %v5566_v16 = vld [vmem:[%s7901_s6 + $0x4] ss:$8 sps:$4 sm:$0xff]   ;;  %s6782_s6 = scalar_select %p1854_p7, 1, 0 }
0x1137   :  { %2078 = vmatprep.subr.bf16.mxu1 %v5566_v16  ;;  %p4655_p7 = scmp.lt.s32.totalorder %s4654_s24, 7 }
0x1138   :  { %2079 = vmatpush1.bf16.msra.mxu1 %v5564_v14  ;;  %v1856_v47 = vstv %s6782_s6  ;;  %s2334_s6 = scalar_select %p2333_p3, %s4686_s14, 0 }
0x1139   :  { %5496 = vmatprep.subr.bf16.mxu1 %v5719_v15  ;;  %vm1857_vm10 = vcmp.eq.s32.totalorder %v1856_v47, 1  ;;  %s8130_s18 = smov (!%p4655_p7, %s2262_s18), 7  ;;  %p4695_p7 = scmp.lt.s32.totalorder %s4694_s17, 7 }
0x113a   :  { %vm1858_vm12 = vmand %vm7906_vm11, %vm1857_vm10  ;;  %vm1914_vm10 = vcmp.eq.s32.totalorder %v1913_v62, 1  ;;  %s4660_s27 = sshll.u32 %s8130_s18, 3  ;;  %s8140_s17 = smov (!%p2351_p4, %s4694_s17), 0 }
0x113b   :  { %v1861_v58 = vsel %vm1858_vm12, %v1853_v53, 0.0  ;;  %vm1915_vm12 = vmand %vm49_vm9, %vm1914_vm10  ;;  %s8142_s6 = smov (!%p4687_p5, %s2334_s6), 7  ;;  %s8144_s17 = smov (!%p4695_p7, %s8140_s17), 7 }
0x113c   :  { %v1862_v59 = vadd.f32 %v1861_v58, %v1843_v55  ;;  %v1918_v8 = vsel %vm1915_vm12, %v1910_v7, 0.0  ;;  %s6962_s24 = scalar_select %p2340_p6, 1, 0 }
0x113d   :  { %s4692_s23 = sshll.u32 %s8142_s6, 3  ;;  %s4700_s3 = sshll.u32 %s8144_s17, 3 }
0x113e   :  { %v1881_v1 = vadd.f32 %v1880_v63, %v1862_v59  ;;  %s2266_s29 = scalar_lea.vmem [#allocation4], %s4660_s27  ;;  %s2284_s14 = scalar_lea.vmem [#allocation4], %s4668_s16 }
0x113f   :  { %s2395_s18 = scalar_select %p2394_p0, 1, 0 }
0x1140   :  { %v1900_v6 = vadd.f32 %v1899_v5, %v1881_v1  ;;  %s2356_s12 = scalar_lea.vmem [#allocation4], %s4700_s3  ;;  %s4719_s17 = sld [smem:[#allocation6 + $0x2]] }
0x1141   :  { %s4727_s6 = sld [smem:[#allocation6 + $0xa]]  ;;  %p2519_p6 = scmp.gt.s32.totalorder %s4736_s26, 0 }
0x1142   :  { %v1919_v9 = vadd.f32 %v1918_v8, %v1900_v6 }
0x1143   :  { %s2520_s3 = scalar_select %p2519_p6, %s4736_s26, 0 }
0x1144   :  { %v1938_v13 = vadd.f32 %v1937_v12, %v1919_v9 }
0x1145   :  { %s8156_s3 = smov (!%p4737_p8, %s2520_s3), 7 }
0x1146   :  { %s4720_s22 = sadd.s32 4294967295, %s4719_s17  ;;  %p2490_p2 = scmp.gt.s32.totalorder %s4719_s17, 0 }
0x1147   :  { %p2483_p1 = scmp.gt.s32.totalorder %s4720_s22, 0  ;;  %p4721_p3 = scmp.lt.s32.totalorder %s4720_s22, 7 }
0x1148   :  { %p2508_p5 = scmp.gt.s32.totalorder %s4727_s6, 0 }
0x1149   :  { %s2484_s4 = scalar_select %p2483_p1, %s4720_s22, 0 }
0x114b   :  { %s8150_s4 = smov (!%p4721_p3, %s2484_s4), 7 }
0x1196   :  { %v1764_v20 = vpop.permute.xlu0 %1763 }
0x1197   :  { %v1766_v21 = vmul.f32 %v5623_v18, %v1764_v20 }
0x1199   :  { %1768 = vrot.lane.b32.xlu1 %v1766_v21, %s5722_s13 }
0x120b   :  { %v1769_v26 = vpop.permute.xlu1 %1768 }
0x120c   :  { %v6691_v29 = vadd.f32 %v1769_v26, %v1761_v11  ;;  %v65_v26 = vsub.s32 1, %v5873_v27 }
0x120e   :  { %5624 = vtanh.f32 %v6691_v29  ;;  %v66_v16 = vrot.slane %v5700_v23, %v65_v26 }
0x121b   :  { %v5625_v31 = vpop.eup %5624 }
0x121c   :  { %1774 = vrot.lane.b32.xlu0 %v5625_v31, %s5721_s1 }
0x1220   :  { %373 = vrot.lane.b32.xlu0 %v5901_v17, %s5722_s13 }
0x128e   :  { %v1775_v19 = vpop.permute.xlu0 %1774 }
0x128f   :  { %v6709_v17 = vmul.f32 %v5623_v18, %v1775_v19 }
0x1291   :  { %v1784_v34 = vpack.c.bf16 %v6709_v17, %v6709_v17 }
0x1292   :  { %v374_v35 = vpop.permute.xlu0 %373 }
0x1293   :  { %376 = vst.msk [vmem:[#allocation2] sm:$0xff] %vm89_vm0, %v374_v35  ;;  %1940 = vrot.lane.b32.xlu1 %v1784_v34, %s5722_s13  ;;  %v6864_v34 = vadd.f32 %v5879_v33, %v66_v16 }
0x1297   :  { %619 = vrot.lane.b32.xlu1 %v6054_v22, %s5722_s13 }
0x129a   :  { %v2016_v37 = vld [vmem:[#allocation2] sm:$0xff] }
0x1305   :  { %v1941_v44 = vpop.permute.xlu1 %1940 }
0x1306   :  { %5461 = vmatmul.mubr.msk.bf16.vlgmr.msra.gmra.mxu0 %vm89_vm0, %v1941_v44 }
0x1307   :  { %5465 = vmatpush3.bf16.msra.mxu0 %v6721_v36  ;;  %5468 = vmatprep.mubr.msk.bf16.mxu0 %vm5720_vm1, %v5719_v15 }
0x1308   :  { %5466 = vmatprep.subr.bf16.mxu0 %v5719_v15 }
0x1309   :  { %v620_v22 = vpop.permute.xlu1 %619 }
0x130a   :  { %623 = vst.msk [vmem:[#allocation2 + $0x8] sm:$0xff] %vm89_vm0, %v620_v22 }
0x130b   :  { %5467 = vmatpush3.bf16.msra.mxu0 %v6728_v50 }
0x130c   :  { %5472 = vmatprep.subr.bf16.mxu0 %v5719_v15 }
0x130e   :  { %5469 = vmatmul.mubr.bf16.vlgmr.msra.gmra.mxu0 %v5718_v2 }
0x130f   :  { %5473 = vmatpush3.bf16.msra.mxu0 %v6721_v36  ;;  %5476 = vmatprep.mubr.msk.bf16.mxu0 %vm5720_vm1, %v5719_v15 }
0x1310   :  { %5474 = vmatprep.subr.bf16.mxu0 %v5719_v15 }
0x1311   :  { %v2017_v38 = vld [vmem:[#allocation2 + $0x8] sm:$0xff] }
0x1312   :  { %v2028_v54 = vpack.c.bf16 %v2017_v38, %v2016_v37 }
0x1313   :  { %5475 = vmatpush3.bf16.msra.mxu0 %v6728_v50 }
0x1314   :  { %4642 = vmatmul.mubr.msk.bf16.vlgmr.msra.gmra.mxu1 %vm89_vm0, %v2028_v54  ;;  %5480 = vmatprep.subr.bf16.mxu0 %v5719_v15 }
0x1315   :  { %2106 = vmatprep.mubr.bf16.mxu1 %v5718_v2  ;;  %5497 = vmatpush3.bf16.msra.mxu1 %v6721_v36 }
0x1316   :  { %5498 = vmatprep.subr.bf16.mxu1 %v5719_v15 }
0x1319   :  { %5499 = vmatpush3.bf16.msra.mxu1 %v6728_v50 }
0x131a   :  { %5512 = vmatprep.subr.bf16.mxu1 %v5719_v15 }
0x13c6   :  { %v1979_v18 = vpop.f32.mrf.mxu0 }
0x13c7   :  { %v1985_v20 = vadd.f32 %v1979_v18, %v1938_v13 }
0x13c8   :  { %v5462_v21 = vpop.f32.mrf.mxu0 }
0x13c9   :  { %5626 = vtanh.f32 %v1985_v20  ;;  %v4637_v33 = vmul.f32 -1.442695, %v1985_v20 }
0x13ca   :  { %v1982_v11 = vpop.f32.mrf.mxu0 }
0x13cc   :  { %v5463_v31 = vpop.f32.mrf.mxu0 }
0x13ce   :  { %v2221_v24 = vpop.f32.mrf.mxu0 }
0x13d0   :  { %v5470_v14 = vpop.f32.mrf.mxu0 }
0x13d2   :  { %v2224_v19 = vpop.f32.mrf.mxu0 }
0x13d4   :  { %v2098_v35 = vpop.f32.mrf.mxu1  ;;  %v5471_v44 = vpop.f32.mrf.mxu0 }
0x13d5   :  { %v2137_v22 = vadd.f32 %v2098_v35, %v6864_v34 }
0x13d6   :  { %v5627_v37 = vpop.eup %5626  ;;  %v2100_v38 = vpop.f32.mrf.mxu1 }
0x13d7   :  { %2153 = vst [vmem:[#allocation4] sm:$0xff] %v2100_v38  ;;  %v2227_v54 = vadd.f32 %v2221_v24, %v2137_v22  ;;  %1995 = vrot.lane.b32.xlu0 %v5627_v37, %s5721_s1  ;;  %v2270_v22 = vstv %s6926_s21  ;;  %v2288_v38 = vstv %s6932_s11  ;;  %s2370_s21 = scalar_select %p2369_p9, %s6966_s19, 0 }
0x13d8   :  { %v6868_v57 = vpop.f32.mrf.mxu1  ;;  %vm2271_vm6 = vcmp.eq.s32.totalorder %v2270_v22, 1  ;;  %vm2289_vm7 = vcmp.eq.s32.totalorder %v2288_v38, 1  ;;  %s7001_s11 = scalar_select %p2376_p10, 1, 0 }
0x13d9   :  { %5628 = vtanh.f32 %v2227_v54  ;;  %v4652_v40 = vmul.f32 -1.442695, %v2227_v54  ;;  %vm6993_vm10 = vmand %vm43_vm2, %vm2271_vm6  ;;  %s8146_s21 = smov (!%p4703_p12, %s2370_s21), 7  ;;  %p2526_p9 = scmp.gt.s32.totalorder %s4735_s2, 0 }
0x13da   :  { %v2104_v61 = vpop.f32.mrf.mxu1  ;;  %5630 = vpow2.f32 %v4637_v33  ;;  %vm7007_vm15 = vmand %vm44_vm5, %vm2289_vm7  ;;  %s4708_s27 = sshll.u32 %s8146_s21, 3  ;;  %s7092_s21 = sld [smem:[#allocation6 + $0x22]] }
0x13db   :  { %2154 = vst [vmem:[#allocation4 + $0x8] sm:$0xff] %v2104_v61  ;;  %5632 = vpow2.f32 %v4652_v40  ;;  %v2306_v61 = vstv %s6943_s15  ;;  %v2324_v40 = vstv %s6945_s28  ;;  %s2338_s15 = scalar_lea.vmem [#allocation4], %s4692_s23  ;;  %s4716_s28 = sshll.u32 %s8148_s5, 3 }
0x13dc   :  { %vm2307_vm12 = vcmp.eq.s32.totalorder %v2306_v61, 1  ;;  %vm2325_vm3 = vcmp.eq.s32.totalorder %v2324_v40, 1  ;;  %s2374_s16 = scalar_lea.vmem [#allocation4], %s4708_s27  ;;  %s2392_s20 = scalar_lea.vmem [#allocation4], %s4716_s28 }
0x13dd   :  { %vm7026_vm6 = vmand %vm45_vm8, %vm2307_vm12  ;;  %s7086_s19 = scalar_select %p2490_p2, 1, 0 }
0x13de   :  { %s4743_s23 = sld [smem:[#allocation6 + $0x1a]] }
0x13e0   :  { %p2562_p2 = scmp.gt.s32.totalorder %s7092_s21, 0 }
0x13e2   :  { %s7143_s2 = scalar_select %p2562_p2, 1, 0 }
0x13e4   :  { %s4744_s5 = sadd.s32 4294967295, %s4743_s23  ;;  %p2544_p12 = scmp.gt.s32.totalorder %s4743_s23, 0 }
0x13e5   :  { %p2537_p10 = scmp.gt.s32.totalorder %s4744_s5, 0  ;;  %p4745_p11 = scmp.lt.s32.totalorder %s4744_s5, 7 }
0x13e6   :  { %v5629_v39 = vpop.eup %5628 }
0x13e7   :  { %2237 = vrot.lane.b32.xlu1 %v5629_v39, %s5721_s1  ;;  %v5631_v41 = vpop.eup %5630  ;;  %s8158_s5 = smov (!%p2537_p10, %s4744_s5), 0 }
0x13e8   :  { %v1989_v42 = vadd.f32 1.0, %v5631_v41  ;;  %v5633_v43 = vpop.eup %5632  ;;  %s8160_s5 = smov (!%p4745_p11, %s8158_s5), 7 }
0x13e9   :  { %v2231_v45 = vadd.f32 1.0, %v5633_v43 }
0x13ea   :  { %5634 = vrcp.f32 %v1989_v42  ;;  %v2138_v42 = vadd.f32 %v6868_v57, %v6864_v34 }
0x13eb   :  { %5636 = vrcp.f32 %v2231_v45 }
0x13f7   :  { %v5635_v46 = vpop.eup %5634 }
0x13f8   :  { %v5637_v0 = vpop.eup %5636  ;;  %v1993_v52 = vmul.f32 %v5635_v46, %v6691_v29 }
0x13f9   :  { %v2235_v56 = vmul.f32 0.0, %v5637_v0 }
0x1449   :  { %v1996_v47 = vpop.permute.xlu0 %1995 }
0x144a   :  { %v1998_v48 = vmul.f32 %v5635_v46, %v1996_v47  ;;  %v2342_v47 = vstv %s6962_s24  ;;  %s4728_s24 = sadd.s32 4294967295, %s4727_s6  ;;  %s4750_s6 = sshll.u32 %s8160_s5, 3 }
0x144b   :  { %vm2343_vm7 = vcmp.eq.s32.totalorder %v2342_v47, 1  ;;  %p2501_p4 = scmp.gt.s32.totalorder %s4728_s24, 0  ;;  %p4729_p7 = scmp.lt.s32.totalorder %s4728_s24, 7 }
0x144c   :  { %2000 = vrot.lane.b32.xlu0 %v1998_v48, %s5722_s13 }
0x144d   :  { %s8152_s24 = smov (!%p2501_p4, %s4728_s24), 0 }
0x144e   :  { %s8154_s24 = smov (!%p4729_p7, %s8152_s24), 7 }
0x1459   :  { %v2238_v49 = vpop.permute.xlu1 %2237 }
0x145a   :  { %v2240_v51 = vmul.f32 %v5637_v0, %v2238_v49 }
0x145c   :  { %2242 = vrot.lane.b32.xlu1 %v2240_v51, %s5722_s13 }
0x14be   :  { %v2001_v53 = vpop.permute.xlu0 %2000 }
0x14bf   :  { %v2003_v55 = vadd.f32 %v2001_v53, %v1993_v52  ;;  %v2360_v52 = vstv %s6978_s0  ;;  %s7090_s0 = scalar_select %p2508_p5, 1, 0 }
0x14c0   :  { %vm2361_vm12 = vcmp.eq.s32.totalorder %v2360_v52, 1 }
0x14c1   :  { %5638 = vtanh.f32 %v2003_v55 }
0x14ce   :  { %v5639_v58 = vpop.eup %5638  ;;  %v2243_v59 = vpop.permute.xlu1 %2242 }
0x14cf   :  { %v6874_v60 = vadd.f32 %v2243_v59, %v2235_v56  ;;  %2006 = vrot.lane.b32.xlu0 %v5639_v58, %s5721_s1  ;;  %v2378_v59 = vstv %s7001_s11  ;;  %s7096_s11 = sld [smem:[#allocation6 + $0x2a]] }
0x14d1   :  { %5640 = vtanh.f32 %v6874_v60 }
0x14d3   :  { %851 = vrot.lane.b32.xlu0 %v6181_v25, %s5722_s13 }
0x14d5   :  { %s7108_s27 = sadd.s32 4294967295, %s7096_s11  ;;  %p2580_p5 = scmp.gt.s32.totalorder %s7096_s11, 0 }
0x14d6   :  { %p2573_p0 = scmp.gt.s32.totalorder %s7108_s27, 0  ;;  %p4761_p3 = scmp.lt.s32.totalorder %s7108_s27, 7 }
0x14d7   :  { %1315 = vrot.lane.b32.xlu0 %v6446_v30, %s5722_s13 }
0x14d8   :  { %s2574_s22 = scalar_select %p2573_p0, %s7108_s27, 0 }
0x14da   :  { %s8164_s22 = smov (!%p4761_p3, %s2574_s22), 7 }
0x14db   :  { %1779 = vrot.lane.b32.xlu0 %v6709_v17, %s5722_s13 }
0x14de   :  { %v5641_v29 = vpop.eup %5640 }
0x14df   :  { %2248 = vrot.lane.b32.xlu1 %v5641_v29, %s5721_s1 }
0x14e3   :  { %1083 = vrot.lane.b32.xlu1 %v6308_v28, %s5722_s13 }
0x14e7   :  { %1547 = vrot.lane.b32.xlu1 %v6573_v32, %s5722_s13 }
0x1541   :  { %v2007_v62 = vpop.permute.xlu0 %2006 }
0x1542   :  { %v2009_v63 = vmul.f32 %v5635_v46, %v2007_v62 }
0x1544   :  { %2011 = vrot.lane.b32.xlu1 %v2009_v63, %s5722_s13 }
0x1545   :  { %v852_v25 = vpop.permute.xlu0 %851 }
0x1546   :  { %855 = vst.msk [vmem:[#allocation2 + $0x10] sm:$0xff] %vm89_vm0, %v852_v25  ;;  %v2396_v25 = vstv %s2395_s18  ;;  %s4752_s18 = sadd.s32 4294967295, %s7092_s21 }
0x1547   :  { %p2555_p13 = scmp.gt.s32.totalorder %s4752_s18, 0  ;;  %p4753_p1 = scmp.lt.s32.totalorder %s4752_s18, 7 }
0x1549   :  { %v1316_v30 = vpop.permute.xlu0 %1315  ;;  %s2556_s28 = scalar_select %p2555_p13, %s4752_s18, 0 }
0x154a   :  { %1319 = vst.msk [vmem:[#allocation2 + $0x20] sm:$0xff] %vm89_vm0, %v1316_v30 }
0x154b   :  { %s8162_s28 = smov (!%p4753_p1, %s2556_s28), 7 }
0x154d   :  { %v1780_v17 = vpop.permute.xlu0 %1779  ;;  %v2018_v5 = vld [vmem:[#allocation2 + $0x10] sm:$0xff] }
0x154e   :  { %1783 = vst.msk [vmem:[#allocation2 + $0x30] sm:$0xff] %vm89_vm0, %v1780_v17 }
0x1551   :  { %v2249_v1 = vpop.permute.xlu1 %2248  ;;  %v2020_v9 = vld [vmem:[#allocation2 + $0x20] sm:$0xff] }
0x1552   :  { %v6893_v3 = vmul.f32 %v5637_v0, %v2249_v1  ;;  %v2564_v0 = vstv %s7143_s2  ;;  %s4801_s2 = sld [smem:[#allocation6 + $0x13]] }
0x1554   :  { %v2257_v28 = vpack.c.bf16 %v6893_v3, %v6893_v3 }
0x1555   :  { %v1084_v32 = vpop.permute.xlu1 %1083  ;;  %v2022_v13 = vld [vmem:[#allocation2 + $0x30] sm:$0xff] }
0x1556   :  { %1087 = vst.msk [vmem:[#allocation2 + $0x18] sm:$0xff] %vm89_vm0, %v1084_v32  ;;  %2404 = vrot.lane.b32.xlu0 %v2257_v28, %s5722_s13 }
0x1558   :  { %p2748_p3 = scmp.gt.s32.totalorder %s4801_s2, 0 }
0x1559   :  { %v1548_v4 = vpop.permute.xlu1 %1547 }
0x155a   :  { %1551 = vst.msk [vmem:[#allocation2 + $0x28] sm:$0xff] %vm89_vm0, %v1548_v4 }
0x155d   :  { %v2019_v6 = vld [vmem:[#allocation2 + $0x18] sm:$0xff] }
0x155e   :  { %v2029_v7 = vpack.c.bf16 %v2019_v6, %v2018_v5 }
0x1560   :  { %4643 = vmatmul.mubr.msk.bf16.gmra.mxu1 %vm89_vm0, %v2029_v7 }
0x1561   :  { %2116 = vmatprep.mubr.bf16.mxu1 %v5718_v2  ;;  %v2021_v8 = vld [vmem:[#allocation2 + $0x28] sm:$0xff] }
0x1562   :  { %v2030_v10 = vpack.c.bf16 %v2021_v8, %v2020_v9 }
0x1568   :  { %4644 = vmatmul.mubr.msk.bf16.gmra.mxu1 %vm89_vm0, %v2030_v10 }
0x1569   :  { %2126 = vmatprep.mubr.bf16.mxu1 %v5718_v2 }
0x15b6   :  { %v2012_v12 = vpop.permute.xlu1 %2011 }
0x15b7   :  { %2015 = vst.msk [vmem:[#allocation2 + $0x38] sm:$0xff] %vm89_vm0, %v2012_v12 }
0x15be   :  { %v2023_v18 = vld [vmem:[#allocation2 + $0x38] sm:$0xff] }
0x15bf   :  { %v2031_v20 = vpack.c.bf16 %v2023_v18, %v2022_v13 }
0x15c1   :  { %4645 = vmatmul.mubr.msk.bf16.gmra.mxu1 %vm89_vm0, %v2031_v20 }
0x15c2   :  { %5500 = vmatprep.mubr.msk.bf16.mxu1 %vm5720_vm1, %v5719_v15 }
0x15c8   :  { %v2405_v21 = vpop.permute.xlu0 %2404 }
0x15c9   :  { %5477 = vmatmul.mubr.msk.bf16.vlgmr.msra.gmra.mxu0 %vm89_vm0, %v2405_v21 }
0x15ca   :  { %5481 = vmatpush3.bf16.msra.mxu0 %v6721_v36  ;;  %5484 = vmatprep.mubr.msk.bf16.mxu0 %vm5720_vm1, %v5719_v15 }
0x15cb   :  { %5482 = vmatprep.subr.bf16.mxu0 %v5719_v15 }
0x15ce   :  { %5483 = vmatpush3.bf16.msra.mxu0 %v6728_v50 }
0x15cf   :  { %5488 = vmatprep.subr.bf16.mxu0 %v5719_v15 }
0x1620   :  { %v6915_v2 = vpop.f32.mrf.mxu1 }
0x1622   :  { %v2110_v11 = vpop.f32.mrf.mxu1 }
0x1623   :  { %2155 = vst [vmem:[#allocation4 + $0x10] sm:$0xff] %v2110_v11 }
0x1624   :  { %v6917_v26 = vpop.f32.mrf.mxu1 }
0x1626   :  { %v2114_v31 = vpop.f32.mrf.mxu1 }
0x1627   :  { %2156 = vst [vmem:[#allocation4 + $0x18] sm:$0xff] %v2114_v31 }
0x1628   :  { %v6919_v24 = vpop.f32.mrf.mxu1 }
0x162a   :  { %v2120_v23 = vpop.f32.mrf.mxu1 }
0x162b   :  { %2157 = vst [vmem:[#allocation4 + $0x20] sm:$0xff] %v2120_v23 }
0x162c   :  { %v6921_v16 = vpop.f32.mrf.mxu1 }
0x162e   :  { %v2124_v14 = vpop.f32.mrf.mxu1 }
0x162f   :  { %2158 = vst [vmem:[#allocation4 + $0x28] sm:$0xff] %v2124_v14 }
0x1681   :  { %v6958_v19 = vpop.f32.mrf.mxu1 }
0x1683   :  { %v2130_v35 = vpop.f32.mrf.mxu1 }
0x1684   :  { %2159 = vst [vmem:[#allocation4 + $0x30] sm:$0xff] %v2130_v35 }
0x1685   :  { %v6968_v44 = vpop.f32.mrf.mxu1 }
0x1687   :  { %v2134_v37 = vpop.f32.mrf.mxu1 }
0x1688   :  { %2160 = vst [vmem:[#allocation4 + $0x38] sm:$0xff] %v2134_v37 }
0x1689   :  { %v6983_v54 = vpop.f32.mrf.mxu0 }
0x168b   :  { %v5478_v39 = vpop.f32.mrf.mxu0 }
0x168d   :  { %v2446_v41 = vpop.f32.mrf.mxu0 }
0x168f   :  { %v2267_v45 = vld [vmem:[%s2266_s29] sm:$0xff]  ;;  %v5479_v57 = vpop.f32.mrf.mxu0  ;;  %s7100_s29 = scalar_select %p2526_p9, 1, 0 }
0x1690   :  { %v2285_v46 = vld [vmem:[%s2284_s14] sm:$0xff]  ;;  %v2275_v48 = vsel %vm6993_vm10, %v2267_v45, 0.0  ;;  %vm7041_vm10 = vmand %vm7906_vm11, %vm2325_vm3  ;;  %vm2379_vm3 = vcmp.eq.s32.totalorder %v2378_v59, 1  ;;  %vm2397_vm11 = vcmp.eq.s32.totalorder %v2396_v25, 1  ;;  %s4726_s14 = sshll.u32 %s8150_s4, 3  ;;  %s4758_s4 = sshll.u32 %s8162_s28, 3 }
0x1691   :  { %v2276_v49 = vadd.f32 %v2275_v48, %v2138_v42  ;;  %v2303_v51 = vld [vmem:[%s2302_s25] sm:$0xff]  ;;  %v2293_v53 = vsel %vm7007_vm15, %v2285_v46, 0.0  ;;  %vm2344_vm15 = vmand %vm47_vm14, %vm2343_vm7  ;;  %s4734_s25 = sshll.u32 %s8154_s24, 3  ;;  %s2488_s17 = scalar_lea.vmem [#allocation4], %s4726_s14  ;;  %v2139_v42 = vadd.f32 %v6915_v2, %v6864_v34  ;;  %v2528_v43 = vstv %s7100_s29 }
0x1692   :  { %v2321_v58 = vld [vmem:[%s2320_s30] sm:$0xff]  ;;  %v2311_v29 = vsel %vm7026_vm6, %v2303_v51, 0.0  ;;  %vm2362_vm6 = vmand %vm48_vm4, %vm2361_vm12  ;;  %s7105_s30 = sld [smem:[#allocation6 + $0x32]]  ;;  %s4766_s29 = sshll.u32 %s8164_s22, 3 }
0x1693   :  { %v2294_v56 = vadd.f32 %v2293_v53, %v2276_v49  ;;  %v2339_v63 = vld [vmem:[%s2338_s15] sm:$0xff]  ;;  %v2329_v30 = vsel %vm7041_vm10, %v2321_v58, 0.0  ;;  %vm2380_vm7 = vmand %vm49_vm9, %vm2379_vm3  ;;  %s7110_s15 = scalar_select %p2544_p12, 1, 0 }
0x1694   :  { %v2357_v1 = vld [vmem:[%s2356_s12] sm:$0xff]  ;;  %v2347_v28 = vsel %vm2344_vm15, %v2339_v63, 0.0  ;;  %vm2398_vm10 = vmand %vm50_vm13, %vm2397_vm11  ;;  %s4742_s12 = sshll.u32 %s8156_s3, 3  ;;  %s2542_s3 = scalar_lea.vmem [#allocation4], %s4750_s6 }
0x1695   :  { %v2312_v62 = vadd.f32 %v2311_v29, %v2294_v56  ;;  %v2375_v4 = vld [vmem:[%s2374_s16] sm:$0xff]  ;;  %v2365_v5 = vsel %vm2362_vm6, %v2357_v1, 0.0  ;;  %s7117_s16 = sld [smem:[#allocation6 + $0x3a]]  ;;  %vm2529_vm6 = vcmp.eq.s32.totalorder %v2528_v43, 1  ;;  %v2546_v2 = vstv %s7110_s15  ;;  %s2524_s24 = scalar_lea.vmem [#allocation4], %s4742_s12 }
0x1696   :  { %v2393_v7 = vld [vmem:[%s2392_s20] sm:$0xff]  ;;  %v2383_v8 = vsel %vm2380_vm7, %v2375_v4, 0.0  ;;  %vm2530_vm7 = vmand %vm45_vm8, %vm2529_vm6  ;;  %s2560_s11 = scalar_lea.vmem [#allocation4], %s4758_s4  ;;  %s2578_s18 = scalar_lea.vmem [#allocation4], %s4766_s29 }
0x1697   :  { %v2330_v17 = vadd.f32 %v2329_v30, %v2312_v62  ;;  %v2401_v10 = vsel %vm2398_vm10, %v2393_v7, 0.0  ;;  %v2489_v40 = vld [vmem:[%s2488_s17] sm:$0xff]  ;;  %vm2547_vm10 = vcmp.eq.s32.totalorder %v2546_v2, 1  ;;  %s4793_s17 = sld [smem:[#allocation6 + $0xb]] }
0x1698   :  { %s7121_s20 = sadd.s32 4294967295, %s7105_s30  ;;  %p2598_p7 = scmp.gt.s32.totalorder %s7105_s30, 0  ;;  %v2525_v57 = vld [vmem:[%s2524_s24] sm:$0xff] }
0x1699   :  { %v2348_v32 = vadd.f32 %v2347_v28, %v2330_v17  ;;  %p2591_p4 = scmp.gt.s32.totalorder %s7121_s20, 0  ;;  %p4769_p6 = scmp.lt.s32.totalorder %s7121_s20, 7  ;;  %v2533_v49 = vsel %vm2530_vm7, %v2525_v57, 0.0  ;;  %v2543_v51 = vld [vmem:[%s2542_s3] sm:$0xff] }
0x169a   :  { %s2599_s21 = scalar_select %p2598_p7, 1, 0  ;;  %v2561_v58 = vld [vmem:[%s2560_s11] sm:$0xff] }
0x169b   :  { %v2366_v6 = vadd.f32 %v2365_v5, %v2348_v32  ;;  %s2592_s26 = scalar_select %p2591_p4, %s7121_s20, 0  ;;  %v2579_v63 = vld [vmem:[%s2578_s18] sm:$0xff] }
0x169c   :  { %s7159_s23 = sadd.s32 4294967295, %s7117_s16  ;;  %p2616_p10 = scmp.gt.s32.totalorder %s7117_s16, 0  ;;  %v2600_v59 = vstv %s2599_s21 }
0x169d   :  { %v2384_v9 = vadd.f32 %v2383_v8, %v2366_v6  ;;  %p2609_p8 = scmp.gt.s32.totalorder %s7159_s23, 0  ;;  %s8166_s26 = smov (!%p4769_p6, %s2592_s26), 7 }
0x169e   :  { %p4777_p9 = scmp.lt.s32.totalorder %s7159_s23, 7  ;;  %s4774_s14 = sshll.u32 %s8166_s26, 3 }
0x169f   :  { %v2402_v12 = vadd.f32 %v2401_v10, %v2384_v9  ;;  %s8168_s23 = smov (!%p2609_p8, %s7159_s23), 0  ;;  %s2596_s30 = scalar_lea.vmem [#allocation4], %s4774_s14 }
0x16a0   :  { %s8170_s23 = smov (!%p4777_p9, %s8168_s23), 7  ;;  %v2597_v1 = vld [vmem:[%s2596_s30] sm:$0xff]  ;;  %s4785_s20 = sld [smem:[#allocation6 + $0x3]] }
0x16a1   :  { %v2449_v13 = vadd.f32 %v6983_v54, %v2402_v12  ;;  %s2617_s5 = scalar_select %p2616_p10, 1, 0 }
0x16a2   :  { %s4794_s6 = sadd.s32 4294967295, %s4793_s17  ;;  %p2730_p2 = scmp.gt.s32.totalorder %s4793_s17, 0 }
0x16a3   :  { %5642 = vtanh.f32 %v2449_v13  ;;  %v4718_v20 = vmul.f32 -1.442695, %v2449_v13  ;;  %v2618_v25 = vstv %s2617_s5  ;;  %p2723_p12 = scmp.gt.s32.totalorder %s4794_s6, 0  ;;  %p4795_p1 = scmp.lt.s32.totalorder %s4794_s6, 7 }
0x16a4   :  { %s4802_s26 = sadd.s32 4294967295, %s4801_s2  ;;  %s7236_s14 = sld [smem:[#allocation6 + $0x2b]] }
0x16a5   :  { %5644 = vpow2.f32 %v4718_v20  ;;  %s2724_s4 = scalar_select %p2723_p12, %s4794_s6, 0 }
0x16a6   :  { %s4786_s22 = sadd.s32 4294967295, %s4785_s20  ;;  %p2712_p13 = scmp.gt.s32.totalorder %s4785_s20, 0 }
0x16a7   :  { %p2705_p11 = scmp.gt.s32.totalorder %s4786_s22, 0  ;;  %p4787_p0 = scmp.lt.s32.totalorder %s4786_s22, 7 }
0x16a8   :  { %s8176_s4 = smov (!%p4795_p1, %s2724_s4), 7  ;;  %p2741_p4 = scmp.gt.s32.totalorder %s4802_s26, 0 }
0x16a9   :  { %s8172_s22 = smov (!%p2705_p11, %s4786_s22), 0  ;;  %s4800_s3 = sshll.u32 %s8176_s4, 3 }
0x16aa   :  { %s8174_s22 = smov (!%p4787_p0, %s8172_s22), 7  ;;  %s7241_s5 = sld [smem:[#allocation6 + $0x33]] }
0x16ab   :  { %s7228_s24 = scalar_select %p2730_p2, 1, 0 }
0x16ac   :  { %s4792_s21 = sshll.u32 %s8174_s22, 3  ;;  %s7266_s16 = sld [smem:[#allocation6 + $0x3b]] }
0x16ad   :  { %s7233_s29 = scalar_select %p2748_p3, 1, 0 }
0x16ae   :  { %s2710_s28 = scalar_lea.vmem [#allocation4], %s4792_s21  ;;  %s2728_s22 = scalar_lea.vmem [#allocation4], %s4800_s3 }
0x16af   :  { %p2802_p1 = scmp.gt.s32.totalorder %s7236_s14, 0 }
0x16b0   :  { %v5643_v18 = vpop.eup %5642  ;;  %s7264_s12 = sadd.s32 4294967295, %s7241_s5  ;;  %p2820_p3 = scmp.gt.s32.totalorder %s7241_s5, 0 }
0x16b1   :  { %2459 = vrot.lane.b32.xlu1 %v5643_v18, %s5721_s1  ;;  %p2813_p0 = scmp.gt.s32.totalorder %s7264_s12, 0  ;;  %p4835_p2 = scmp.lt.s32.totalorder %s7264_s12, 7 }
0x16b2   :  { %v5645_v21 = vpop.eup %5644  ;;  %s7300_s4 = sadd.s32 4294967295, %s7266_s16 }
0x16b3   :  { %v2453_v11 = vadd.f32 1.0, %v5645_v21  ;;  %s2814_s2 = scalar_select %p2813_p0, %s7264_s12, 0 }
0x16b4   :  { %s4875_s12 = sld [smem:[#allocation6 + $0x1c]] }
0x16b5   :  { %5646 = vrcp.f32 %v2453_v11  ;;  %s8190_s2 = smov (!%p4835_p2, %s2814_s2), 7 }
0x16b6   :  { %s4840_s3 = sshll.u32 %s8190_s2, 3 }
0x16ba   :  { %s4876_s2 = sadd.s32 4294967295, %s4875_s12 }
0x16bb   :  { %p2981_p2 = scmp.gt.s32.totalorder %s4876_s2, 0 }
0x16c2   :  { %v5647_v31 = vpop.eup %5646 }
0x16c3   :  { %v2457_v35 = vmul.f32 %v5647_v31, %v6874_v60  ;;  %v2510_v60 = vstv %s7090_s0  ;;  %s2581_s0 = scalar_select %p2580_p5, 1, 0 }
0x16c4   :  { %vm2511_vm15 = vcmp.eq.s32.totalorder %v2510_v60, 1  ;;  %p4803_p5 = scmp.lt.s32.totalorder %s4802_s26, 7  ;;  %s8178_s26 = smov (!%p2741_p4, %s4802_s26), 0 }
0x16c5   :  { %vm2512_vm3 = vmand %vm44_vm5, %vm2511_vm15  ;;  %vm2565_vm15 = vcmp.eq.s32.totalorder %v2564_v0, 1  ;;  %v2582_v53 = vstv %s2581_s0  ;;  %p2831_p4 = scmp.gt.s32.totalorder %s7300_s4, 0 }
0x16c6   :  { %vm2583_vm6 = vcmp.eq.s32.totalorder %v2582_v53, 1  ;;  %s8182_s26 = smov (!%p4803_p5, %s8178_s26), 7  ;;  %p4843_p5 = scmp.lt.s32.totalorder %s7300_s4, 7 }
0x16c7   :  { %vm2584_vm7 = vmand %vm48_vm4, %vm2583_vm6  ;;  %s8192_s4 = smov (!%p2831_p4, %s7300_s4), 0  ;;  %p4877_p4 = scmp.lt.s32.totalorder %s4876_s2, 7 }
0x16c8   :  { %v2587_v30 = vsel %vm2584_vm7, %v2579_v63, 0.0  ;;  %s8194_s4 = smov (!%p4843_p5, %s8192_s4), 7 }
0x1723   :  { %v2460_v23 = vpop.permute.xlu1 %2459 }
0x1724   :  { %v2462_v14 = vmul.f32 %v5647_v31, %v2460_v23 }
0x1726   :  { %2464 = vrot.lane.b32.xlu0 %v2462_v14, %s5722_s13 }
0x1798   :  { %v2465_v22 = vpop.permute.xlu0 %2464 }
0x1799   :  { %v7070_v37 = vadd.f32 %v2465_v22, %v2457_v35 }
0x179b   :  { %5648 = vtanh.f32 %v7070_v37 }
0x17a8   :  { %v5649_v38 = vpop.eup %5648 }
0x17a9   :  { %2470 = vrot.lane.b32.xlu1 %v5649_v38, %s5721_s1 }
0x181b   :  { %v2471_v54 = vpop.permute.xlu1 %2470 }
0x181c   :  { %v7074_v61 = vmul.f32 %v5647_v31, %v2471_v54 }
0x181e   :  { %v2479_v39 = vpack.c.bf16 %v7074_v61, %v7074_v61 }
0x1820   :  { %2626 = vrot.lane.b32.xlu0 %v2479_v39, %s5722_s13 }
0x1892   :  { %v2627_v33 = vpop.permute.xlu0 %2626 }
0x1893   :  { %5485 = vmatmul.mubr.msk.bf16.vlgmr.msra.gmra.mxu0 %vm89_vm0, %v2627_v33 }
0x1894   :  { %5489 = vmatpush3.bf16.msra.mxu0 %v6721_v36  ;;  %5492 = vmatprep.mubr.msk.bf16.mxu0 %vm5720_vm1, %v5719_v15  ;;  %v2492_v36 = vstv %s7086_s19  ;;  %s2506_s19 = scalar_lea.vmem [#allocation4], %s4734_s25  ;;  %s4782_s25 = sshll.u32 %s8170_s23, 3 }
0x1895   :  { %5490 = vmatprep.subr.bf16.mxu0 %v5719_v15  ;;  %vm2493_vm11 = vcmp.eq.s32.totalorder %v2492_v36, 1  ;;  %v2507_v45 = vld [vmem:[%s2506_s19] sm:$0xff]  ;;  %s2614_s27 = scalar_lea.vmem [#allocation4], %s4782_s25  ;;  %s7220_s19 = sld [smem:[#allocation6 + $0x1b]] }
0x1896   :  { %vm7125_vm12 = vmand %vm43_vm2, %vm2493_vm11  ;;  %v2515_v47 = vsel %vm2512_vm3, %v2507_v45, 0.0  ;;  %vm7947_vm11 = vcmp.eq.s32.totalorder %v5873_v27, 3  ;;  %v2615_v4 = vld [vmem:[%s2614_s27] sm:$0xff]  ;;  %s7226_s23 = sld [smem:[#allocation6 + $0x23]]  ;;  %s7246_s25 = sadd.s32 4294967295, %s7236_s14  ;;  %v2140_v45 = vadd.f32 %v6917_v26, %v6864_v34 }
0x1897   :  { %v2497_v41 = vsel %vm7125_vm12, %v2489_v40, 0.0  ;;  %vm2548_vm12 = vmand %vm7947_vm11, %vm2547_vm10  ;;  %vm2601_vm10 = vcmp.eq.s32.totalorder %v2600_v59, 1  ;;  %s4808_s27 = sshll.u32 %s8182_s26, 3  ;;  %p2795_p12 = scmp.gt.s32.totalorder %s7246_s25, 0 }
0x1898   :  { %5491 = vmatpush3.bf16.msra.mxu0 %v6728_v50  ;;  %v2498_v46 = vadd.f32 %v2497_v41, %v2139_v42  ;;  %v2551_v55 = vsel %vm2548_vm12, %v2543_v51, 0.0  ;;  %vm2566_vm3 = vmand %vm47_vm14, %vm2565_vm15  ;;  %vm2619_vm12 = vcmp.eq.s32.totalorder %v2618_v25, 1  ;;  %v7216_v50 = vld [vmem:[%s7902_s7 + $0x10] sm:$0xff]   ;;  %v2732_v41 = vstv %s7228_s24  ;;  %v2711_v42 = vld [vmem:[%s2710_s28] sm:$0xff]  ;;  %s2821_s24 = scalar_select %p2820_p3, 1, 0 }
0x1899   :  { %5504 = vmatprep.subr.bf16.mxu0 %v5719_v15  ;;  %v2569_v29 = vsel %vm2566_vm3, %v2561_v58, 0.0  ;;  %vm2602_vm11 = vmand %vm49_vm9, %vm2601_vm10  ;;  %vm2733_vm7 = vcmp.eq.s32.totalorder %v2732_v41, 1  ;;  %s2796_s20 = scalar_select %p2795_p12, %s7246_s25, 0 }
0x189a   :  { %v2516_v48 = vadd.f32 %v2515_v47, %v2498_v46  ;;  %v2605_v28 = vsel %vm2602_vm11, %v2597_v1, 0.0  ;;  %vm2620_vm15 = vmand %vm50_vm13, %vm2619_vm12  ;;  %v2750_v46 = vstv %s7233_s29  ;;  %v2729_v47 = vld [vmem:[%s2728_s22] sm:$0xff]  ;;  %s2818_s14 = scalar_lea.vmem [#allocation4], %s4840_s3  ;;  %s4867_s28 = sld [smem:[#allocation6 + $0x14]] }
0x189b   :  { %v2623_v5 = vsel %vm2620_vm15, %v2615_v4, 0.0  ;;  %s4810_s0 = sadd.s32 4294967295, %s7220_s19  ;;  %p2766_p9 = scmp.gt.s32.totalorder %s7220_s19, 0  ;;  %vm7282_vm10 = vmand %vm44_vm5, %vm2733_vm7  ;;  %vm2751_vm11 = vcmp.eq.s32.totalorder %v2750_v46, 1 }
0x189c   :  { %v2534_v52 = vadd.f32 %v2533_v49, %v2516_v48  ;;  %p2759_p6 = scmp.gt.s32.totalorder %s4810_s0, 0  ;;  %s4818_s11 = sadd.s32 4294967295, %s7226_s23  ;;  %v2737_v48 = vsel %vm7282_vm10, %v2729_v47, 0.0  ;;  %vm2752_vm12 = vmand %vm45_vm8, %vm2751_vm11  ;;  %v2141_v47 = vadd.f32 %v6919_v24, %v6864_v34 }
0x189d   :  { %p4811_p7 = scmp.lt.s32.totalorder %s4810_s0, 7  ;;  %p2777_p8 = scmp.gt.s32.totalorder %s4818_s11, 0 }
0x189e   :  { %v2552_v56 = vadd.f32 %v2551_v55, %v2534_v52  ;;  %s8180_s0 = smov (!%p2759_p6, %s4810_s0), 0  ;;  %p4819_p10 = scmp.lt.s32.totalorder %s4818_s11, 7 }
0x189f   :  { %s8184_s0 = smov (!%p4811_p7, %s8180_s0), 7  ;;  %p2784_p11 = scmp.gt.s32.totalorder %s7226_s23, 0 }
0x18a0   :  { %v2570_v62 = vadd.f32 %v2569_v29, %v2552_v56  ;;  %s2778_s18 = scalar_select %p2777_p8, %s4818_s11, 0 }
0x18a1   :  { %s7248_s30 = scalar_select %p2766_p9, 1, 0 }
0x18a2   :  { %v2588_v17 = vadd.f32 %v2587_v30, %v2570_v62  ;;  %s4816_s15 = sshll.u32 %s8184_s0, 3  ;;  %s8186_s18 = smov (!%p4819_p10, %s2778_s18), 7  ;;  %v2822_v62 = vstv %s2821_s24 }
0x18a3   :  { %s7278_s17 = scalar_select %p2784_p11, 1, 0  ;;  %v2768_v26 = vstv %s7248_s30 }
0x18a4   :  { %v2606_v32 = vadd.f32 %v2605_v28, %v2588_v17  ;;  %s4824_s6 = sshll.u32 %s8186_s18, 3  ;;  %s2746_s19 = scalar_lea.vmem [#allocation4], %s4808_s27  ;;  %vm2769_vm15 = vcmp.eq.s32.totalorder %v2768_v26, 1 }
0x18a5   :  { %v2747_v0 = vld [vmem:[%s2746_s19] sm:$0xff]  ;;  %v2786_v51 = vstv %s7278_s17  ;;  %s2764_s26 = scalar_lea.vmem [#allocation4], %s4816_s15  ;;  %p2838_p6 = scmp.gt.s32.totalorder %s7266_s16, 0 }
0x18a6   :  { %v2624_v6 = vadd.f32 %v2623_v5, %v2606_v32  ;;  %v2755_v52 = vsel %vm2752_vm12, %v2747_v0, 0.0  ;;  %v2765_v53 = vld [vmem:[%s2764_s26] sm:$0xff]  ;;  %vm2787_vm7 = vcmp.eq.s32.totalorder %v2786_v51, 1  ;;  %s2782_s21 = scalar_lea.vmem [#allocation4], %s4824_s6  ;;  %s4848_s11 = sshll.u32 %s8194_s4, 3 }
0x18a7   :  { %v2783_v29 = vld [vmem:[%s2782_s21] sm:$0xff]  ;;  %vm2788_vm10 = vmand %vm47_vm14, %vm2787_vm7  ;;  %s2839_s0 = scalar_select %p2838_p6, 1, 0 }
0x18a8   :  { %v2791_v63 = vsel %vm2788_vm10, %v2783_v29, 0.0  ;;  %v2819_v32 = vld [vmem:[%s2818_s14] sm:$0xff]  ;;  %s2836_s5 = scalar_lea.vmem [#allocation4], %s4848_s11  ;;  %s4851_s18 = sld [smem:[#allocation6 + $0x4]] }
0x18a9   :  { %v2840_v17 = vstv %s2839_s0  ;;  %s4859_s30 = sld [smem:[#allocation6 + $0xc]]  ;;  %s4868_s17 = sadd.s32 4294967295, %s4867_s28 }
0x18aa   :  { %s7355_s22 = sld [smem:[#allocation6 + $0x24]]  ;;  %p2970_p0 = scmp.gt.s32.totalorder %s4867_s28, 0 }
0x18ab   :  { %s7360_s19 = sld [smem:[#allocation6 + $0x2c]]  ;;  %p2988_p3 = scmp.gt.s32.totalorder %s4875_s12, 0 }
0x18ac   :  { %s2982_s26 = scalar_select %p2981_p2, %s4876_s2, 0 }
0x18ad   :  { %s7367_s24 = scalar_select %p2988_p3, 1, 0 }
0x18ae   :  { %p2934_p10 = scmp.gt.s32.totalorder %s4851_s18, 0  ;;  %s7370_s3 = sld [smem:[#allocation6 + $0x34]] }
0x18af   :  { %s4860_s15 = sadd.s32 4294967295, %s4859_s30  ;;  %p2952_p12 = scmp.gt.s32.totalorder %s4859_s30, 0  ;;  %v2990_v24 = vstv %s7367_s24 }
0x18b0   :  { %p2945_p9 = scmp.gt.s32.totalorder %s4860_s15, 0  ;;  %p4861_p11 = scmp.lt.s32.totalorder %s4860_s15, 7 }
0x18b1   :  { %s2935_s16 = scalar_select %p2934_p10, 1, 0 }
0x18b2   :  { %s8198_s15 = smov (!%p2945_p9, %s4860_s15), 0  ;;  %s7373_s0 = sadd.s32 4294967295, %s7360_s19 }
0x18b3   :  { %s8200_s15 = smov (!%p4861_p11, %s8198_s15), 7  ;;  %s8208_s26 = smov (!%p4877_p4, %s2982_s26), 7 }
0x18b4   :  { %s7357_s6 = scalar_select %p2952_p12, 1, 0 }
0x18b5   :  { %s4866_s4 = sshll.u32 %s8200_s15, 3  ;;  %s4882_s11 = sshll.u32 %s8208_s26, 3 }
0x18b6   :  { %s7391_s14 = sld [smem:[#allocation6 + $0x3c]]  ;;  %p4893_p9 = scmp.lt.s32.totalorder %s7373_s0, 7 }
0x18b7   :  { %p3024_p10 = scmp.gt.s32.totalorder %s7360_s19, 0  ;;  %s4917_s24 = sld [smem:[#allocation6 + $0x5]] }
0x18bc   :  { %s7426_s15 = sadd.s32 4294967295, %s7391_s14  ;;  %p3060_p2 = scmp.gt.s32.totalorder %s7391_s14, 0 }
0x18bd   :  { %p3156_p4 = scmp.gt.s32.totalorder %s4917_s24, 0  ;;  %s4941_s14 = sld [smem:[#allocation6 + $0x1d]] }
0x1953   :  { %v2665_v7 = vpop.f32.mrf.mxu0 }
0x1954   :  { %v2671_v8 = vadd.f32 %v2665_v7, %v2624_v6  ;;  %v2837_v6 = vld [vmem:[%s2836_s5] sm:$0xff] }
0x1955   :  { %v5486_v9 = vpop.f32.mrf.mxu0 }
0x1956   :  { %5650 = vtanh.f32 %v2671_v8  ;;  %v4784_v18 = vmul.f32 -1.442695, %v2671_v8 }
0x1957   :  { %v2668_v10 = vpop.f32.mrf.mxu0 }
0x1958   :  { %5652 = vpow2.f32 %v4784_v18 }
0x1959   :  { %v5487_v12 = vpop.f32.mrf.mxu0 }
0x1963   :  { %v5651_v13 = vpop.eup %5650 }
0x1964   :  { %2681 = vrot.lane.b32.xlu1 %v5651_v13, %s5721_s1 }
0x1965   :  { %v5653_v20 = vpop.eup %5652 }
0x1966   :  { %v2675_v21 = vadd.f32 1.0, %v5653_v20 }
0x1968   :  { %5654 = vrcp.f32 %v2675_v21 }
0x1975   :  { %v5655_v11 = vpop.eup %5654 }
0x1976   :  { %v2679_v14 = vmul.f32 %v5655_v11, %v7070_v37  ;;  %v7207_v37 = vld [vmem:[%s7902_s7 + $0x18] sm:$0xff]   ;;  %s2713_s7 = scalar_select %p2712_p13, 1, 0 }
0x1977   :  { %p4827_p13 = scmp.lt.s32.totalorder %s7246_s25, 7  ;;  %s4852_s25 = sadd.s32 4294967295, %s4851_s18 }
0x1978   :  { %v2714_v60 = vstv %s2713_s7  ;;  %s2803_s7 = scalar_select %p2802_p1, 1, 0 }
0x1979   :  { %vm2715_vm3 = vcmp.eq.s32.totalorder %v2714_v60, 1  ;;  %s8188_s20 = smov (!%p4827_p13, %s2796_s20), 7  ;;  %p2927_p7 = scmp.gt.s32.totalorder %s4852_s25, 0 }
0x197a   :  { %vm7256_vm6 = vmand %vm43_vm2, %vm2715_vm3  ;;  %s4832_s23 = sshll.u32 %s8188_s20, 3  ;;  %vm7952_vm3 = vcmp.eq.s32.totalorder %v5873_v27, 3  ;;  %v2804_v56 = vstv %s2803_s7  ;;  %p4853_p8 = scmp.lt.s32.totalorder %s4852_s25, 7 }
0x197b   :  { %v2719_v43 = vsel %vm7256_vm6, %v2711_v42, 0.0  ;;  %vm2770_vm6 = vmand %vm7952_vm3, %vm2769_vm15  ;;  %vm2805_vm11 = vcmp.eq.s32.totalorder %v2804_v56, 1  ;;  %s2800_s29 = scalar_lea.vmem [#allocation4], %s4832_s23  ;;  %vm2823_vm15 = vcmp.eq.s32.totalorder %v2822_v62, 1  ;;  %p2963_p13 = scmp.gt.s32.totalorder %s4868_s17, 0 }
0x197c   :  { %v2720_v57 = vadd.f32 %v2719_v43, %v2140_v45  ;;  %v2773_v58 = vsel %vm2770_vm6, %v2765_v53, 0.0  ;;  %v2801_v30 = vld [vmem:[%s2800_s29] sm:$0xff]  ;;  %vm2806_vm12 = vmand %vm48_vm4, %vm2805_vm11  ;;  %vm2841_vm6 = vcmp.eq.s32.totalorder %v2840_v17, 1  ;;  %s2928_s27 = scalar_select %p2927_p7, %s4852_s25, 0  ;;  %v2954_v45 = vstv %s7357_s6 }
0x197d   :  { %v2809_v1 = vsel %vm2806_vm12, %v2801_v30, 0.0  ;;  %vm2824_vm3 = vmand %vm49_vm9, %vm2823_vm15  ;;  %p4869_p1 = scmp.lt.s32.totalorder %s4868_s17, 7  ;;  %s8202_s17 = smov (!%p2963_p13, %s4868_s17), 0  ;;  %vm2955_vm12 = vcmp.eq.s32.totalorder %v2954_v45, 1 }
0x197e   :  { %v2738_v49 = vadd.f32 %v2737_v48, %v2720_v57  ;;  %v2827_v4 = vsel %vm2824_vm3, %v2819_v32, 0.0  ;;  %vm2842_vm7 = vmand %vm50_vm13, %vm2841_vm6  ;;  %s8196_s27 = smov (!%p4853_p8, %s2928_s27), 7  ;;  %s4884_s23 = sadd.s32 4294967295, %s7355_s22 }
0x197f   :  { %v2845_v7 = vsel %vm2842_vm7, %v2837_v6, 0.0  ;;  %s4858_s20 = sshll.u32 %s8196_s27, 3  ;;  %s8204_s17 = smov (!%p4869_p1, %s8202_s17), 7  ;;  %vm7410_vm15 = vmand %vm44_vm5, %vm2955_vm12  ;;  %vm2991_vm7 = vcmp.eq.s32.totalorder %v2990_v24, 1 }
0x1980   :  { %v2756_v55 = vadd.f32 %v2755_v52, %v2738_v49  ;;  %s7362_s7 = scalar_select %p2970_p0, 1, 0 }
0x1981   :  { %p2999_p5 = scmp.gt.s32.totalorder %s4884_s23, 0  ;;  %s4874_s21 = sshll.u32 %s8204_s17, 3 }
0x1982   :  { %v2774_v59 = vadd.f32 %v2773_v58, %v2756_v55  ;;  %p4885_p6 = scmp.lt.s32.totalorder %s4884_s23, 7  ;;  %p3017_p7 = scmp.gt.s32.totalorder %s7373_s0, 0  ;;  %v2972_v57 = vstv %s7362_s7 }
0x1983   :  { %s8206_s23 = smov (!%p2999_p5, %s4884_s23), 0  ;;  %p3006_p8 = scmp.gt.s32.totalorder %s7355_s22, 0  ;;  %vm2973_vm3 = vcmp.eq.s32.totalorder %v2972_v57, 1 }
0x1984   :  { %v2792_v25 = vadd.f32 %v2791_v63, %v2774_v59  ;;  %s2932_s29 = scalar_lea.vmem [#allocation4], %s4858_s20  ;;  %s8210_s23 = smov (!%p4885_p6, %s8206_s23), 7  ;;  %vm2974_vm6 = vmand %vm45_vm8, %vm2973_vm3 }
0x1985   :  { %v2933_v46 = vld [vmem:[%s2932_s29] sm:$0xff]  ;;  %s3018_s5 = scalar_select %p3017_p7, %s7373_s0, 0 }
0x1986   :  { %v2810_v28 = vadd.f32 %v2809_v1, %v2792_v25  ;;  %s7398_s18 = sadd.s32 4294967295, %s7370_s3  ;;  %s4890_s30 = sshll.u32 %s8210_s23, 3 }
0x1987   :  { %s7405_s25 = scalar_select %p3006_p8, 1, 0 }
0x1988   :  { %v2828_v5 = vadd.f32 %v2827_v4, %v2810_v28  ;;  %s2950_s27 = scalar_lea.vmem [#allocation4], %s4866_s4  ;;  %p3035_p11 = scmp.gt.s32.totalorder %s7398_s18, 0 }
0x1989   :  { %v2951_v48 = vld [vmem:[%s2950_s27] sm:$0xff]  ;;  %s8212_s5 = smov (!%p4893_p9, %s3018_s5), 7  ;;  %p4901_p12 = scmp.lt.s32.totalorder %s7398_s18, 7  ;;  %v3008_v53 = vstv %s7405_s25 }
0x198a   :  { %v2846_v8 = vadd.f32 %v2845_v7, %v2828_v5  ;;  %v2959_v49 = vsel %vm7410_vm15, %v2951_v48, 0.0  ;;  %p3042_p13 = scmp.gt.s32.totalorder %s7370_s3, 0  ;;  %s2968_s28 = scalar_lea.vmem [#allocation4], %s4874_s21  ;;  %vm3009_vm12 = vcmp.eq.s32.totalorder %v3008_v53, 1 }
0x198b   :  { %v2969_v51 = vld [vmem:[%s2968_s28] sm:$0xff]  ;;  %s3036_s12 = scalar_select %p3035_p11, %s7398_s18, 0  ;;  %vm3010_vm15 = vmand %vm47_vm14, %vm3009_vm12 }
0x198c   :  { %s4898_s20 = sshll.u32 %s8212_s5, 3  ;;  %p3053_p0 = scmp.gt.s32.totalorder %s7426_s15, 0  ;;  %v2977_v55 = vsel %vm2974_vm6, %v2969_v51, 0.0 }
0x198d   :  { %s3043_s22 = scalar_select %p3042_p13, 1, 0 }
0x198e   :  { %s2986_s17 = scalar_lea.vmem [#allocation4], %s4882_s11  ;;  %s8214_s12 = smov (!%p4901_p12, %s3036_s12), 7 }
0x198f   :  { %v2987_v56 = vld [vmem:[%s2986_s17] sm:$0xff]  ;;  %p4909_p1 = scmp.lt.s32.totalorder %s7426_s15, 7  ;;  %s8216_s15 = smov (!%p3053_p0, %s7426_s15), 0  ;;  %v3044_v25 = vstv %s3043_s22 }
0x1990   :  { %s3004_s6 = scalar_lea.vmem [#allocation4], %s4890_s30  ;;  %s4906_s2 = sshll.u32 %s8214_s12, 3 }
0x1991   :  { %v3005_v63 = vld [vmem:[%s3004_s6] sm:$0xff]  ;;  %s3061_s4 = scalar_select %p3060_p2, 1, 0 }
0x1992   :  { %s8218_s15 = smov (!%p4909_p1, %s8216_s15), 7  ;;  %v3013_v30 = vsel %vm3010_vm15, %v3005_v63, 0.0  ;;  %s3022_s19 = scalar_lea.vmem [#allocation4], %s4898_s20 }
0x1993   :  { %v3023_v1 = vld [vmem:[%s3022_s19] sm:$0xff]  ;;  %s4914_s7 = sshll.u32 %s8218_s15, 3  ;;  %v3062_v28 = vstv %s3061_s4  ;;  %s3040_s23 = scalar_lea.vmem [#allocation4], %s4906_s2 }
0x1994   :  { %v3041_v5 = vld [vmem:[%s3040_s23] sm:$0xff]  ;;  %s3058_s26 = scalar_lea.vmem [#allocation4], %s4914_s7  ;;  %s4918_s21 = sadd.s32 4294967295, %s4917_s24 }
0x1995   :  { %s4925_s3 = sld [smem:[#allocation6 + $0xd]]  ;;  %p3149_p3 = scmp.gt.s32.totalorder %s4918_s21, 0 }
0x1996   :  { %s7475_s0 = sld [smem:[#allocation6 + $0x15]]  ;;  %p4919_p5 = scmp.lt.s32.totalorder %s4918_s21, 7 }
0x1997   :  { %s3150_s29 = scalar_select %p3149_p3, %s4918_s21, 0 }
0x1998   :  { %s7478_s18 = scalar_select %p3156_p4, 1, 0 }
0x1999   :  { %s8220_s29 = smov (!%p4919_p5, %s3150_s29), 7  ;;  %s4942_s30 = sadd.s32 4294967295, %s4941_s14 }
0x199a   :  { %s7482_s27 = sld [smem:[#allocation6 + $0x25]]  ;;  %s4924_s28 = sshll.u32 %s8220_s29, 3 }
0x199b   :  { %s4926_s11 = sadd.s32 4294967295, %s4925_s3  ;;  %p3174_p9 = scmp.gt.s32.totalorder %s4925_s3, 0 }
0x199c   :  { %s4934_s5 = sadd.s32 4294967295, %s7475_s0  ;;  %p3167_p6 = scmp.gt.s32.totalorder %s4926_s11, 0 }
0x199d   :  { %p3185_p7 = scmp.gt.s32.totalorder %s4934_s5, 0  ;;  %p4927_p8 = scmp.lt.s32.totalorder %s4926_s11, 7 }
0x199e   :  { %s8222_s11 = smov (!%p3167_p6, %s4926_s11), 0  ;;  %p3203_p11 = scmp.gt.s32.totalorder %s4942_s30, 0 }
0x199f   :  { %s3186_s25 = scalar_select %p3185_p7, %s4934_s5, 0 }
0x19a0   :  { %s7484_s15 = scalar_select %p3174_p9, 1, 0 }
0x19a1   :  { %s8224_s11 = smov (!%p4927_p8, %s8222_s11), 7  ;;  %p3192_p12 = scmp.gt.s32.totalorder %s7475_s0, 0 }
0x19a2   :  { %s7492_s12 = sld [smem:[#allocation6 + $0x2d]]  ;;  %p3210_p13 = scmp.gt.s32.totalorder %s4941_s14, 0 }
0x19a3   :  { %p4943_p0 = scmp.lt.s32.totalorder %s4942_s30, 7  ;;  %s4950_s20 = sadd.s32 4294967295, %s7482_s27 }
0x19a4   :  { %s7495_s22 = scalar_select %p3192_p12, 1, 0 }
0x19a5   :  { %s7497_s17 = scalar_select %p3210_p13, 1, 0 }
0x19a6   :  { %s4932_s6 = sshll.u32 %s8224_s11, 3  ;;  %p3221_p1 = scmp.gt.s32.totalorder %s4950_s20, 0  ;;  %v3194_v57 = vstv %s7495_s22 }
0x19a7   :  { %s7506_s4 = sld [smem:[#allocation6 + $0x35]]  ;;  %p4951_p2 = scmp.lt.s32.totalorder %s4950_s20, 7 }
0x19a8   :  { %s7504_s2 = sadd.s32 4294967295, %s7492_s12  ;;  %s8230_s20 = smov (!%p3221_p1, %s4950_s20), 0 }
0x19a9   :  { %p3239_p3 = scmp.gt.s32.totalorder %s7504_s2, 0  ;;  %s3154_s23 = scalar_lea.vmem [#allocation4], %s4924_s28 }
0x19aa   :  { %p3228_p4 = scmp.gt.s32.totalorder %s7482_s27, 0  ;;  %s8232_s20 = smov (!%p4951_p2, %s8230_s20), 7 }
0x19ab   :  { %s3240_s24 = scalar_select %p3239_p3, %s7504_s2, 0 }
0x19ac   :  { %p4959_p5 = scmp.lt.s32.totalorder %s7504_s2, 7  ;;  %s4956_s0 = sshll.u32 %s8232_s20, 3 }
0x19ad   :  { %s7528_s21 = sadd.s32 4294967295, %s7506_s4  ;;  %s3172_s29 = scalar_lea.vmem [#allocation4], %s4932_s6 }
0x19ae   :  { %s7533_s3 = scalar_select %p3228_p4, 1, 0  ;;  %v3173_v48 = vld [vmem:[%s3172_s29] sm:$0xff] }
0x19af   :  { %p3246_p6 = scmp.gt.s32.totalorder %s7492_s12, 0  ;;  %p3257_p7 = scmp.gt.s32.totalorder %s7528_s21, 0 }
0x19b0   :  { %s8234_s24 = smov (!%p4959_p5, %s3240_s24), 7  ;;  %p4967_p8 = scmp.lt.s32.totalorder %s7528_s21, 7 }
0x19b1   :  { %p3264_p9 = scmp.gt.s32.totalorder %s7506_s4, 0  ;;  %s4983_s6 = sld [smem:[#allocation6 + $0x6]] }
0x19b2   :  { %s4991_s4 = sld [smem:[#allocation6 + $0xe]] }
0x19b3   :  { %s3265_s27 = scalar_select %p3264_p9, 1, 0 }
0x19b5   :  { %v3266_v63 = vstv %s3265_s27  ;;  %s5023_s27 = sld [smem:[#allocation6 + $0x2e]] }
0x19b7   :  { %s4984_s2 = sadd.s32 4294967295, %s4983_s6 }
0x19b8   :  { %p3371_p13 = scmp.gt.s32.totalorder %s4984_s2, 0  ;;  %p4985_p1 = scmp.lt.s32.totalorder %s4984_s2, 7 }
0x19b9   :  { %p3396_p3 = scmp.gt.s32.totalorder %s4991_s4, 0 }
0x19d6   :  { %v2682_v31 = vpop.permute.xlu1 %2681 }
0x19d7   :  { %v2684_v23 = vmul.f32 %v5655_v11, %v2682_v31 }
0x19d9   :  { %2686 = vrot.lane.b32.xlu0 %v2684_v23, %s5722_s13 }
0x1a4b   :  { %v2687_v35 = vpop.permute.xlu0 %2686 }
0x1a4c   :  { %v7194_v22 = vadd.f32 %v2687_v35, %v2679_v14 }
0x1a4e   :  { %5656 = vtanh.f32 %v7194_v22 }
0x1a5b   :  { %v5657_v38 = vpop.eup %5656 }
0x1a5c   :  { %2692 = vrot.lane.b32.xlu1 %v5657_v38, %s5721_s1 }
0x1ace   :  { %v2693_v54 = vpop.permute.xlu1 %2692 }
0x1acf   :  { %v7198_v39 = vmul.f32 %v5655_v11, %v2693_v54 }
0x1ad1   :  { %v2701_v33 = vpack.c.bf16 %v7198_v39, %v7198_v39 }
0x1ad3   :  { %2848 = vrot.lane.b32.xlu0 %v2701_v33, %s5722_s13 }
0x1b45   :  { %v2849_v36 = vpop.permute.xlu0 %2848 }
0x1b46   :  { %5493 = vmatmul.mubr.msk.bf16.vlgmr.msra.gmra.mxu0 %vm89_vm0, %v2849_v36 }
0x1b47   :  { %5505 = vmatpush3.bf16.msra.mxu0 %v7207_v37  ;;  %5508 = vmatprep.mubr.msk.bf16.mxu0 %vm5720_vm1, %v5719_v15 }
0x1b48   :  { %5506 = vmatprep.subr.bf16.mxu0 %v5719_v15 }
0x1b4b   :  { %5507 = vmatpush3.bf16.msra.mxu0 %v7216_v50 }
0x1b4c   :  { %5520 = vmatprep.subr.bf16.mxu0 %v5719_v15 }
0x1c06   :  { %v2887_v9 = vpop.f32.mrf.mxu0 }
0x1c07   :  { %v2893_v10 = vadd.f32 %v2887_v9, %v2846_v8  ;;  %v3059_v8 = vld [vmem:[%s3058_s26] sm:$0xff]  ;;  %s7519_s26 = sld [smem:[#allocation6 + $0x3d]] }
0x1c08   :  { %v5494_v12 = vpop.f32.mrf.mxu0 }
0x1c09   :  { %5658 = vtanh.f32 %v2893_v10  ;;  %v4850_v21 = vmul.f32 -1.442695, %v2893_v10 }
0x1c0a   :  { %v2890_v13 = vpop.f32.mrf.mxu0 }
0x1c0b   :  { %5660 = vpow2.f32 %v4850_v21 }
0x1c0c   :  { %v5495_v18 = vpop.f32.mrf.mxu0 }
0x1c0d   :  { %s7552_s11 = sadd.s32 4294967295, %s7519_s26  ;;  %p3282_p12 = scmp.gt.s32.totalorder %s7519_s26, 0 }
0x1c0f   :  { %s3283_s12 = scalar_select %p3282_p12, 1, 0 }
0x1c16   :  { %v5659_v20 = vpop.eup %5658 }
0x1c17   :  { %2903 = vrot.lane.b32.xlu1 %v5659_v20, %s5721_s1 }
0x1c18   :  { %v5661_v11 = vpop.eup %5660 }
0x1c19   :  { %v2897_v31 = vadd.f32 1.0, %v5661_v11 }
0x1c1b   :  { %5662 = vrcp.f32 %v2897_v31 }
0x1c28   :  { %v5663_v23 = vpop.eup %5662 }
0x1c29   :  { %v2901_v38 = vmul.f32 %v5663_v23, %v7194_v22  ;;  %v2936_v22 = vstv %s2935_s16  ;;  %s3025_s16 = scalar_select %p3024_p10, 1, 0 }
0x1c2a   :  { %vm2937_vm10 = vcmp.eq.s32.totalorder %v2936_v22, 1  ;;  %p4935_p10 = scmp.lt.s32.totalorder %s4934_s5, 7 }
0x1c2b   :  { %vm7381_vm11 = vmand %vm43_vm2, %vm2937_vm10  ;;  %vm7957_vm10 = vcmp.eq.s32.totalorder %v5873_v27, 3  ;;  %v3026_v59 = vstv %s3025_s16  ;;  %s3204_s16 = scalar_select %p3203_p11, %s4942_s30, 0 }
0x1c2c   :  { %v2941_v2 = vsel %vm7381_vm11, %v2933_v46, 0.0  ;;  %vm2992_vm11 = vmand %vm7957_vm10, %vm2991_vm7  ;;  %vm3027_vm3 = vcmp.eq.s32.totalorder %v3026_v59, 1  ;;  %vm3045_vm7 = vcmp.eq.s32.totalorder %v3044_v25, 1  ;;  %s8226_s25 = smov (!%p4935_p10, %s3186_s25), 7  ;;  %s4964_s30 = sshll.u32 %s8234_s24, 3 }
0x1c2d   :  { %v2942_v0 = vadd.f32 %v2941_v2, %v2141_v47  ;;  %v2995_v29 = vsel %vm2992_vm11, %v2987_v56, 0.0  ;;  %vm3028_vm6 = vmand %vm48_vm4, %vm3027_vm3  ;;  %vm3063_vm11 = vcmp.eq.s32.totalorder %v3062_v28, 1  ;;  %s8228_s16 = smov (!%p4943_p0, %s3204_s16), 7  ;;  %s4940_s19 = sshll.u32 %s8226_s25, 3  ;;  %v2142_v47 = vadd.f32 %v6921_v16, %v6864_v34 }
0x1c2e   :  { %v3031_v32 = vsel %vm3028_vm6, %v3023_v1, 0.0  ;;  %vm3046_vm10 = vmand %vm49_vm9, %vm3045_vm7  ;;  %s4948_s7 = sshll.u32 %s8228_s16, 3  ;;  %vm3195_vm7 = vcmp.eq.s32.totalorder %v3194_v57, 1  ;;  %v3212_v16 = vstv %s7497_s17  ;;  %s3190_s14 = scalar_lea.vmem [#allocation4], %s4940_s19  ;;  %v3284_v1 = vstv %s3283_s12 }
0x1c2f   :  { %v2960_v52 = vadd.f32 %v2959_v49, %v2942_v0  ;;  %v3049_v6 = vsel %vm3046_vm10, %v3041_v5, 0.0  ;;  %vm3064_vm12 = vmand %vm50_vm13, %vm3063_vm11  ;;  %v3191_v49 = vld [vmem:[%s3190_s14] sm:$0xff]  ;;  %s3258_s5 = scalar_select %p3257_p7, %s7528_s21, 0  ;;  %vm3213_vm11 = vcmp.eq.s32.totalorder %v3212_v16, 1 }
0x1c30   :  { %v3067_v9 = vsel %vm3064_vm12, %v3059_v8, 0.0  ;;  %vm3196_vm10 = vmand %vm45_vm8, %vm3195_vm7  ;;  %p3275_p10 = scmp.gt.s32.totalorder %s7552_s11, 0  ;;  %vm7962_vm12 = vcmp.eq.s32.totalorder %v5873_v27, 3  ;;  %s3208_s25 = scalar_lea.vmem [#allocation4], %s4948_s7 }
0x1c31   :  { %v2978_v58 = vadd.f32 %v2977_v55, %v2960_v52  ;;  %v3230_v52 = vstv %s7533_s3  ;;  %v3199_v53 = vsel %vm3196_vm10, %v3191_v49, 0.0  ;;  %v3209_v55 = vld [vmem:[%s3208_s25] sm:$0xff]  ;;  %s8236_s5 = smov (!%p4967_p8, %s3258_s5), 7  ;;  %p4975_p11 = scmp.lt.s32.totalorder %s7552_s11, 7  ;;  %vm3267_vm10 = vcmp.eq.s32.totalorder %v3266_v63, 1 }
0x1c32   :  { %s8238_s11 = smov (!%p3275_p10, %s7552_s11), 0  ;;  %s4972_s28 = sshll.u32 %s8236_s5, 3 }
0x1c33   :  { %v2996_v62 = vadd.f32 %v2995_v29, %v2978_v58  ;;  %s8240_s11 = smov (!%p4975_p11, %s8238_s11), 7  ;;  %s3244_s16 = scalar_lea.vmem [#allocation4], %s4964_s30 }
0x1c34   :  { %s4980_s22 = sshll.u32 %s8240_s11, 3  ;;  %s3262_s20 = scalar_lea.vmem [#allocation4], %s4972_s28 }
0x1c35   :  { %v3014_v17 = vadd.f32 %v3013_v30, %v2996_v62  ;;  %s3280_s17 = scalar_lea.vmem [#allocation4], %s4980_s22  ;;  %s4999_s19 = sld [smem:[#allocation6 + $0x16]] }
0x1c36   :  { %p3378_p0 = scmp.gt.s32.totalorder %s4983_s6, 0  ;;  %s5007_s21 = sld [smem:[#allocation6 + $0x1e]] }
0x1c37   :  { %v3032_v4 = vadd.f32 %v3031_v32, %v3014_v17  ;;  %v3245_v17 = vld [vmem:[%s3244_s16] sm:$0xff]  ;;  %s3372_s7 = scalar_select %p3371_p13, %s4984_s2, 0 }
0x1c38   :  { %s7596_s26 = scalar_select %p3378_p0, 1, 0 }
0x1c39   :  { %v3050_v7 = vadd.f32 %v3049_v6, %v3032_v4  ;;  %v3263_v4 = vld [vmem:[%s3262_s20] sm:$0xff]  ;;  %s8242_s7 = smov (!%p4985_p1, %s3372_s7), 7  ;;  %s7602_s11 = sld [smem:[#allocation6 + $0x26]] }
0x1c3a   :  { %s7600_s3 = scalar_select %p3396_p3, 1, 0 }
0x1c3b   :  { %v3068_v10 = vadd.f32 %v3067_v9, %v3050_v7  ;;  %v3281_v7 = vld [vmem:[%s3280_s17] sm:$0xff]  ;;  %s5000_s24 = sadd.s32 4294967295, %s4999_s19  ;;  %s4990_s14 = sshll.u32 %s8242_s7, 3 }
0x1c3c   :  { %p3407_p4 = scmp.gt.s32.totalorder %s5000_s24, 0  ;;  %s5008_s29 = sadd.s32 4294967295, %s5007_s21 }
0x1c3d   :  { %p3425_p7 = scmp.gt.s32.totalorder %s5008_s29, 0  ;;  %p3414_p8 = scmp.gt.s32.totalorder %s4999_s19, 0 }
0x1c3e   :  { %p5009_p9 = scmp.lt.s32.totalorder %s5008_s29, 7  ;;  %p3432_p10 = scmp.gt.s32.totalorder %s5007_s21, 0 }
0x1c3f   :  { %s8250_s29 = smov (!%p3425_p7, %s5008_s29), 0  ;;  %s5016_s30 = sadd.s32 4294967295, %s7602_s11 }
0x1c40   :  { %s7609_s5 = scalar_select %p3414_p8, 1, 0 }
0x1c41   :  { %s8252_s29 = smov (!%p5009_p9, %s8250_s29), 7  ;;  %p3443_p11 = scmp.gt.s32.totalorder %s5016_s30, 0 }
0x1c42   :  { %s7619_s28 = scalar_select %p3432_p10, 1, 0  ;;  %v3416_v57 = vstv %s7609_s5 }
0x1c43   :  { %s5014_s12 = sshll.u32 %s8252_s29, 3  ;;  %p5017_p12 = scmp.lt.s32.totalorder %s5016_s30, 7 }
0x1c44   :  { %s8254_s30 = smov (!%p3443_p11, %s5016_s30), 0  ;;  %p3450_p13 = scmp.gt.s32.totalorder %s7602_s11, 0 }
0x1c45   :  { %s7623_s16 = sadd.s32 4294967295, %s5023_s27  ;;  %s7625_s22 = sld [smem:[#allocation6 + $0x3e]] }
0x1c46   :  { %s3376_s20 = scalar_lea.vmem [#allocation4], %s4990_s14  ;;  %p3468_p0 = scmp.gt.s32.totalorder %s5023_s27, 0 }
0x1c47   :  { %s8256_s30 = smov (!%p5017_p12, %s8254_s30), 7  ;;  %p3461_p1 = scmp.gt.s32.totalorder %s7623_s16, 0 }
0x1c48   :  { %s7642_s6 = scalar_select %p3450_p13, 1, 0 }
0x1c49   :  { %s7647_s2 = scalar_select %p3468_p0, 1, 0 }
0x1c4a   :  { %s3462_s7 = scalar_select %p3461_p1, %s7623_s16, 0 }
0x1c4b   :  { %p5025_p3 = scmp.lt.s32.totalorder %s7623_s16, 7  ;;  %p3504_p8 = scmp.gt.s32.totalorder %s7625_s22, 0 }
0x1c4d   :  { %s8258_s7 = smov (!%p5025_p3, %s3462_s7), 7 }
0x1c4e   :  { %s5030_s11 = sshll.u32 %s8258_s7, 3 }
0x1c4f   :  { %s3505_s29 = scalar_select %p3504_p8, 1, 0 }
0x1c89   :  { %v2904_v14 = vpop.permute.xlu1 %2903 }
0x1c8a   :  { %v2906_v35 = vmul.f32 %v5663_v23, %v2904_v14 }
0x1c8c   :  { %2908 = vrot.lane.b32.xlu0 %v2906_v35, %s5722_s13 }
0x1cfe   :  { %v2909_v54 = vpop.permute.xlu0 %2908 }
0x1cff   :  { %v7335_v33 = vadd.f32 %v2909_v54, %v2901_v38 }
0x1d01   :  { %5664 = vtanh.f32 %v7335_v33 }
0x1d0e   :  { %v5665_v36 = vpop.eup %5664 }
0x1d0f   :  { %2914 = vrot.lane.b32.xlu1 %v5665_v36, %s5721_s1 }
0x1d81   :  { %v2915_v60 = vpop.permute.xlu1 %2914 }
0x1d82   :  { %v7339_v40 = vmul.f32 %v5663_v23, %v2915_v60 }
0x1d84   :  { %v2923_v41 = vpack.c.bf16 %v7339_v40, %v7339_v40 }
0x1d86   :  { %3070 = vrot.lane.b32.xlu0 %v2923_v41, %s5722_s13 }
0x1df8   :  { %v3071_v42 = vpop.permute.xlu0 %3070 }
0x1df9   :  { %5501 = vmatmul.mubr.msk.bf16.vlgmr.msra.gmra.mxu1 %vm89_vm0, %v3071_v42 }
0x1dfa   :  { %5513 = vmatpush3.bf16.msra.mxu1 %v7207_v37  ;;  %5516 = vmatprep.mubr.msk.bf16.mxu1 %vm5720_vm1, %v5719_v15 }
0x1dfb   :  { %5514 = vmatprep.subr.bf16.mxu1 %v5719_v15 }
0x1dfe   :  { %5515 = vmatpush3.bf16.msra.mxu1 %v7216_v50 }
0x1eb9   :  { %v3109_v12 = vpop.f32.mrf.mxu1 }
0x1eba   :  { %v3115_v13 = vadd.f32 %v3109_v12, %v3068_v10 }
0x1ebb   :  { %v5502_v18 = vpop.f32.mrf.mxu1 }
0x1ebc   :  { %5666 = vtanh.f32 %v3115_v13  ;;  %v4916_v31 = vmul.f32 -1.442695, %v3115_v13 }
0x1ebd   :  { %v3112_v20 = vpop.f32.mrf.mxu1 }
0x1ebe   :  { %5668 = vpow2.f32 %v4916_v31 }
0x1ebf   :  { %v5503_v21 = vpop.f32.mrf.mxu1 }
0x1ec9   :  { %v5667_v11 = vpop.eup %5666 }
0x1eca   :  { %3125 = vrot.lane.b32.xlu1 %v5667_v11, %s5721_s1 }
0x1ecb   :  { %v5669_v23 = vpop.eup %5668 }
0x1ecc   :  { %v3119_v14 = vadd.f32 1.0, %v5669_v23 }
0x1ece   :  { %5670 = vrcp.f32 %v3119_v14 }
0x1edb   :  { %v5671_v35 = vpop.eup %5670 }
0x1edc   :  { %v3123_v36 = vmul.f32 %v5671_v35, %v7335_v33  ;;  %v3155_v33 = vld [vmem:[%s3154_s23] sm:$0xff]  ;;  %s4992_s23 = sadd.s32 4294967295, %s4991_s4  ;;  %s5022_s4 = sshll.u32 %s8256_s30, 3 }
0x1edd   :  { %p3389_p2 = scmp.gt.s32.totalorder %s4992_s23, 0  ;;  %p4993_p5 = scmp.lt.s32.totalorder %s4992_s23, 7 }
0x1ede   :  { %s3448_s14 = scalar_lea.vmem [#allocation4], %s5022_s4 }
0x1edf   :  { %s8244_s23 = smov (!%p3389_p2, %s4992_s23), 0 }
0x1ee0   :  { %s8246_s23 = smov (!%p4993_p5, %s8244_s23), 7 }
0x1f3c   :  { %v3126_v38 = vpop.permute.xlu1 %3125 }
0x1f3d   :  { %v3128_v54 = vmul.f32 %v5671_v35, %v3126_v38 }
0x1f3f   :  { %3130 = vrot.lane.b32.xlu0 %v3128_v54, %s5722_s13 }
0x1fb1   :  { %v3131_v60 = vpop.permute.xlu0 %3130 }
0x1fb2   :  { %v7460_v41 = vadd.f32 %v3131_v60, %v3123_v36 }
0x1fb4   :  { %5672 = vtanh.f32 %v7460_v41 }
0x1fc1   :  { %v5673_v42 = vpop.eup %5672 }
0x1fc2   :  { %3136 = vrot.lane.b32.xlu1 %v5673_v42, %s5721_s1 }
0x2034   :  { %v3137_v22 = vpop.permute.xlu1 %3136 }
0x2035   :  { %v7464_v43 = vmul.f32 %v5671_v35, %v3137_v22 }
0x2037   :  { %v3145_v45 = vpack.c.bf16 %v7464_v43, %v7464_v43 }
0x2039   :  { %3292 = vrot.lane.b32.xlu0 %v3145_v45, %s5722_s13 }
0x20ab   :  { %v3293_v46 = vpop.permute.xlu0 %3292 }
0x20ac   :  { %5509 = vmatmul.mubr.msk.bf16.vlgmr.msra.gmra.mxu0 %vm89_vm0, %v3293_v46 }
0x20ad   :  { %5521 = vmatpush3.bf16.msra.mxu0 %v7207_v37  ;;  %5524 = vmatprep.mubr.msk.bf16.mxu0 %vm5720_vm1, %v5719_v15 }
0x20ae   :  { %5522 = vmatprep.subr.bf16.mxu0 %v5719_v15  ;;  %v3158_v15 = vstv %s7478_s18  ;;  %s3247_s18 = scalar_select %p3246_p6, 1, 0 }
0x20af   :  { %vm3159_vm1 = vcmp.eq.s32.totalorder %v3158_v15, 1  ;;  %p5001_p6 = scmp.lt.s32.totalorder %s5000_s24, 7 }
0x20b0   :  { %vm7513_vm15 = vmand %vm43_vm2, %vm3159_vm1  ;;  %v3248_v58 = vstv %s3247_s18  ;;  %s4998_s18 = sshll.u32 %s8246_s23, 3 }
0x20b1   :  { %5523 = vmatpush3.bf16.msra.mxu0 %v7216_v50  ;;  %v3176_v50 = vstv %s7484_s15  ;;  %v3163_v2 = vsel %vm7513_vm15, %v3155_v33, 0.0  ;;  %vm3214_vm1 = vmand %vm7962_vm12, %vm3213_vm11  ;;  %vm3231_vm15 = vcmp.eq.s32.totalorder %v3230_v52, 1  ;;  %s3226_s15 = scalar_lea.vmem [#allocation4], %s4956_s0  ;;  %vm3285_vm12 = vcmp.eq.s32.totalorder %v3284_v1, 1  ;;  %v3377_v33 = vld [vmem:[%s3376_s20] sm:$0xff]  ;;  %s3394_s19 = scalar_lea.vmem [#allocation4], %s4998_s18 }
0x20b2   :  { %vm3177_vm3 = vcmp.eq.s32.totalorder %v3176_v50, 1  ;;  %v3164_v0 = vadd.f32 %v3163_v2, %v2142_v47  ;;  %v3217_v59 = vsel %vm3214_vm1, %v3209_v55, 0.0  ;;  %v3227_v62 = vld [vmem:[%s3226_s15] sm:$0xff]  ;;  %vm3268_vm11 = vmand %vm49_vm9, %vm3267_vm10  ;;  %s3408_s0 = scalar_select %p3407_p4, %s5000_s24, 0  ;;  %v3398_v50 = vstv %s7600_s3 }
0x20b3   :  { %vm7538_vm6 = vmand %vm44_vm5, %vm3177_vm3  ;;  %v3271_v5 = vsel %vm3268_vm11, %v3263_v4, 0.0  ;;  %s7617_s15 = sld [smem:[#allocation6 + $0x36]]  ;;  %v2143_v47 = vadd.f32 %v6958_v19, %v6864_v34  ;;  %vm3417_vm10 = vcmp.eq.s32.totalorder %v3416_v57, 1  ;;  %v3434_v19 = vstv %s7619_s28  ;;  %s3430_s3 = scalar_lea.vmem [#allocation4], %s5014_s12 }
0x20b4   :  { %v3181_v24 = vsel %vm7538_vm6, %v3173_v48, 0.0  ;;  %vm3232_vm3 = vmand %vm47_vm14, %vm3231_vm15  ;;  %vm3249_vm6 = vcmp.eq.s32.totalorder %v3248_v58, 1  ;;  %s8248_s0 = smov (!%p5001_p6, %s3408_s0), 7  ;;  %v3395_v48 = vld [vmem:[%s3394_s19] sm:$0xff]  ;;  %s3466_s18 = scalar_lea.vmem [#allocation4], %s5030_s11 }
0x20b5   :  { %v3182_v51 = vadd.f32 %v3181_v24, %v3164_v0  ;;  %v3235_v25 = vsel %vm3232_vm3, %v3227_v62, 0.0  ;;  %vm3250_vm7 = vmand %vm48_vm4, %vm3249_vm6  ;;  %s5006_s25 = sshll.u32 %s8248_s0, 3  ;;  %vm3399_vm6 = vcmp.eq.s32.totalorder %v3398_v50, 1  ;;  %s5057_s28 = sld [smem:[#allocation6 + $0xf]] }
0x20b6   :  { %v3253_v28 = vsel %vm3250_vm7, %v3245_v17, 0.0  ;;  %vm3286_vm1 = vmand %vm50_vm13, %vm3285_vm12  ;;  %s3412_s24 = scalar_lea.vmem [#allocation4], %s5006_s25  ;;  %vm3435_vm12 = vcmp.eq.s32.totalorder %v3434_v19, 1  ;;  %v3506_v17 = vstv %s3505_s29  ;;  %s7719_s19 = sld [smem:[#allocation6 + $0x27]] }
0x20b7   :  { %v3200_v56 = vadd.f32 %v3199_v53, %v3182_v51  ;;  %v3289_v8 = vsel %vm3286_vm1, %v3281_v7, 0.0  ;;  %vm7653_vm7 = vmand %vm44_vm5, %vm3399_vm6  ;;  %v3413_v24 = vld [vmem:[%s3412_s24] sm:$0xff]  ;;  %v3452_v51 = vstv %s7642_s6  ;;  %vm7967_vm1 = vcmp.eq.s32.totalorder %v5873_v27, 3  ;;  %s7724_s24 = sld [smem:[#allocation6 + $0x2f]] }
0x20b8   :  { %v3403_v16 = vsel %vm7653_vm7, %v3395_v48, 0.0  ;;  %vm3418_vm11 = vmand %vm45_vm8, %vm3417_vm10  ;;  %v3431_v53 = vld [vmem:[%s3430_s3] sm:$0xff] }
0x20b9   :  { %v3218_v29 = vadd.f32 %v3217_v59, %v3200_v56  ;;  %s7638_s17 = sadd.s32 4294967295, %s7617_s15  ;;  %p3486_p5 = scmp.gt.s32.totalorder %s7617_s15, 0  ;;  %v3421_v52 = vsel %vm3418_vm11, %v3413_v24, 0.0  ;;  %v3470_v56 = vstv %s7647_s2 }
0x20ba   :  { %p3479_p2 = scmp.gt.s32.totalorder %s7638_s17, 0  ;;  %p5033_p4 = scmp.lt.s32.totalorder %s7638_s17, 7  ;;  %vm3471_vm7 = vcmp.eq.s32.totalorder %v3470_v56, 1 }
0x20bb   :  { %v3236_v30 = vadd.f32 %v3235_v25, %v3218_v29  ;;  %s3487_s21 = scalar_select %p3486_p5, 1, 0  ;;  %v3449_v29 = vld [vmem:[%s3448_s14] sm:$0xff]  ;;  %vm3472_vm10 = vmand %vm48_vm4, %vm3471_vm7 }
0x20bc   :  { %s3480_s23 = scalar_select %p3479_p2, %s7638_s17, 0 }
0x20bd   :  { %v3254_v32 = vadd.f32 %v3253_v28, %v3236_v30  ;;  %v3488_v62 = vstv %s3487_s21  ;;  %v3467_v30 = vld [vmem:[%s3466_s18] sm:$0xff]  ;;  %s5049_s15 = sld [smem:[#allocation6 + $0x7]]  ;;  %s5058_s16 = sadd.s32 4294967295, %s5057_s28 }
0x20be   :  { %s8260_s23 = smov (!%p5033_p4, %s3480_s23), 7  ;;  %vm3489_vm11 = vcmp.eq.s32.totalorder %v3488_v62, 1  ;;  %v3475_v1 = vsel %vm3472_vm10, %v3467_v30, 0.0  ;;  %p3611_p11 = scmp.gt.s32.totalorder %s5058_s16, 0 }
0x20bf   :  { %v3272_v6 = vadd.f32 %v3271_v5, %v3254_v32  ;;  %s5038_s5 = sshll.u32 %s8260_s23, 3  ;;  %p5059_p13 = scmp.lt.s32.totalorder %s5058_s16, 7 }
0x20c0   :  { %s3484_s30 = scalar_lea.vmem [#allocation4], %s5038_s5  ;;  %s5073_s17 = sld [smem:[#allocation6 + $0x1f]] }
0x20c1   :  { %v3290_v9 = vadd.f32 %v3289_v8, %v3272_v6  ;;  %v3485_v32 = vld [vmem:[%s3484_s30] sm:$0xff]  ;;  %s3612_s20 = scalar_select %p3611_p11, %s5058_s16, 0 }
0x20c2   :  { %p3618_p0 = scmp.gt.s32.totalorder %s5057_s28, 0  ;;  %s5082_s3 = sadd.s32 4294967295, %s7719_s19 }
0x20c3   :  { %s5050_s12 = sadd.s32 4294967295, %s5049_s15  ;;  %p3600_p12 = scmp.gt.s32.totalorder %s5049_s15, 0 }
0x20c4   :  { %p3593_p9 = scmp.gt.s32.totalorder %s5050_s12, 0  ;;  %p5051_p10 = scmp.lt.s32.totalorder %s5050_s12, 7 }
0x20c5   :  { %s3601_s6 = scalar_select %p3600_p12, 1, 0 }
0x20c6   :  { %s8264_s12 = smov (!%p3593_p9, %s5050_s12), 0  ;;  %s8268_s20 = smov (!%p5059_p13, %s3612_s20), 7 }
0x20c7   :  { %s8266_s12 = smov (!%p5051_p10, %s8264_s12), 7  ;;  %s5064_s23 = sshll.u32 %s8268_s20, 3 }
0x20c8   :  { %s5056_s2 = sshll.u32 %s8266_s12, 3  ;;  %p3654_p5 = scmp.gt.s32.totalorder %s5073_s17, 0 }
0x20c9   :  { %s7721_s7 = scalar_select %p3618_p0, 1, 0 }
0x20ca   :  { %s7731_s11 = scalar_select %p3654_p5, 1, 0 }
0x20cb   :  { %s7734_s5 = sld [smem:[#allocation6 + $0x37]]  ;;  %p5083_p8 = scmp.lt.s32.totalorder %s5082_s3, 7  ;;  %v3620_v50 = vstv %s7721_s7 }
0x20cc   :  { %s7737_s29 = sadd.s32 4294967295, %s7724_s24  ;;  %p3672_p10 = scmp.gt.s32.totalorder %s7719_s19, 0  ;;  %vm3621_vm7 = vcmp.eq.s32.totalorder %v3620_v50, 1 }
0x20cd   :  { %p3683_p9 = scmp.gt.s32.totalorder %s7737_s29, 0  ;;  %s3598_s18 = scalar_lea.vmem [#allocation4], %s5056_s2 }
0x20ce   :  { %s7755_s30 = sld [smem:[#allocation6 + $0x3f]]  ;;  %p5091_p11 = scmp.lt.s32.totalorder %s7737_s29, 7 }
0x20cf   :  { %s7769_s28 = scalar_select %p3672_p10, 1, 0 }
0x20d0   :  { %s3616_s16 = scalar_lea.vmem [#allocation4], %s5064_s23  ;;  %p3690_p12 = scmp.gt.s32.totalorder %s7724_s24, 0 }
0x20d1   :  { %s7762_s15 = sadd.s32 4294967295, %s7734_s5  ;;  %v3617_v48 = vld [vmem:[%s3616_s16] sm:$0xff]  ;;  %p3708_p0 = scmp.gt.s32.totalorder %s7734_s5, 0  ;;  %v3674_v24 = vstv %s7769_s28 }
0x20d2   :  { %p3701_p13 = scmp.gt.s32.totalorder %s7762_s15, 0 }
0x20d3   :  { %s3709_s19 = scalar_select %p3708_p0, 1, 0 }
0x216c   :  { %v3331_v10 = vpop.f32.mrf.mxu0 }
0x216d   :  { %v3337_v12 = vadd.f32 %v3331_v10, %v3290_v9 }
0x216e   :  { %v5510_v13 = vpop.f32.mrf.mxu0 }
0x216f   :  { %5674 = vtanh.f32 %v3337_v12  ;;  %v4982_v11 = vmul.f32 -1.442695, %v3337_v12 }
0x2170   :  { %v3334_v18 = vpop.f32.mrf.mxu0 }
0x2171   :  { %5676 = vpow2.f32 %v4982_v11 }
0x2172   :  { %v5511_v20 = vpop.f32.mrf.mxu0 }
0x217c   :  { %v5675_v21 = vpop.eup %5674 }
0x217d   :  { %3347 = vrot.lane.b32.xlu1 %v5675_v21, %s5721_s1 }
0x217e   :  { %v5677_v31 = vpop.eup %5676 }
0x217f   :  { %v3341_v23 = vadd.f32 1.0, %v5677_v31 }
0x2181   :  { %5678 = vrcp.f32 %v3341_v23 }
0x218e   :  { %v5679_v14 = vpop.eup %5678 }
0x218f   :  { %v3345_v54 = vmul.f32 %v5679_v14, %v7460_v41  ;;  %v3380_v41 = vstv %s7596_s26  ;;  %s7664_s26 = sadd.s32 4294967295, %s7625_s22  ;;  %s5065_s22 = sld [smem:[#allocation6 + $0x17]] }
0x2190   :  { %vm3381_vm15 = vcmp.eq.s32.totalorder %v3380_v41, 1  ;;  %p3497_p6 = scmp.gt.s32.totalorder %s7664_s26, 0  ;;  %p5041_p7 = scmp.lt.s32.totalorder %s7664_s26, 7 }
0x2191   :  { %vm7629_vm3 = vmand %vm43_vm2, %vm3381_vm15 }
0x2192   :  { %v3385_v2 = vsel %vm7629_vm3, %v3377_v33, 0.0  ;;  %vm3436_vm15 = vmand %vm7967_vm1, %vm3435_vm12  ;;  %s3498_s0 = scalar_select %p3497_p6, %s7664_s26, 0  ;;  %vm3453_vm3 = vcmp.eq.s32.totalorder %v3452_v51, 1  ;;  %vm3507_vm1 = vcmp.eq.s32.totalorder %v3506_v17, 1  ;;  %v3599_v33 = vld [vmem:[%s3598_s18] sm:$0xff] }
0x2193   :  { %v3386_v0 = vadd.f32 %v3385_v2, %v2143_v47  ;;  %v3439_v58 = vsel %vm3436_vm15, %v3431_v53, 0.0  ;;  %vm3454_vm6 = vmand %vm47_vm14, %vm3453_vm3  ;;  %s5074_s26 = sadd.s32 4294967295, %s5073_s17  ;;  %v2144_v47 = vadd.f32 %v6968_v44, %v6864_v34  ;;  %v3656_v34 = vstv %s7731_s11 }
0x2194   :  { %s8262_s0 = smov (!%p5041_p7, %s3498_s0), 7  ;;  %v3457_v63 = vsel %vm3454_vm6, %v3449_v29, 0.0  ;;  %vm3490_vm12 = vmand %vm49_vm9, %vm3489_vm11  ;;  %p3647_p4 = scmp.gt.s32.totalorder %s5074_s26, 0  ;;  %vm3657_vm11 = vcmp.eq.s32.totalorder %v3656_v34, 1 }
0x2195   :  { %v3404_v49 = vadd.f32 %v3403_v16, %v3386_v0  ;;  %s5046_s27 = sshll.u32 %s8262_s0, 3  ;;  %v3493_v4 = vsel %vm3490_vm12, %v3485_v32, 0.0  ;;  %vm3508_vm15 = vmand %vm50_vm13, %vm3507_vm1  ;;  %s5066_s4 = sadd.s32 4294967295, %s5065_s22  ;;  %vm3675_vm1 = vcmp.eq.s32.totalorder %v3674_v24, 1 }
0x2196   :  { %s3502_s25 = scalar_lea.vmem [#allocation4], %s5046_s27  ;;  %p3629_p1 = scmp.gt.s32.totalorder %s5066_s4, 0 }
0x2197   :  { %v3422_v55 = vadd.f32 %v3421_v52, %v3404_v49  ;;  %v3503_v6 = vld [vmem:[%s3502_s25] sm:$0xff]  ;;  %p3636_p2 = scmp.gt.s32.totalorder %s5065_s22, 0  ;;  %p5067_p3 = scmp.lt.s32.totalorder %s5066_s4, 7 }
0x2198   :  { %v3511_v7 = vsel %vm3508_vm15, %v3503_v6, 0.0  ;;  %s8270_s4 = smov (!%p3629_p1, %s5066_s4), 0  ;;  %p5075_p6 = scmp.lt.s32.totalorder %s5074_s26, 7  ;;  %vm3676_vm15 = vmand %vm47_vm14, %vm3675_vm1 }
0x2199   :  { %v3440_v59 = vadd.f32 %v3439_v58, %v3422_v55  ;;  %s7726_s21 = scalar_select %p3636_p2, 1, 0 }
0x219a   :  { %s8272_s4 = smov (!%p5067_p3, %s8270_s4), 7  ;;  %p3665_p7 = scmp.gt.s32.totalorder %s5082_s3, 0 }
0x219b   :  { %v3458_v25 = vadd.f32 %v3457_v63, %v3440_v59  ;;  %s3648_s0 = scalar_select %p3647_p4, %s5074_s26, 0  ;;  %v3638_v57 = vstv %s7726_s21  ;;  %v3710_v59 = vstv %s3709_s19 }
0x219c   :  { %s5072_s14 = sshll.u32 %s8272_s4, 3  ;;  %s8274_s3 = smov (!%p3665_p7, %s5082_s3), 0  ;;  %vm3639_vm10 = vcmp.eq.s32.totalorder %v3638_v57, 1 }
0x219d   :  { %v3476_v28 = vadd.f32 %v3475_v1, %v3458_v25  ;;  %s8276_s0 = smov (!%p5075_p6, %s3648_s0), 7  ;;  %s8278_s3 = smov (!%p5083_p8, %s8274_s3), 7 }
0x219e   :  { %s5080_s27 = sshll.u32 %s8276_s0, 3  ;;  %s5088_s12 = sshll.u32 %s8278_s3, 3 }
0x219f   :  { %v3494_v5 = vadd.f32 %v3493_v4, %v3476_v28  ;;  %s3684_s25 = scalar_select %p3683_p9, %s7737_s29, 0 }
0x21a0   :  { %p5099_p1 = scmp.lt.s32.totalorder %s7762_s15, 7  ;;  %s7790_s22 = sadd.s32 4294967295, %s7755_s30 }
0x21a1   :  { %v3512_v8 = vadd.f32 %v3511_v7, %v3494_v5  ;;  %s8280_s25 = smov (!%p5091_p11, %s3684_s25), 7  ;;  %s3634_s20 = scalar_lea.vmem [#allocation4], %s5072_s14 }
0x21a2   :  { %v3635_v19 = vld [vmem:[%s3634_s20] sm:$0xff]  ;;  %s3702_s17 = scalar_select %p3701_p13, %s7762_s15, 0 }
0x21a3   :  { %s5096_s2 = sshll.u32 %s8280_s25, 3  ;;  %p3719_p2 = scmp.gt.s32.totalorder %s7790_s22, 0 }
0x21a4   :  { %s3652_s4 = scalar_lea.vmem [#allocation4], %s5080_s27  ;;  %s8282_s17 = smov (!%p5099_p1, %s3702_s17), 7 }
0x21a5   :  { %v3653_v51 = vld [vmem:[%s3652_s4] sm:$0xff]  ;;  %p5107_p3 = scmp.lt.s32.totalorder %s7790_s22, 7  ;;  %p3726_p4 = scmp.gt.s32.totalorder %s7755_s30, 0 }
0x21a6   :  { %s8284_s22 = smov (!%p3719_p2, %s7790_s22), 0  ;;  %s3670_s7 = scalar_lea.vmem [#allocation4], %s5088_s12 }
0x21a7   :  { %v3671_v58 = vld [vmem:[%s3670_s7] sm:$0xff]  ;;  %s5104_s26 = sshll.u32 %s8282_s17, 3  ;;  %s8286_s22 = smov (!%p5107_p3, %s8284_s22), 7 }
0x21a8   :  { %s3727_s23 = scalar_select %p3726_p4, 1, 0  ;;  %v3679_v29 = vsel %vm3676_vm15, %v3671_v58, 0.0 }
0x21a9   :  { %s3688_s24 = scalar_lea.vmem [#allocation4], %s5096_s2  ;;  %s5112_s21 = sshll.u32 %s8286_s22, 3 }
0x21aa   :  { %v3689_v63 = vld [vmem:[%s3688_s24] sm:$0xff]  ;;  %v3728_v25 = vstv %s3727_s23  ;;  %s3706_s3 = scalar_lea.vmem [#allocation4], %s5104_s26  ;;  %s3724_s0 = scalar_lea.vmem [#allocation4], %s5112_s21 }
0x21ab   :  { %v3707_v1 = vld [vmem:[%s3706_s3] sm:$0xff] }
0x21ac   :  { %v3725_v4 = vld [vmem:[%s3724_s0] sm:$0xff] }
0x21ef   :  { %v3348_v35 = vpop.permute.xlu1 %3347 }
0x21f0   :  { %v3350_v38 = vmul.f32 %v5679_v14, %v3348_v35 }
0x21f2   :  { %3352 = vrot.lane.b32.xlu0 %v3350_v38, %s5722_s13 }
0x2264   :  { %v3353_v36 = vpop.permute.xlu0 %3352 }
0x2265   :  { %v7586_v60 = vadd.f32 %v3353_v36, %v3345_v54 }
0x2267   :  { %5680 = vtanh.f32 %v7586_v60 }
0x2274   :  { %v5681_v42 = vpop.eup %5680 }
0x2275   :  { %3358 = vrot.lane.b32.xlu1 %v5681_v42, %s5721_s1 }
0x22e7   :  { %v3359_v22 = vpop.permute.xlu1 %3358 }
0x22e8   :  { %v7590_v45 = vmul.f32 %v5679_v14, %v3359_v22 }
0x22ea   :  { %v3367_v46 = vpack.c.bf16 %v7590_v45, %v7590_v45 }
0x22ec   :  { %3514 = vrot.lane.b32.xlu0 %v3367_v46, %s5722_s13 }
0x235e   :  { %v3515_v15 = vpop.permute.xlu0 %3514 }
0x235f   :  { %5517 = vmatmul.mubr.msk.bf16.vlgmr.msra.gmra.mxu1 %vm89_vm0, %v3515_v15 }
0x241f   :  { %v3553_v9 = vpop.f32.mrf.mxu1 }
0x2420   :  { %v3559_v10 = vadd.f32 %v3553_v9, %v3512_v8 }
0x2421   :  { %v5518_v12 = vpop.f32.mrf.mxu1 }
0x2422   :  { %5682 = vtanh.f32 %v3559_v10  ;;  %v5048_v21 = vmul.f32 -1.442695, %v3559_v10 }
0x2423   :  { %v3556_v13 = vpop.f32.mrf.mxu1 }
0x2424   :  { %5684 = vpow2.f32 %v5048_v21 }
0x2425   :  { %v5519_v18 = vpop.f32.mrf.mxu1 }
0x242f   :  { %v5683_v20 = vpop.eup %5682 }
0x2430   :  { %3569 = vrot.lane.b32.xlu1 %v5683_v20, %s5721_s1 }
0x2431   :  { %v5685_v11 = vpop.eup %5684 }
0x2432   :  { %v3563_v31 = vadd.f32 1.0, %v5685_v11 }
0x2434   :  { %5686 = vrcp.f32 %v3563_v31 }
0x2441   :  { %v5687_v23 = vpop.eup %5686 }
0x2442   :  { %v3567_v38 = vmul.f32 %v5687_v23, %v7586_v60  ;;  %v3602_v60 = vstv %s3601_s6  ;;  %s3691_s6 = scalar_select %p3690_p12, 1, 0 }
0x2443   :  { %vm3603_vm3 = vcmp.eq.s32.totalorder %v3602_v60, 1 }
0x2444   :  { %vm7745_vm6 = vmand %vm43_vm2, %vm3603_vm3  ;;  %v3692_v53 = vstv %s3691_s6 }
0x2445   :  { %v3607_v2 = vsel %vm7745_vm6, %v3599_v33, 0.0  ;;  %vm7774_vm2 = vmand %vm44_vm5, %vm3621_vm7  ;;  %vm3693_vm3 = vcmp.eq.s32.totalorder %v3692_v53, 1  ;;  %vm3711_vm7 = vcmp.eq.s32.totalorder %v3710_v59, 1 }
0x2446   :  { %v3608_v0 = vadd.f32 %v3607_v2, %v2144_v47  ;;  %v3625_v44 = vsel %vm7774_vm2, %v3617_v48, 0.0  ;;  %vm3640_vm5 = vmand %vm45_vm8, %vm3639_vm10  ;;  %vm7972_vm8 = vcmp.eq.s32.totalorder %v5873_v27, 3  ;;  %vm3729_vm2 = vcmp.eq.s32.totalorder %v3728_v25, 1 }
0x2447   :  { %v3643_v49 = vsel %vm3640_vm5, %v3635_v19, 0.0  ;;  %vm3658_vm12 = vmand %vm7972_vm8, %vm3657_vm11 }
0x2448   :  { %v3626_v16 = vadd.f32 %v3625_v44, %v3608_v0  ;;  %v3661_v55 = vsel %vm3658_vm12, %v3653_v51, 0.0  ;;  %vm3694_vm6 = vmand %vm48_vm4, %vm3693_vm3  ;;  %v5115_v44 = vld [vmem:[%s7904_s9] ss:$0 sm:$0xff]  ;;  %vm3923_vm4 = vcmask 64512  }
0x2449   :  { %v3697_v30 = vsel %vm3694_vm6, %v3689_v63, 0.0  ;;  %vm3712_vm14 = vmand %vm49_vm9, %vm3711_vm7 }
0x244a   :  { %v3644_v52 = vadd.f32 %v3643_v49, %v3626_v16  ;;  %v3715_v28 = vsel %vm3712_vm14, %v3707_v1, 0.0  ;;  %vm3730_vm10 = vmand %vm50_vm13, %vm3729_vm2 }
0x244b   :  { %v3733_v5 = vsel %vm3730_vm10, %v3725_v4, 0.0 }
0x244c   :  { %v3662_v56 = vadd.f32 %v3661_v55, %v3644_v52 }
0x244e   :  { %v3680_v62 = vadd.f32 %v3679_v29, %v3662_v56 }
0x2450   :  { %v3698_v17 = vadd.f32 %v3697_v30, %v3680_v62 }
0x2452   :  { %v3716_v32 = vadd.f32 %v3715_v28, %v3698_v17 }
0x2454   :  { %v3734_v6 = vadd.f32 %v3733_v5, %v3716_v32 }
0x24a2   :  { %v3570_v14 = vpop.permute.xlu1 %3569 }
0x24a3   :  { %v3572_v35 = vmul.f32 %v5687_v23, %v3570_v14 }
0x24a5   :  { %3574 = vrot.lane.b32.xlu0 %v3572_v35, %s5722_s13 }
0x2517   :  { %v3575_v54 = vpop.permute.xlu0 %3574 }
0x2518   :  { %v7704_v36 = vadd.f32 %v3575_v54, %v3567_v38 }
0x251a   :  { %5688 = vtanh.f32 %v7704_v36 }
0x2527   :  { %v5689_v42 = vpop.eup %5688 }
0x2528   :  { %3580 = vrot.lane.b32.xlu1 %v5689_v42, %s5721_s1  ;;  %v5569_v42 = vld [vmem:[%s7903_s8] sm:$0xff]  }
0x259a   :  { %v3581_v22 = vpop.permute.xlu1 %3580 }
0x259b   :  { %v7708_v46 = vmul.f32 %v5687_v23, %v3581_v22 }
0x259d   :  { %v3589_v15 = vpack.c.bf16 %v7708_v46, %v7708_v46 }
0x259f   :  { %3736 = vrot.lane.b32.xlu0 %v3589_v15, %s5722_s13 }
0x2611   :  { %v3737_v41 = vpop.permute.xlu0 %3736 }
0x2612   :  { %5525 = vmatmul.mubr.msk.bf16.vlgmr.msra.gmra.mxu0 %vm89_vm0, %v3737_v41 }
0x26d2   :  { %v3775_v7 = vpop.f32.mrf.mxu0 }
0x26d3   :  { %v3781_v8 = vadd.f32 %v3775_v7, %v3734_v6 }
0x26d4   :  { %v5526_v9 = vpop.f32.mrf.mxu0 }
0x26d5   :  { %5690 = vtanh.f32 %v3781_v8  ;;  %v5114_v18 = vmul.f32 -1.442695, %v3781_v8 }
0x26d6   :  { %v3778_v10 = vpop.f32.mrf.mxu0 }
0x26d7   :  { %5692 = vpow2.f32 %v5114_v18 }
0x26d8   :  { %v5527_v12 = vpop.f32.mrf.mxu0 }
0x26e2   :  { %v5691_v13 = vpop.eup %5690 }
0x26e3   :  { %3791 = vrot.lane.b32.xlu1 %v5691_v13, %s5721_s1 }
0x26e4   :  { %v5693_v20 = vpop.eup %5692 }
0x26e5   :  { %v3785_v21 = vadd.f32 1.0, %v5693_v20 }
0x26e7   :  { %5694 = vrcp.f32 %v3785_v21 }
0x26f4   :  { %v5695_v11 = vpop.eup %5694 }
0x26f5   :  { %v3789_v23 = vmul.f32 %v5695_v11, %v7704_v36 }
0x2755   :  { %v3792_v31 = vpop.permute.xlu1 %3791 }
0x2756   :  { %v3794_v27 = vmul.f32 %v5695_v11, %v3792_v31 }
0x2758   :  { %3796 = vrot.lane.b32.xlu0 %v3794_v27, %s5722_s13 }
0x275c   :  { %2253 = vrot.lane.b32.xlu0 %v6893_v3, %s5722_s13 }
0x2760   :  { %2697 = vrot.lane.b32.xlu0 %v7198_v39, %s5722_s13  ;;  %v5568_v39 = vld [vmem:[%s7903_s8 + $0x8] sm:$0xff]  }
0x2761   :  { %5528 = vmatprep.subr.bf16.mxu1 %v5568_v39 }
0x2762   :  { %5529 = vmatpush3.bf16.msra.mxu1 %v5568_v39 }
0x2763   :  { %5530 = vmatprep.subr.bf16.mxu1 %v5569_v42 }
0x2764   :  { %3141 = vrot.lane.b32.xlu0 %v7464_v43, %s5722_s13 }
0x2766   :  { %5531 = vmatpush3.bf16.msra.mxu1 %v5569_v42 }
0x2768   :  { %3585 = vrot.lane.b32.xlu0 %v7708_v46, %s5722_s13 }
0x27ca   :  { %v3797_v14 = vpop.permute.xlu0 %3796 }
0x27cb   :  { %v3799_v35 = vadd.f32 %v3797_v14, %v3789_v23 }
0x27cd   :  { %5696 = vtanh.f32 %v3799_v35 }
0x27ce   :  { %v2254_v38 = vpop.permute.xlu0 %2253 }
0x27cf   :  { %2256 = vst.msk [vmem:[#allocation2] sm:$0xff] %vm89_vm0, %v2254_v38 }
0x27d2   :  { %v2698_v54 = vpop.permute.xlu0 %2697 }
0x27d3   :  { %2700 = vst.msk [vmem:[#allocation2 + $0x10] sm:$0xff] %vm89_vm0, %v2698_v54 }
0x27d6   :  { %v3142_v3 = vpop.permute.xlu0 %3141  ;;  %v3811_v37 = vld [vmem:[#allocation2] sm:$0xff] }
0x27d7   :  { %3144 = vst.msk [vmem:[#allocation2 + $0x20] sm:$0xff] %vm89_vm0, %v3142_v3 }
0x27da   :  { %v5697_v43 = vpop.eup %5696  ;;  %v3586_v36 = vpop.permute.xlu0 %3585 }
0x27db   :  { %3588 = vst.msk [vmem:[#allocation2 + $0x30] sm:$0xff] %vm89_vm0, %v3586_v36  ;;  %3802 = vrot.lane.b32.xlu1 %v5697_v43, %s5721_s1 }
0x27de   :  { %v3815_v2 = vld [vmem:[#allocation2 + $0x20] sm:$0xff] }
0x27df   :  { %2475 = vrot.lane.b32.xlu1 %v7074_v61, %s5722_s13 }
0x27e2   :  { %v3817_v48 = vld [vmem:[#allocation2 + $0x30] sm:$0xff] }
0x27e3   :  { %2919 = vrot.lane.b32.xlu1 %v7339_v40, %s5722_s13  ;;  %v3813_v40 = vld [vmem:[#allocation2 + $0x10] sm:$0xff] }
0x27e7   :  { %3363 = vrot.lane.b32.xlu1 %v7590_v45, %s5722_s13 }
0x284d   :  { %v3803_v22 = vpop.permute.xlu1 %3802 }
0x284e   :  { %v3805_v46 = vmul.f32 %v5695_v11, %v3803_v22 }
0x2850   :  { %3807 = vrot.lane.b32.xlu1 %v3805_v46, %s5722_s13 }
0x2851   :  { %v2476_v15 = vpop.permute.xlu1 %2475 }
0x2852   :  { %2478 = vst.msk [vmem:[#allocation2 + $0x8] sm:$0xff] %vm89_vm0, %v2476_v15 }
0x2855   :  { %v2920_v41 = vpop.permute.xlu1 %2919 }
0x2856   :  { %2922 = vst.msk [vmem:[#allocation2 + $0x18] sm:$0xff] %vm89_vm0, %v2920_v41 }
0x2859   :  { %v3364_v60 = vpop.permute.xlu1 %3363  ;;  %v3812_v50 = vld [vmem:[#allocation2 + $0x8] sm:$0xff] }
0x285a   :  { %3366 = vst.msk [vmem:[#allocation2 + $0x28] sm:$0xff] %vm89_vm0, %v3364_v60  ;;  %v3819_v61 = vpack.c.bf16 %v3812_v50, %v3811_v37 }
0x285c   :  { %5532 = vmatprep.mubr.msk.bf16.mxu1 %vm89_vm0, %v3819_v61 }
0x285d   :  { %v3814_v45 = vld [vmem:[#allocation2 + $0x18] sm:$0xff] }
0x285e   :  { %v3820_v33 = vpack.c.bf16 %v3814_v45, %v3813_v40 }
0x2860   :  { %5533 = vmatmul.mubr.msk.bf16.vlgmr.msra.gmra.mxu1 %vm89_vm0, %v3820_v33 }
0x2861   :  { %v3816_v47 = vld [vmem:[#allocation2 + $0x28] sm:$0xff] }
0x2862   :  { %v3821_v57 = vpack.c.bf16 %v3816_v47, %v3815_v2 }
0x2864   :  { %5536 = vmatprep.mubr.msk.bf16.mxu1 %vm89_vm0, %v3821_v57 }
0x28c2   :  { %v3808_v26 = vpop.permute.xlu1 %3807 }
0x28c3   :  { %3810 = vst.msk [vmem:[#allocation2 + $0x38] sm:$0xff] %vm89_vm0, %v3808_v26 }
0x28ca   :  { %v3818_v0 = vld [vmem:[#allocation2 + $0x38] sm:$0xff] }
0x28cb   :  { %v3822_v34 = vpack.c.bf16 %v3818_v0, %v3817_v48 }
0x28cd   :  { %5537 = vmatmul.mubr.msk.bf16.gmra.mxu1 %vm89_vm0, %v3822_v34 }
0x2920   :  { %v5534_v19 = vpop.f32.mrf.mxu1 }
0x2921   :  { %v3901_v16 = vadd.f32 %v5534_v19, %v5115_v44 }
0x2922   :  { %v3892_v24 = vpop.f32.mrf.mxu1 }
0x2923   :  { %3926 = vst.msk [vmem:[%s7905_s10 + $0x10] sm:$0xff] %vm3923_vm4, %v3901_v16  ;;  %v3893_v49 = vadd.f32 %v5115_v44, %v3892_v24 }
0x2924   :  { %v5535_v51 = vpop.f32.mrf.mxu1 }
0x2925   :  { %3924 = vst.msk [vmem:[%s7905_s10] sm:$0xff] %vm3923_vm4, %v3893_v49  ;;  %v3904_v52 = vadd.f32 %v5535_v51, %v5115_v44 }
0x2926   :  { %v3895_v53 = vpop.f32.mrf.mxu1 }
0x2927   :  { %3927 = vst.msk [vmem:[%s7905_s10 + $0x18] sm:$0xff] %vm3923_vm4, %v3904_v52  ;;  %v3896_v55 = vadd.f32 %v5115_v44, %v3895_v53 }
0x2929   :  { %3925 = vst.msk [vmem:[%s7905_s10 + $0x8] sm:$0xff] %vm3923_vm4, %v3896_v55 }
0x298d   :  { %v5538_v56 = vpop.f32.mrf.mxu1 }
0x298e   :  { %v3917_v58 = vadd.f32 %v5538_v56, %v5115_v44 }
0x298f   :  { %v3908_v59 = vpop.f32.mrf.mxu1 }
0x2990   :  { %3930 = vst.msk [vmem:[%s7905_s10 + $0x30] sm:$0xff] %vm3923_vm4, %v3917_v58  ;;  %v3909_v29 = vadd.f32 %v5115_v44, %v3908_v59 }
0x2991   :  { %v5539_v62 = vpop.f32.mrf.mxu1 }
0x2992   :  { %3928 = vst.msk [vmem:[%s7905_s10 + $0x20] sm:$0xff] %vm3923_vm4, %v3909_v29  ;;  %v3920_v63 = vadd.f32 %v5539_v62, %v5115_v44 }
0x2993   :  { %v3911_v25 = vpop.f32.mrf.mxu1 }
0x2994   :  { %3931 = vst.msk [vmem:[%s7905_s10 + $0x38] sm:$0xff] %vm3923_vm4, %v3920_v63  ;;  %v3912_v30 = vadd.f32 %v5115_v44, %v3911_v25 }
0x2996   :  { %3929 = vst.msk [vmem:[%s7905_s10 + $0x28] sm:$0xff] %vm3923_vm4, %v3912_v30 }

</bundles_post_ra>
